<compile_context>
chip_gen: v6e
topology: v6e:2x2x1
jax: 0.10.0
libtpu: 0.0.40
codegen_flags: <defaults>
</compile_context>

<pallas_src>
import math
import numpy as np
import jax
import jax.numpy as jnp
from jax import lax
from jax.experimental import pallas as pl
from jax.experimental.pallas import tpu as pltpu

WINDOW_SIZE = 11
SIGMA = 1.5
PAD = WINDOW_SIZE // 2
C1 = 0.01 ** 2
C2 = 0.03 ** 2
MAX_PLANES_PER_BLOCK = 8


def _gaussian_1d(window_size: int, sigma: float) -> np.ndarray:
    g = np.array(
        [math.exp(-((x - window_size // 2) ** 2) / (2.0 * sigma ** 2))
         for x in range(window_size)],
        dtype=np.float64,
    )
    return g / g.sum()


_G1D = _gaussian_1d(WINDOW_SIZE, SIGMA)


def _band_matrix(n: int) -> np.ndarray:
    """n x n Gaussian band matrix with 'same' zero padding folded in.

    (Gv @ X)[i, j] == sum_k g[k - i + PAD] * X[k, j]  (zero outside [0, n))
    which is exactly the vertical pass of F.conv2d(padding=PAD) with the
    separable Gaussian window.  The matrix is symmetric since g is symmetric.
    """
    m = np.zeros((n, n), dtype=np.float64)
    for i in range(n):
        for k in range(max(0, i - PAD), min(n, i + PAD + 1)):
            m[i, k] = _G1D[k - i + PAD]
    return m.astype(np.float32)


def _choose_planes_per_block(num_planes: int, h: int, w: int) -> int:
    """Largest divisor of num_planes that keeps the VMEM working set modest."""
    vmem_budget = 24 * 1024 * 1024  # conservative, fits v5e/v6e/v7x scoped VMEM
    bytes_per_plane = 16 * 4 * h * w  # ~16 f32 planes of working set per plane
    max_p = max(1, min(MAX_PLANES_PER_BLOCK, vmem_budget // bytes_per_plane))
    for p in range(min(num_planes, max_p), 0, -1):
        if num_planes % p == 0:
            return p
    return 1


def _make_ssim_kernel(P: int, H: int, W: int):
    """Processes P image planes per grid step; writes per-block column sums."""

    def kernel(x1_ref, x2_ref, gv_ref, gh_ref, out_ref):
        a = x1_ref[...]            # (P*H, W) f32, P planes stacked along rows
        b = x2_ref[...]            # (P*H, W)
        gv = gv_ref[...]           # (H, H) vertical Gaussian band matrix
        gh = gh_ref[...]           # (W, W) horizontal Gaussian band matrix

        # The five quantities whose Gaussian conv we need, stacked along the
        # sublane axis so the horizontal pass is a single large MXU matmul.
        stats = jnp.concatenate([a, b, a * a, b * b, a * b], axis=0)  # (5PH, W)
        hp = jnp.dot(stats, gh,
                     precision=lax.Precision.HIGHEST,
                     preferred_element_type=jnp.float32)              # (5PH, W)

        col_sums = jnp.zeros((1, W), jnp.float32)
        for p in range(P):
            def vpass(s, _p=p):
                start = (s * P + _p) * H          # static, H-aligned slice
                chunk = hp[start:start + H, :]    # (H, W)
                return jnp.dot(gv, chunk,
                               precision=lax.Precision.HIGHEST,
                               preferred_element_type=jnp.float32)

            mu1 = vpass(0)
            mu2 = vpass(1)
            s11 = vpass(2)
            s22 = vpass(3)
            s12 = vpass(4)

            mu1_sq = mu1 * mu1
            mu2_sq = mu2 * mu2
            mu1_mu2 = mu1 * mu2
            sigma1_sq = s11 - mu1_sq
            sigma2_sq = s22 - mu2_sq
            sigma12 = s12 - mu1_mu2

            num = (2.0 * mu1_mu2 + C1) * (2.0 * sigma12 + C2)
            den = (mu1_sq + mu2_sq + C1) * (sigma1_sq + sigma2_sq + C2)
            ssim = num * pl.reciprocal(den, approx=True)

            col_sums = col_sums + jnp.sum(ssim, axis=0, keepdims=True)

        out_ref[0] = col_sums      # (1, W) block owned by this grid step

    return kernel


def log_ssim_loss(img1: jax.Array, img2: jax.Array) -> jax.Array:
    """-log10(mean(SSIM_map(img1, img2))) with an 11x11 gaussian window."""
    assert img1.shape == img2.shape
    B, C, H, W = img1.shape
    img1 = img1.astype(jnp.float32)
    img2 = img2.astype(jnp.float32)

    num_planes = B * C
    P = _choose_planes_per_block(num_planes, H, W)
    num_blocks = num_planes // P

    # Metadata-only reshape: (B, C, H, W) -> (B*C*H, W); no HBM traffic,
    # no jnp.pad (padding lives inside the band matrices).
    x1 = img1.reshape(num_planes * H, W)
    x2 = img2.reshape(num_planes * H, W)

    gv = jnp.asarray(_band_matrix(H))   # (H, H)
    gh = jnp.asarray(_band_matrix(W))   # (W, W)

    plane_spec = pl.BlockSpec((P * H, W), lambda i: (i, 0))

    col_sums = pl.pallas_call(
        _make_ssim_kernel(P, H, W),
        out_shape=jax.ShapeDtypeStruct((num_blocks, 1, W), jnp.float32),
        grid_spec=pltpu.PrefetchScalarGridSpec(
            num_scalar_prefetch=0,
            grid=(num_blocks,),
            in_specs=[
                plane_spec,                                   # img1 planes
                plane_spec,                                   # img2 planes
                pl.BlockSpec((H, H), lambda i: (0, 0)),       # Gv
                pl.BlockSpec((W, W), lambda i: (0, 0)),       # Gh
            ],
            out_specs=pl.BlockSpec((1, 1, W), lambda i: (i, 0, 0)),
        ),
        compiler_params=pltpu.CompilerParams(
            dimension_semantics=("parallel",),
            vmem_limit_bytes=32 * 1024 * 1024,
        ),
    )(x1, x2, gv, gh)

    # Final reduction + mean + -log10 is trivial scalar glue.
    mean_ssim = jnp.sum(col_sums) / float(num_planes * H * W)
    return -jnp.log10(mean_ssim)


def _numpy_reference(i1: np.ndarray, i2: np.ndarray) -> float:
    """Direct 121-tap reference (float64) matching the PyTorch module."""
    i1 = np.asarray(i1, np.float64)
    i2 = np.asarray(i2, np.float64)
    _, _, H, W = i1.shape
    w2d = np.outer(_G1D, _G1D)

    def conv(x):
        xp = np.pad(x, ((0, 0), (0, 0), (PAD, PAD), (PAD, PAD)))
        out = np.zeros_like(x)
        for u in range(WINDOW_SIZE):
            for v in range(WINDOW_SIZE):
                out += w2d[u, v] * xp[:, :, u:u + H, v:v + W]
        return out

    mu1, mu2 = conv(i1), conv(i2)
    mu1_sq, mu2_sq, mu1_mu2 = mu1 * mu1, mu2 * mu2, mu1 * mu2
    sigma1_sq = conv(i1 * i1) - mu1_sq
    sigma2_sq = conv(i2 * i2) - mu2_sq
    sigma12 = conv(i1 * i2) - mu1_mu2
    ssim = ((2 * mu1_mu2 + C1) * (2 * sigma12 + C2)) / (
        (mu1_sq + mu2_sq + C1) * (sigma1_sq + sigma2_sq + C2))
    return float(-np.log10(ssim.mean()))


if __name__ == "__main__":
    key = jax.random.PRNGKey(0)
    k1, k2 = jax.random.split(key)
    B, C, H, W = 2, 3, 16, 16  # channel=3 matches the module default
    img1 = jax.random.uniform(k1, (B, C, H, W), dtype=jnp.float32)
    img2 = jax.random.uniform(k2, (B, C, H, W), dtype=jnp.float32)

    loss = jax.block_until_ready(log_ssim_loss(img1, img2))
    assert jnp.isfinite(loss), f"non-finite loss: {loss}"

    ref = _numpy_reference(np.asarray(img1), np.asarray(img2))
    assert abs(float(loss) - ref) < 5e-3, f"mismatch: kernel={float(loss)} ref={ref}"

    print("KERNEL_OK")
</pallas_src>

<mosaic_0001>
module attributes {stable_mosaic.version = 11 : i64} {
  func.func @kernel(%arg0: i32, %arg1: memref<96x16xf32, #tpu.memory_space<vmem>>, %arg2: memref<96x16xf32, #tpu.memory_space<vmem>>, %arg3: memref<16x16xf32, #tpu.memory_space<vmem>>, %arg4: memref<16x16xf32, #tpu.memory_space<vmem>>, %arg5: memref<1x1x16xf32, #tpu.memory_space<vmem>>) attributes {dimension_semantics = [#tpu.dimension_semantics<parallel>], iteration_bounds = array<i64: 1>, scalar_prefetch = 0 : i64, scratch_operands = 0 : i64, tpu.core_type = #tpu.core_type<tc>, window_params = [{transform_indices = @transform_0, window_bounds = array<i64: 96, 16>}, {transform_indices = @transform_1, window_bounds = array<i64: 96, 16>}, {pipeline_mode = #tpu.pipeline_mode<synchronous>, transform_indices = @transform_2, window_bounds = array<i64: 16, 16>}, {pipeline_mode = #tpu.pipeline_mode<synchronous>, transform_indices = @transform_3, window_bounds = array<i64: 16, 16>}, {transform_indices = @transform_4, window_bounds = array<i64: 1, 1, 16>}]} {
    %c0 = arith.constant 0 : index
    %c0_0 = arith.constant 0 : index
    %0 = vector.load %arg1[%c0, %c0_0] : memref<96x16xf32, #tpu.memory_space<vmem>>, vector<96x16xf32>
    %c0_1 = arith.constant 0 : index
    %c0_2 = arith.constant 0 : index
    %1 = vector.load %arg2[%c0_1, %c0_2] : memref<96x16xf32, #tpu.memory_space<vmem>>, vector<96x16xf32>
    %c0_3 = arith.constant 0 : index
    %c0_4 = arith.constant 0 : index
    %2 = vector.load %arg3[%c0_3, %c0_4] : memref<16x16xf32, #tpu.memory_space<vmem>>, vector<16x16xf32>
    %c0_5 = arith.constant 0 : index
    %c0_6 = arith.constant 0 : index
    %3 = vector.load %arg4[%c0_5, %c0_6] : memref<16x16xf32, #tpu.memory_space<vmem>>, vector<16x16xf32>
    %4 = arith.mulf %0, %0 : vector<96x16xf32>
    %5 = arith.mulf %1, %1 : vector<96x16xf32>
    %6 = arith.mulf %0, %1 : vector<96x16xf32>
    %7 = tpu.concatenate %0, %1, %4, %5, %6 in 0 : vector<96x16xf32>, vector<96x16xf32>, vector<96x16xf32>, vector<96x16xf32>, vector<96x16xf32> -> vector<480x16xf32>
    %cst = arith.constant dense<0.000000e+00> : vector<480x16xf32>
    %8 = tpu.matmul %7, %3, %cst {dimension_numbers = #tpu.dot_dimension_numbers<[1], [0], [0], [1], [0, 0, 1, 1], [], []>, precision = #tpu.contract_precision<fp32>} : vector<480x16xf32>, vector<16x16xf32>, vector<480x16xf32> -> vector<480x16xf32>
    %cst_7 = arith.constant 0.000000e+00 : f32
    %9 = vector.broadcast %cst_7 : f32 to vector<1x16xf32>
    %10 = vector.extract_strided_slice %8 {offsets = [0, 0], sizes = [16, 16], strides = [1, 1]} : vector<480x16xf32> to vector<16x16xf32>
    %cst_8 = arith.constant dense<0.000000e+00> : vector<16x16xf32>
    %11 = tpu.matmul %2, %10, %cst_8 {dimension_numbers = #tpu.dot_dimension_numbers<[1], [0], [0], [1], [0, 0, 1, 1], [], []>, precision = #tpu.contract_precision<fp32>} : vector<16x16xf32>, vector<16x16xf32>, vector<16x16xf32> -> vector<16x16xf32>
    %12 = vector.extract_strided_slice %8 {offsets = [96, 0], sizes = [16, 16], strides = [1, 1]} : vector<480x16xf32> to vector<16x16xf32>
    %cst_9 = arith.constant dense<0.000000e+00> : vector<16x16xf32>
    %13 = tpu.matmul %2, %12, %cst_9 {dimension_numbers = #tpu.dot_dimension_numbers<[1], [0], [0], [1], [0, 0, 1, 1], [], []>, precision = #tpu.contract_precision<fp32>} : vector<16x16xf32>, vector<16x16xf32>, vector<16x16xf32> -> vector<16x16xf32>
    %14 = vector.extract_strided_slice %8 {offsets = [192, 0], sizes = [16, 16], strides = [1, 1]} : vector<480x16xf32> to vector<16x16xf32>
    %cst_10 = arith.constant dense<0.000000e+00> : vector<16x16xf32>
    %15 = tpu.matmul %2, %14, %cst_10 {dimension_numbers = #tpu.dot_dimension_numbers<[1], [0], [0], [1], [0, 0, 1, 1], [], []>, precision = #tpu.contract_precision<fp32>} : vector<16x16xf32>, vector<16x16xf32>, vector<16x16xf32> -> vector<16x16xf32>
    %16 = vector.extract_strided_slice %8 {offsets = [288, 0], sizes = [16, 16], strides = [1, 1]} : vector<480x16xf32> to vector<16x16xf32>
    %cst_11 = arith.constant dense<0.000000e+00> : vector<16x16xf32>
    %17 = tpu.matmul %2, %16, %cst_11 {dimension_numbers = #tpu.dot_dimension_numbers<[1], [0], [0], [1], [0, 0, 1, 1], [], []>, precision = #tpu.contract_precision<fp32>} : vector<16x16xf32>, vector<16x16xf32>, vector<16x16xf32> -> vector<16x16xf32>
    %18 = vector.extract_strided_slice %8 {offsets = [384, 0], sizes = [16, 16], strides = [1, 1]} : vector<480x16xf32> to vector<16x16xf32>
    %cst_12 = arith.constant dense<0.000000e+00> : vector<16x16xf32>
    %19 = tpu.matmul %2, %18, %cst_12 {dimension_numbers = #tpu.dot_dimension_numbers<[1], [0], [0], [1], [0, 0, 1, 1], [], []>, precision = #tpu.contract_precision<fp32>} : vector<16x16xf32>, vector<16x16xf32>, vector<16x16xf32> -> vector<16x16xf32>
    %20 = arith.mulf %11, %11 : vector<16x16xf32>
    %21 = arith.mulf %13, %13 : vector<16x16xf32>
    %22 = arith.mulf %11, %13 : vector<16x16xf32>
    %23 = arith.subf %15, %20 : vector<16x16xf32>
    %24 = arith.subf %17, %21 : vector<16x16xf32>
    %25 = arith.subf %19, %22 : vector<16x16xf32>
    %cst_13 = arith.constant 2.000000e+00 : f32
    %26 = vector.broadcast %cst_13 : f32 to vector<16x16xf32>
    %27 = arith.mulf %26, %22 : vector<16x16xf32>
    %cst_14 = arith.constant 9.99999974E-5 : f32
    %28 = vector.broadcast %cst_14 : f32 to vector<16x16xf32>
    %29 = arith.addf %27, %28 : vector<16x16xf32>
    %cst_15 = arith.constant 2.000000e+00 : f32
    %30 = vector.broadcast %cst_15 : f32 to vector<16x16xf32>
    %31 = arith.mulf %30, %25 : vector<16x16xf32>
    %cst_16 = arith.constant 8.99999984E-4 : f32
    %32 = vector.broadcast %cst_16 : f32 to vector<16x16xf32>
    %33 = arith.addf %31, %32 : vector<16x16xf32>
    %34 = arith.mulf %29, %33 : vector<16x16xf32>
    %35 = arith.addf %20, %21 : vector<16x16xf32>
    %cst_17 = arith.constant 9.99999974E-5 : f32
    %36 = vector.broadcast %cst_17 : f32 to vector<16x16xf32>
    %37 = arith.addf %35, %36 : vector<16x16xf32>
    %38 = arith.addf %23, %24 : vector<16x16xf32>
    %cst_18 = arith.constant 8.99999984E-4 : f32
    %39 = vector.broadcast %cst_18 : f32 to vector<16x16xf32>
    %40 = arith.addf %38, %39 : vector<16x16xf32>
    %41 = arith.mulf %37, %40 : vector<16x16xf32>
    %42 = tpu.reciprocal %41 {approx = true} : vector<16x16xf32> -> vector<16x16xf32>
    %43 = arith.mulf %34, %42 : vector<16x16xf32>
    %cst_19 = arith.constant dense<0.000000e+00> : vector<16xf32>
    %44 = vector.multi_reduction <add>, %43, %cst_19 [0] : vector<16x16xf32> to vector<16xf32>
    %45 = vector.shape_cast %44 : vector<16xf32> to vector<1x16xf32>
    %46 = arith.addf %9, %45 : vector<1x16xf32>
    %47 = vector.extract_strided_slice %8 {offsets = [16, 0], sizes = [16, 16], strides = [1, 1]} : vector<480x16xf32> to vector<16x16xf32>
    %cst_20 = arith.constant dense<0.000000e+00> : vector<16x16xf32>
    %48 = tpu.matmul %2, %47, %cst_20 {dimension_numbers = #tpu.dot_dimension_numbers<[1], [0], [0], [1], [0, 0, 1, 1], [], []>, precision = #tpu.contract_precision<fp32>} : vector<16x16xf32>, vector<16x16xf32>, vector<16x16xf32> -> vector<16x16xf32>
    %49 = vector.extract_strided_slice %8 {offsets = [112, 0], sizes = [16, 16], strides = [1, 1]} : vector<480x16xf32> to vector<16x16xf32>
    %cst_21 = arith.constant dense<0.000000e+00> : vector<16x16xf32>
    %50 = tpu.matmul %2, %49, %cst_21 {dimension_numbers = #tpu.dot_dimension_numbers<[1], [0], [0], [1], [0, 0, 1, 1], [], []>, precision = #tpu.contract_precision<fp32>} : vector<16x16xf32>, vector<16x16xf32>, vector<16x16xf32> -> vector<16x16xf32>
    %51 = vector.extract_strided_slice %8 {offsets = [208, 0], sizes = [16, 16], strides = [1, 1]} : vector<480x16xf32> to vector<16x16xf32>
    %cst_22 = arith.constant dense<0.000000e+00> : vector<16x16xf32>
    %52 = tpu.matmul %2, %51, %cst_22 {dimension_numbers = #tpu.dot_dimension_numbers<[1], [0], [0], [1], [0, 0, 1, 1], [], []>, precision = #tpu.contract_precision<fp32>} : vector<16x16xf32>, vector<16x16xf32>, vector<16x16xf32> -> vector<16x16xf32>
    %53 = vector.extract_strided_slice %8 {offsets = [304, 0], sizes = [16, 16], strides = [1, 1]} : vector<480x16xf32> to vector<16x16xf32>
    %cst_23 = arith.constant dense<0.000000e+00> : vector<16x16xf32>
    %54 = tpu.matmul %2, %53, %cst_23 {dimension_numbers = #tpu.dot_dimension_numbers<[1], [0], [0], [1], [0, 0, 1, 1], [], []>, precision = #tpu.contract_precision<fp32>} : vector<16x16xf32>, vector<16x16xf32>, vector<16x16xf32> -> vector<16x16xf32>
    %55 = vector.extract_strided_slice %8 {offsets = [400, 0], sizes = [16, 16], strides = [1, 1]} : vector<480x16xf32> to vector<16x16xf32>
    %cst_24 = arith.constant dense<0.000000e+00> : vector<16x16xf32>
    %56 = tpu.matmul %2, %55, %cst_24 {dimension_numbers = #tpu.dot_dimension_numbers<[1], [0], [0], [1], [0, 0, 1, 1], [], []>, precision = #tpu.contract_precision<fp32>} : vector<16x16xf32>, vector<16x16xf32>, vector<16x16xf32> -> vector<16x16xf32>
    %57 = arith.mulf %48, %48 : vector<16x16xf32>
    %58 = arith.mulf %50, %50 : vector<16x16xf32>
    %59 = arith.mulf %48, %50 : vector<16x16xf32>
    %60 = arith.subf %52, %57 : vector<16x16xf32>
    %61 = arith.subf %54, %58 : vector<16x16xf32>
    %62 = arith.subf %56, %59 : vector<16x16xf32>
    %cst_25 = arith.constant 2.000000e+00 : f32
    %63 = vector.broadcast %cst_25 : f32 to vector<16x16xf32>
    %64 = arith.mulf %63, %59 : vector<16x16xf32>
    %cst_26 = arith.constant 9.99999974E-5 : f32
    %65 = vector.broadcast %cst_26 : f32 to vector<16x16xf32>
    %66 = arith.addf %64, %65 : vector<16x16xf32>
    %cst_27 = arith.constant 2.000000e+00 : f32
    %67 = vector.broadcast %cst_27 : f32 to vector<16x16xf32>
    %68 = arith.mulf %67, %62 : vector<16x16xf32>
    %cst_28 = arith.constant 8.99999984E-4 : f32
    %69 = vector.broadcast %cst_28 : f32 to vector<16x16xf32>
    %70 = arith.addf %68, %69 : vector<16x16xf32>
    %71 = arith.mulf %66, %70 : vector<16x16xf32>
    %72 = arith.addf %57, %58 : vector<16x16xf32>
    %cst_29 = arith.constant 9.99999974E-5 : f32
    %73 = vector.broadcast %cst_29 : f32 to vector<16x16xf32>
    %74 = arith.addf %72, %73 : vector<16x16xf32>
    %75 = arith.addf %60, %61 : vector<16x16xf32>
    %cst_30 = arith.constant 8.99999984E-4 : f32
    %76 = vector.broadcast %cst_30 : f32 to vector<16x16xf32>
    %77 = arith.addf %75, %76 : vector<16x16xf32>
    %78 = arith.mulf %74, %77 : vector<16x16xf32>
    %79 = tpu.reciprocal %78 {approx = true} : vector<16x16xf32> -> vector<16x16xf32>
    %80 = arith.mulf %71, %79 : vector<16x16xf32>
    %cst_31 = arith.constant dense<0.000000e+00> : vector<16xf32>
    %81 = vector.multi_reduction <add>, %80, %cst_31 [0] : vector<16x16xf32> to vector<16xf32>
    %82 = vector.shape_cast %81 : vector<16xf32> to vector<1x16xf32>
    %83 = arith.addf %46, %82 : vector<1x16xf32>
    %84 = vector.extract_strided_slice %8 {offsets = [32, 0], sizes = [16, 16], strides = [1, 1]} : vector<480x16xf32> to vector<16x16xf32>
    %cst_32 = arith.constant dense<0.000000e+00> : vector<16x16xf32>
    %85 = tpu.matmul %2, %84, %cst_32 {dimension_numbers = #tpu.dot_dimension_numbers<[1], [0], [0], [1], [0, 0, 1, 1], [], []>, precision = #tpu.contract_precision<fp32>} : vector<16x16xf32>, vector<16x16xf32>, vector<16x16xf32> -> vector<16x16xf32>
    %86 = vector.extract_strided_slice %8 {offsets = [128, 0], sizes = [16, 16], strides = [1, 1]} : vector<480x16xf32> to vector<16x16xf32>
    %cst_33 = arith.constant dense<0.000000e+00> : vector<16x16xf32>
    %87 = tpu.matmul %2, %86, %cst_33 {dimension_numbers = #tpu.dot_dimension_numbers<[1], [0], [0], [1], [0, 0, 1, 1], [], []>, precision = #tpu.contract_precision<fp32>} : vector<16x16xf32>, vector<16x16xf32>, vector<16x16xf32> -> vector<16x16xf32>
    %88 = vector.extract_strided_slice %8 {offsets = [224, 0], sizes = [16, 16], strides = [1, 1]} : vector<480x16xf32> to vector<16x16xf32>
    %cst_34 = arith.constant dense<0.000000e+00> : vector<16x16xf32>
    %89 = tpu.matmul %2, %88, %cst_34 {dimension_numbers = #tpu.dot_dimension_numbers<[1], [0], [0], [1], [0, 0, 1, 1], [], []>, precision = #tpu.contract_precision<fp32>} : vector<16x16xf32>, vector<16x16xf32>, vector<16x16xf32> -> vector<16x16xf32>
    %90 = vector.extract_strided_slice %8 {offsets = [320, 0], sizes = [16, 16], strides = [1, 1]} : vector<480x16xf32> to vector<16x16xf32>
    %cst_35 = arith.constant dense<0.000000e+00> : vector<16x16xf32>
    %91 = tpu.matmul %2, %90, %cst_35 {dimension_numbers = #tpu.dot_dimension_numbers<[1], [0], [0], [1], [0, 0, 1, 1], [], []>, precision = #tpu.contract_precision<fp32>} : vector<16x16xf32>, vector<16x16xf32>, vector<16x16xf32> -> vector<16x16xf32>
    %92 = vector.extract_strided_slice %8 {offsets = [416, 0], sizes = [16, 16], strides = [1, 1]} : vector<480x16xf32> to vector<16x16xf32>
    %cst_36 = arith.constant dense<0.000000e+00> : vector<16x16xf32>
    %93 = tpu.matmul %2, %92, %cst_36 {dimension_numbers = #tpu.dot_dimension_numbers<[1], [0], [0], [1], [0, 0, 1, 1], [], []>, precision = #tpu.contract_precision<fp32>} : vector<16x16xf32>, vector<16x16xf32>, vector<16x16xf32> -> vector<16x16xf32>
    %94 = arith.mulf %85, %85 : vector<16x16xf32>
    %95 = arith.mulf %87, %87 : vector<16x16xf32>
    %96 = arith.mulf %85, %87 : vector<16x16xf32>
    %97 = arith.subf %89, %94 : vector<16x16xf32>
    %98 = arith.subf %91, %95 : vector<16x16xf32>
    %99 = arith.subf %93, %96 : vector<16x16xf32>
    %cst_37 = arith.constant 2.000000e+00 : f32
    %100 = vector.broadcast %cst_37 : f32 to vector<16x16xf32>
    %101 = arith.mulf %100, %96 : vector<16x16xf32>
    %cst_38 = arith.constant 9.99999974E-5 : f32
    %102 = vector.broadcast %cst_38 : f32 to vector<16x16xf32>
    %103 = arith.addf %101, %102 : vector<16x16xf32>
    %cst_39 = arith.constant 2.000000e+00 : f32
    %104 = vector.broadcast %cst_39 : f32 to vector<16x16xf32>
    %105 = arith.mulf %104, %99 : vector<16x16xf32>
    %cst_40 = arith.constant 8.99999984E-4 : f32
    %106 = vector.broadcast %cst_40 : f32 to vector<16x16xf32>
    %107 = arith.addf %105, %106 : vector<16x16xf32>
    %108 = arith.mulf %103, %107 : vector<16x16xf32>
    %109 = arith.addf %94, %95 : vector<16x16xf32>
    %cst_41 = arith.constant 9.99999974E-5 : f32
    %110 = vector.broadcast %cst_41 : f32 to vector<16x16xf32>
    %111 = arith.addf %109, %110 : vector<16x16xf32>
    %112 = arith.addf %97, %98 : vector<16x16xf32>
    %cst_42 = arith.constant 8.99999984E-4 : f32
    %113 = vector.broadcast %cst_42 : f32 to vector<16x16xf32>
    %114 = arith.addf %112, %113 : vector<16x16xf32>
    %115 = arith.mulf %111, %114 : vector<16x16xf32>
    %116 = tpu.reciprocal %115 {approx = true} : vector<16x16xf32> -> vector<16x16xf32>
    %117 = arith.mulf %108, %116 : vector<16x16xf32>
    %cst_43 = arith.constant dense<0.000000e+00> : vector<16xf32>
    %118 = vector.multi_reduction <add>, %117, %cst_43 [0] : vector<16x16xf32> to vector<16xf32>
    %119 = vector.shape_cast %118 : vector<16xf32> to vector<1x16xf32>
    %120 = arith.addf %83, %119 : vector<1x16xf32>
    %121 = vector.extract_strided_slice %8 {offsets = [48, 0], sizes = [16, 16], strides = [1, 1]} : vector<480x16xf32> to vector<16x16xf32>
    %cst_44 = arith.constant dense<0.000000e+00> : vector<16x16xf32>
    %122 = tpu.matmul %2, %121, %cst_44 {dimension_numbers = #tpu.dot_dimension_numbers<[1], [0], [0], [1], [0, 0, 1, 1], [], []>, precision = #tpu.contract_precision<fp32>} : vector<16x16xf32>, vector<16x16xf32>, vector<16x16xf32> -> vector<16x16xf32>
    %123 = vector.extract_strided_slice %8 {offsets = [144, 0], sizes = [16, 16], strides = [1, 1]} : vector<480x16xf32> to vector<16x16xf32>
    %cst_45 = arith.constant dense<0.000000e+00> : vector<16x16xf32>
    %124 = tpu.matmul %2, %123, %cst_45 {dimension_numbers = #tpu.dot_dimension_numbers<[1], [0], [0], [1], [0, 0, 1, 1], [], []>, precision = #tpu.contract_precision<fp32>} : vector<16x16xf32>, vector<16x16xf32>, vector<16x16xf32> -> vector<16x16xf32>
    %125 = vector.extract_strided_slice %8 {offsets = [240, 0], sizes = [16, 16], strides = [1, 1]} : vector<480x16xf32> to vector<16x16xf32>
    %cst_46 = arith.constant dense<0.000000e+00> : vector<16x16xf32>
    %126 = tpu.matmul %2, %125, %cst_46 {dimension_numbers = #tpu.dot_dimension_numbers<[1], [0], [0], [1], [0, 0, 1, 1], [], []>, precision = #tpu.contract_precision<fp32>} : vector<16x16xf32>, vector<16x16xf32>, vector<16x16xf32> -> vector<16x16xf32>
    %127 = vector.extract_strided_slice %8 {offsets = [336, 0], sizes = [16, 16], strides = [1, 1]} : vector<480x16xf32> to vector<16x16xf32>
    %cst_47 = arith.constant dense<0.000000e+00> : vector<16x16xf32>
    %128 = tpu.matmul %2, %127, %cst_47 {dimension_numbers = #tpu.dot_dimension_numbers<[1], [0], [0], [1], [0, 0, 1, 1], [], []>, precision = #tpu.contract_precision<fp32>} : vector<16x16xf32>, vector<16x16xf32>, vector<16x16xf32> -> vector<16x16xf32>
    %129 = vector.extract_strided_slice %8 {offsets = [432, 0], sizes = [16, 16], strides = [1, 1]} : vector<480x16xf32> to vector<16x16xf32>
    %cst_48 = arith.constant dense<0.000000e+00> : vector<16x16xf32>
    %130 = tpu.matmul %2, %129, %cst_48 {dimension_numbers = #tpu.dot_dimension_numbers<[1], [0], [0], [1], [0, 0, 1, 1], [], []>, precision = #tpu.contract_precision<fp32>} : vector<16x16xf32>, vector<16x16xf32>, vector<16x16xf32> -> vector<16x16xf32>
    %131 = arith.mulf %122, %122 : vector<16x16xf32>
    %132 = arith.mulf %124, %124 : vector<16x16xf32>
    %133 = arith.mulf %122, %124 : vector<16x16xf32>
    %134 = arith.subf %126, %131 : vector<16x16xf32>
    %135 = arith.subf %128, %132 : vector<16x16xf32>
    %136 = arith.subf %130, %133 : vector<16x16xf32>
    %cst_49 = arith.constant 2.000000e+00 : f32
    %137 = vector.broadcast %cst_49 : f32 to vector<16x16xf32>
    %138 = arith.mulf %137, %133 : vector<16x16xf32>
    %cst_50 = arith.constant 9.99999974E-5 : f32
    %139 = vector.broadcast %cst_50 : f32 to vector<16x16xf32>
    %140 = arith.addf %138, %139 : vector<16x16xf32>
    %cst_51 = arith.constant 2.000000e+00 : f32
    %141 = vector.broadcast %cst_51 : f32 to vector<16x16xf32>
    %142 = arith.mulf %141, %136 : vector<16x16xf32>
    %cst_52 = arith.constant 8.99999984E-4 : f32
    %143 = vector.broadcast %cst_52 : f32 to vector<16x16xf32>
    %144 = arith.addf %142, %143 : vector<16x16xf32>
    %145 = arith.mulf %140, %144 : vector<16x16xf32>
    %146 = arith.addf %131, %132 : vector<16x16xf32>
    %cst_53 = arith.constant 9.99999974E-5 : f32
    %147 = vector.broadcast %cst_53 : f32 to vector<16x16xf32>
    %148 = arith.addf %146, %147 : vector<16x16xf32>
    %149 = arith.addf %134, %135 : vector<16x16xf32>
    %cst_54 = arith.constant 8.99999984E-4 : f32
    %150 = vector.broadcast %cst_54 : f32 to vector<16x16xf32>
    %151 = arith.addf %149, %150 : vector<16x16xf32>
    %152 = arith.mulf %148, %151 : vector<16x16xf32>
    %153 = tpu.reciprocal %152 {approx = true} : vector<16x16xf32> -> vector<16x16xf32>
    %154 = arith.mulf %145, %153 : vector<16x16xf32>
    %cst_55 = arith.constant dense<0.000000e+00> : vector<16xf32>
    %155 = vector.multi_reduction <add>, %154, %cst_55 [0] : vector<16x16xf32> to vector<16xf32>
    %156 = vector.shape_cast %155 : vector<16xf32> to vector<1x16xf32>
    %157 = arith.addf %120, %156 : vector<1x16xf32>
    %158 = vector.extract_strided_slice %8 {offsets = [64, 0], sizes = [16, 16], strides = [1, 1]} : vector<480x16xf32> to vector<16x16xf32>
    %cst_56 = arith.constant dense<0.000000e+00> : vector<16x16xf32>
    %159 = tpu.matmul %2, %158, %cst_56 {dimension_numbers = #tpu.dot_dimension_numbers<[1], [0], [0], [1], [0, 0, 1, 1], [], []>, precision = #tpu.contract_precision<fp32>} : vector<16x16xf32>, vector<16x16xf32>, vector<16x16xf32> -> vector<16x16xf32>
    %160 = vector.extract_strided_slice %8 {offsets = [160, 0], sizes = [16, 16], strides = [1, 1]} : vector<480x16xf32> to vector<16x16xf32>
    %cst_57 = arith.constant dense<0.000000e+00> : vector<16x16xf32>
    %161 = tpu.matmul %2, %160, %cst_57 {dimension_numbers = #tpu.dot_dimension_numbers<[1], [0], [0], [1], [0, 0, 1, 1], [], []>, precision = #tpu.contract_precision<fp32>} : vector<16x16xf32>, vector<16x16xf32>, vector<16x16xf32> -> vector<16x16xf32>
    %162 = vector.extract_strided_slice %8 {offsets = [256, 0], sizes = [16, 16], strides = [1, 1]} : vector<480x16xf32> to vector<16x16xf32>
    %cst_58 = arith.constant dense<0.000000e+00> : vector<16x16xf32>
    %163 = tpu.matmul %2, %162, %cst_58 {dimension_numbers = #tpu.dot_dimension_numbers<[1], [0], [0], [1], [0, 0, 1, 1], [], []>, precision = #tpu.contract_precision<fp32>} : vector<16x16xf32>, vector<16x16xf32>, vector<16x16xf32> -> vector<16x16xf32>
    %164 = vector.extract_strided_slice %8 {offsets = [352, 0], sizes = [16, 16], strides = [1, 1]} : vector<480x16xf32> to vector<16x16xf32>
    %cst_59 = arith.constant dense<0.000000e+00> : vector<16x16xf32>
    %165 = tpu.matmul %2, %164, %cst_59 {dimension_numbers = #tpu.dot_dimension_numbers<[1], [0], [0], [1], [0, 0, 1, 1], [], []>, precision = #tpu.contract_precision<fp32>} : vector<16x16xf32>, vector<16x16xf32>, vector<16x16xf32> -> vector<16x16xf32>
    %166 = vector.extract_strided_slice %8 {offsets = [448, 0], sizes = [16, 16], strides = [1, 1]} : vector<480x16xf32> to vector<16x16xf32>
    %cst_60 = arith.constant dense<0.000000e+00> : vector<16x16xf32>
    %167 = tpu.matmul %2, %166, %cst_60 {dimension_numbers = #tpu.dot_dimension_numbers<[1], [0], [0], [1], [0, 0, 1, 1], [], []>, precision = #tpu.contract_precision<fp32>} : vector<16x16xf32>, vector<16x16xf32>, vector<16x16xf32> -> vector<16x16xf32>
    %168 = arith.mulf %159, %159 : vector<16x16xf32>
    %169 = arith.mulf %161, %161 : vector<16x16xf32>
    %170 = arith.mulf %159, %161 : vector<16x16xf32>
    %171 = arith.subf %163, %168 : vector<16x16xf32>
    %172 = arith.subf %165, %169 : vector<16x16xf32>
    %173 = arith.subf %167, %170 : vector<16x16xf32>
    %cst_61 = arith.constant 2.000000e+00 : f32
    %174 = vector.broadcast %cst_61 : f32 to vector<16x16xf32>
    %175 = arith.mulf %174, %170 : vector<16x16xf32>
    %cst_62 = arith.constant 9.99999974E-5 : f32
    %176 = vector.broadcast %cst_62 : f32 to vector<16x16xf32>
    %177 = arith.addf %175, %176 : vector<16x16xf32>
    %cst_63 = arith.constant 2.000000e+00 : f32
    %178 = vector.broadcast %cst_63 : f32 to vector<16x16xf32>
    %179 = arith.mulf %178, %173 : vector<16x16xf32>
    %cst_64 = arith.constant 8.99999984E-4 : f32
    %180 = vector.broadcast %cst_64 : f32 to vector<16x16xf32>
    %181 = arith.addf %179, %180 : vector<16x16xf32>
    %182 = arith.mulf %177, %181 : vector<16x16xf32>
    %183 = arith.addf %168, %169 : vector<16x16xf32>
    %cst_65 = arith.constant 9.99999974E-5 : f32
    %184 = vector.broadcast %cst_65 : f32 to vector<16x16xf32>
    %185 = arith.addf %183, %184 : vector<16x16xf32>
    %186 = arith.addf %171, %172 : vector<16x16xf32>
    %cst_66 = arith.constant 8.99999984E-4 : f32
    %187 = vector.broadcast %cst_66 : f32 to vector<16x16xf32>
    %188 = arith.addf %186, %187 : vector<16x16xf32>
    %189 = arith.mulf %185, %188 : vector<16x16xf32>
    %190 = tpu.reciprocal %189 {approx = true} : vector<16x16xf32> -> vector<16x16xf32>
    %191 = arith.mulf %182, %190 : vector<16x16xf32>
    %cst_67 = arith.constant dense<0.000000e+00> : vector<16xf32>
    %192 = vector.multi_reduction <add>, %191, %cst_67 [0] : vector<16x16xf32> to vector<16xf32>
    %193 = vector.shape_cast %192 : vector<16xf32> to vector<1x16xf32>
    %194 = arith.addf %157, %193 : vector<1x16xf32>
    %195 = vector.extract_strided_slice %8 {offsets = [80, 0], sizes = [16, 16], strides = [1, 1]} : vector<480x16xf32> to vector<16x16xf32>
    %cst_68 = arith.constant dense<0.000000e+00> : vector<16x16xf32>
    %196 = tpu.matmul %2, %195, %cst_68 {dimension_numbers = #tpu.dot_dimension_numbers<[1], [0], [0], [1], [0, 0, 1, 1], [], []>, precision = #tpu.contract_precision<fp32>} : vector<16x16xf32>, vector<16x16xf32>, vector<16x16xf32> -> vector<16x16xf32>
    %197 = vector.extract_strided_slice %8 {offsets = [176, 0], sizes = [16, 16], strides = [1, 1]} : vector<480x16xf32> to vector<16x16xf32>
    %cst_69 = arith.constant dense<0.000000e+00> : vector<16x16xf32>
    %198 = tpu.matmul %2, %197, %cst_69 {dimension_numbers = #tpu.dot_dimension_numbers<[1], [0], [0], [1], [0, 0, 1, 1], [], []>, precision = #tpu.contract_precision<fp32>} : vector<16x16xf32>, vector<16x16xf32>, vector<16x16xf32> -> vector<16x16xf32>
    %199 = vector.extract_strided_slice %8 {offsets = [272, 0], sizes = [16, 16], strides = [1, 1]} : vector<480x16xf32> to vector<16x16xf32>
    %cst_70 = arith.constant dense<0.000000e+00> : vector<16x16xf32>
    %200 = tpu.matmul %2, %199, %cst_70 {dimension_numbers = #tpu.dot_dimension_numbers<[1], [0], [0], [1], [0, 0, 1, 1], [], []>, precision = #tpu.contract_precision<fp32>} : vector<16x16xf32>, vector<16x16xf32>, vector<16x16xf32> -> vector<16x16xf32>
    %201 = vector.extract_strided_slice %8 {offsets = [368, 0], sizes = [16, 16], strides = [1, 1]} : vector<480x16xf32> to vector<16x16xf32>
    %cst_71 = arith.constant dense<0.000000e+00> : vector<16x16xf32>
    %202 = tpu.matmul %2, %201, %cst_71 {dimension_numbers = #tpu.dot_dimension_numbers<[1], [0], [0], [1], [0, 0, 1, 1], [], []>, precision = #tpu.contract_precision<fp32>} : vector<16x16xf32>, vector<16x16xf32>, vector<16x16xf32> -> vector<16x16xf32>
    %203 = vector.extract_strided_slice %8 {offsets = [464, 0], sizes = [16, 16], strides = [1, 1]} : vector<480x16xf32> to vector<16x16xf32>
    %cst_72 = arith.constant dense<0.000000e+00> : vector<16x16xf32>
    %204 = tpu.matmul %2, %203, %cst_72 {dimension_numbers = #tpu.dot_dimension_numbers<[1], [0], [0], [1], [0, 0, 1, 1], [], []>, precision = #tpu.contract_precision<fp32>} : vector<16x16xf32>, vector<16x16xf32>, vector<16x16xf32> -> vector<16x16xf32>
    %205 = arith.mulf %196, %196 : vector<16x16xf32>
    %206 = arith.mulf %198, %198 : vector<16x16xf32>
    %207 = arith.mulf %196, %198 : vector<16x16xf32>
    %208 = arith.subf %200, %205 : vector<16x16xf32>
    %209 = arith.subf %202, %206 : vector<16x16xf32>
    %210 = arith.subf %204, %207 : vector<16x16xf32>
    %cst_73 = arith.constant 2.000000e+00 : f32
    %211 = vector.broadcast %cst_73 : f32 to vector<16x16xf32>
    %212 = arith.mulf %211, %207 : vector<16x16xf32>
    %cst_74 = arith.constant 9.99999974E-5 : f32
    %213 = vector.broadcast %cst_74 : f32 to vector<16x16xf32>
    %214 = arith.addf %212, %213 : vector<16x16xf32>
    %cst_75 = arith.constant 2.000000e+00 : f32
    %215 = vector.broadcast %cst_75 : f32 to vector<16x16xf32>
    %216 = arith.mulf %215, %210 : vector<16x16xf32>
    %cst_76 = arith.constant 8.99999984E-4 : f32
    %217 = vector.broadcast %cst_76 : f32 to vector<16x16xf32>
    %218 = arith.addf %216, %217 : vector<16x16xf32>
    %219 = arith.mulf %214, %218 : vector<16x16xf32>
    %220 = arith.addf %205, %206 : vector<16x16xf32>
    %cst_77 = arith.constant 9.99999974E-5 : f32
    %221 = vector.broadcast %cst_77 : f32 to vector<16x16xf32>
    %222 = arith.addf %220, %221 : vector<16x16xf32>
    %223 = arith.addf %208, %209 : vector<16x16xf32>
    %cst_78 = arith.constant 8.99999984E-4 : f32
    %224 = vector.broadcast %cst_78 : f32 to vector<16x16xf32>
    %225 = arith.addf %223, %224 : vector<16x16xf32>
    %226 = arith.mulf %222, %225 : vector<16x16xf32>
    %227 = tpu.reciprocal %226 {approx = true} : vector<16x16xf32> -> vector<16x16xf32>
    %228 = arith.mulf %219, %227 : vector<16x16xf32>
    %cst_79 = arith.constant dense<0.000000e+00> : vector<16xf32>
    %229 = vector.multi_reduction <add>, %228, %cst_79 [0] : vector<16x16xf32> to vector<16xf32>
    %230 = vector.shape_cast %229 : vector<16xf32> to vector<1x16xf32>
    %231 = arith.addf %194, %230 : vector<1x16xf32>
    %c0_80 = arith.constant 0 : index
    %c0_81 = arith.constant 0 : index
    %c0_82 = arith.constant 0 : index
    %232 = vector.load %arg5[%c0_80, %c0_81, %c0_82] : memref<1x1x16xf32, #tpu.memory_space<vmem>>, vector<1x1x16xf32>
    %233 = vector.shape_cast %232 : vector<1x1x16xf32> to vector<1x16xf32>
    %234 = vector.shape_cast %231 : vector<1x16xf32> to vector<1x1x16xf32>
    tpu.vector_store %arg5[%c0_80, %c0_81, %c0_82], %234 {strides = array<i32>} : memref<1x1x16xf32, #tpu.memory_space<vmem>>, vector<1x1x16xf32>,
    return
  }
  func.func @transform_0(%arg0: i32) -> (i32, i32) {
    %c0_i32 = arith.constant 0 : i32
    %c0_i32_0 = arith.constant 0 : i32
    return %arg0, %c0_i32 : i32, i32
  }
  func.func @transform_1(%arg0: i32) -> (i32, i32) {
    %c0_i32 = arith.constant 0 : i32
    %c0_i32_0 = arith.constant 0 : i32
    return %arg0, %c0_i32 : i32, i32
  }
  func.func @transform_2(%arg0: i32) -> (i32, i32) {
    %c0_i32 = arith.constant 0 : i32
    %c0_i32_0 = arith.constant 0 : i32
    %c0_i32_1 = arith.constant 0 : i32
    return %c0_i32, %c0_i32_0 : i32, i32
  }
  func.func @transform_3(%arg0: i32) -> (i32, i32) {
    %c0_i32 = arith.constant 0 : i32
    %c0_i32_0 = arith.constant 0 : i32
    %c0_i32_1 = arith.constant 0 : i32
    return %c0_i32, %c0_i32_0 : i32, i32
  }
  func.func @transform_4(%arg0: i32) -> (i32, i32, i32) {
    %c0_i32 = arith.constant 0 : i32
    %c0_i32_0 = arith.constant 0 : i32
    %c0_i32_1 = arith.constant 0 : i32
    return %arg0, %c0_i32, %c0_i32_0 : i32, i32, i32
  }
}

</mosaic_0001>

<bundles_post_ra>
// kernel: tpu_custom_call.1
= control target key start
LH: loop header
LB: loop body
LE: loop exit
PB: predicated region body
PF: predicated region fallthrough
CT: control target
= control target key end

     0   :  { %vm82_vm0 = vcmask 130048   ;;  %s24940_s0 = inlined_call_operand.vmem [shape: f32[96,16], index: 0, kind: input, shape index: {}]   ;;  %s24941_s1 = inlined_call_operand.vmem [shape: f32[96,16], index: 1, kind: input, shape index: {}]   ;;  %s24942_s2 = inlined_call_operand.vmem [shape: f32[16,16], index: 2, kind: input, shape index: {}]   ;;  %s24943_s3 = inlined_call_operand.vmem [shape: f32[16,16], index: 3, kind: input, shape index: {}]   ;;  %s24944_s4 = inlined_call_operand.hbm [shape: f32[1,1,16], index: 4, kind: output, shape index: {}]  }
   0x1   :  { %v45_v0 = vld [vmem:[%s24943_s3 + $0x8] sm:$0xff]  ;;  %v44_v1 = vld [vmem:[%s24943_s3] sm:$0xff]  ;;  %v21636_v8 = vld [vmem:[%s24940_s0 + $0x10] sm:$0xff] }
   0x2   :  { %v21615_v2 = vld [vmem:[%s24940_s0] sm:$0xff]  ;;  %v21617_v3 = vand.u32 4294901760, %v45_v0  ;;  %v21619_v4 = vand.u32 4294901760, %v44_v1  ;;  %v21631_v7 = vld [vmem:[%s24940_s0 + $0x8] sm:$0xff]  ;;  %v90_v12 = vsel %vm82_vm0, %v21636_v8, 0  ;;  %v21651_v13 = vld [vmem:[%s24940_s0 + $0x18] sm:$0xff] }
   0x3   :  { %v21624_v5 = vld [vmem:[%s24941_s1] sm:$0xff]  ;;  %v84_v6 = vsel %vm82_vm0, %v21615_v2, 0  ;;  %v87_v11 = vsel %vm82_vm0, %v21631_v7, 0  ;;  %v21661_v15 = vld [vmem:[%s24940_s0 + $0x28] sm:$0xff]  ;;  %v21672_v19 = vand.u32 4294901760, %v90_v12  ;;  %v93_v21 = vsel %vm82_vm0, %v21651_v13, 0 }
   0x4   :  { %25131 = vst [vmem:[#allocation5_spill] sm:$0xff] %v21619_v4  ;;  %v21640_v9 = vmul.f32 %v21624_v5, %v21615_v2  ;;  %v21642_v10 = vand.u32 4294901760, %v84_v6  ;;  %v21656_v14 = vld [vmem:[%s24940_s0 + $0x20] sm:$0xff]  ;;  %19709 = vmatprep.subr.mxu0 %v21617_v3  ;;  %v21665_v16 = vsub.f32 %v45_v0, %v21617_v3  ;;  %v21667_v17 = vand.u32 4294901760, %v87_v11  ;;  %v21728_v40 = vld [vmem:[%s24940_s0 + $0x30] sm:$0xff]  ;;  %v21733_v41 = vld [vmem:[%s24940_s0 + $0x38] sm:$0xff] }
   0x5   :  { %v21670_v18 = vsub.f32 %v44_v1, %v21619_v4  ;;  %25134 = vst [vmem:[#allocation8_spill] sm:$0xff] %v21672_v19  ;;  %19710 = vmatpush3.msra.mxu0 %v21617_v3  ;;  %v96_v22 = vsel %vm82_vm0, %v21656_v14, 0  ;;  %v99_v23 = vsel %vm82_vm0, %v21661_v15, 0  ;;  %v21696_v27 = vsub.f32 %v90_v12, %v21672_v19  ;;  %v21744_v46 = vld [vmem:[%s24940_s0 + $0x40] sm:$0xff] }
   0x6   :  { %25132 = vst [vmem:[#allocation6_spill] sm:$0xff] %v21642_v10  ;;  %25133 = vst [vmem:[#allocation7_spill] sm:$0xff] %v21667_v17  ;;  %v21676_v20 = vsub.f32 %v84_v6, %v21642_v10  ;;  %19807 = vmatprep.mubr.f32.mxu1 %v21642_v10  ;;  %19711 = vmatprep.subr.mxu0 %v21619_v4  ;;  %v21687_v24 = vand.u32 4294901760, %v21665_v16  ;;  %v21690_v25 = vsub.f32 %v87_v11, %v21667_v17 }
   0x7   :  { %v21693_v26 = vand.u32 4294901760, %v21670_v18  ;;  %19712 = vmatpush3.msra.mxu0 %v21619_v4  ;;  %v21700_v29 = vand.u32 4294901760, %v93_v21  ;;  %v21702_v30 = vand.u32 4294901760, %v96_v22  ;;  %v21704_v31 = vand.u32 4294901760, %v99_v23 }
   0x8   :  { %v24955_v28 = vand.u32 4294901760, %v21676_v20  ;;  %v962_v32 = vsub.f32 %v21665_v16, %v21687_v24  ;;  %v24954_v33 = vand.u32 4294901760, %v21690_v25  ;;  %v24953_v35 = vand.u32 4294901760, %v21696_v27  ;;  %19897 = vmatprep.subr.mxu0 %v21665_v16 }
   0x9   :  { %25135 = vst [vmem:[#allocation9_spill] sm:$0xff] %v21700_v29  ;;  %25136 = vst [vmem:[#allocation10_spill] sm:$0xff] %v21702_v30  ;;  %v969_v34 = vsub.f32 %v21670_v18, %v21693_v26  ;;  %v21717_v37 = vsub.f32 %v93_v21, %v21700_v29  ;;  %v21720_v38 = vsub.f32 %v96_v22, %v21702_v30 }
   0xa   :  { %25137 = vst [vmem:[#allocation11_spill] sm:$0xff] %v21704_v31  ;;  %v333_v36 = vsub.f32 %v21676_v20, %v24955_v28  ;;  %v21723_v39 = vsub.f32 %v99_v23, %v21704_v31  ;;  %v963_v42 = vand.u32 4294901760, %v962_v32  ;;  %v343_v43 = vsub.f32 %v21690_v25, %v24954_v33 }
   0xb   :  { %25138 = vst [vmem:[#allocation12_spill] sm:$0xff] %v21717_v37  ;;  %25139 = vst [vmem:[#allocation13_spill] sm:$0xff] %v21720_v38  ;;  %v970_v44 = vand.u32 4294901760, %v969_v34  ;;  %v353_v45 = vsub.f32 %v21696_v27, %v24953_v35 }
   0xc   :  { %25140 = vst [vmem:[#allocation14_spill] sm:$0xff] %v21723_v39 }
   0xd   :  { %9 = vsyncpa [#allocation3], 0  ;;  %v334_v47 = vand.u32 4294901760, %v333_v36  ;;  %v24952_v48 = vand.u32 4294901760, %v21717_v37  ;;  %v24948_v49 = vand.u32 4294901760, %v21720_v38  ;;  %v24947_v50 = vand.u32 4294901760, %v21723_v39  ;;  %19803 = vmatprep.subr.mxu1 %v963_v42 }
   0xe   :  { %v21752_v51 = vld [vmem:[%s24940_s0 + $0x48] sm:$0xff]  ;;  %v21757_v52 = vld [vmem:[%s24940_s0 + $0x50] sm:$0xff]  ;;  %v344_v53 = vand.u32 4294901760, %v343_v43  ;;  %v354_v54 = vand.u32 4294901760, %v353_v45  ;;  %v102_v55 = vsel %vm82_vm0, %v21728_v40, 0  ;;  %v105_v56 = vsel %vm82_vm0, %v21733_v41, 0  ;;  %19804 = vmatpush3.msra.mxu1 %v963_v42 }
   0xf   :  { %19713 = vmatprep.mubr.f32.mxu0 %v334_v47  ;;  %v363_v57 = vsub.f32 %v21717_v37, %v24952_v48  ;;  %v373_v58 = vsub.f32 %v21720_v38, %v24948_v49  ;;  %v383_v59 = vsub.f32 %v21723_v39, %v24947_v50  ;;  %v21772_v60 = vand.u32 4294901760, %v102_v55  ;;  %19805 = vmatprep.subr.mxu1 %v970_v44  ;;  %v21785_v1 = vld [vmem:[%s24940_s0 + $0x58] sm:$0xff]  ;;  %v21790_v6 = vld [vmem:[%s24941_s1 + $0x8] sm:$0xff] }
  0x10   :  { %19714 = vmatmul.mubr.f32.vlgmr.msra.gmra.mxu0 %v344_v53  ;;  %v21774_v61 = vand.u32 4294901760, %v105_v56  ;;  %v108_v62 = vsel %vm82_vm0, %v21744_v46, 0  ;;  %v111_v63 = vsel %vm82_vm0, %v21752_v51, 0  ;;  %v114_v0 = vsel %vm82_vm0, %v21757_v52, 0  ;;  %19806 = vmatpush3.msra.mxu1 %v970_v44 }
  0x11   :  { %25141 = vst [vmem:[#allocation15_spill] sm:$0xff] %v21772_v60  ;;  %19716 = vmatprep.mubr.f32.mxu0 %v354_v54  ;;  %v364_v11 = vand.u32 4294901760, %v363_v57  ;;  %v374_v12 = vand.u32 4294901760, %v373_v58  ;;  %v384_v21 = vand.u32 4294901760, %v383_v59  ;;  %v21793_v22 = vsub.f32 %v102_v55, %v21772_v60  ;;  %19808 = vmatmul.mubr.f32.vlgmr.msra.gmra.mxu1 %v21667_v17 }
  0x12   :  { %25142 = vst [vmem:[#allocation16_spill] sm:$0xff] %v21774_v61  ;;  %v21797_v23 = vsub.f32 %v105_v56, %v21774_v61  ;;  %v21799_v32 = vand.u32 4294901760, %v108_v62  ;;  %v21801_v34 = vand.u32 4294901760, %v111_v63  ;;  %v21803_v36 = vand.u32 4294901760, %v114_v0  ;;  %19898 = vmatpush3.msra.mxu0 %v21665_v16  ;;  %19810 = vmatprep.mubr.f32.mxu1 %v21672_v19 }
  0x13   :  { %25143 = vst [vmem:[#allocation17_spill] sm:$0xff] %v21793_v22  ;;  %v24945_v42 = vand.u32 4294901760, %v21793_v22  ;;  %v117_v43 = vsel %vm82_vm0, %v21785_v1, 0  ;;  %v120_v44 = vsel %vm82_vm0, %v21624_v5, 0  ;;  %v123_v45 = vsel %vm82_vm0, %v21790_v6, 0  ;;  %19991 = vmatprep.subr.mxu1 %v21617_v3  ;;  %19899 = vmatprep.subr.mxu0 %v21670_v18 }
  0x14   :  { %25144 = vst [vmem:[#allocation18_spill] sm:$0xff] %v21797_v23  ;;  %25145 = vst [vmem:[#allocation19_spill] sm:$0xff] %v21799_v32  ;;  %19717 = vmatmul.mubr.f32.gmra.mxu0 %v364_v11  ;;  %v24946_v47 = vand.u32 4294901760, %v21797_v23  ;;  %v21817_v16 = vsub.f32 %v108_v62, %v21799_v32  ;;  %v21820_v53 = vsub.f32 %v111_v63, %v21801_v34  ;;  %19992 = vmatpush3.msra.mxu1 %v21617_v3  ;;  %v21846_v11 = vld [vmem:[%s24941_s1 + $0x10] sm:$0xff]  ;;  %vm18601_vm1 = vcmask 122880  }
  0x15   :  { %25146 = vst [vmem:[#allocation20_spill] sm:$0xff] %v21801_v34  ;;  %25147 = vst [vmem:[#allocation21_spill] sm:$0xff] %v21803_v36  ;;  %v21823_v54 = vsub.f32 %v114_v0, %v21803_v36  ;;  %19719 = vmatprep.mubr.f32.mxu0 %v374_v12  ;;  %v393_v55 = vsub.f32 %v21793_v22, %v24945_v42  ;;  %v21829_v56 = vand.u32 4294901760, %v117_v43  ;;  %v21831_v57 = vand.u32 4294901760, %v120_v44 }
  0x16   :  { %25148 = vst [vmem:[#allocation22_spill] sm:$0xff] %v21817_v16  ;;  %25149 = vst [vmem:[#allocation23_spill] sm:$0xff] %v21820_v53  ;;  %v21833_v58 = vand.u32 4294901760, %v123_v45  ;;  %19811 = vmatmul.mubr.f32.gmra.mxu1 %v21700_v29  ;;  %v403_v59 = vsub.f32 %v21797_v23, %v24946_v47  ;;  %v24951_v62 = vand.u32 4294901760, %v21817_v16  ;;  %v24949_v63 = vand.u32 4294901760, %v21820_v53  ;;  %19900 = vmatpush3.msra.mxu0 %v21670_v18 }
  0x17   :  { %25150 = vst [vmem:[#allocation24_spill] sm:$0xff] %v21823_v54  ;;  %25151 = vst [vmem:[#allocation25_spill] sm:$0xff] %v21829_v56  ;;  %v24950_v0 = vand.u32 4294901760, %v21823_v54  ;;  %19813 = vmatprep.mubr.f32.mxu1 %v21702_v30  ;;  %v394_v12 = vand.u32 4294901760, %v393_v55  ;;  %v21851_v42 = vsub.f32 %v117_v43, %v21829_v56  ;;  %v21854_v47 = vsub.f32 %v120_v44, %v21831_v57  ;;  %v21872_v44 = vld [vmem:[%s24941_s1 + $0x18] sm:$0xff] }
  0x18   :  { %25152 = vst [vmem:[#allocation26_spill] sm:$0xff] %v21831_v57  ;;  %25153 = vst [vmem:[#allocation27_spill] sm:$0xff] %v21833_v58  ;;  %v21857_v50 = vsub.f32 %v123_v45, %v21833_v58  ;;  %19993 = vmatprep.subr.mxu1 %v21619_v4  ;;  %19720 = vmatmul.mubr.f32.gmra.mxu0 %v384_v21  ;;  %v404_v49 = vand.u32 4294901760, %v403_v59  ;;  %v413_v18 = vsub.f32 %v21817_v16, %v24951_v62  ;;  %v21888_v62 = vld [vmem:[%s24941_s1 + $0x28] sm:$0xff] }
  0x19   :  { %25154 = vst [vmem:[#allocation28_spill] sm:$0xff] %v21851_v42  ;;  %25155 = vst [vmem:[#allocation29_spill] sm:$0xff] %v21854_v47  ;;  %v423_v55 = vsub.f32 %v21820_v53, %v24949_v63  ;;  %v433_v43 = vsub.f32 %v21823_v54, %v24950_v0  ;;  %19994 = vmatpush3.msra.mxu1 %v21619_v4  ;;  %19722 = vmatprep.mubr.f32.mxu0 %v394_v12  ;;  %v24958_v21 = vand.u32 4294901760, %v21851_v42  ;;  %v21883_v0 = vld [vmem:[%s24941_s1 + $0x20] sm:$0xff]  ;;  %v21991_v54 = vld [vmem:[%s24941_s1 + $0x58] sm:$0xff] }
  0x1a   :  { %25156 = vst [vmem:[#allocation30_spill] sm:$0xff] %v21857_v50  ;;  %v24959_v45 = vand.u32 4294901760, %v21854_v47  ;;  %v126_v63 = vsel %vm82_vm0, %v21846_v11, 0  ;;  %20085 = vmatprep.subr.mxu0 %v21687_v24  ;;  %19814 = vmatmul.mubr.f32.gmra.mxu1 %v21704_v31  ;;  %v414_v12 = vand.u32 4294901760, %v413_v18  ;;  %v129_v31 = vsel %vm82_vm0, %v21872_v44, 0  ;;  %v21907_v18 = vld [vmem:[%s24941_s1 + $0x30] sm:$0xff] }
  0x1b   :  { %v424_v48 = vand.u32 4294901760, %v423_v55  ;;  %v21892_v35 = vand.u32 4294901760, %v126_v63  ;;  %20179 = vmatprep.subr.mxu1 %v21617_v3  ;;  %19816 = vmatprep.mubr.f32.mxu1 %v21772_v60  ;;  %v434_v33 = vand.u32 4294901760, %v433_v43  ;;  %v443_v28 = vsub.f32 %v21851_v42, %v24958_v21  ;;  %v21921_v60 = vld [vmem:[%s24941_s1 + $0x38] sm:$0xff] }
  0x1c   :  { %v453_v59 = vsub.f32 %v21854_v47, %v24959_v45  ;;  %19723 = vmatmul.mubr.f32.gmra.mxu0 %v404_v49  ;;  %v21912_v43 = vand.u32 4294901760, %v129_v31  ;;  %v132_v21 = vsel %vm82_vm0, %v21883_v0, 0  ;;  %v135_v45 = vsel %vm82_vm0, %v21888_v62, 0  ;;  %v21926_v49 = vld [vmem:[%s24941_s1 + $0x40] sm:$0xff] }
  0x1d   :  { %25157 = vst [vmem:[#allocation31_spill] sm:$0xff] %v21892_v35  ;;  %v21910_v55 = vsub.f32 %v126_v63, %v21892_v35  ;;  %19725 = vmatprep.mubr.f32.mxu0 %v414_v12  ;;  %v444_v63 = vand.u32 4294901760, %v443_v28  ;;  %v25160_v29 = vand.u32 4294901760, %v21857_v50  ;;  %v21931_v17 = vand.u32 4294901760, %v132_v21  ;;  %v21945_v28 = vld [vmem:[%s24941_s1 + $0x48] sm:$0xff] }
  0x1e   :  { %25159 = vst [vmem:[#allocation33_spill] sm:$0xff] %v21912_v43  ;;  %v454_v30 = vand.u32 4294901760, %v453_v59  ;;  %19817 = vmatmul.mubr.f32.gmra.mxu1 %v21774_v61  ;;  %v21936_v47 = vsub.f32 %v129_v31, %v21912_v43  ;;  %v21938_v42 = vand.u32 4294901760, %v135_v45  ;;  %v138_v12 = vsel %vm82_vm0, %v21907_v18, 0 }
  0x1f   :  { %25158 = vst [vmem:[#allocation32_spill] sm:$0xff] %v21910_v55  ;;  %v463_v19 = vsub.f32 %v21857_v50, %v25160_v29  ;;  %25161 = vst [vmem:[#allocation34_spill] sm:$0xff] %v21931_v17  ;;  %19819 = vmatprep.mubr.f32.mxu1 %v21799_v32  ;;  %v21949_v29 = vsub.f32 %v132_v21, %v21931_v17  ;;  %v21951_v59 = vand.u32 4294901760, %v138_v12  ;;  %v141_v31 = vsel %vm82_vm0, %v21921_v60, 0 }
  0x20   :  { %25162 = vst [vmem:[#allocation35_spill] sm:$0xff] %v21936_v47  ;;  %25163 = vst [vmem:[#allocation36_spill] sm:$0xff] %v21938_v42  ;;  %v144_v10 = vsel %vm82_vm0, %v21926_v49, 0  ;;  %19726 = vmatmul.mubr.f32.gmra.mxu0 %v424_v48  ;;  %v25166_v61 = vand.u32 4294901760, %v21910_v55  ;;  %v21962_v32 = vsub.f32 %v135_v45, %v21938_v42  ;;  %v21964_v21 = vand.u32 4294901760, %v141_v31 }
  0x21   :  { %25164 = vst [vmem:[#allocation37_spill] sm:$0xff] %v21949_v29  ;;  %25165 = vst [vmem:[#allocation38_spill] sm:$0xff] %v21951_v59  ;;  %19728 = vmatprep.mubr.f32.mxu0 %v434_v33  ;;  %v21968_v16 = vsub.f32 %v138_v12, %v21951_v59  ;;  %v21970_v23 = vand.u32 4294901760, %v144_v10  ;;  %v147_v48 = vsel %vm82_vm0, %v21945_v28, 0  ;;  %v25173_v45 = vand.u32 4294901760, %v21936_v47 }
  0x22   :  { %v473_v50 = vsub.f32 %v21910_v55, %v25166_v61  ;;  %25167 = vst [vmem:[#allocation39_spill] sm:$0xff] %v21962_v32  ;;  %25168 = vst [vmem:[#allocation40_spill] sm:$0xff] %v21964_v21  ;;  %v21977_v61 = vld [vmem:[%s24941_s1 + $0x50] sm:$0xff]  ;;  %19820 = vmatmul.mubr.f32.gmra.mxu1 %v21801_v34  ;;  %v21984_v12 = vsub.f32 %v141_v31, %v21964_v21  ;;  %v21986_v53 = vand.u32 4294901760, %v147_v48  ;;  %v464_v34 = vand.u32 4294901760, %v463_v19 }
  0x23   :  { %25169 = vst [vmem:[#allocation41_spill] sm:$0xff] %v21968_v16  ;;  %25170 = vst [vmem:[#allocation42_spill] sm:$0xff] %v21970_v23  ;;  %19822 = vmatprep.mubr.f32.mxu1 %v21803_v36  ;;  %v46_v55 = vmul.f32 %v21615_v2, %v21615_v2  ;;  %v483_v36 = vsub.f32 %v21936_v47, %v25173_v45  ;;  %v150_v31 = vsel %vm82_vm0, %v21977_v61, 0  ;;  %v25174_v22 = vand.u32 4294901760, %v21949_v29 }
  0x24   :  { %25171 = vst [vmem:[#allocation43_spill] sm:$0xff] %v21984_v12  ;;  %25172 = vst [vmem:[#allocation44_spill] sm:$0xff] %v21986_v53  ;;  %19729 = vmatmul.mubr.f32.gmra.mxu0 %v444_v63  ;;  %v474_v33 = vand.u32 4294901760, %v473_v50  ;;  %v22004_v38 = vsub.f32 %v144_v10, %v21970_v23  ;;  %v25176_v2 = vand.u32 4294901760, %v21962_v32  ;;  %v22010_v63 = vand.u32 4294901760, %v150_v31 }
  0x25   :  { %19731 = vmatprep.mubr.f32.mxu0 %v454_v30  ;;  %v493_v39 = vsub.f32 %v21949_v29, %v25174_v22  ;;  %v153_v45 = vsel %vm82_vm0, %v21991_v54, 0  ;;  %v25178_v30 = vand.u32 4294901760, %v21968_v16  ;;  %v22020_v22 = vsub.f32 %v147_v48, %v21986_v53 }
  0x26   :  { %25175 = vst [vmem:[#allocation45_spill] sm:$0xff] %v22004_v38  ;;  %19823 = vmatmul.mubr.f32.gmra.mxu1 %v21829_v56  ;;  %v503_v19 = vsub.f32 %v21962_v32, %v25176_v2  ;;  %25177 = vst [vmem:[#allocation46_spill] sm:$0xff] %v22010_v63  ;;  %v22022_v56 = vand.u32 4294901760, %v153_v45  ;;  %v484_v2 = vand.u32 4294901760, %v483_v36  ;;  %v156_v32 = vsel %vm82_vm0, %v46_v55, 0 }
  0x27   :  { %19825 = vmatprep.mubr.f32.mxu1 %v21831_v57  ;;  %v513_v50 = vsub.f32 %v21968_v16, %v25178_v30  ;;  %25179 = vst [vmem:[#allocation47_spill] sm:$0xff] %v22020_v22  ;;  %v47_v29 = vmul.f32 %v21631_v7, %v21631_v7  ;;  %v494_v57 = vand.u32 4294901760, %v493_v39  ;;  %v22029_v30 = vsub.f32 %v150_v31, %v22010_v63 }
  0x28   :  { %25180 = vst [vmem:[#allocation48_spill] sm:$0xff] %v22022_v56  ;;  %19732 = vmatmul.mubr.f32.gmra.mxu0 %v464_v34  ;;  %v22031_v10 = vand.u32 4294901760, %v156_v32  ;;  %v504_v48 = vand.u32 4294901760, %v503_v19  ;;  %v48_v36 = vmul.f32 %v21636_v8, %v21636_v8  ;;  %v49_v55 = vmul.f32 %v21651_v13, %v21651_v13 }
  0x29   :  { %19734 = vmatprep.mubr.f32.mxu0 %v474_v33  ;;  %25181 = vst [vmem:[#allocation49_spill] sm:$0xff] %v22029_v30  ;;  %v159_v34 = vsel %vm82_vm0, %v47_v29, 0  ;;  %v514_v39 = vand.u32 4294901760, %v513_v50  ;;  %v25183_v33 = vand.u32 4294901760, %v21984_v12  ;;  %v25186_v50 = vand.u32 4294901760, %v22004_v38 }
  0x2a   :  { %25182 = vst [vmem:[#allocation50_spill] sm:$0xff] %v22031_v10  ;;  %19826 = vmatmul.mubr.f32.gmra.mxu1 %v21833_v58  ;;  %v22045_v58 = vsub.f32 %v153_v45, %v22022_v56  ;;  %v22047_v29 = vand.u32 4294901760, %v159_v34  ;;  %v162_v19 = vsel %vm82_vm0, %v48_v36, 0  ;;  %v165_v16 = vsel %vm82_vm0, %v49_v55, 0 }
  0x2b   :  { %19828 = vmatprep.mubr.f32.mxu1 %v21892_v35  ;;  %v523_v31 = vsub.f32 %v21984_v12, %v25183_v33  ;;  %v50_v35 = vmul.f32 %v21656_v14, %v21656_v14  ;;  %v533_v33 = vsub.f32 %v22004_v38, %v25186_v50  ;;  %v22058_v45 = vsub.f32 %v156_v32, %v22031_v10 }
  0x2c   :  { %25184 = vst [vmem:[#allocation51_spill] sm:$0xff] %v22045_v58  ;;  %19735 = vmatmul.mubr.f32.gmra.mxu0 %v484_v2  ;;  %25185 = vst [vmem:[#allocation52_spill] sm:$0xff] %v22047_v29  ;;  %v22060_v2 = vand.u32 4294901760, %v162_v19  ;;  %v22063_v36 = vand.u32 4294901760, %v165_v16  ;;  %v25190_v50 = vand.u32 4294901760, %v22020_v22  ;;  %v25036_v32 = vand.u32 4294901760, %v22045_v58 }
  0x2d   :  { %19737 = vmatprep.mubr.f32.mxu0 %v494_v57  ;;  %25187 = vst [vmem:[#allocation53_spill] sm:$0xff] %v22058_v45  ;;  %v168_v55 = vsel %vm82_vm0, %v50_v35, 0  ;;  %v51_v57 = vmul.f32 %v21661_v15, %v21661_v15  ;;  %v524_v12 = vand.u32 4294901760, %v523_v31  ;;  %v22074_v38 = vsub.f32 %v159_v34, %v22047_v29 }
  0x2e   :  { %25188 = vst [vmem:[#allocation54_spill] sm:$0xff] %v22060_v2  ;;  %19829 = vmatmul.mubr.f32.gmra.mxu1 %v21912_v43  ;;  %25189 = vst [vmem:[#allocation55_spill] sm:$0xff] %v22063_v36  ;;  %v543_v47 = vsub.f32 %v22020_v22, %v25190_v50  ;;  %v22076_v43 = vand.u32 4294901760, %v168_v55  ;;  %v52_v4 = vmul.f32 %v21728_v40, %v21728_v40  ;;  %v25193_v31 = vand.u32 4294901760, %v22029_v30 }
  0x2f   :  { %19831 = vmatprep.mubr.f32.mxu1 %v21931_v17  ;;  %25191 = vst [vmem:[#allocation56_spill] sm:$0xff] %v22074_v38  ;;  %v171_v35 = vsel %vm82_vm0, %v51_v57, 0  ;;  %v534_v17 = vand.u32 4294901760, %v533_v33  ;;  %v22090_v34 = vsub.f32 %v165_v16, %v22063_v36 }
  0x30   :  { %19738 = vmatmul.mubr.f32.gmra.mxu0 %v504_v48  ;;  %25192 = vst [vmem:[#allocation57_spill] sm:$0xff] %v22076_v43  ;;  %v553_v37 = vsub.f32 %v22029_v30, %v25193_v31  ;;  %v22086_v48 = vsub.f32 %v162_v19, %v22060_v2  ;;  %v174_v57 = vsel %vm82_vm0, %v52_v4, 0  ;;  %v544_v33 = vand.u32 4294901760, %v543_v47 }
  0x31   :  { %19740 = vmatprep.mubr.f32.mxu0 %v514_v39  ;;  %25195 = vst [vmem:[#allocation59_spill] sm:$0xff] %v22090_v34  ;;  %v53_v39 = vmul.f32 %v21733_v41, %v21733_v41  ;;  %v563_v31 = vsub.f32 %v22045_v58, %v25036_v32  ;;  %v22100_v19 = vsub.f32 %v168_v55, %v22076_v43  ;;  %v22102_v50 = vand.u32 4294901760, %v171_v35 }
  0x32   :  { %25194 = vst [vmem:[#allocation58_spill] sm:$0xff] %v22086_v48  ;;  %19832 = vmatmul.mubr.f32.gmra.mxu1 %v21938_v42  ;;  %v22105_v42 = vand.u32 4294901760, %v174_v57  ;;  %v554_v47 = vand.u32 4294901760, %v553_v37  ;;  %v25199_v30 = vand.u32 4294901760, %v22058_v45  ;;  %v25202_v55 = vand.u32 4294901760, %v22074_v38 }
  0x33   :  { %19834 = vmatprep.mubr.f32.mxu1 %v21951_v59  ;;  %25196 = vst [vmem:[#allocation60_spill] sm:$0xff] %v22100_v19  ;;  %25197 = vst [vmem:[#allocation61_spill] sm:$0xff] %v22102_v50  ;;  %v177_v4 = vsel %vm82_vm0, %v53_v39, 0  ;;  %v54_v59 = vmul.f32 %v21744_v46, %v21744_v46  ;;  %v55_v39 = vmul.f32 %v21752_v51, %v21752_v51  ;;  %v564_v58 = vand.u32 4294901760, %v563_v31 }
  0x34   :  { %19741 = vmatmul.mubr.f32.gmra.mxu0 %v524_v12  ;;  %25198 = vst [vmem:[#allocation62_spill] sm:$0xff] %v22105_v42  ;;  %v573_v32 = vsub.f32 %v22058_v45, %v25199_v30  ;;  %v22122_v37 = vsub.f32 %v171_v35, %v22102_v50  ;;  %v22124_v30 = vand.u32 4294901760, %v177_v4  ;;  %v583_v12 = vsub.f32 %v22074_v38, %v25202_v55 }
  0x35   :  { %19743 = vmatprep.mubr.f32.mxu0 %v534_v17  ;;  %v180_v16 = vsel %vm82_vm0, %v54_v59, 0  ;;  %v22130_v59 = vsub.f32 %v174_v57, %v22105_v42  ;;  %v56_v31 = vmul.f32 %v21757_v52, %v21757_v52  ;;  %v25204_v35 = vand.u32 4294901760, %v22086_v48 }
  0x36   :  { %19835 = vmatmul.mubr.f32.gmra.mxu1 %v21964_v21  ;;  %25200 = vst [vmem:[#allocation63_spill] sm:$0xff] %v22122_v37  ;;  %25201 = vst [vmem:[#allocation64_spill] sm:$0xff] %v22124_v30  ;;  %v183_v21 = vsel %vm82_vm0, %v55_v39, 0  ;;  %v574_v17 = vand.u32 4294901760, %v573_v32  ;;  %v22138_v45 = vand.u32 4294901760, %v180_v16  ;;  %v25206_v57 = vand.u32 4294901760, %v22090_v34 }
  0x37   :  { %19837 = vmatprep.mubr.f32.mxu1 %v21970_v23  ;;  %25203 = vst [vmem:[#allocation65_spill] sm:$0xff] %v22130_v59  ;;  %v593_v23 = vsub.f32 %v22086_v48, %v25204_v35  ;;  %v186_v39 = vsel %vm82_vm0, %v56_v31, 0  ;;  %v58_v32 = vmul.f32 %v21624_v5, %v21624_v5  ;;  %v22155_v38 = vsub.f32 %v177_v4, %v22124_v30 }
  0x38   :  { %19744 = vmatmul.mubr.f32.gmra.mxu0 %v544_v33  ;;  %25205 = vst [vmem:[#allocation66_spill] sm:$0xff] %v22138_v45  ;;  %v57_v33 = vmul.f32 %v21785_v1, %v21785_v1  ;;  %v603_v55 = vsub.f32 %v22090_v34, %v25206_v57  ;;  %v584_v57 = vand.u32 4294901760, %v583_v12  ;;  %v59_v5 = vmul.f32 %v21790_v6, %v21790_v6 }
  0x39   :  { %19746 = vmatprep.mubr.f32.mxu0 %v554_v47  ;;  %v25207_v47 = vand.u32 4294901760, %v22100_v19  ;;  %25208 = vst [vmem:[#allocation67_spill] sm:$0xff] %v22155_v38  ;;  %v22163_v34 = vsub.f32 %v180_v16, %v22138_v45  ;;  %v60_v12 = vmul.f32 %v21846_v11, %v21846_v11 }
  0x3a   :  { %19838 = vmatmul.mubr.f32.gmra.mxu1 %v21986_v53  ;;  %v22157_v53 = vand.u32 4294901760, %v183_v21  ;;  %v189_v48 = vsel %vm82_vm0, %v57_v33, 0  ;;  %v604_v4 = vand.u32 4294901760, %v603_v55  ;;  %v25213_v33 = vand.u32 4294901760, %v22130_v59 }
  0x3b   :  { %19840 = vmatprep.mubr.f32.mxu1 %v22010_v63  ;;  %v613_v35 = vsub.f32 %v22100_v19, %v25207_v47  ;;  %v594_v63 = vand.u32 4294901760, %v593_v23  ;;  %25210 = vst [vmem:[#allocation69_spill] sm:$0xff] %v22163_v34  ;;  %v22165_v47 = vand.u32 4294901760, %v186_v39  ;;  %v25211_v23 = vand.u32 4294901760, %v22122_v37 }
  0x3c   :  { %25209 = vst [vmem:[#allocation68_spill] sm:$0xff] %v22157_v53  ;;  %19747 = vmatmul.mubr.f32.gmra.mxu0 %v564_v58  ;;  %v192_v58 = vsel %vm82_vm0, %v58_v32, 0  ;;  %v22178_v19 = vsub.f32 %v183_v21, %v22157_v53  ;;  %v633_v55 = vsub.f32 %v22130_v59, %v25213_v33  ;;  %v22183_v32 = vand.u32 4294901760, %v189_v48 }
  0x3d   :  { %19749 = vmatprep.mubr.f32.mxu0 %v574_v17  ;;  %v614_v31 = vand.u32 4294901760, %v613_v35  ;;  %v623_v16 = vsub.f32 %v22122_v37, %v25211_v23  ;;  %v61_v35 = vmul.f32 %v21872_v44, %v21872_v44  ;;  %v22190_v17 = vsub.f32 %v186_v39, %v22165_v47 }
  0x3e   :  { %19841 = vmatmul.mubr.f32.gmra.mxu1 %v22022_v56  ;;  %25212 = vst [vmem:[#allocation70_spill] sm:$0xff] %v22178_v19  ;;  %v195_v56 = vsel %vm82_vm0, %v59_v5, 0  ;;  %v22192_v21 = vand.u32 4294901760, %v192_v58  ;;  %v62_v33 = vmul.f32 %v21883_v0, %v21883_v0  ;;  %v25216_v5 = vand.u32 4294901760, %v22155_v38 }
  0x3f   :  { %19843 = vmatprep.mubr.f32.mxu1 %v22031_v10  ;;  %25214 = vst [vmem:[#allocation71_spill] sm:$0xff] %v22190_v17  ;;  %v22203_v10 = vand.u32 4294901760, %v195_v56  ;;  %v201_v39 = vsel %vm82_vm0, %v61_v35, 0  ;;  %v624_v59 = vand.u32 4294901760, %v623_v16  ;;  %v634_v37 = vand.u32 4294901760, %v633_v55 }
  0x40   :  { %19750 = vmatmul.mubr.f32.gmra.mxu0 %v584_v57  ;;  %25215 = vst [vmem:[#allocation72_spill] sm:$0xff] %v22192_v21  ;;  %v198_v57 = vsel %vm82_vm0, %v60_v12, 0  ;;  %v22207_v12 = vsub.f32 %v189_v48, %v22183_v32  ;;  %v22218_v35 = vsub.f32 %v192_v58, %v22192_v21  ;;  %v22221_v48 = vand.u32 4294901760, %v201_v39 }
  0x41   :  { %19752 = vmatprep.mubr.f32.mxu0 %v594_v63  ;;  %v643_v63 = vsub.f32 %v22155_v38, %v25216_v5  ;;  %v25217_v5 = vand.u32 4294901760, %v22163_v34  ;;  %v64_v16 = vmul.f32 %v21907_v18, %v21907_v18  ;;  %v25219_v55 = vand.u32 4294901760, %v22178_v19 }
  0x42   :  { %19844 = vmatmul.mubr.f32.gmra.mxu1 %v22047_v29  ;;  %v22209_v29 = vand.u32 4294901760, %v198_v57  ;;  %25218 = vst [vmem:[#allocation73_spill] sm:$0xff] %v22218_v35  ;;  %v22231_v38 = vsub.f32 %v195_v56, %v22203_v10 }
  0x43   :  { %19846 = vmatprep.mubr.f32.mxu1 %v22060_v2  ;;  %v63_v2 = vmul.f32 %v21888_v62, %v21888_v62  ;;  %v653_v23 = vsub.f32 %v22163_v34, %v25217_v5  ;;  %v663_v5 = vsub.f32 %v22178_v19, %v25219_v55  ;;  %v210_v34 = vsel %vm82_vm0, %v64_v16, 0 }
  0x44   :  { %19753 = vmatmul.mubr.f32.gmra.mxu0 %v604_v4  ;;  %v204_v4 = vsel %vm82_vm0, %v62_v33, 0  ;;  %25220 = vst [vmem:[#allocation74_spill] sm:$0xff] %v22231_v38  ;;  %v22236_v33 = vsub.f32 %v198_v57, %v22209_v29  ;;  %v25222_v55 = vand.u32 4294901760, %v22190_v17  ;;  %v66_v16 = vmul.f32 %v21926_v49, %v21926_v49 }
  0x45   :  { %19755 = vmatprep.mubr.f32.mxu0 %v614_v31  ;;  %v644_v31 = vand.u32 4294901760, %v643_v63  ;;  %v207_v58 = vsel %vm82_vm0, %v63_v2, 0  ;;  %v65_v63 = vmul.f32 %v21921_v60, %v21921_v60  ;;  %v22245_v2 = vand.u32 4294901760, %v204_v4 }
  0x46   :  { %19847 = vmatmul.mubr.f32.gmra.mxu1 %v22063_v36  ;;  %v25087_v36 = vand.u32 4294901760, %v22207_v12  ;;  %25221 = vst [vmem:[#allocation75_spill] sm:$0xff] %v22236_v33  ;;  %v673_v56 = vsub.f32 %v22190_v17, %v25222_v55  ;;  %v22251_v57 = vand.u32 4294901760, %v207_v58  ;;  %v22257_v55 = vand.u32 4294901760, %v210_v34 }
  0x47   :  { %19849 = vmatprep.mubr.f32.mxu1 %v22076_v43  ;;  %v654_v43 = vand.u32 4294901760, %v653_v23  ;;  %v67_v17 = vmul.f32 %v21945_v28, %v21945_v28 }
  0x48   :  { %19756 = vmatmul.mubr.f32.gmra.mxu0 %v624_v59  ;;  %v22249_v59 = vsub.f32 %v201_v39, %v22221_v48  ;;  %v683_v19 = vsub.f32 %v22207_v12, %v25087_v36  ;;  %v674_v22 = vand.u32 4294901760, %v673_v56  ;;  %v22275_v36 = vsub.f32 %v207_v58, %v22251_v57 }
  0x49   :  { %19758 = vmatprep.mubr.f32.mxu0 %v634_v37  ;;  %v664_v37 = vand.u32 4294901760, %v663_v5  ;;  %v25223_v5 = vand.u32 4294901760, %v22218_v35  ;;  %v25224_v56 = vand.u32 4294901760, %v22231_v38  ;;  %v25225_v58 = vand.u32 4294901760, %v22236_v33 }
  0x4a   :  { %19850 = vmatmul.mubr.f32.gmra.mxu1 %v22102_v50  ;;  %v213_v50 = vsel %vm82_vm0, %v65_v63, 0  ;;  %v216_v63 = vsel %vm82_vm0, %v66_v16, 0 }
  0x4b   :  { %19852 = vmatprep.mubr.f32.mxu1 %v22105_v42  ;;  %v693_v23 = vsub.f32 %v22218_v35, %v25223_v5  ;;  %v22270_v42 = vsub.f32 %v204_v4, %v22245_v2  ;;  %v703_v5 = vsub.f32 %v22231_v38, %v25224_v56  ;;  %v22285_v4 = vsub.f32 %v210_v34, %v22257_v55 }
  0x4c   :  { %19759 = vmatmul.mubr.f32.gmra.mxu0 %v644_v31  ;;  %v22287_v39 = vand.u32 4294901760, %v213_v50  ;;  %v684_v31 = vand.u32 4294901760, %v683_v19  ;;  %v713_v16 = vsub.f32 %v22236_v33, %v25225_v58  ;;  %v22296_v38 = vand.u32 4294901760, %v216_v63 }
  0x4d   :  { %19761 = vmatprep.mubr.f32.mxu0 %v654_v43  ;;  %v68_v43 = vmul.f32 %v21977_v61, %v21977_v61  ;;  %v694_v35 = vand.u32 4294901760, %v693_v23  ;;  %v25226_v34 = vand.u32 4294901760, %v22249_v59 }
  0x4e   :  { %19853 = vmatmul.mubr.f32.gmra.mxu1 %v22124_v30  ;;  %v219_v30 = vsel %vm82_vm0, %v67_v17, 0  ;;  %v704_v17 = vand.u32 4294901760, %v703_v5  ;;  %v22307_v23 = vsub.f32 %v213_v50, %v22287_v39  ;;  %v25227_v5 = vand.u32 4294901760, %v22270_v42 }
  0x4f   :  { %19855 = vmatprep.mubr.f32.mxu1 %v22138_v45  ;;  %v69_v45 = vmul.f32 %v21991_v54, %v21991_v54  ;;  %v723_v19 = vsub.f32 %v22249_v59, %v25226_v34  ;;  %v222_v58 = vsel %vm82_vm0, %v68_v43, 0  ;;  %v22309_v56 = vand.u32 4294901760, %v219_v30 }
  0x50   :  { %19762 = vmatmul.mubr.f32.gmra.mxu0 %v664_v37  ;;  %v71_v34 = vmul.f32 %v21790_v6, %v21631_v7  ;;  %v72_v43 = vmul.f32 %v21846_v11, %v21636_v8  ;;  %v22320_v50 = vsub.f32 %v216_v63, %v22296_v38  ;;  %v22322_v37 = vand.u32 4294901760, %v222_v58 }
  0x51   :  { %19764 = vmatprep.mubr.f32.mxu0 %v674_v22  ;;  %v225_v33 = vsel %vm82_vm0, %v69_v45, 0  ;;  %v733_v22 = vsub.f32 %v22270_v42, %v25227_v5  ;;  %v724_v45 = vand.u32 4294901760, %v723_v19  ;;  %v25228_v7 = vand.u32 4294901760, %v22275_v36 }
  0x52   :  { %19856 = vmatmul.mubr.f32.gmra.mxu1 %v22157_v53  ;;  %v714_v53 = vand.u32 4294901760, %v713_v16  ;;  %v25229_v6 = vand.u32 4294901760, %v22285_v4  ;;  %v22336_v63 = vsub.f32 %v219_v30, %v22309_v56  ;;  %v22338_v16 = vand.u32 4294901760, %v225_v33 }
  0x53   :  { %19858 = vmatprep.mubr.f32.mxu1 %v22165_v47  ;;  %v743_v8 = vsub.f32 %v22275_v36, %v25228_v7  ;;  %v231_v19 = vsel %vm82_vm0, %v71_v34, 0  ;;  %v234_v5 = vsel %vm82_vm0, %v72_v43, 0  ;;  %v73_v7 = vmul.f32 %v21872_v44, %v21651_v13 }
  0x54   :  { %19765 = vmatmul.mubr.f32.gmra.mxu0 %v684_v31  ;;  %v228_v31 = vsel %vm82_vm0, %v21640_v9, 0  ;;  %v753_v11 = vsub.f32 %v22285_v4, %v25229_v6  ;;  %25230 = vst [vmem:[#allocation76_spill] sm:$0xff] %v22338_v16  ;;  %v25102_v6 = vand.u32 4294901760, %v22320_v50  ;;  %v74_v30 = vmul.f32 %v21883_v0, %v21656_v14 }
  0x55   :  { %19767 = vmatprep.mubr.f32.mxu0 %v694_v35  ;;  %v22340_v9 = vand.u32 4294901760, %v228_v31  ;;  %v22348_v35 = vsub.f32 %v222_v58, %v22322_v37  ;;  %v25231_v34 = vand.u32 4294901760, %v22307_v23  ;;  %v22358_v13 = vsub.f32 %v225_v33, %v22338_v16 }
  0x56   :  { %19859 = vmatmul.mubr.f32.gmra.mxu1 %v22183_v32  ;;  %v22362_v44 = vand.u32 4294901760, %v234_v5  ;;  %v754_v58 = vand.u32 4294901760, %v753_v11  ;;  %v25103_v14 = vand.u32 4294901760, %v22336_v63 }
  0x57   :  { %19861 = vmatprep.mubr.f32.mxu1 %v22192_v21  ;;  %v734_v21 = vand.u32 4294901760, %v733_v22  ;;  %v763_v43 = vsub.f32 %v22307_v23, %v25231_v34  ;;  %v22366_v0 = vsub.f32 %v228_v31, %v22340_v9  ;;  %v237_v22 = vsel %vm82_vm0, %v73_v7, 0 }
  0x58   :  { %19768 = vmatmul.mubr.f32.gmra.mxu0 %v704_v17  ;;  %v744_v17 = vand.u32 4294901760, %v743_v8  ;;  %v773_v8 = vsub.f32 %v22320_v50, %v25102_v6  ;;  %v25104_v33 = vand.u32 4294901760, %v22348_v35  ;;  %v240_v34 = vsel %vm82_vm0, %v74_v30, 0 }
  0x59   :  { %19770 = vmatprep.mubr.f32.mxu0 %v714_v53  ;;  %v22360_v53 = vand.u32 4294901760, %v231_v19  ;;  %v76_v31 = vmul.f32 %v21907_v18, %v21728_v40  ;;  %v22385_v7 = vsub.f32 %v234_v5, %v22362_v44  ;;  %v22387_v6 = vand.u32 4294901760, %v237_v22 }
  0x5a   :  { %19862 = vmatmul.mubr.f32.gmra.mxu1 %v22203_v10  ;;  %v764_v30 = vand.u32 4294901760, %v763_v43  ;;  %v25106_v40 = vand.u32 4294901760, %v22366_v0  ;;  %v774_v18 = vand.u32 4294901760, %v773_v8 }
  0x5b   :  { %19864 = vmatprep.mubr.f32.mxu1 %v22209_v29  ;;  %25232 = vst [vmem:[#allocation77_spill] sm:$0xff] %v22360_v53  ;;  %v22382_v11 = vsub.f32 %v231_v19, %v22360_v53  ;;  %v793_v19 = vsub.f32 %v22348_v35, %v25104_v33  ;;  %v246_v43 = vsel %vm82_vm0, %v76_v31, 0  ;;  %v22412_v33 = vsub.f32 %v237_v22, %v22387_v6 }
  0x5c   :  { %19771 = vmatmul.mubr.f32.gmra.mxu0 %v724_v45  ;;  %v75_v45 = vmul.f32 %v21888_v62, %v21661_v15  ;;  %v783_v15 = vsub.f32 %v22336_v63, %v25103_v14  ;;  %v22393_v62 = vand.u32 4294901760, %v240_v34  ;;  %v78_v14 = vmul.f32 %v21926_v49, %v21744_v46 }
  0x5d   :  { %19773 = vmatprep.mubr.f32.mxu0 %v734_v21  ;;  %v25105_v21 = vand.u32 4294901760, %v22358_v13  ;;  %v25107_v8 = vand.u32 4294901760, %v22382_v11  ;;  %v794_v31 = vand.u32 4294901760, %v793_v19  ;;  %v79_v22 = vmul.f32 %v21945_v28, %v21752_v51 }
  0x5e   :  { %19865 = vmatmul.mubr.f32.gmra.mxu1 %v22221_v48  ;;  %v243_v5 = vsel %vm82_vm0, %v75_v45, 0  ;;  %v22418_v46 = vsub.f32 %v240_v34, %v22393_v62  ;;  %v25233_v19 = vand.u32 4294901760, %v22385_v7  ;;  %v25109_v51 = vand.u32 4294901760, %v22412_v33 }
  0x5f   :  { %19867 = vmatprep.mubr.f32.mxu1 %v22245_v2  ;;  %v22420_v49 = vand.u32 4294901760, %v243_v5 }
  0x60   :  { %19774 = vmatmul.mubr.f32.gmra.mxu0 %v744_v17  ;;  %v77_v17 = vmul.f32 %v21921_v60, %v21733_v41  ;;  %v784_v41 = vand.u32 4294901760, %v783_v15  ;;  %v813_v60 = vsub.f32 %v22366_v0, %v25106_v40  ;;  %v80_v15 = vmul.f32 %v21977_v61, %v21757_v52 }
  0x61   :  { %19776 = vmatprep.mubr.f32.mxu0 %v754_v58  ;;  %v803_v58 = vsub.f32 %v22358_v13, %v25105_v21  ;;  %v22422_v21 = vand.u32 4294901760, %v246_v43  ;;  %v22441_v40 = vsub.f32 %v243_v5, %v22420_v49 }
  0x62   :  { %19868 = vmatmul.mubr.f32.gmra.mxu1 %v22251_v57  ;;  %v249_v45 = vsel %vm82_vm0, %v77_v17, 0  ;;  %v833_v17 = vsub.f32 %v22385_v7, %v25233_v19  ;;  %v814_v28 = vand.u32 4294901760, %v813_v60  ;;  %v81_v19 = vmul.f32 %v21991_v54, %v21785_v1 }
  0x63   :  { %19870 = vmatprep.mubr.f32.mxu1 %v22257_v55  ;;  %v804_v34 = vand.u32 4294901760, %v803_v58  ;;  %v22443_v52 = vand.u32 4294901760, %v249_v45  ;;  %v22446_v61 = vsub.f32 %v246_v43, %v22422_v21  ;;  %v843_v43 = vsub.f32 %v22412_v33, %v25109_v51 }
  0x64   :  { %19777 = vmatmul.mubr.f32.gmra.mxu0 %v764_v30  ;;  %v252_v30 = vsel %vm82_vm0, %v78_v14, 0  ;;  %v25108_v14 = vand.u32 4294901760, %v22418_v46  ;;  %v834_v60 = vand.u32 4294901760, %v833_v17 }
  0x65   :  { %19779 = vmatprep.mubr.f32.mxu0 %v774_v18  ;;  %v823_v18 = vsub.f32 %v22382_v11, %v25107_v8  ;;  %v22448_v58 = vand.u32 4294901760, %v252_v30  ;;  %v255_v8 = vsel %vm82_vm0, %v79_v22, 0  ;;  %v25112_v22 = vand.u32 4294901760, %v22441_v40 }
  0x66   :  { %19871 = vmatmul.mubr.f32.gmra.mxu1 %v22287_v39  ;;  %v22464_v1 = vsub.f32 %v249_v45, %v22443_v52  ;;  %v22466_v54 = vand.u32 4294901760, %v255_v8 }
  0x67   :  { %19873 = vmatprep.mubr.f32.mxu1 %v22296_v38  ;;  %v824_v5 = vand.u32 4294901760, %v823_v18  ;;  %v22470_v18 = vsub.f32 %v252_v30, %v22448_v58  ;;  %v863_v45 = vsub.f32 %v22441_v40, %v25112_v22 }
  0x68   :  { %19780 = vmatmul.mubr.f32.gmra.mxu0 %v784_v41  ;;  %v258_v41 = vsel %vm82_vm0, %v80_v15, 0  ;;  %v22482_v51 = vsub.f32 %v255_v8, %v22466_v54 }
  0x69   :  { %19782 = vmatprep.mubr.f32.mxu0 %v794_v31  ;;  %v853_v31 = vsub.f32 %v22418_v46, %v25108_v14  ;;  %v22472_v17 = vand.u32 4294901760, %v258_v41  ;;  %v844_v14 = vand.u32 4294901760, %v843_v43  ;;  %v25115_v43 = vand.u32 4294901760, %v22470_v18 }
  0x6a   :  { %19874 = vmatmul.mubr.f32.gmra.mxu1 %v22309_v56  ;;  %v864_v8 = vand.u32 4294901760, %v863_v45 }
  0x6b   :  { %19876 = vmatprep.mubr.f32.mxu1 %v22322_v37  ;;  %v854_v15 = vand.u32 4294901760, %v853_v31  ;;  %v902_v31 = vand.u32 4294901760, %v22482_v51 }
  0x6c   :  { %19783 = vmatmul.mubr.f32.gmra.mxu0 %v804_v34  ;;  %v261_v34 = vsel %vm82_vm0, %v81_v19, 0  ;;  %v25234_v19 = vand.u32 4294901760, %v22446_v61 }
  0x6d   :  { %19785 = vmatprep.mubr.f32.mxu0 %v814_v28  ;;  %v882_v28 = vand.u32 4294901760, %v22464_v1  ;;  %v22484_v30 = vand.u32 4294901760, %v261_v34  ;;  %v903_v45 = vsub.f32 %v22482_v51, %v902_v31 }
  0x6e   :  { %19877 = vmatmul.mubr.f32.gmra.mxu1 %v22338_v16  ;;  %v873_v16 = vsub.f32 %v22446_v61, %v25234_v19 }
  0x6f   :  { %19879 = vmatprep.mubr.f32.mxu1 %v22340_v9  ;;  %v22500_v22 = vsub.f32 %v261_v34, %v22484_v30 }
  0x70   :  { %19786 = vmatmul.mubr.f32.gmra.mxu0 %v824_v5  ;;  %v22491_v5 = vsub.f32 %v258_v41, %v22472_v17  ;;  %v874_v19 = vand.u32 4294901760, %v873_v16  ;;  %v893_v41 = vsub.f32 %v22470_v18, %v25115_v43  ;;  %v904_v43 = vand.u32 4294901760, %v903_v45  ;;  %v25238_v45 = vld [vmem:[#allocation12_spill] sm:$0xff] }
  0x71   :  { %19788 = vmatprep.mubr.f32.mxu0 %v834_v60  ;;  %v883_v60 = vsub.f32 %v22464_v1, %v882_v28  ;;  %v922_v34 = vand.u32 4294901760, %v22500_v22 }
  0x72   :  { %19880 = vmatmul.mubr.f32.gmra.mxu1 %v22360_v53  ;;  %v912_v53 = vand.u32 4294901760, %v22491_v5  ;;  %v894_v16 = vand.u32 4294901760, %v893_v41  ;;  %v25235_v41 = vand.u32 4294901760, %v21676_v20 }
  0x73   :  { %19882 = vmatprep.mubr.f32.mxu1 %v22362_v44 }
  0x74   :  { %19789 = vmatmul.mubr.f32.gmra.mxu0 %v844_v14  ;;  %v884_v14 = vand.u32 4294901760, %v883_v60 }
  0x75   :  { %19791 = vmatprep.mubr.f32.mxu0 %v854_v15  ;;  %v913_v15 = vsub.f32 %v22491_v5, %v912_v53 }
  0x76   :  { %19883 = vmatmul.mubr.f32.gmra.mxu1 %v22387_v6 }
  0x77   :  { %19885 = vmatprep.mubr.f32.mxu1 %v22393_v62  ;;  %v914_v60 = vand.u32 4294901760, %v913_v15  ;;  %v25244_v15 = vld [vmem:[#allocation17_spill] sm:$0xff] }
  0x78   :  { %19792 = vmatmul.mubr.f32.gmra.mxu0 %v864_v8  ;;  %v923_v8 = vsub.f32 %v22500_v22, %v922_v34 }
  0x79   :  { %19794 = vmatprep.mubr.f32.mxu0 %v874_v19 }
  0x7a   :  { %19886 = vmatmul.mubr.f32.gmra.mxu1 %v22420_v49  ;;  %v924_v19 = vand.u32 4294901760, %v923_v8  ;;  %v25246_v8 = vand.u32 4294901760, %v25244_v15 }
  0x7b   :  { %19888 = vmatprep.mubr.f32.mxu1 %v22422_v21 }
  0x7c   :  { %19795 = vmatmul.mubr.f32.gmra.mxu0 %v884_v14  ;;  %v25237_v14 = vand.u32 4294901760, %v21696_v27 }
  0x7d   :  { %19797 = vmatprep.mubr.f32.mxu0 %v894_v16  ;;  %v25240_v16 = vld [vmem:[#allocation13_spill] sm:$0xff] }
  0x7e   :  { %19889 = vmatmul.mubr.f32.gmra.mxu1 %v22443_v52 }
  0x7f   :  { %19891 = vmatprep.mubr.f32.mxu1 %v22448_v58 }
  0x80   :  { %19798 = vmatmul.mubr.f32.gmra.mxu0 %v904_v43  ;;  %v25236_v43 = vand.u32 4294901760, %v21690_v25 }
  0x81   :  { %19800 = vmatprep.mubr.f32.mxu0 %v914_v60  ;;  %v25247_v60 = vld [vmem:[#allocation18_spill] sm:$0xff] }
  0x82   :  { %19892 = vmatmul.mubr.f32.gmra.mxu1 %v22466_v54 }
  0x83   :  { %19894 = vmatprep.mubr.f32.mxu1 %v22472_v17 }
  0x84   :  { %19801 = vmatmul.mubr.f32.gmra.mxu0 %v924_v19  ;;  %v25249_v19 = vand.u32 4294901760, %v25247_v60 }
  0x85   :  { %19901 = vmatprep.mubr.f32.mxu0 %v21676_v20  ;;  %v25239_v20 = vld [vmem:[#allocation5_spill] sm:$0xff] }
  0x86   :  { %19895 = vmatmul.mubr.f32.gmra.mxu1 %v22484_v30 }
  0x87   :  { %19995 = vmatprep.mubr.f32.mxu1 %v25235_v41 }
  0x88   :  { %19902 = vmatmul.mubr.f32.vlgmr.msra.gmra.mxu0 %v21690_v25  ;;  %v25242_v25 = vand.u32 4294901760, %v25240_v16 }
  0x89   :  { %19904 = vmatprep.mubr.f32.mxu0 %v21696_v27  ;;  %20086 = vmatpush3.msra.mxu0 %v21687_v24  ;;  %v25241_v24 = vand.u32 4294901760, %v25238_v45  ;;  %v25243_v27 = vld [vmem:[#allocation14_spill] sm:$0xff] }
  0x8a   :  { %19996 = vmatmul.mubr.f32.vlgmr.msra.gmra.mxu1 %v25236_v43  ;;  %20087 = vmatprep.subr.mxu0 %v21693_v26  ;;  %v25251_v43 = vld [vmem:[#allocation23_spill] sm:$0xff] }
  0x8b   :  { %19998 = vmatprep.mubr.f32.mxu1 %v25237_v14  ;;  %20180 = vmatpush3.msra.mxu1 %v21617_v3  ;;  %v25245_v3 = vand.u32 4294901760, %v25243_v27  ;;  %v25252_v14 = vld [vmem:[#allocation24_spill] sm:$0xff] }
  0x8c   :  { %19905 = vmatmul.mubr.f32.gmra.mxu0 %v25238_v45  ;;  %20181 = vmatprep.subr.mxu1 %v25239_v20  ;;  %v25253_v45 = vand.u32 4294901760, %v25251_v43 }
  0x8d   :  { %19907 = vmatprep.mubr.f32.mxu0 %v25240_v16  ;;  %20088 = vmatpush3.msra.mxu0 %v21693_v26  ;;  %v25248_v26 = vld [vmem:[#allocation22_spill] sm:$0xff]  ;;  %v25255_v16 = vld [vmem:[#allocation28_spill] sm:$0xff] }
  0x8e   :  { %19999 = vmatmul.mubr.f32.gmra.mxu1 %v25241_v24  ;;  %v25250_v41 = vand.u32 4294901760, %v25248_v26  ;;  %v25256_v24 = vld [vmem:[#allocation29_spill] sm:$0xff] }
  0x8f   :  { %20001 = vmatprep.mubr.f32.mxu1 %v25242_v25  ;;  %20182 = vmatpush3.msra.mxu1 %v25239_v20  ;;  %v25254_v20 = vand.u32 4294901760, %v25252_v14  ;;  %v25257_v25 = vand.u32 4294901760, %v25255_v16 }
  0x90   :  { %19908 = vmatmul.mubr.f32.gmra.mxu0 %v25243_v27  ;;  %v25258_v27 = vand.u32 4294901760, %v25256_v24 }
  0x91   :  { %19910 = vmatprep.mubr.f32.mxu0 %v25244_v15  ;;  %v25259_v15 = vld [vmem:[#allocation30_spill] sm:$0xff] }
  0x92   :  { %20002 = vmatmul.mubr.f32.gmra.mxu1 %v25245_v3  ;;  %v25260_v3 = vld [vmem:[#allocation32_spill] sm:$0xff] }
  0x93   :  { %20004 = vmatprep.mubr.f32.mxu1 %v25246_v8  ;;  %v25261_v8 = vand.u32 4294901760, %v25259_v15 }
  0x94   :  { %19911 = vmatmul.mubr.f32.gmra.mxu0 %v25247_v60  ;;  %v25262_v60 = vand.u32 4294901760, %v25260_v3 }
  0x95   :  { %19913 = vmatprep.mubr.f32.mxu0 %v25248_v26  ;;  %v25263_v26 = vld [vmem:[#allocation35_spill] sm:$0xff] }
  0x96   :  { %20005 = vmatmul.mubr.f32.gmra.mxu1 %v25249_v19  ;;  %v25264_v19 = vld [vmem:[#allocation37_spill] sm:$0xff] }
  0x97   :  { %20007 = vmatprep.mubr.f32.mxu1 %v25250_v41  ;;  %v25265_v41 = vand.u32 4294901760, %v25263_v26 }
  0x98   :  { %19914 = vmatmul.mubr.f32.gmra.mxu0 %v25251_v43  ;;  %v25266_v43 = vand.u32 4294901760, %v25264_v19 }
  0x99   :  { %19916 = vmatprep.mubr.f32.mxu0 %v25252_v14  ;;  %v25267_v14 = vld [vmem:[#allocation39_spill] sm:$0xff] }
  0x9a   :  { %20008 = vmatmul.mubr.f32.gmra.mxu1 %v25253_v45  ;;  %v25268_v45 = vld [vmem:[#allocation41_spill] sm:$0xff] }
  0x9b   :  { %20010 = vmatprep.mubr.f32.mxu1 %v25254_v20  ;;  %v25269_v20 = vand.u32 4294901760, %v25267_v14 }
  0x9c   :  { %19917 = vmatmul.mubr.f32.gmra.mxu0 %v25255_v16  ;;  %v25270_v16 = vand.u32 4294901760, %v25268_v45 }
  0x9d   :  { %19919 = vmatprep.mubr.f32.mxu0 %v25256_v24  ;;  %v25271_v24 = vld [vmem:[#allocation43_spill] sm:$0xff] }
  0x9e   :  { %20011 = vmatmul.mubr.f32.gmra.mxu1 %v25257_v25  ;;  %v25272_v25 = vld [vmem:[#allocation45_spill] sm:$0xff] }
  0x9f   :  { %20013 = vmatprep.mubr.f32.mxu1 %v25258_v27  ;;  %v25273_v27 = vand.u32 4294901760, %v25271_v24 }
  0xa0   :  { %19920 = vmatmul.mubr.f32.gmra.mxu0 %v25259_v15  ;;  %v25274_v15 = vand.u32 4294901760, %v25272_v25 }
  0xa1   :  { %19922 = vmatprep.mubr.f32.mxu0 %v25260_v3  ;;  %v25275_v3 = vld [vmem:[#allocation47_spill] sm:$0xff] }
  0xa2   :  { %20014 = vmatmul.mubr.f32.gmra.mxu1 %v25261_v8  ;;  %v25276_v8 = vld [vmem:[#allocation49_spill] sm:$0xff] }
  0xa3   :  { %20016 = vmatprep.mubr.f32.mxu1 %v25262_v60  ;;  %v25277_v60 = vand.u32 4294901760, %v25275_v3 }
  0xa4   :  { %19923 = vmatmul.mubr.f32.gmra.mxu0 %v25263_v26  ;;  %v25278_v26 = vand.u32 4294901760, %v25276_v8 }
  0xa5   :  { %19925 = vmatprep.mubr.f32.mxu0 %v25264_v19  ;;  %v25279_v19 = vld [vmem:[#allocation51_spill] sm:$0xff] }
  0xa6   :  { %20017 = vmatmul.mubr.f32.gmra.mxu1 %v25265_v41  ;;  %v25280_v41 = vld [vmem:[#allocation53_spill] sm:$0xff] }
  0xa7   :  { %20019 = vmatprep.mubr.f32.mxu1 %v25266_v43  ;;  %v25281_v43 = vand.u32 4294901760, %v25279_v19 }
  0xa8   :  { %19926 = vmatmul.mubr.f32.gmra.mxu0 %v25267_v14  ;;  %v25282_v14 = vand.u32 4294901760, %v25280_v41 }
  0xa9   :  { %19928 = vmatprep.mubr.f32.mxu0 %v25268_v45  ;;  %v25283_v45 = vld [vmem:[#allocation56_spill] sm:$0xff] }
  0xaa   :  { %20020 = vmatmul.mubr.f32.gmra.mxu1 %v25269_v20  ;;  %v25284_v20 = vld [vmem:[#allocation58_spill] sm:$0xff] }
  0xab   :  { %20022 = vmatprep.mubr.f32.mxu1 %v25270_v16  ;;  %v25285_v16 = vand.u32 4294901760, %v25283_v45 }
  0xac   :  { %19929 = vmatmul.mubr.f32.gmra.mxu0 %v25271_v24  ;;  %v25286_v24 = vand.u32 4294901760, %v25284_v20 }
  0xad   :  { %19931 = vmatprep.mubr.f32.mxu0 %v25272_v25  ;;  %v25287_v25 = vld [vmem:[#allocation59_spill] sm:$0xff] }
  0xae   :  { %20023 = vmatmul.mubr.f32.gmra.mxu1 %v25273_v27  ;;  %v25288_v27 = vld [vmem:[#allocation60_spill] sm:$0xff] }
  0xaf   :  { %20025 = vmatprep.mubr.f32.mxu1 %v25274_v15  ;;  %v25289_v15 = vand.u32 4294901760, %v25287_v25 }
  0xb0   :  { %19932 = vmatmul.mubr.f32.gmra.mxu0 %v25275_v3  ;;  %v25290_v3 = vand.u32 4294901760, %v25288_v27 }
  0xb1   :  { %19934 = vmatprep.mubr.f32.mxu0 %v25276_v8  ;;  %v25291_v8 = vld [vmem:[#allocation63_spill] sm:$0xff] }
  0xb2   :  { %20026 = vmatmul.mubr.f32.gmra.mxu1 %v25277_v60  ;;  %v25292_v60 = vld [vmem:[#allocation65_spill] sm:$0xff] }
  0xb3   :  { %20028 = vmatprep.mubr.f32.mxu1 %v25278_v26  ;;  %v25293_v26 = vand.u32 4294901760, %v25291_v8 }
  0xb4   :  { %19935 = vmatmul.mubr.f32.gmra.mxu0 %v25279_v19  ;;  %v25294_v19 = vand.u32 4294901760, %v25292_v60 }
  0xb5   :  { %19937 = vmatprep.mubr.f32.mxu0 %v25280_v41  ;;  %v25295_v41 = vld [vmem:[#allocation67_spill] sm:$0xff] }
  0xb6   :  { %20029 = vmatmul.mubr.f32.gmra.mxu1 %v25281_v43  ;;  %v25296_v43 = vld [vmem:[#allocation69_spill] sm:$0xff] }
  0xb7   :  { %20031 = vmatprep.mubr.f32.mxu1 %v25282_v14  ;;  %v25297_v14 = vand.u32 4294901760, %v25295_v41 }
  0xb8   :  { %19938 = vmatmul.mubr.f32.gmra.mxu0 %v25283_v45  ;;  %v25298_v45 = vand.u32 4294901760, %v25296_v43 }
  0xb9   :  { %19940 = vmatprep.mubr.f32.mxu0 %v25284_v20  ;;  %v25299_v20 = vld [vmem:[#allocation70_spill] sm:$0xff] }
  0xba   :  { %20032 = vmatmul.mubr.f32.gmra.mxu1 %v25285_v16  ;;  %v25300_v16 = vld [vmem:[#allocation71_spill] sm:$0xff] }
  0xbb   :  { %20034 = vmatprep.mubr.f32.mxu1 %v25286_v24  ;;  %v25301_v24 = vand.u32 4294901760, %v25299_v20 }
  0xbc   :  { %19941 = vmatmul.mubr.f32.gmra.mxu0 %v25287_v25  ;;  %v25302_v25 = vand.u32 4294901760, %v25300_v16 }
  0xbd   :  { %19943 = vmatprep.mubr.f32.mxu0 %v25288_v27  ;;  %v25303_v27 = vld [vmem:[#allocation73_spill] sm:$0xff] }
  0xbe   :  { %20035 = vmatmul.mubr.f32.gmra.mxu1 %v25289_v15  ;;  %v25304_v15 = vand.u32 4294901760, %v22207_v12 }
  0xbf   :  { %20037 = vmatprep.mubr.f32.mxu1 %v25290_v3  ;;  %v25305_v3 = vand.u32 4294901760, %v25303_v27 }
  0xc0   :  { %19944 = vmatmul.mubr.f32.gmra.mxu0 %v25291_v8 }
  0xc1   :  { %19946 = vmatprep.mubr.f32.mxu0 %v25292_v60  ;;  %v25306_v60 = vld [vmem:[#allocation74_spill] sm:$0xff] }
  0xc2   :  { %20038 = vmatmul.mubr.f32.gmra.mxu1 %v25293_v26  ;;  %v25307_v26 = vld [vmem:[#allocation75_spill] sm:$0xff] }
  0xc3   :  { %20040 = vmatprep.mubr.f32.mxu1 %v25294_v19 }
  0xc4   :  { %19947 = vmatmul.mubr.f32.gmra.mxu0 %v25295_v41 }
  0xc5   :  { %19949 = vmatprep.mubr.f32.mxu0 %v25296_v43  ;;  %v25308_v43 = vand.u32 4294901760, %v25306_v60 }
  0xc6   :  { %20041 = vmatmul.mubr.f32.gmra.mxu1 %v25297_v14 }
  0xc7   :  { %20043 = vmatprep.mubr.f32.mxu1 %v25298_v45  ;;  %v25309_v45 = vand.u32 4294901760, %v25307_v26 }
  0xc8   :  { %19950 = vmatmul.mubr.f32.gmra.mxu0 %v25299_v20 }
  0xc9   :  { %19952 = vmatprep.mubr.f32.mxu0 %v25300_v16 }
  0xca   :  { %20044 = vmatmul.mubr.f32.gmra.mxu1 %v25301_v24 }
  0xcb   :  { %20046 = vmatprep.mubr.f32.mxu1 %v25302_v25 }
  0xcc   :  { %19953 = vmatmul.mubr.f32.gmra.mxu0 %v22207_v12 }
  0xcd   :  { %19955 = vmatprep.mubr.f32.mxu0 %v25303_v27  ;;  %v25310_v27 = vand.u32 4294901760, %v22249_v59 }
  0xce   :  { %20047 = vmatmul.mubr.f32.gmra.mxu1 %v25304_v15 }
  0xcf   :  { %20049 = vmatprep.mubr.f32.mxu1 %v25305_v3  ;;  %v25311_v3 = vand.u32 4294901760, %v22270_v42 }
  0xd0   :  { %v19715_v8 = vpop.f32.mrf.mxu0  ;;  %19956 = vmatmul.mubr.f32.gmra.mxu0 %v25306_v60 }
  0xd1   :  { %19958 = vmatprep.mubr.f32.mxu0 %v25307_v26  ;;  %v19809_v41 = vpop.f32.mrf.mxu1 }
  0xd2   :  { %v336_v19 = vpop.f32.mrf.mxu0  ;;  %20050 = vmatmul.mubr.f32.gmra.mxu1 %v25308_v43  ;;  %v22646_v14 = vadd.f32 %v19809_v41, %v19715_v8  ;;  %v25312_v43 = vand.u32 4294901760, %v22275_v36 }
  0xd3   :  { %20052 = vmatprep.mubr.f32.mxu1 %v25309_v45  ;;  %v1007_v20 = vpop.f32.mrf.mxu1  ;;  %v25313_v45 = vand.u32 4294901760, %v22285_v4 }
  0xd4   :  { %v19718_v12 = vpop.f32.mrf.mxu0  ;;  %19959 = vmatmul.mubr.f32.gmra.mxu0 %v22249_v59  ;;  %v22651_v16 = vadd.f32 %v1007_v20, %v336_v19 }
  0xd5   :  { %19961 = vmatprep.mubr.f32.mxu0 %v22270_v42 }
  0xd6   :  { %v356_v24 = vpop.f32.mrf.mxu0  ;;  %v19812_v25 = vpop.f32.mrf.mxu1  ;;  %20053 = vmatmul.mubr.f32.gmra.mxu1 %v25310_v27  ;;  %v25314_v27 = vand.u32 4294901760, %v22307_v23 }
  0xd7   :  { %v22656_v15 = vadd.f32 %v19812_v25, %v19718_v12  ;;  %20055 = vmatprep.mubr.f32.mxu1 %v25311_v3  ;;  %v25315_v3 = vand.u32 4294901760, %v22320_v50 }
  0xd8   :  { %v19721_v8 = vpop.f32.mrf.mxu0  ;;  %v1019_v60 = vpop.f32.mrf.mxu1  ;;  %19962 = vmatmul.mubr.f32.gmra.mxu0 %v22275_v36 }
  0xd9   :  { %v22661_v26 = vadd.f32 %v1019_v60, %v356_v24  ;;  %19964 = vmatprep.mubr.f32.mxu0 %v22285_v4 }
  0xda   :  { %v376_v19 = vpop.f32.mrf.mxu0  ;;  %v19815_v41 = vpop.f32.mrf.mxu1  ;;  %20056 = vmatmul.mubr.f32.gmra.mxu1 %v25312_v43  ;;  %v25316_v43 = vand.u32 4294901760, %v22336_v63 }
  0xdb   :  { %v22666_v59 = vadd.f32 %v19815_v41, %v19721_v8  ;;  %20058 = vmatprep.mubr.f32.mxu1 %v25313_v45  ;;  %v25317_v45 = vand.u32 4294901760, %v22348_v35 }
  0xdc   :  { %v19724_v42 = vpop.f32.mrf.mxu0  ;;  %v1031_v12 = vpop.f32.mrf.mxu1  ;;  %19965 = vmatmul.mubr.f32.gmra.mxu0 %v22307_v23 }
  0xdd   :  { %v22671_v20 = vadd.f32 %v1031_v12, %v376_v19  ;;  %19967 = vmatprep.mubr.f32.mxu0 %v22320_v50 }
  0xde   :  { %v396_v24 = vpop.f32.mrf.mxu0  ;;  %v19818_v25 = vpop.f32.mrf.mxu1  ;;  %20059 = vmatmul.mubr.f32.gmra.mxu1 %v25314_v27  ;;  %v25319_v27 = vand.u32 4294901760, %v22358_v13 }
  0xdf   :  { %v22676_v36 = vadd.f32 %v19818_v25, %v19724_v42  ;;  %20061 = vmatprep.mubr.f32.mxu1 %v25315_v3  ;;  %v25320_v3 = vand.u32 4294901760, %v22366_v0 }
  0xe0   :  { %v19727_v4 = vpop.f32.mrf.mxu0  ;;  %v1043_v8 = vpop.f32.mrf.mxu1  ;;  %19968 = vmatmul.mubr.f32.gmra.mxu0 %v22336_v63 }
  0xe1   :  { %v22681_v60 = vadd.f32 %v1043_v8, %v396_v24  ;;  %19970 = vmatprep.mubr.f32.mxu0 %v22348_v35 }
  0xe2   :  { %v416_v19 = vpop.f32.mrf.mxu0  ;;  %v19821_v41 = vpop.f32.mrf.mxu1  ;;  %20062 = vmatmul.mubr.f32.gmra.mxu1 %v25316_v43  ;;  %v25322_v43 = vand.u32 4294901760, %v22382_v11 }
  0xe3   :  { %v22686_v23 = vadd.f32 %v19821_v41, %v19727_v4  ;;  %20064 = vmatprep.mubr.f32.mxu1 %v25317_v45  ;;  %v25323_v45 = vand.u32 4294901760, %v22385_v7 }
  0xe4   :  { %v19730_v50 = vpop.f32.mrf.mxu0  ;;  %v1055_v42 = vpop.f32.mrf.mxu1  ;;  %19971 = vmatmul.mubr.f32.gmra.mxu0 %v22358_v13 }
  0xe5   :  { %v22691_v12 = vadd.f32 %v1055_v42, %v416_v19  ;;  %19973 = vmatprep.mubr.f32.mxu0 %v22366_v0 }
  0xe6   :  { %v436_v24 = vpop.f32.mrf.mxu0  ;;  %v19824_v25 = vpop.f32.mrf.mxu1  ;;  %20065 = vmatmul.mubr.f32.gmra.mxu1 %v25319_v27  ;;  %v25325_v27 = vand.u32 4294901760, %v22412_v33 }
  0xe7   :  { %25318 = vst [vmem:[#allocation12_spill] sm:$0xff] %v22691_v12  ;;  %v22696_v63 = vadd.f32 %v19824_v25, %v19730_v50  ;;  %20067 = vmatprep.mubr.f32.mxu1 %v25320_v3  ;;  %v25326_v3 = vand.u32 4294901760, %v22418_v46  ;;  %v25352_v12 = vld [vmem:[#allocation26_spill] sm:$0xff] }
  0xe8   :  { %v19733_v35 = vpop.f32.mrf.mxu0  ;;  %v1067_v4 = vpop.f32.mrf.mxu1  ;;  %19974 = vmatmul.mubr.f32.gmra.mxu0 %v22382_v11 }
  0xe9   :  { %v22701_v8 = vadd.f32 %v1067_v4, %v436_v24  ;;  %19976 = vmatprep.mubr.f32.mxu0 %v22385_v7 }
  0xea   :  { %v456_v19 = vpop.f32.mrf.mxu0  ;;  %v19827_v41 = vpop.f32.mrf.mxu1  ;;  %20068 = vmatmul.mubr.f32.gmra.mxu1 %v25322_v43  ;;  %v25328_v43 = vand.u32 4294901760, %v22441_v40 }
  0xeb   :  { %25321 = vst [vmem:[#allocation5_spill] sm:$0xff] %v22701_v8  ;;  %v22706_v13 = vadd.f32 %v19827_v41, %v19733_v35  ;;  %20070 = vmatprep.mubr.f32.mxu1 %v25323_v45  ;;  %v25329_v45 = vand.u32 4294901760, %v22446_v61  ;;  %v25349_v8 = vld [vmem:[#allocation21_spill] sm:$0xff] }
  0xec   :  { %v19736_v0 = vpop.f32.mrf.mxu0  ;;  %v1079_v50 = vpop.f32.mrf.mxu1  ;;  %19977 = vmatmul.mubr.f32.gmra.mxu0 %v22412_v33 }
  0xed   :  { %v22711_v42 = vadd.f32 %v1079_v50, %v456_v19  ;;  %19979 = vmatprep.mubr.f32.mxu0 %v22418_v46 }
  0xee   :  { %v476_v24 = vpop.f32.mrf.mxu0  ;;  %v19830_v25 = vpop.f32.mrf.mxu1  ;;  %20071 = vmatmul.mubr.f32.gmra.mxu1 %v25325_v27  ;;  %v25331_v27 = vand.u32 4294901760, %v22470_v18 }
  0xef   :  { %25324 = vst [vmem:[#allocation13_spill] sm:$0xff] %v22711_v42  ;;  %v22716_v11 = vadd.f32 %v19830_v25, %v19736_v0  ;;  %20073 = vmatprep.mubr.f32.mxu1 %v25326_v3  ;;  %v25374_v42 = vld [vmem:[#allocation54_spill] sm:$0xff] }
  0xf0   :  { %v19739_v7 = vpop.f32.mrf.mxu0  ;;  %v1091_v35 = vpop.f32.mrf.mxu1  ;;  %19980 = vmatmul.mubr.f32.gmra.mxu0 %v22441_v40 }
  0xf1   :  { %v22721_v4 = vadd.f32 %v1091_v35, %v476_v24  ;;  %19982 = vmatprep.mubr.f32.mxu0 %v22446_v61 }
  0xf2   :  { %v496_v19 = vpop.f32.mrf.mxu0  ;;  %v19833_v41 = vpop.f32.mrf.mxu1  ;;  %20074 = vmatmul.mubr.f32.gmra.mxu1 %v25328_v43  ;;  %v25334_v43 = vld [vmem:[#allocation6_spill] sm:$0xff] }
  0xf3   :  { %25327 = vst [vmem:[#allocation14_spill] sm:$0xff] %v22721_v4  ;;  %v22726_v33 = vadd.f32 %v19833_v41, %v19739_v7  ;;  %20076 = vmatprep.mubr.f32.mxu1 %v25329_v45  ;;  %v25364_v4 = vld [vmem:[#allocation42_spill] sm:$0xff] }
  0xf4   :  { %v19742_v46 = vpop.f32.mrf.mxu0  ;;  %v1103_v0 = vpop.f32.mrf.mxu1  ;;  %19983 = vmatmul.mubr.f32.gmra.mxu0 %v22464_v1 }
  0xf5   :  { %v22731_v50 = vadd.f32 %v1103_v0, %v496_v19  ;;  %19985 = vmatprep.mubr.f32.mxu0 %v22470_v18 }
  0xf6   :  { %v516_v24 = vpop.f32.mrf.mxu0  ;;  %v19836_v25 = vpop.f32.mrf.mxu1  ;;  %20077 = vmatmul.mubr.f32.gmra.mxu1 %v882_v28 }
  0xf7   :  { %25330 = vst [vmem:[#allocation17_spill] sm:$0xff] %v22731_v50  ;;  %v22736_v40 = vadd.f32 %v19836_v25, %v19742_v46  ;;  %20079 = vmatprep.mubr.f32.mxu1 %v25331_v27  ;;  %v25361_v50 = vld [vmem:[#allocation38_spill] sm:$0xff] }
  0xf8   :  { %v19745_v61 = vpop.f32.mrf.mxu0  ;;  %v1115_v3 = vpop.f32.mrf.mxu1  ;;  %19986 = vmatmul.mubr.f32.gmra.mxu0 %v22482_v51 }
  0xf9   :  { %v22741_v7 = vadd.f32 %v1115_v3, %v516_v24  ;;  %19988 = vmatprep.mubr.f32.mxu0 %v22491_v5  ;;  %v25337_v24 = vld [vmem:[#allocation8_spill] sm:$0xff]  ;;  %v25338_v3 = vld [vmem:[#allocation9_spill] sm:$0xff] }
  0xfa   :  { %v536_v35 = vpop.f32.mrf.mxu0  ;;  %v19839_v19 = vpop.f32.mrf.mxu1  ;;  %20080 = vmatmul.mubr.f32.gmra.mxu1 %v902_v31 }
  0xfb   :  { %25332 = vst [vmem:[#allocation18_spill] sm:$0xff] %v22741_v7  ;;  %v22746_v1 = vadd.f32 %v19839_v19, %v19745_v61  ;;  %20082 = vmatprep.mubr.f32.mxu1 %v912_v53  ;;  %v25335_v53 = vld [vmem:[#allocation7_spill] sm:$0xff]  ;;  %v25340_v19 = vld [vmem:[#allocation10_spill] sm:$0xff] }
  0xfc   :  { %v19748_v18 = vpop.f32.mrf.mxu0  ;;  %v1127_v28 = vpop.f32.mrf.mxu1  ;;  %19989 = vmatmul.mubr.f32.gmra.mxu0 %v22500_v22  ;;  %v25355_v7 = vld [vmem:[#allocation31_spill] sm:$0xff] }
  0xfd   :  { %v22751_v41 = vadd.f32 %v1127_v28, %v536_v35  ;;  %20089 = vmatprep.mubr.f32.mxu0 %v25334_v43 }
  0xfe   :  { %v556_v45 = vpop.f32.mrf.mxu0  ;;  %v19842_v46 = vpop.f32.mrf.mxu1  ;;  %20083 = vmatmul.mubr.f32.gmra.mxu1 %v922_v34 }
  0xff   :  { %25333 = vst [vmem:[#allocation22_spill] sm:$0xff] %v22751_v41  ;;  %v22756_v51 = vadd.f32 %v19842_v46, %v19748_v18  ;;  %20183 = vmatprep.mubr.f32.mxu1 %v25334_v43 }
 0x100   :  { %v19751_v31 = vpop.f32.mrf.mxu0  ;;  %v1139_v5 = vpop.f32.mrf.mxu1  ;;  %20090 = vmatmul.mubr.f32.vlgmr.msra.gmra.mxu0 %v25335_v53 }
 0x101   :  { %v22760_v0 = vadd.f32 %v1139_v5, %v556_v45  ;;  %20092 = vmatprep.mubr.f32.mxu0 %v25337_v24 }
 0x102   :  { %v576_v25 = vpop.f32.mrf.mxu0  ;;  %v19845_v27 = vpop.f32.mrf.mxu1  ;;  %20184 = vmatmul.mubr.f32.vlgmr.msra.gmra.mxu1 %v25335_v53  ;;  %v25343_v53 = vld [vmem:[#allocation15_spill] sm:$0xff] }
 0x103   :  { %25336 = vst [vmem:[#allocation23_spill] sm:$0xff] %v22760_v0  ;;  %v22764_v61 = vadd.f32 %v19845_v27, %v19751_v31  ;;  %20186 = vmatprep.mubr.f32.mxu1 %v25337_v24  ;;  %v25341_v31 = vld [vmem:[#allocation11_spill] sm:$0xff] }
 0x104   :  { %v19754_v22 = vpop.f32.mrf.mxu0  ;;  %v1151_v34 = vpop.f32.mrf.mxu1  ;;  %20093 = vmatmul.mubr.f32.gmra.mxu0 %v25338_v3 }
 0x105   :  { %v22768_v35 = vadd.f32 %v1151_v34, %v576_v25  ;;  %20095 = vmatprep.mubr.f32.mxu0 %v25340_v19 }
 0x106   :  { %v596_v18 = vpop.f32.mrf.mxu0  ;;  %v19848_v28 = vpop.f32.mrf.mxu1  ;;  %20187 = vmatmul.mubr.f32.gmra.mxu1 %v25338_v3  ;;  %v25344_v3 = vld [vmem:[#allocation16_spill] sm:$0xff] }
 0x107   :  { %25339 = vst [vmem:[#allocation24_spill] sm:$0xff] %v22768_v35  ;;  %v22772_v43 = vadd.f32 %v19848_v28, %v19754_v22  ;;  %20189 = vmatprep.mubr.f32.mxu1 %v25340_v19  ;;  %v25346_v28 = vld [vmem:[#allocation19_spill] sm:$0xff]  ;;  %v25370_v35 = vld [vmem:[#allocation50_spill] sm:$0xff] }
 0x108   :  { %v19757_v45 = vpop.f32.mrf.mxu0  ;;  %v1163_v46 = vpop.f32.mrf.mxu1  ;;  %20096 = vmatmul.mubr.f32.gmra.mxu0 %v25341_v31 }
 0x109   :  { %v22776_v5 = vadd.f32 %v1163_v46, %v596_v18  ;;  %20098 = vmatprep.mubr.f32.mxu0 %v25343_v53 }
 0x10a   :  { %v616_v24 = vpop.f32.mrf.mxu0  ;;  %v19851_v25 = vpop.f32.mrf.mxu1  ;;  %20190 = vmatmul.mubr.f32.gmra.mxu1 %v25341_v31 }
 0x10b   :  { %25342 = vst [vmem:[#allocation28_spill] sm:$0xff] %v22776_v5  ;;  %v22780_v27 = vadd.f32 %v19851_v25, %v19757_v45  ;;  %20192 = vmatprep.mubr.f32.mxu1 %v25343_v53  ;;  %v25347_v25 = vld [vmem:[#allocation20_spill] sm:$0xff] }
 0x10c   :  { %v19760_v22 = vpop.f32.mrf.mxu0  ;;  %v1175_v34 = vpop.f32.mrf.mxu1  ;;  %20099 = vmatmul.mubr.f32.gmra.mxu0 %v25344_v3 }
 0x10d   :  { %v22784_v19 = vadd.f32 %v1175_v34, %v616_v24  ;;  %20101 = vmatprep.mubr.f32.mxu0 %v25346_v28 }
 0x10e   :  { %v636_v18 = vpop.f32.mrf.mxu0  ;;  %v19854_v46 = vpop.f32.mrf.mxu1  ;;  %20193 = vmatmul.mubr.f32.gmra.mxu1 %v25344_v3 }
 0x10f   :  { %25345 = vst [vmem:[#allocation29_spill] sm:$0xff] %v22784_v19  ;;  %v22788_v0 = vadd.f32 %v19854_v46, %v19760_v22  ;;  %20195 = vmatprep.mubr.f32.mxu1 %v25346_v28  ;;  %v25350_v46 = vld [vmem:[#allocation25_spill] sm:$0xff]  ;;  %v25358_v19 = vld [vmem:[#allocation34_spill] sm:$0xff] }
 0x110   :  { %v19763_v45 = vpop.f32.mrf.mxu0  ;;  %v1187_v31 = vpop.f32.mrf.mxu1  ;;  %20102 = vmatmul.mubr.f32.gmra.mxu0 %v25347_v25 }
 0x111   :  { %v22792_v53 = vadd.f32 %v1187_v31, %v636_v18  ;;  %20104 = vmatprep.mubr.f32.mxu0 %v25349_v8 }
 0x112   :  { %v656_v24 = vpop.f32.mrf.mxu0  ;;  %v19857_v34 = vpop.f32.mrf.mxu1  ;;  %20196 = vmatmul.mubr.f32.gmra.mxu1 %v25347_v25 }
 0x113   :  { %25348 = vst [vmem:[#allocation30_spill] sm:$0xff] %v22792_v53  ;;  %v22796_v41 = vadd.f32 %v19857_v34, %v19763_v45  ;;  %20198 = vmatprep.mubr.f32.mxu1 %v25349_v8  ;;  %v25353_v34 = vld [vmem:[#allocation27_spill] sm:$0xff] }
 0x114   :  { %v19766_v22 = vpop.f32.mrf.mxu0  ;;  %v1199_v3 = vpop.f32.mrf.mxu1  ;;  %20105 = vmatmul.mubr.f32.gmra.mxu0 %v25350_v46 }
 0x115   :  { %v22800_v28 = vadd.f32 %v1199_v3, %v656_v24  ;;  %20107 = vmatprep.mubr.f32.mxu0 %v25352_v12 }
 0x116   :  { %v676_v18 = vpop.f32.mrf.mxu0  ;;  %v19860_v31 = vpop.f32.mrf.mxu1  ;;  %20199 = vmatmul.mubr.f32.gmra.mxu1 %v25350_v46 }
 0x117   :  { %25351 = vst [vmem:[#allocation32_spill] sm:$0xff] %v22800_v28  ;;  %v22804_v53 = vadd.f32 %v19860_v31, %v19766_v22  ;;  %20201 = vmatprep.mubr.f32.mxu1 %v25352_v12  ;;  %v25356_v31 = vld [vmem:[#allocation33_spill] sm:$0xff] }
 0x118   :  { %v19769_v45 = vpop.f32.mrf.mxu0  ;;  %v1211_v25 = vpop.f32.mrf.mxu1  ;;  %20108 = vmatmul.mubr.f32.gmra.mxu0 %v25353_v34 }
 0x119   :  { %v22808_v8 = vadd.f32 %v1211_v25, %v676_v18  ;;  %20110 = vmatprep.mubr.f32.mxu0 %v25355_v7 }
 0x11a   :  { %v696_v24 = vpop.f32.mrf.mxu0  ;;  %v19863_v3 = vpop.f32.mrf.mxu1  ;;  %20202 = vmatmul.mubr.f32.gmra.mxu1 %v25353_v34 }
 0x11b   :  { %25354 = vst [vmem:[#allocation35_spill] sm:$0xff] %v22808_v8  ;;  %v22812_v28 = vadd.f32 %v19863_v3, %v19769_v45  ;;  %20204 = vmatprep.mubr.f32.mxu1 %v25355_v7  ;;  %v25359_v3 = vld [vmem:[#allocation36_spill] sm:$0xff] }
 0x11c   :  { %v19772_v22 = vpop.f32.mrf.mxu0  ;;  %v1223_v46 = vpop.f32.mrf.mxu1  ;;  %20111 = vmatmul.mubr.f32.gmra.mxu0 %v25356_v31 }
 0x11d   :  { %v22816_v12 = vadd.f32 %v1223_v46, %v696_v24  ;;  %20113 = vmatprep.mubr.f32.mxu0 %v25358_v19 }
 0x11e   :  { %v716_v18 = vpop.f32.mrf.mxu0  ;;  %v19866_v25 = vpop.f32.mrf.mxu1  ;;  %20205 = vmatmul.mubr.f32.gmra.mxu1 %v25356_v31 }
 0x11f   :  { %25357 = vst [vmem:[#allocation37_spill] sm:$0xff] %v22816_v12  ;;  %v22820_v8 = vadd.f32 %v19866_v25, %v19772_v22  ;;  %20207 = vmatprep.mubr.f32.mxu1 %v25358_v19  ;;  %v25362_v25 = vld [vmem:[#allocation40_spill] sm:$0xff]  ;;  %v25367_v12 = vld [vmem:[#allocation46_spill] sm:$0xff] }
 0x120   :  { %v19775_v45 = vpop.f32.mrf.mxu0  ;;  %v1235_v34 = vpop.f32.mrf.mxu1  ;;  %20114 = vmatmul.mubr.f32.gmra.mxu0 %v25359_v3 }
 0x121   :  { %v22824_v7 = vadd.f32 %v1235_v34, %v716_v18  ;;  %20116 = vmatprep.mubr.f32.mxu0 %v25361_v50 }
 0x122   :  { %v736_v24 = vpop.f32.mrf.mxu0  ;;  %v19869_v46 = vpop.f32.mrf.mxu1  ;;  %20208 = vmatmul.mubr.f32.gmra.mxu1 %v25359_v3 }
 0x123   :  { %25360 = vst [vmem:[#allocation39_spill] sm:$0xff] %v22824_v7  ;;  %v22828_v5 = vadd.f32 %v19869_v46, %v19775_v45  ;;  %20210 = vmatprep.mubr.f32.mxu1 %v25361_v50  ;;  %v25365_v46 = vld [vmem:[#allocation44_spill] sm:$0xff] }
 0x124   :  { %v19778_v22 = vpop.f32.mrf.mxu0  ;;  %v1247_v31 = vpop.f32.mrf.mxu1  ;;  %20117 = vmatmul.mubr.f32.gmra.mxu0 %v25362_v25 }
 0x125   :  { %v22832_v19 = vadd.f32 %v1247_v31, %v736_v24  ;;  %20119 = vmatprep.mubr.f32.mxu0 %v25364_v4 }
 0x126   :  { %v756_v18 = vpop.f32.mrf.mxu0  ;;  %v19872_v34 = vpop.f32.mrf.mxu1  ;;  %20211 = vmatmul.mubr.f32.gmra.mxu1 %v25362_v25 }
 0x127   :  { %25363 = vst [vmem:[#allocation41_spill] sm:$0xff] %v22832_v19  ;;  %v22836_v7 = vadd.f32 %v19872_v34, %v19778_v22  ;;  %20213 = vmatprep.mubr.f32.mxu1 %v25364_v4  ;;  %v25368_v34 = vld [vmem:[#allocation48_spill] sm:$0xff] }
 0x128   :  { %v19781_v45 = vpop.f32.mrf.mxu0  ;;  %v1259_v3 = vpop.f32.mrf.mxu1  ;;  %20120 = vmatmul.mubr.f32.gmra.mxu0 %v25365_v46 }
 0x129   :  { %v22840_v50 = vadd.f32 %v1259_v3, %v756_v18  ;;  %20122 = vmatprep.mubr.f32.mxu0 %v25367_v12 }
 0x12a   :  { %v776_v24 = vpop.f32.mrf.mxu0  ;;  %v19875_v31 = vpop.f32.mrf.mxu1  ;;  %20214 = vmatmul.mubr.f32.gmra.mxu1 %v25365_v46 }
 0x12b   :  { %25366 = vst [vmem:[#allocation43_spill] sm:$0xff] %v22840_v50  ;;  %v22844_v19 = vadd.f32 %v19875_v31, %v19781_v45  ;;  %20216 = vmatprep.mubr.f32.mxu1 %v25367_v12  ;;  %v25372_v31 = vld [vmem:[#allocation52_spill] sm:$0xff] }
 0x12c   :  { %v19784_v22 = vpop.f32.mrf.mxu0  ;;  %v1271_v25 = vpop.f32.mrf.mxu1  ;;  %20123 = vmatmul.mubr.f32.gmra.mxu0 %v25368_v34 }
 0x12d   :  { %v22848_v4 = vadd.f32 %v1271_v25, %v776_v24  ;;  %20125 = vmatprep.mubr.f32.mxu0 %v25370_v35 }
 0x12e   :  { %v796_v18 = vpop.f32.mrf.mxu0  ;;  %v19878_v3 = vpop.f32.mrf.mxu1  ;;  %20217 = vmatmul.mubr.f32.gmra.mxu1 %v25368_v34 }
 0x12f   :  { %25369 = vst [vmem:[#allocation45_spill] sm:$0xff] %v22848_v4  ;;  %v22852_v50 = vadd.f32 %v19878_v3, %v19784_v22  ;;  %20219 = vmatprep.mubr.f32.mxu1 %v25370_v35  ;;  %v25376_v3 = vld [vmem:[#allocation55_spill] sm:$0xff] }
 0x130   :  { %v19787_v45 = vpop.f32.mrf.mxu0  ;;  %v1283_v46 = vpop.f32.mrf.mxu1  ;;  %20126 = vmatmul.mubr.f32.gmra.mxu0 %v25372_v31 }
 0x131   :  { %25371 = vst [vmem:[#allocation47_spill] sm:$0xff] %v22852_v50  ;;  %v22856_v12 = vadd.f32 %v1283_v46, %v796_v18  ;;  %20128 = vmatprep.mubr.f32.mxu0 %v25374_v42  ;;  %v25378_v50 = vld [vmem:[#allocation57_spill] sm:$0xff] }
 0x132   :  { %v816_v24 = vpop.f32.mrf.mxu0  ;;  %v19881_v25 = vpop.f32.mrf.mxu1  ;;  %20220 = vmatmul.mubr.f32.gmra.mxu1 %v25372_v31 }
 0x133   :  { %25373 = vst [vmem:[#allocation49_spill] sm:$0xff] %v22856_v12  ;;  %v22860_v4 = vadd.f32 %v19881_v25, %v19787_v45  ;;  %20222 = vmatprep.mubr.f32.mxu1 %v25374_v42  ;;  %v25380_v25 = vld [vmem:[#allocation61_spill] sm:$0xff] }
 0x134   :  { %v19790_v22 = vpop.f32.mrf.mxu0  ;;  %v1295_v34 = vpop.f32.mrf.mxu1  ;;  %20129 = vmatmul.mubr.f32.gmra.mxu0 %v25376_v3 }
 0x135   :  { %25375 = vst [vmem:[#allocation51_spill] sm:$0xff] %v22860_v4  ;;  %v22864_v35 = vadd.f32 %v1295_v34, %v816_v24  ;;  %20131 = vmatprep.mubr.f32.mxu0 %v25378_v50  ;;  %v25382_v4 = vld [vmem:[#allocation62_spill] sm:$0xff] }
 0x136   :  { %v836_v18 = vpop.f32.mrf.mxu0  ;;  %v19884_v46 = vpop.f32.mrf.mxu1  ;;  %20223 = vmatmul.mubr.f32.gmra.mxu1 %v25376_v3 }
 0x137   :  { %25377 = vst [vmem:[#allocation53_spill] sm:$0xff] %v22864_v35  ;;  %v22868_v12 = vadd.f32 %v19884_v46, %v19790_v22  ;;  %20225 = vmatprep.mubr.f32.mxu1 %v25378_v50  ;;  %v25383_v46 = vld [vmem:[#allocation64_spill] sm:$0xff] }
 0x138   :  { %v19793_v45 = vpop.f32.mrf.mxu0  ;;  %v1307_v31 = vpop.f32.mrf.mxu1  ;;  %20132 = vmatmul.mubr.f32.gmra.mxu0 %v25380_v25 }
 0x139   :  { %25379 = vst [vmem:[#allocation56_spill] sm:$0xff] %v22868_v12  ;;  %v22872_v42 = vadd.f32 %v1307_v31, %v836_v18  ;;  %20134 = vmatprep.mubr.f32.mxu0 %v25382_v4  ;;  %v25385_v12 = vld [vmem:[#allocation66_spill] sm:$0xff] }
 0x13a   :  { %v856_v24 = vpop.f32.mrf.mxu0  ;;  %v19887_v34 = vpop.f32.mrf.mxu1  ;;  %20226 = vmatmul.mubr.f32.gmra.mxu1 %v25380_v25 }
 0x13b   :  { %25381 = vst [vmem:[#allocation58_spill] sm:$0xff] %v22872_v42  ;;  %v22876_v35 = vadd.f32 %v19887_v34, %v19793_v45  ;;  %20228 = vmatprep.mubr.f32.mxu1 %v25382_v4  ;;  %v25386_v34 = vld [vmem:[#allocation68_spill] sm:$0xff] }
 0x13c   :  { %v19796_v22 = vpop.f32.mrf.mxu0  ;;  %v1319_v3 = vpop.f32.mrf.mxu1  ;;  %20135 = vmatmul.mubr.f32.gmra.mxu0 %v25383_v46 }
 0x13d   :  { %v22880_v50 = vadd.f32 %v1319_v3, %v856_v24  ;;  %20137 = vmatprep.mubr.f32.mxu0 %v25385_v12 }
 0x13e   :  { %v876_v18 = vpop.f32.mrf.mxu0  ;;  %v19890_v31 = vpop.f32.mrf.mxu1  ;;  %20229 = vmatmul.mubr.f32.gmra.mxu1 %v25383_v46 }
 0x13f   :  { %25384 = vst [vmem:[#allocation59_spill] sm:$0xff] %v22880_v50  ;;  %v22884_v42 = vadd.f32 %v19890_v31, %v19796_v22  ;;  %20231 = vmatprep.mubr.f32.mxu1 %v25385_v12  ;;  %v25389_v31 = vld [vmem:[#allocation72_spill] sm:$0xff] }
 0x140   :  { %v19799_v45 = vpop.f32.mrf.mxu0  ;;  %v1331_v25 = vpop.f32.mrf.mxu1  ;;  %20138 = vmatmul.mubr.f32.gmra.mxu0 %v25386_v34 }
 0x141   :  { %v22888_v4 = vadd.f32 %v1331_v25, %v876_v18  ;;  %20140 = vmatprep.mubr.f32.mxu0 %v22165_v47 }
 0x142   :  { %v896_v24 = vpop.f32.mrf.mxu0  ;;  %v19893_v3 = vpop.f32.mrf.mxu1  ;;  %20232 = vmatmul.mubr.f32.gmra.mxu1 %v25386_v34 }
 0x143   :  { %25387 = vst [vmem:[#allocation60_spill] sm:$0xff] %v22888_v4  ;;  %v22892_v50 = vadd.f32 %v19893_v3, %v19799_v45  ;;  %20234 = vmatprep.mubr.f32.mxu1 %v22165_v47 }
 0x144   :  { %v19802_v22 = vpop.f32.mrf.mxu0  ;;  %v1343_v46 = vpop.f32.mrf.mxu1  ;;  %20141 = vmatmul.mubr.f32.gmra.mxu0 %v22183_v32 }
 0x145   :  { %v22896_v12 = vadd.f32 %v1343_v46, %v896_v24  ;;  %20143 = vmatprep.mubr.f32.mxu0 %v25389_v31 }
 0x146   :  { %v916_v18 = vpop.f32.mrf.mxu0  ;;  %v19896_v25 = vpop.f32.mrf.mxu1  ;;  %20235 = vmatmul.mubr.f32.gmra.mxu1 %v22183_v32 }
 0x147   :  { %25388 = vst [vmem:[#allocation63_spill] sm:$0xff] %v22896_v12  ;;  %v22900_v4 = vadd.f32 %v19896_v25, %v19802_v22  ;;  %20237 = vmatprep.mubr.f32.mxu1 %v25389_v31 }
 0x148   :  { %v1355_v45 = vpop.f32.mrf.mxu1  ;;  %v19903_v34 = vpop.f32.mrf.mxu0  ;;  %20144 = vmatmul.mubr.f32.gmra.mxu0 %v22203_v10 }
 0x149   :  { %v22904_v47 = vadd.f32 %v1355_v45, %v916_v18  ;;  %v1445_v3 = vadd.f32 %v19903_v34, %v22646_v14  ;;  %20146 = vmatprep.mubr.f32.mxu0 %v22209_v29 }
 0x14a   :  { %v1437_v24 = vpop.f32.mrf.mxu0  ;;  %v19997_v46 = vpop.f32.mrf.mxu1  ;;  %20238 = vmatmul.mubr.f32.gmra.mxu1 %v22203_v10 }
 0x14b   :  { %25390 = vst [vmem:[#allocation65_spill] sm:$0xff] %v22904_v47  ;;  %v1438_v32 = vadd.f32 %v1437_v24, %v22651_v16  ;;  %v22910_v22 = vadd.f32 %v19997_v46, %v1445_v3  ;;  %20240 = vmatprep.mubr.f32.mxu1 %v22209_v29 }
 0x14c   :  { %v19906_v31 = vpop.f32.mrf.mxu0  ;;  %v1925_v25 = vpop.f32.mrf.mxu1  ;;  %20147 = vmatmul.mubr.f32.gmra.mxu0 %v22221_v48 }
 0x14d   :  { %v1459_v18 = vadd.f32 %v19906_v31, %v22656_v15  ;;  %v22915_v45 = vadd.f32 %v1925_v25, %v1438_v32  ;;  %20149 = vmatprep.mubr.f32.mxu0 %v22245_v2 }
 0x14e   :  { %v1451_v14 = vpop.f32.mrf.mxu0  ;;  %v20000_v34 = vpop.f32.mrf.mxu1  ;;  %20241 = vmatmul.mubr.f32.gmra.mxu1 %v22221_v48 }
 0x14f   :  { %v1452_v10 = vadd.f32 %v1451_v14, %v22661_v26  ;;  %v22920_v16 = vadd.f32 %v20000_v34, %v1459_v18  ;;  %20243 = vmatprep.mubr.f32.mxu1 %v22245_v2 }
 0x150   :  { %v19909_v29 = vpop.f32.mrf.mxu0  ;;  %v1941_v3 = vpop.f32.mrf.mxu1  ;;  %20150 = vmatmul.mubr.f32.gmra.mxu0 %v22251_v57 }
 0x151   :  { %v1473_v15 = vadd.f32 %v19909_v29, %v22666_v59  ;;  %v22925_v24 = vadd.f32 %v1941_v3, %v1452_v10  ;;  %20152 = vmatprep.mubr.f32.mxu0 %v22257_v55 }
 0x152   :  { %v1465_v46 = vpop.f32.mrf.mxu0  ;;  %v20003_v32 = vpop.f32.mrf.mxu1  ;;  %20244 = vmatmul.mubr.f32.gmra.mxu1 %v22251_v57 }
 0x153   :  { %v1466_v48 = vadd.f32 %v1465_v46, %v22671_v20  ;;  %v22930_v26 = vadd.f32 %v20003_v32, %v1473_v15  ;;  %20246 = vmatprep.mubr.f32.mxu1 %v22257_v55 }
 0x154   :  { %v19912_v2 = vpop.f32.mrf.mxu0  ;;  %v1957_v31 = vpop.f32.mrf.mxu1  ;;  %20153 = vmatmul.mubr.f32.gmra.mxu0 %v22287_v39 }
 0x155   :  { %v1487_v59 = vadd.f32 %v19912_v2, %v22676_v36  ;;  %v22935_v25 = vadd.f32 %v1957_v31, %v1466_v48  ;;  %20155 = vmatprep.mubr.f32.mxu0 %v22296_v38 }
 0x156   :  { %v1479_v18 = vpop.f32.mrf.mxu0  ;;  %v20006_v14 = vpop.f32.mrf.mxu1  ;;  %20247 = vmatmul.mubr.f32.gmra.mxu1 %v22287_v39 }
 0x157   :  { %25391 = vst [vmem:[#allocation67_spill] sm:$0xff] %v22935_v25  ;;  %v1480_v57 = vadd.f32 %v1479_v18, %v22681_v60  ;;  %v22940_v20 = vadd.f32 %v20006_v14, %v1487_v59  ;;  %20249 = vmatprep.mubr.f32.mxu1 %v22296_v38  ;;  %v42_v38 = vld [vmem:[%s24942_s2] sm:$0xff] }
 0x158   :  { %v19915_v55 = vpop.f32.mrf.mxu0  ;;  %v1973_v34 = vpop.f32.mrf.mxu1  ;;  %20156 = vmatmul.mubr.f32.gmra.mxu0 %v22309_v56  ;;  %v25398_v59 = vld [vmem:[#allocation77_spill] sm:$0xff] }
 0x159   :  { %v1501_v36 = vadd.f32 %v19915_v55, %v22686_v23  ;;  %v22945_v10 = vadd.f32 %v1973_v34, %v1480_v57  ;;  %20158 = vmatprep.mubr.f32.mxu0 %v22322_v37  ;;  %v25395_v23 = vld [vmem:[#allocation76_spill] sm:$0xff] }
 0x15a   :  { %v22948_v29 = vpop.f32.mrf.mxu0  ;;  %v20009_v3 = vpop.f32.mrf.mxu1  ;;  %20250 = vmatmul.mubr.f32.gmra.mxu1 %v22309_v56 }
 0x15b   :  { %25392 = vst [vmem:[#allocation69_spill] sm:$0xff] %v22945_v10  ;;  %25393 = vst [vmem:[#allocation70_spill] sm:$0xff] %v22948_v29  ;;  %v22951_v39 = vadd.f32 %v20009_v3, %v1501_v36  ;;  %20252 = vmatprep.mubr.f32.mxu1 %v22322_v37  ;;  %v3260_v37 = vsel %vm82_vm0, %v42_v38, 0 }
 0x15c   :  { %v19918_v60 = vpop.f32.mrf.mxu0  ;;  %v22957_v15 = vpop.f32.mrf.mxu1  ;;  %20159 = vmatmul.mubr.f32.gmra.mxu0 %v25395_v23  ;;  %v22974_v18 = vand.u32 4294901760, %v3260_v37 }
 0x15d   :  { %25394 = vst [vmem:[#allocation71_spill] sm:$0xff] %v22957_v15  ;;  %v1515_v46 = vadd.f32 %v19918_v60, %v22696_v63  ;;  %20161 = vmatprep.mubr.f32.mxu0 %v22340_v9 }
 0x15e   :  { %v22962_v32 = vpop.f32.mrf.mxu0  ;;  %v20012_v56 = vpop.f32.mrf.mxu1  ;;  %20253 = vmatmul.mubr.f32.gmra.mxu1 %v25395_v23  ;;  %v22988_v36 = vsub.f32 %v3260_v37, %v22974_v18 }
 0x15f   :  { %25396 = vst [vmem:[#allocation73_spill] sm:$0xff] %v22962_v32  ;;  %v22966_v48 = vadd.f32 %v20012_v56, %v1515_v46  ;;  %20255 = vmatprep.mubr.f32.mxu1 %v22340_v9 }
 0x160   :  { %v19921_v2 = vpop.f32.mrf.mxu0  ;;  %v22969_v31 = vpop.f32.mrf.mxu1  ;;  %20162 = vmatmul.mubr.f32.gmra.mxu0 %v25398_v59  ;;  %v23002_v46 = vand.u32 4294901760, %v22988_v36 }
 0x161   :  { %25397 = vst [vmem:[#allocation74_spill] sm:$0xff] %v22969_v31  ;;  %v1529_v63 = vadd.f32 %v19921_v2, %v22706_v13  ;;  %20164 = vmatprep.mubr.f32.mxu0 %v22362_v44 }
 0x162   :  { %v22976_v14 = vpop.f32.mrf.mxu0  ;;  %v20015_v57 = vpop.f32.mrf.mxu1  ;;  %20256 = vmatmul.mubr.f32.gmra.mxu1 %v25398_v59  ;;  %v3335_v59 = vsub.f32 %v22988_v36, %v23002_v46 }
 0x163   :  { %v22979_v55 = vadd.f32 %v20015_v57, %v1529_v63  ;;  %20258 = vmatprep.mubr.f32.mxu1 %v22362_v44 }
 0x164   :  { %v19924_v9 = vpop.f32.mrf.mxu0  ;;  %v22982_v34 = vpop.f32.mrf.mxu1  ;;  %20165 = vmatmul.mubr.f32.gmra.mxu0 %v22387_v6 }
 0x165   :  { %v1543_v13 = vadd.f32 %v19924_v9, %v22716_v11  ;;  %20167 = vmatprep.mubr.f32.mxu0 %v22393_v62 }
 0x166   :  { %v22990_v3 = vpop.f32.mrf.mxu0  ;;  %v20018_v38 = vpop.f32.mrf.mxu1  ;;  %20259 = vmatmul.mubr.f32.gmra.mxu1 %v22387_v6 }
 0x167   :  { %v22993_v60 = vadd.f32 %v20018_v38, %v1543_v13  ;;  %20261 = vmatprep.mubr.f32.mxu1 %v22393_v62  ;;  %v23028_v13 = vand.u32 4294901760, %v3335_v59 }
 0x168   :  { %v19927_v44 = vpop.f32.mrf.mxu0  ;;  %v22996_v23 = vpop.f32.mrf.mxu1  ;;  %20168 = vmatmul.mubr.f32.gmra.mxu0 %v22420_v49 }
 0x169   :  { %v1557_v11 = vadd.f32 %v19927_v44, %v22726_v33  ;;  %20170 = vmatprep.mubr.f32.mxu0 %v22422_v21 }
 0x16a   :  { %v23004_v56 = vpop.f32.mrf.mxu0  ;;  %v20021_v37 = vpop.f32.mrf.mxu1  ;;  %20262 = vmatmul.mubr.f32.gmra.mxu1 %v22420_v49 }
 0x16b   :  { %25399 = vst [vmem:[#allocation75_spill] sm:$0xff] %v23004_v56  ;;  %v23007_v6 = vadd.f32 %v20021_v37, %v1557_v11  ;;  %20264 = vmatprep.mubr.f32.mxu1 %v22422_v21 }
 0x16c   :  { %v19930_v62 = vpop.f32.mrf.mxu0  ;;  %v23010_v2 = vpop.f32.mrf.mxu1  ;;  %20171 = vmatmul.mubr.f32.gmra.mxu0 %v22443_v52 }
 0x16d   :  { %25400 = vst [vmem:[#allocation6_spill] sm:$0xff] %v23010_v2  ;;  %v1571_v33 = vadd.f32 %v19930_v62, %v22736_v40  ;;  %20173 = vmatprep.mubr.f32.mxu0 %v22448_v58 }
 0x16e   :  { %v23017_v63 = vpop.f32.mrf.mxu0  ;;  %v20024_v57 = vpop.f32.mrf.mxu1  ;;  %20265 = vmatmul.mubr.f32.gmra.mxu1 %v22443_v52 }
 0x16f   :  { %25401 = vst [vmem:[#allocation7_spill] sm:$0xff] %v23017_v63  ;;  %v23020_v49 = vadd.f32 %v20024_v57, %v1571_v33  ;;  %20267 = vmatprep.mubr.f32.mxu1 %v22448_v58 }
 0x170   :  { %v19933_v21 = vpop.f32.mrf.mxu0  ;;  %v23023_v9 = vpop.f32.mrf.mxu1  ;;  %20174 = vmatmul.mubr.f32.gmra.mxu0 %v22466_v54 }
 0x171   :  { %25402 = vst [vmem:[#allocation8_spill] sm:$0xff] %v23023_v9  ;;  %v1585_v40 = vadd.f32 %v19933_v21, %v22746_v1  ;;  %20176 = vmatprep.mubr.f32.mxu0 %v22472_v17 }
 0x172   :  { %v23030_v38 = vpop.f32.mrf.mxu0  ;;  %v20027_v44 = vpop.f32.mrf.mxu1  ;;  %20268 = vmatmul.mubr.f32.gmra.mxu1 %v22466_v54 }
 0x173   :  { %25403 = vst [vmem:[#allocation9_spill] sm:$0xff] %v23030_v38  ;;  %v23033_v52 = vadd.f32 %v20027_v44, %v1585_v40  ;;  %20270 = vmatprep.mubr.f32.mxu1 %v22472_v17 }
 0x174   :  { %v19936_v58 = vpop.f32.mrf.mxu0  ;;  %v23036_v11 = vpop.f32.mrf.mxu1  ;;  %20177 = vmatmul.mubr.f32.gmra.mxu0 %v22484_v30 }
 0x175   :  { %25404 = vst [vmem:[#allocation10_spill] sm:$0xff] %v23036_v11  ;;  %v1599_v1 = vadd.f32 %v19936_v58, %v22756_v51  ;;  %20277 = vmatprep.mubr.f32.mxu0 %v23028_v13 }
 0x176   :  { %v23041_v37 = vpop.f32.mrf.mxu0  ;;  %v20030_v62 = vpop.f32.mrf.mxu1  ;;  %20271 = vmatmul.mubr.f32.gmra.mxu1 %v22484_v30 }
 0x177   :  { %25405 = vst [vmem:[#allocation11_spill] sm:$0xff] %v23041_v37  ;;  %v23044_v33 = vadd.f32 %v20030_v62, %v1599_v1  ;;  %20284 = vmatprep.mubr.f32.mxu1 %v22974_v18 }
 0x178   :  { %v19939_v54 = vpop.f32.mrf.mxu0  ;;  %v23047_v17 = vpop.f32.mrf.mxu1 }
 0x179   :  { %25406 = vst [vmem:[#allocation15_spill] sm:$0xff] %v23047_v17  ;;  %v1613_v59 = vadd.f32 %v19939_v54, %v22764_v61 }
 0x17a   :  { %v23050_v57 = vpop.f32.mrf.mxu0  ;;  %v20033_v21 = vpop.f32.mrf.mxu1 }
 0x17b   :  { %v23052_v51 = vadd.f32 %v20033_v21, %v1613_v59 }
 0x17c   :  { %v19942_v40 = vpop.f32.mrf.mxu0  ;;  %v23054_v44 = vpop.f32.mrf.mxu1 }
 0x17d   :  { %v1627_v58 = vadd.f32 %v19942_v40, %v22772_v43 }
 0x17e   :  { %v23057_v30 = vpop.f32.mrf.mxu0  ;;  %v20036_v1 = vpop.f32.mrf.mxu1 }
 0x17f   :  { %v23059_v62 = vadd.f32 %v20036_v1, %v1627_v58 }
 0x180   :  { %v19945_v47 = vpop.f32.mrf.mxu0  ;;  %v23061_v37 = vpop.f32.mrf.mxu1 }
 0x181   :  { %v1641_v61 = vadd.f32 %v19945_v47, %v22780_v27 }
 0x182   :  { %v23064_v54 = vpop.f32.mrf.mxu0  ;;  %v20039_v17 = vpop.f32.mrf.mxu1 }
 0x183   :  { %25407 = vst [vmem:[#allocation16_spill] sm:$0xff] %v23064_v54  ;;  %v23066_v59 = vadd.f32 %v20039_v17, %v1641_v61 }
 0x184   :  { %v19948_v21 = vpop.f32.mrf.mxu0  ;;  %v23068_v31 = vpop.f32.mrf.mxu1 }
 0x185   :  { %25408 = vst [vmem:[#allocation19_spill] sm:$0xff] %v23068_v31  ;;  %v1655_v43 = vadd.f32 %v19948_v21, %v22788_v0 }
 0x186   :  { %v23071_v40 = vpop.f32.mrf.mxu0  ;;  %v20042_v32 = vpop.f32.mrf.mxu1 }
 0x187   :  { %25409 = vst [vmem:[#allocation20_spill] sm:$0xff] %v23071_v40  ;;  %v23073_v58 = vadd.f32 %v20042_v32, %v1655_v43 }
 0x188   :  { %v19951_v1 = vpop.f32.mrf.mxu0  ;;  %v23075_v12 = vpop.f32.mrf.mxu1 }
 0x189   :  { %25410 = vst [vmem:[#allocation21_spill] sm:$0xff] %v23075_v12  ;;  %v1669_v27 = vadd.f32 %v19951_v1, %v22796_v41 }
 0x18a   :  { %v23078_v47 = vpop.f32.mrf.mxu0  ;;  %v20045_v11 = vpop.f32.mrf.mxu1 }
 0x18b   :  { %25411 = vst [vmem:[#allocation25_spill] sm:$0xff] %v23078_v47  ;;  %v23080_v17 = vadd.f32 %v20045_v11, %v1669_v27 }
 0x18c   :  { %v19954_v61 = vpop.f32.mrf.mxu0  ;;  %v23082_v38 = vpop.f32.mrf.mxu1 }
 0x18d   :  { %25412 = vst [vmem:[#allocation26_spill] sm:$0xff] %v23082_v38  ;;  %v1683_v0 = vadd.f32 %v19954_v61, %v22804_v53 }
 0x18e   :  { %v23085_v21 = vpop.f32.mrf.mxu0  ;;  %v20048_v15 = vpop.f32.mrf.mxu1 }
 0x18f   :  { %25413 = vst [vmem:[#allocation27_spill] sm:$0xff] %v23085_v21  ;;  %v23087_v32 = vadd.f32 %v20048_v15, %v1683_v0 }
 0x190   :  { %v19957_v43 = vpop.f32.mrf.mxu0  ;;  %v23089_v29 = vpop.f32.mrf.mxu1 }
 0x191   :  { %25414 = vst [vmem:[#allocation31_spill] sm:$0xff] %v23089_v29  ;;  %v1697_v41 = vadd.f32 %v19957_v43, %v22812_v28 }
 0x192   :  { %v23092_v1 = vpop.f32.mrf.mxu0  ;;  %v20051_v47 = vpop.f32.mrf.mxu1 }
 0x193   :  { %v23094_v11 = vadd.f32 %v20051_v47, %v1697_v41 }
 0x194   :  { %v19960_v27 = vpop.f32.mrf.mxu0  ;;  %v23096_v12 = vpop.f32.mrf.mxu1 }
 0x195   :  { %v1711_v53 = vadd.f32 %v19960_v27, %v22820_v8 }
 0x196   :  { %v23099_v61 = vpop.f32.mrf.mxu0  ;;  %v20054_v21 = vpop.f32.mrf.mxu1 }
 0x197   :  { %25415 = vst [vmem:[#allocation33_spill] sm:$0xff] %v23099_v61  ;;  %v23101_v15 = vadd.f32 %v20054_v21, %v1711_v53 }
 0x198   :  { %v19963_v0 = vpop.f32.mrf.mxu0  ;;  %v23103_v38 = vpop.f32.mrf.mxu1 }
 0x199   :  { %25416 = vst [vmem:[#allocation34_spill] sm:$0xff] %v23103_v38  ;;  %v1725_v28 = vadd.f32 %v19963_v0, %v22828_v5 }
 0x19a   :  { %v23106_v43 = vpop.f32.mrf.mxu0  ;;  %v20057_v29 = vpop.f32.mrf.mxu1 }
 0x19b   :  { %25417 = vst [vmem:[#allocation36_spill] sm:$0xff] %v23106_v43  ;;  %v23108_v47 = vadd.f32 %v20057_v29, %v1725_v28 }
 0x19c   :  { %v19966_v41 = vpop.f32.mrf.mxu0  ;;  %v23110_v40 = vpop.f32.mrf.mxu1 }
 0x19d   :  { %25418 = vst [vmem:[#allocation38_spill] sm:$0xff] %v23110_v40  ;;  %v1739_v8 = vadd.f32 %v19966_v41, %v22836_v7  ;;  %v25423_v40 = vld [vmem:[#allocation47_spill] sm:$0xff] }
 0x19e   :  { %v23113_v27 = vpop.f32.mrf.mxu0  ;;  %v20060_v9 = vpop.f32.mrf.mxu1 }
 0x19f   :  { %25419 = vst [vmem:[#allocation40_spill] sm:$0xff] %v23113_v27  ;;  %v23115_v21 = vadd.f32 %v20060_v9, %v1739_v8 }
 0x1a0   :  { %v19969_v53 = vpop.f32.mrf.mxu0  ;;  %v23117_v63 = vpop.f32.mrf.mxu1 }
 0x1a1   :  { %25420 = vst [vmem:[#allocation42_spill] sm:$0xff] %v23117_v63  ;;  %v1753_v5 = vadd.f32 %v19969_v53, %v22844_v19  ;;  %v25426_v63 = vld [vmem:[#allocation51_spill] sm:$0xff] }
 0x1a2   :  { %v23120_v0 = vpop.f32.mrf.mxu0  ;;  %v20063_v10 = vpop.f32.mrf.mxu1 }
 0x1a3   :  { %25421 = vst [vmem:[#allocation44_spill] sm:$0xff] %v23120_v0  ;;  %v23122_v29 = vadd.f32 %v20063_v10, %v1753_v5 }
 0x1a4   :  { %v19972_v28 = vpop.f32.mrf.mxu0  ;;  %v23124_v43 = vpop.f32.mrf.mxu1 }
 0x1a5   :  { %25422 = vst [vmem:[#allocation46_spill] sm:$0xff] %v23124_v43  ;;  %v1767_v7 = vadd.f32 %v19972_v28, %v25423_v40  ;;  %v25427_v43 = vld [vmem:[#allocation56_spill] sm:$0xff] }
 0x1a6   :  { %v23127_v41 = vpop.f32.mrf.mxu0  ;;  %v20066_v27 = vpop.f32.mrf.mxu1 }
 0x1a7   :  { %25424 = vst [vmem:[#allocation48_spill] sm:$0xff] %v23127_v41  ;;  %v23129_v9 = vadd.f32 %v20066_v27, %v1767_v7 }
 0x1a8   :  { %v19975_v8 = vpop.f32.mrf.mxu0  ;;  %v23131_v31 = vpop.f32.mrf.mxu1 }
 0x1a9   :  { %25425 = vst [vmem:[#allocation50_spill] sm:$0xff] %v23131_v31  ;;  %v1781_v19 = vadd.f32 %v19975_v8, %v25426_v63 }
 0x1aa   :  { %v23134_v53 = vpop.f32.mrf.mxu0  ;;  %v20069_v0 = vpop.f32.mrf.mxu1 }
 0x1ab   :  { %v23136_v10 = vadd.f32 %v20069_v0, %v1781_v19  ;;  %v43_v0 = vld [vmem:[%s24942_s2 + $0x8] sm:$0xff]  ;;  %s21580_s2 = smov [#allocation2]  }
 0x1ac   :  { %v19978_v5 = vpop.f32.mrf.mxu0  ;;  %v23138_v54 = vpop.f32.mrf.mxu1  ;;  %s18609_s15 = sshll.u32 %s21580_s2, 4  ;;  %s18610_s15 = int_to_ptr.vmem [resolvable:$true] %s18609_s15 }
 0x1ad   :  { %v1795_v40 = vadd.f32 %v19978_v5, %v25427_v43  ;;  %s21558_s16 = scalar_lea.vmem %s18610_s15, 16  ;;  %s21562_s17 = scalar_lea.vmem %s18610_s15, 32 }
 0x1ae   :  { %v23141_v28 = vpop.f32.mrf.mxu0  ;;  %v20072_v41 = vpop.f32.mrf.mxu1  ;;  %p21559_p0 = scmp.ne.s32.totalorder %s18610_s15, %s21558_s16  ;;  %p21563_p1 = scmp.lt.s32.totalorder %s18610_s15, %s18610_s15 }
 0x1af   :  { %25428 = vst [vmem:[#allocation52_spill] sm:$0xff] %v23141_v28  ;;  %v23143_v27 = vadd.f32 %v20072_v41, %v1795_v40  ;;  %v3263_v41 = vsel %vm82_vm0, %v43_v0, 0  ;;  %p21564_p2 = scmp.lt.s32.totalorder %s21562_s17, %s21558_s16 }
 0x1b0   :  { %v19981_v7 = vpop.f32.mrf.mxu0  ;;  %v23145_v2 = vpop.f32.mrf.mxu1 }
 0x1b1   :  { %25429 = vst [vmem:[#allocation54_spill] sm:$0xff] %v23143_v27  ;;  %25430 = vst [vmem:[#allocation55_spill] sm:$0xff] %v23145_v2  ;;  %v1809_v63 = vadd.f32 %v19981_v7, %v22876_v35  ;;  %v23163_v7 = vand.u32 4294901760, %v3263_v41  ;;  %p21565_p3 = por %p21564_p2, %p21563_p1 }
 0x1b2   :  { %v23151_v8 = vpop.f32.mrf.mxu0  ;;  %v20075_v19 = vpop.f32.mrf.mxu1 }
 0x1b3   :  { %25431 = vst [vmem:[#allocation57_spill] sm:$0xff] %v23151_v8  ;;  %v23153_v31 = vadd.f32 %v20075_v19, %v1809_v63  ;;  %v23173_v0 = vsub.f32 %v3263_v41, %v23163_v7  ;;  %p21566_p4 = pnand %p21565_p3, %p21559_p0 }
 0x1b4   :  { %v19984_v43 = vpop.f32.mrf.mxu0  ;;  %v23155_v5 = vpop.f32.mrf.mxu1 }
 0x1b5   :  { %25432 = vst [vmem:[#allocation61_spill] sm:$0xff] %v23153_v31  ;;  %25433 = vst [vmem:[#allocation62_spill] sm:$0xff] %v23155_v5  ;;  %v1823_v40 = vadd.f32 %v19984_v43, %v22884_v42 }
 0x1b6   :  { %v23159_v56 = vpop.f32.mrf.mxu0  ;;  %v20078_v25 = vpop.f32.mrf.mxu1 }
 0x1b7   :  { %25434 = vst [vmem:[#allocation64_spill] sm:$0xff] %v23159_v56  ;;  %v23161_v35 = vadd.f32 %v20078_v25, %v1823_v40 }
 0x1b8   :  { %v19987_v27 = vpop.f32.mrf.mxu0  ;;  %v23165_v2 = vpop.f32.mrf.mxu1 }
 0x1b9   :  { %25435 = vst [vmem:[#allocation66_spill] sm:$0xff] %v23161_v35  ;;  %25436 = vst [vmem:[#allocation68_spill] sm:$0xff] %v23165_v2  ;;  %v1837_v63 = vadd.f32 %v19987_v27, %v22892_v50  ;;  %v23183_v50 = vand.u32 4294901760, %v23173_v0 }
 0x1ba   :  { %v23168_v19 = vpop.f32.mrf.mxu0  ;;  %v20081_v31 = vpop.f32.mrf.mxu1 }
 0x1bb   :  { %25437 = vst [vmem:[#allocation72_spill] sm:$0xff] %v23168_v19  ;;  %v23170_v5 = vadd.f32 %v20081_v31, %v1837_v63 }
 0x1bc   :  { %v19990_v42 = vpop.f32.mrf.mxu0  ;;  %v23175_v43 = vpop.f32.mrf.mxu1 }
 0x1bd   :  { %25438 = vst [vmem:[#allocation76_spill] sm:$0xff] %v23175_v43  ;;  %v1851_v25 = vadd.f32 %v19990_v42, %v22900_v4  ;;  %v3345_v4 = vsub.f32 %v23173_v0, %v23183_v50 }
 0x1be   :  { %v23178_v40 = vpop.f32.mrf.mxu0  ;;  %v20084_v35 = vpop.f32.mrf.mxu1 }
 0x1bf   :  { %25439 = vst [vmem:[#allocation77_spill] sm:$0xff] %v23178_v40  ;;  %v23180_v56 = vadd.f32 %v20084_v35, %v1851_v25 }
 0x1c0   :  { %v23185_v27 = vpop.f32.mrf.mxu1  ;;  %v20091_v31 = vpop.f32.mrf.mxu0 }
 0x1c1   :  { %25440 = vst [vmem:[#allocation47_spill] sm:$0xff] %v23185_v27  ;;  %v2481_v63 = vadd.f32 %v20091_v31, %v22910_v22 }
 0x1c2   :  { %v2474_v41 = vpop.f32.mrf.mxu0  ;;  %v20185_v19 = vpop.f32.mrf.mxu1 }
 0x1c3   :  { %v2475_v2 = vadd.f32 %v2474_v41, %v22915_v45  ;;  %v2908_v43 = vadd.f32 %v20185_v19, %v2481_v63  ;;  %v23202_v45 = vand.u32 4294901760, %v3345_v4 }
 0x1c4   :  { %v20094_v42 = vpop.f32.mrf.mxu0  ;;  %v2901_v40 = vpop.f32.mrf.mxu1 }
 0x1c5   :  { %v23191_v35 = vand.u32 4294901760, %v2908_v43  ;;  %v2493_v25 = vadd.f32 %v20094_v42, %v22920_v16  ;;  %v2902_v8 = vadd.f32 %v2901_v40, %v2475_v2 }
 0x1c6   :  { %v23194_v28 = vpop.f32.mrf.mxu0  ;;  %v20188_v27 = vpop.f32.mrf.mxu1 }
 0x1c7   :  { %v3382_v22 = vsub.f32 %v2908_v43, %v23191_v35  ;;  %v23197_v31 = vand.u32 4294901760, %v2902_v8  ;;  %v23199_v38 = vadd.f32 %v20188_v27, %v2493_v25  ;;  %20273 = vmatprep.subr.mxu0 %v23191_v35 }
 0x1c8   :  { %v20097_v19 = vpop.f32.mrf.mxu0  ;;  %v23204_v63 = vpop.f32.mrf.mxu1  ;;  %20274 = vmatpush3.msra.mxu0 %v23191_v35 }
 0x1c9   :  { %v3389_v16 = vsub.f32 %v2902_v8, %v23197_v31  ;;  %v2505_v2 = vadd.f32 %v20097_v19, %v22930_v26  ;;  %20275 = vmatprep.subr.mxu0 %v23197_v31  ;;  %v3383_v27 = vand.u32 4294901760, %v3382_v22 }
 0x1ca   :  { %v23210_v43 = vpop.f32.mrf.mxu0  ;;  %v20191_v40 = vpop.f32.mrf.mxu1  ;;  %20276 = vmatpush3.msra.mxu0 %v23197_v31 }
 0x1cb   :  { %25441 = vst [vmem:[#allocation51_spill] sm:$0xff] %v23210_v43  ;;  %v23213_v41 = vadd.f32 %v20191_v40, %v2505_v2  ;;  %20287 = vmatprep.subr.mxu0 %v3382_v22  ;;  %20278 = vmatmul.mubr.f32.vlgmr.msra.gmra.mxu0 %v23202_v45  ;;  %v3384_v8 = vsub.f32 %v3382_v22, %v3383_v27  ;;  %v3390_v26 = vand.u32 4294901760, %v3389_v16 }
 0x1cc   :  { %v20100_v4 = vpop.f32.mrf.mxu0  ;;  %v23216_v42 = vpop.f32.mrf.mxu1  ;;  %20288 = vmatpush3.msra.mxu0 %v3382_v22  ;;  %20291 = vmatprep.mubr.f32.mxu0 %v22988_v36 }
 0x1cd   :  { %25442 = vst [vmem:[#allocation56_spill] sm:$0xff] %v23213_v41  ;;  %25443 = vst [vmem:[#allocation78_spill] sm:$0xff] %v23216_v42  ;;  %v2517_v25 = vadd.f32 %v20100_v4, %v22940_v20  ;;  %20289 = vmatprep.subr.mxu0 %v3389_v16  ;;  %v3385_v2 = vand.u32 4294901760, %v3384_v8  ;;  %v3391_v40 = vsub.f32 %v3389_v16, %v3390_v26 }
 0x1ce   :  { %v23220_v19 = vpop.f32.mrf.mxu0  ;;  %v20194_v43 = vpop.f32.mrf.mxu1  ;;  %20290 = vmatpush3.msra.mxu0 %v3389_v16 }
 0x1cf   :  { %v23222_v41 = vadd.f32 %v20194_v43, %v2517_v25  ;;  %20301 = vmatprep.subr.mxu0 %v3383_v27  ;;  %20292 = vmatmul.mubr.f32.vlgmr.msra.gmra.mxu0 %v23173_v0  ;;  %v3392_v61 = vand.u32 4294901760, %v3391_v40 }
 0x1d0   :  { %20280 = vmatprep.subr.mxu1 %v3385_v2  ;;  %v20103_v42 = vpop.f32.mrf.mxu0  ;;  %v23225_v22 = vpop.f32.mrf.mxu1  ;;  %20302 = vmatpush3.msra.mxu0 %v3383_v27 }
 0x1d1   :  { %25444 = vst [vmem:[#allocation79_spill] sm:$0xff] %v23222_v41  ;;  %v2529_v20 = vadd.f32 %v20103_v42, %v22951_v39  ;;  %20281 = vmatpush3.msra.mxu1 %v3385_v2  ;;  %20303 = vmatprep.subr.mxu0 %v3390_v26  ;;  %v25448_v39 = vld [vmem:[#allocation13_spill] sm:$0xff] }
 0x1d2   :  { %20282 = vmatprep.subr.mxu1 %v3392_v61  ;;  %v23228_v4 = vpop.f32.mrf.mxu0  ;;  %v20197_v8 = vpop.f32.mrf.mxu1  ;;  %20304 = vmatpush3.msra.mxu0 %v3390_v26  ;;  %v1522_v27 = vadd.f32 %v22976_v14, %v25448_v39 }
 0x1d3   :  { %25445 = vst [vmem:[#allocation80_spill] sm:$0xff] %v23228_v4  ;;  %v23230_v16 = vadd.f32 %v20197_v8, %v2529_v20  ;;  %20283 = vmatpush3.msra.mxu1 %v3392_v61  ;;  %20305 = vmatprep.mubr.f32.mxu0 %v22974_v18 }
 0x1d4   :  { %20294 = vmatprep.subr.mxu1 %v23191_v35  ;;  %v20106_v43 = vpop.f32.mrf.mxu0  ;;  %v23234_v25 = vpop.f32.mrf.mxu1  ;;  %20285 = vmatmul.mubr.f32.vlgmr.msra.gmra.mxu1 %v23163_v7  ;;  %v2022_v40 = vadd.f32 %v22982_v34, %v1522_v27 }
 0x1d5   :  { %25446 = vst [vmem:[#allocation81_spill] sm:$0xff] %v23230_v16  ;;  %25447 = vst [vmem:[#allocation82_spill] sm:$0xff] %v23234_v25  ;;  %v2541_v42 = vadd.f32 %v20106_v43, %v22966_v48  ;;  %20295 = vmatpush3.msra.mxu1 %v23191_v35  ;;  %20298 = vmatprep.mubr.f32.mxu1 %v23002_v46 }
 0x1d6   :  { %20296 = vmatprep.subr.mxu1 %v23197_v31  ;;  %v23243_v61 = vpop.f32.mrf.mxu0  ;;  %v20200_v26 = vpop.f32.mrf.mxu1  ;;  %20306 = vmatmul.mubr.f32.vlgmr.msra.gmra.mxu0 %v23163_v7 }
 0x1d7   :  { %25449 = vst [vmem:[#allocation13_spill] sm:$0xff] %v23243_v61  ;;  %v23246_v2 = vadd.f32 %v20200_v26, %v2541_v42  ;;  %20297 = vmatpush3.msra.mxu1 %v23197_v31  ;;  %20319 = vmatprep.mubr.f32.mxu0 %v23028_v13 }
 0x1d8   :  { %20308 = vmatprep.subr.mxu1 %v23191_v35  ;;  %v20109_v48 = vpop.f32.mrf.mxu0  ;;  %v23251_v14 = vpop.f32.mrf.mxu1  ;;  %20299 = vmatmul.mubr.f32.vlgmr.msra.gmra.mxu1 %v23183_v50 }
 0x1d9   :  { %25450 = vst [vmem:[#allocation83_spill] sm:$0xff] %v23246_v2  ;;  %25451 = vst [vmem:[#allocation84_spill] sm:$0xff] %v23251_v14  ;;  %v2553_v20 = vadd.f32 %v20109_v48, %v22979_v55  ;;  %20309 = vmatpush3.msra.mxu1 %v23191_v35  ;;  %20312 = vmatprep.mubr.f32.mxu1 %v22974_v18 }
 0x1da   :  { %20310 = vmatprep.subr.mxu1 %v23197_v31  ;;  %v2546_v8 = vpop.f32.mrf.mxu0  ;;  %v20203_v43 = vpop.f32.mrf.mxu1 }
 0x1db   :  { %v2547_v39 = vadd.f32 %v2546_v8, %v2022_v40  ;;  %v2980_v42 = vadd.f32 %v20203_v43, %v2553_v20  ;;  %20311 = vmatpush3.msra.mxu1 %v23197_v31 }
 0x1dc   :  { %v20112_v26 = vpop.f32.mrf.mxu0  ;;  %v2973_v2 = vpop.f32.mrf.mxu1  ;;  %20313 = vmatmul.mubr.f32.vlgmr.msra.gmra.mxu1 %v23163_v7 }
 0x1dd   :  { %v23261_v14 = vand.u32 4294901760, %v2980_v42  ;;  %v2565_v55 = vadd.f32 %v20112_v26, %v22993_v60  ;;  %v2974_v34 = vadd.f32 %v2973_v2, %v2547_v39  ;;  %20326 = vmatprep.mubr.f32.mxu1 %v22974_v18 }
 0x1de   :  { %v23265_v35 = vpop.f32.mrf.mxu0  ;;  %v20206_v27 = vpop.f32.mrf.mxu1 }
 0x1df   :  { %v3884_v48 = vsub.f32 %v2980_v42, %v23261_v14  ;;  %v23268_v40 = vand.u32 4294901760, %v2974_v34  ;;  %v23270_v20 = vadd.f32 %v20206_v27, %v2565_v55  ;;  %20315 = vmatprep.subr.mxu0 %v23261_v14 }
 0x1e0   :  { %v20115_v31 = vpop.f32.mrf.mxu0  ;;  %v23273_v8 = vpop.f32.mrf.mxu1  ;;  %20316 = vmatpush3.msra.mxu0 %v23261_v14 }
 0x1e1   :  { %v3891_v60 = vsub.f32 %v2974_v34, %v23268_v40  ;;  %v2577_v2 = vadd.f32 %v20115_v31, %v23007_v6  ;;  %20317 = vmatprep.subr.mxu0 %v23268_v40  ;;  %v3885_v42 = vand.u32 4294901760, %v3884_v48 }
 0x1e2   :  { %v23279_v43 = vpop.f32.mrf.mxu0  ;;  %v20209_v39 = vpop.f32.mrf.mxu1  ;;  %20318 = vmatpush3.msra.mxu0 %v23268_v40 }
 0x1e3   :  { %v23282_v26 = vadd.f32 %v20209_v39, %v2577_v2  ;;  %20329 = vmatprep.subr.mxu0 %v3884_v48  ;;  %20320 = vmatmul.mubr.f32.vlgmr.msra.gmra.mxu0 %v23202_v45  ;;  %v3886_v34 = vsub.f32 %v3884_v48, %v3885_v42  ;;  %v3892_v6 = vand.u32 4294901760, %v3891_v60 }
 0x1e4   :  { %v20118_v55 = vpop.f32.mrf.mxu0  ;;  %v23285_v27 = vpop.f32.mrf.mxu1  ;;  %20330 = vmatpush3.msra.mxu0 %v3884_v48  ;;  %20333 = vmatprep.mubr.f32.mxu0 %v22988_v36 }
 0x1e5   :  { %v2589_v31 = vadd.f32 %v20118_v55, %v23020_v49  ;;  %20331 = vmatprep.subr.mxu0 %v3891_v60  ;;  %v3887_v2 = vand.u32 4294901760, %v3886_v34  ;;  %v3893_v39 = vsub.f32 %v3891_v60, %v3892_v6 }
 0x1e6   :  { %v23289_v61 = vpop.f32.mrf.mxu0  ;;  %v20212_v16 = vpop.f32.mrf.mxu1  ;;  %20332 = vmatpush3.msra.mxu0 %v3891_v60 }
 0x1e7   :  { %v23291_v25 = vadd.f32 %v20212_v16, %v2589_v31  ;;  %20343 = vmatprep.subr.mxu0 %v3885_v42  ;;  %20334 = vmatmul.mubr.f32.vlgmr.msra.gmra.mxu0 %v23173_v0  ;;  %v3894_v41 = vand.u32 4294901760, %v3893_v39 }
 0x1e8   :  { %20322 = vmatprep.subr.mxu1 %v3887_v2  ;;  %v20121_v4 = vpop.f32.mrf.mxu0  ;;  %v23294_v48 = vpop.f32.mrf.mxu1  ;;  %20344 = vmatpush3.msra.mxu0 %v3885_v42 }
 0x1e9   :  { %25452 = vst [vmem:[#allocation85_spill] sm:$0xff] %v23291_v25  ;;  %v2601_v49 = vadd.f32 %v20121_v4, %v23033_v52  ;;  %20323 = vmatpush3.msra.mxu1 %v3887_v2  ;;  %20345 = vmatprep.subr.mxu0 %v3892_v6  ;;  %v25456_v52 = vld [vmem:[#allocation24_spill] sm:$0xff] }
 0x1ea   :  { %20324 = vmatprep.subr.mxu1 %v3894_v41  ;;  %v23297_v55 = vpop.f32.mrf.mxu0  ;;  %v20215_v34 = vpop.f32.mrf.mxu1  ;;  %20346 = vmatpush3.msra.mxu0 %v3892_v6  ;;  %v1606_v4 = vadd.f32 %v23050_v57, %v25456_v52 }
 0x1eb   :  { %25453 = vst [vmem:[#allocation86_spill] sm:$0xff] %v23297_v55  ;;  %v23299_v16 = vadd.f32 %v20215_v34, %v2601_v49  ;;  %20325 = vmatpush3.msra.mxu1 %v3894_v41  ;;  %20347 = vmatprep.mubr.f32.mxu0 %v22974_v18 }
 0x1ec   :  { %20336 = vmatprep.subr.mxu1 %v23261_v14  ;;  %v20124_v60 = vpop.f32.mrf.mxu0  ;;  %v23303_v31 = vpop.f32.mrf.mxu1  ;;  %20327 = vmatmul.mubr.f32.vlgmr.msra.gmra.mxu1 %v23163_v7  ;;  %v2118_v39 = vadd.f32 %v23054_v44, %v1606_v4 }
 0x1ed   :  { %25454 = vst [vmem:[#allocation87_spill] sm:$0xff] %v23299_v16  ;;  %25455 = vst [vmem:[#allocation88_spill] sm:$0xff] %v23303_v31  ;;  %v2613_v42 = vadd.f32 %v20124_v60, %v23044_v33  ;;  %20337 = vmatpush3.msra.mxu1 %v23261_v14  ;;  %20340 = vmatprep.mubr.f32.mxu1 %v23002_v46 }
 0x1ee   :  { %20338 = vmatprep.subr.mxu1 %v23268_v40  ;;  %v23312_v41 = vpop.f32.mrf.mxu0  ;;  %v20218_v6 = vpop.f32.mrf.mxu1  ;;  %20348 = vmatmul.mubr.f32.vlgmr.msra.gmra.mxu0 %v23163_v7 }
 0x1ef   :  { %25457 = vst [vmem:[#allocation24_spill] sm:$0xff] %v23312_v41  ;;  %v23315_v2 = vadd.f32 %v20218_v6, %v2613_v42  ;;  %20339 = vmatpush3.msra.mxu1 %v23268_v40  ;;  %20361 = vmatprep.mubr.f32.mxu0 %v23028_v13 }
 0x1f0   :  { %20350 = vmatprep.subr.mxu1 %v23261_v14  ;;  %v20127_v33 = vpop.f32.mrf.mxu0  ;;  %v23320_v57 = vpop.f32.mrf.mxu1  ;;  %20341 = vmatmul.mubr.f32.vlgmr.msra.gmra.mxu1 %v23183_v50 }
 0x1f1   :  { %25458 = vst [vmem:[#allocation89_spill] sm:$0xff] %v23315_v2  ;;  %25459 = vst [vmem:[#allocation90_spill] sm:$0xff] %v23320_v57  ;;  %v2625_v49 = vadd.f32 %v20127_v33, %v23052_v51  ;;  %20351 = vmatpush3.msra.mxu1 %v23261_v14  ;;  %20354 = vmatprep.mubr.f32.mxu1 %v22974_v18 }
 0x1f2   :  { %20352 = vmatprep.subr.mxu1 %v23268_v40  ;;  %v2618_v34 = vpop.f32.mrf.mxu0  ;;  %v20221_v60 = vpop.f32.mrf.mxu1 }
 0x1f3   :  { %v2619_v52 = vadd.f32 %v2618_v34, %v2118_v39  ;;  %v3052_v42 = vadd.f32 %v20221_v60, %v2625_v49  ;;  %20353 = vmatpush3.msra.mxu1 %v23268_v40 }
 0x1f4   :  { %v20130_v6 = vpop.f32.mrf.mxu0  ;;  %v3045_v2 = vpop.f32.mrf.mxu1  ;;  %20355 = vmatmul.mubr.f32.vlgmr.msra.gmra.mxu1 %v23163_v7 }
 0x1f5   :  { %v23330_v57 = vand.u32 4294901760, %v3052_v42  ;;  %v2637_v51 = vadd.f32 %v20130_v6, %v23059_v62  ;;  %v3046_v44 = vadd.f32 %v3045_v2, %v2619_v52  ;;  %20368 = vmatprep.mubr.f32.mxu1 %v22974_v18 }
 0x1f6   :  { %v23334_v14 = vpop.f32.mrf.mxu0  ;;  %v20224_v4 = vpop.f32.mrf.mxu1 }
 0x1f7   :  { %v4386_v33 = vsub.f32 %v3052_v42, %v23330_v57  ;;  %v23337_v39 = vand.u32 4294901760, %v3046_v44  ;;  %v23339_v49 = vadd.f32 %v20224_v4, %v2637_v51  ;;  %20357 = vmatprep.subr.mxu0 %v23330_v57 }
 0x1f8   :  { %v20133_v40 = vpop.f32.mrf.mxu0  ;;  %v23342_v34 = vpop.f32.mrf.mxu1  ;;  %20358 = vmatpush3.msra.mxu0 %v23330_v57 }
 0x1f9   :  { %v4393_v62 = vsub.f32 %v3046_v44, %v23337_v39  ;;  %v2649_v2 = vadd.f32 %v20133_v40, %v23066_v59  ;;  %20359 = vmatprep.subr.mxu0 %v23337_v39  ;;  %v4387_v42 = vand.u32 4294901760, %v4386_v33 }
 0x1fa   :  { %v23348_v60 = vpop.f32.mrf.mxu0  ;;  %v20227_v52 = vpop.f32.mrf.mxu1  ;;  %20360 = vmatpush3.msra.mxu0 %v23337_v39 }
 0x1fb   :  { %v23351_v6 = vadd.f32 %v20227_v52, %v2649_v2  ;;  %20371 = vmatprep.subr.mxu0 %v4386_v33  ;;  %20362 = vmatmul.mubr.f32.vlgmr.msra.gmra.mxu0 %v23202_v45  ;;  %v4388_v44 = vsub.f32 %v4386_v33, %v4387_v42  ;;  %v4394_v59 = vand.u32 4294901760, %v4393_v62 }
 0x1fc   :  { %v20136_v51 = vpop.f32.mrf.mxu0  ;;  %v23354_v4 = vpop.f32.mrf.mxu1  ;;  %20372 = vmatpush3.msra.mxu0 %v4386_v33  ;;  %20375 = vmatprep.mubr.f32.mxu0 %v22988_v36 }
 0x1fd   :  { %v2661_v40 = vadd.f32 %v20136_v51, %v23073_v58  ;;  %20373 = vmatprep.subr.mxu0 %v4393_v62  ;;  %v4389_v2 = vand.u32 4294901760, %v4388_v44  ;;  %v4395_v52 = vsub.f32 %v4393_v62, %v4394_v59 }
 0x1fe   :  { %v23358_v41 = vpop.f32.mrf.mxu0  ;;  %v20230_v16 = vpop.f32.mrf.mxu1  ;;  %20374 = vmatpush3.msra.mxu0 %v4393_v62 }
 0x1ff   :  { %v23360_v31 = vadd.f32 %v20230_v16, %v2661_v40  ;;  %20385 = vmatprep.subr.mxu0 %v4387_v42  ;;  %20376 = vmatmul.mubr.f32.vlgmr.msra.gmra.mxu0 %v23173_v0  ;;  %v4396_v25 = vand.u32 4294901760, %v4395_v52 }
 0x200   :  { %20364 = vmatprep.subr.mxu1 %v4389_v2  ;;  %v20139_v55 = vpop.f32.mrf.mxu0  ;;  %v23363_v33 = vpop.f32.mrf.mxu1  ;;  %20386 = vmatpush3.msra.mxu0 %v4387_v42 }
 0x201   :  { %25460 = vst [vmem:[#allocation91_spill] sm:$0xff] %v23360_v31  ;;  %v2673_v58 = vadd.f32 %v20139_v55, %v23080_v17  ;;  %20365 = vmatpush3.msra.mxu1 %v4389_v2  ;;  %20387 = vmatprep.subr.mxu0 %v4394_v59  ;;  %v25464_v17 = vld [vmem:[#allocation37_spill] sm:$0xff] }
 0x202   :  { %20366 = vmatprep.subr.mxu1 %v4396_v25  ;;  %v23366_v51 = vpop.f32.mrf.mxu0  ;;  %v20233_v44 = vpop.f32.mrf.mxu1  ;;  %20388 = vmatpush3.msra.mxu0 %v4394_v59  ;;  %v1690_v55 = vadd.f32 %v23092_v1, %v25464_v17 }
 0x203   :  { %25461 = vst [vmem:[#allocation92_spill] sm:$0xff] %v23366_v51  ;;  %v23368_v16 = vadd.f32 %v20233_v44, %v2673_v58  ;;  %20367 = vmatpush3.msra.mxu1 %v4396_v25  ;;  %20389 = vmatprep.mubr.f32.mxu0 %v22974_v18 }
 0x204   :  { %20378 = vmatprep.subr.mxu1 %v23330_v57  ;;  %v20142_v62 = vpop.f32.mrf.mxu0  ;;  %v23372_v40 = vpop.f32.mrf.mxu1  ;;  %20369 = vmatmul.mubr.f32.vlgmr.msra.gmra.mxu1 %v23163_v7  ;;  %v2214_v52 = vadd.f32 %v23096_v12, %v1690_v55 }
 0x205   :  { %25462 = vst [vmem:[#allocation93_spill] sm:$0xff] %v23368_v16  ;;  %25463 = vst [vmem:[#allocation94_spill] sm:$0xff] %v23372_v40  ;;  %v2685_v42 = vadd.f32 %v20142_v62, %v23087_v32  ;;  %20379 = vmatpush3.msra.mxu1 %v23330_v57  ;;  %20382 = vmatprep.mubr.f32.mxu1 %v23002_v46 }
 0x206   :  { %20380 = vmatprep.subr.mxu1 %v23337_v39  ;;  %v23381_v25 = vpop.f32.mrf.mxu0  ;;  %v20236_v59 = vpop.f32.mrf.mxu1  ;;  %20390 = vmatmul.mubr.f32.vlgmr.msra.gmra.mxu0 %v23163_v7 }
 0x207   :  { %25465 = vst [vmem:[#allocation37_spill] sm:$0xff] %v23381_v25  ;;  %v23384_v2 = vadd.f32 %v20236_v59, %v2685_v42  ;;  %20381 = vmatpush3.msra.mxu1 %v23337_v39  ;;  %20403 = vmatprep.mubr.f32.mxu0 %v23028_v13 }
 0x208   :  { %20392 = vmatprep.subr.mxu1 %v23330_v57  ;;  %v20145_v32 = vpop.f32.mrf.mxu0  ;;  %v23389_v1 = vpop.f32.mrf.mxu1  ;;  %20383 = vmatmul.mubr.f32.vlgmr.msra.gmra.mxu1 %v23183_v50 }
 0x209   :  { %25466 = vst [vmem:[#allocation95_spill] sm:$0xff] %v23384_v2  ;;  %25467 = vst [vmem:[#allocation96_spill] sm:$0xff] %v23389_v1  ;;  %v2697_v58 = vadd.f32 %v20145_v32, %v23094_v11  ;;  %20393 = vmatpush3.msra.mxu1 %v23330_v57  ;;  %20396 = vmatprep.mubr.f32.mxu1 %v22974_v18 }
 0x20a   :  { %20394 = vmatprep.subr.mxu1 %v23337_v39  ;;  %v2690_v44 = vpop.f32.mrf.mxu0  ;;  %v20239_v62 = vpop.f32.mrf.mxu1 }
 0x20b   :  { %v2691_v17 = vadd.f32 %v2690_v44, %v2214_v52  ;;  %v3124_v42 = vadd.f32 %v20239_v62, %v2697_v58  ;;  %20395 = vmatpush3.msra.mxu1 %v23337_v39 }
 0x20c   :  { %v20148_v59 = vpop.f32.mrf.mxu0  ;;  %v3117_v2 = vpop.f32.mrf.mxu1  ;;  %20397 = vmatmul.mubr.f32.vlgmr.msra.gmra.mxu1 %v23163_v7 }
 0x20d   :  { %v23399_v1 = vand.u32 4294901760, %v3124_v42  ;;  %v2709_v12 = vadd.f32 %v20148_v59, %v23101_v15  ;;  %v3118_v11 = vadd.f32 %v3117_v2, %v2691_v17  ;;  %20410 = vmatprep.mubr.f32.mxu1 %v22974_v18 }
 0x20e   :  { %v23403_v57 = vpop.f32.mrf.mxu0  ;;  %v20242_v55 = vpop.f32.mrf.mxu1 }
 0x20f   :  { %v4888_v32 = vsub.f32 %v3124_v42, %v23399_v1  ;;  %v23406_v52 = vand.u32 4294901760, %v3118_v11  ;;  %v23408_v58 = vadd.f32 %v20242_v55, %v2709_v12  ;;  %20399 = vmatprep.subr.mxu0 %v23399_v1 }
 0x210   :  { %v20151_v39 = vpop.f32.mrf.mxu0  ;;  %v23411_v44 = vpop.f32.mrf.mxu1  ;;  %20400 = vmatpush3.msra.mxu0 %v23399_v1 }
 0x211   :  { %v4895_v15 = vsub.f32 %v3118_v11, %v23406_v52  ;;  %v2721_v2 = vadd.f32 %v20151_v39, %v23108_v47  ;;  %20401 = vmatprep.subr.mxu0 %v23406_v52  ;;  %v4889_v42 = vand.u32 4294901760, %v4888_v32 }
 0x212   :  { %v23417_v62 = vpop.f32.mrf.mxu0  ;;  %v20245_v17 = vpop.f32.mrf.mxu1  ;;  %20402 = vmatpush3.msra.mxu0 %v23406_v52 }
 0x213   :  { %v23420_v59 = vadd.f32 %v20245_v17, %v2721_v2  ;;  %20413 = vmatprep.subr.mxu0 %v4888_v32  ;;  %20404 = vmatmul.mubr.f32.vlgmr.msra.gmra.mxu0 %v23202_v45  ;;  %v4890_v11 = vsub.f32 %v4888_v32, %v4889_v42  ;;  %v4896_v47 = vand.u32 4294901760, %v4895_v15 }
 0x214   :  { %v20154_v12 = vpop.f32.mrf.mxu0  ;;  %v23423_v55 = vpop.f32.mrf.mxu1  ;;  %20414 = vmatpush3.msra.mxu0 %v4888_v32  ;;  %20417 = vmatprep.mubr.f32.mxu0 %v22988_v36 }
 0x215   :  { %v2733_v39 = vadd.f32 %v20154_v12, %v23115_v21  ;;  %20415 = vmatprep.subr.mxu0 %v4895_v15  ;;  %v4891_v2 = vand.u32 4294901760, %v4890_v11  ;;  %v4897_v17 = vsub.f32 %v4895_v15, %v4896_v47 }
 0x216   :  { %v23427_v25 = vpop.f32.mrf.mxu0  ;;  %v20248_v16 = vpop.f32.mrf.mxu1  ;;  %20416 = vmatpush3.msra.mxu0 %v4895_v15 }
 0x217   :  { %25468 = vst [vmem:[#allocation97_spill] sm:$0xff] %v23427_v25  ;;  %v23429_v40 = vadd.f32 %v20248_v16, %v2733_v39  ;;  %20427 = vmatprep.subr.mxu0 %v4889_v42  ;;  %20418 = vmatmul.mubr.f32.vlgmr.msra.gmra.mxu0 %v23173_v0  ;;  %v4898_v31 = vand.u32 4294901760, %v4897_v17 }
 0x218   :  { %20406 = vmatprep.subr.mxu1 %v4891_v2  ;;  %v20157_v51 = vpop.f32.mrf.mxu0  ;;  %v23432_v32 = vpop.f32.mrf.mxu1  ;;  %20428 = vmatpush3.msra.mxu0 %v4889_v42 }
 0x219   :  { %25469 = vst [vmem:[#allocation98_spill] sm:$0xff] %v23429_v40  ;;  %25470 = vst [vmem:[#allocation99_spill] sm:$0xff] %v23432_v32  ;;  %v2745_v21 = vadd.f32 %v20157_v51, %v23122_v29  ;;  %20407 = vmatpush3.msra.mxu1 %v4891_v2  ;;  %20429 = vmatprep.subr.mxu0 %v4896_v47  ;;  %v25474_v29 = vld [vmem:[#allocation53_spill] sm:$0xff] }
 0x21a   :  { %20408 = vmatprep.subr.mxu1 %v4898_v31  ;;  %v23435_v12 = vpop.f32.mrf.mxu0  ;;  %v20251_v11 = vpop.f32.mrf.mxu1  ;;  %20430 = vmatpush3.msra.mxu0 %v4896_v47  ;;  %v1774_v51 = vadd.f32 %v23134_v53, %v25474_v29 }
 0x21b   :  { %25471 = vst [vmem:[#allocation100_spill] sm:$0xff] %v23435_v12  ;;  %v23437_v16 = vadd.f32 %v20251_v11, %v2745_v21  ;;  %20409 = vmatpush3.msra.mxu1 %v4898_v31  ;;  %20431 = vmatprep.mubr.f32.mxu0 %v22974_v18 }
 0x21c   :  { %20420 = vmatprep.subr.mxu1 %v23399_v1  ;;  %v20160_v15 = vpop.f32.mrf.mxu0  ;;  %v23441_v39 = vpop.f32.mrf.mxu1  ;;  %20411 = vmatmul.mubr.f32.vlgmr.msra.gmra.mxu1 %v23163_v7  ;;  %v2310_v17 = vadd.f32 %v23138_v54, %v1774_v51 }
 0x21d   :  { %25472 = vst [vmem:[#allocation101_spill] sm:$0xff] %v23437_v16  ;;  %25473 = vst [vmem:[#allocation102_spill] sm:$0xff] %v23441_v39  ;;  %v2757_v42 = vadd.f32 %v20160_v15, %v23129_v9  ;;  %20421 = vmatpush3.msra.mxu1 %v23399_v1  ;;  %20424 = vmatprep.mubr.f32.mxu1 %v23002_v46  ;;  %v23503_v16 = vand.u32 4294901760, %v23199_v38 }
 0x21e   :  { %20422 = vmatprep.subr.mxu1 %v23406_v52  ;;  %v23450_v31 = vpop.f32.mrf.mxu0  ;;  %v20254_v47 = vpop.f32.mrf.mxu1  ;;  %20432 = vmatmul.mubr.f32.vlgmr.msra.gmra.mxu0 %v23163_v7 }
 0x21f   :  { %25475 = vst [vmem:[#allocation53_spill] sm:$0xff] %v23450_v31  ;;  %v23453_v2 = vadd.f32 %v20254_v47, %v2757_v42  ;;  %20423 = vmatpush3.msra.mxu1 %v23406_v52  ;;  %20445 = vmatprep.mubr.f32.mxu0 %v23028_v13 }
 0x220   :  { %20434 = vmatprep.subr.mxu1 %v23399_v1  ;;  %v20163_v9 = vpop.f32.mrf.mxu0  ;;  %v23458_v53 = vpop.f32.mrf.mxu1  ;;  %20425 = vmatmul.mubr.f32.vlgmr.msra.gmra.mxu1 %v23183_v50 }
 0x221   :  { %25476 = vst [vmem:[#allocation103_spill] sm:$0xff] %v23453_v2  ;;  %25477 = vst [vmem:[#allocation104_spill] sm:$0xff] %v23458_v53  ;;  %v2769_v21 = vadd.f32 %v20163_v9, %v23136_v10  ;;  %20435 = vmatpush3.msra.mxu1 %v23399_v1  ;;  %20438 = vmatprep.mubr.f32.mxu1 %v22974_v18 }
 0x222   :  { %20436 = vmatprep.subr.mxu1 %v23406_v52  ;;  %v2762_v11 = vpop.f32.mrf.mxu0  ;;  %v20257_v15 = vpop.f32.mrf.mxu1 }
 0x223   :  { %v2763_v29 = vadd.f32 %v2762_v11, %v2310_v17  ;;  %v3196_v42 = vadd.f32 %v20257_v15, %v2769_v21  ;;  %20437 = vmatpush3.msra.mxu1 %v23406_v52  ;;  %v2487_v52 = vadd.f32 %v23194_v28, %v22925_v24 }
 0x224   :  { %v23467_v47 = vpop.f32.mrf.mxu0  ;;  %v3189_v2 = vpop.f32.mrf.mxu1  ;;  %20439 = vmatmul.mubr.f32.vlgmr.msra.gmra.mxu1 %v23163_v7 }
 0x225   :  { %v23470_v54 = vand.u32 4294901760, %v3196_v42  ;;  %v3190_v10 = vadd.f32 %v3189_v2, %v2763_v29  ;;  %20452 = vmatprep.mubr.f32.mxu1 %v22974_v18  ;;  %v2914_v24 = vadd.f32 %v23204_v63, %v2487_v52 }
 0x226   :  { %v23473_v1 = vpop.f32.mrf.mxu0  ;;  %v23475_v51 = vpop.f32.mrf.mxu1 }
 0x227   :  { %v5390_v9 = vsub.f32 %v3196_v42, %v23470_v54  ;;  %v23478_v17 = vand.u32 4294901760, %v3190_v10  ;;  %20441 = vmatprep.subr.mxu0 %v23470_v54  ;;  %v23510_v52 = vand.u32 4294901760, %v2914_v24 }
 0x228   :  { %v23483_v21 = vpop.f32.mrf.mxu0  ;;  %v23485_v11 = vpop.f32.mrf.mxu1  ;;  %20442 = vmatpush3.msra.mxu0 %v23470_v54 }
 0x229   :  { %v5397_v2 = vsub.f32 %v3190_v10, %v23478_v17  ;;  %20443 = vmatprep.subr.mxu0 %v23478_v17  ;;  %v5391_v42 = vand.u32 4294901760, %v5390_v9 }
 0x22a   :  { %v23490_v15 = vpop.f32.mrf.mxu0  ;;  %v23492_v29 = vpop.f32.mrf.mxu1  ;;  %20444 = vmatpush3.msra.mxu0 %v23478_v17 }
 0x22b   :  { %20455 = vmatprep.subr.mxu0 %v5390_v9  ;;  %20446 = vmatmul.mubr.f32.vlgmr.msra.gmra.mxu0 %v23202_v45  ;;  %v5392_v10 = vsub.f32 %v5390_v9, %v5391_v42  ;;  %v5398_v31 = vand.u32 4294901760, %v5397_v2 }
 0x22c   :  { %v23497_v28 = vpop.f32.mrf.mxu0  ;;  %v23499_v53 = vpop.f32.mrf.mxu1  ;;  %20456 = vmatpush3.msra.mxu0 %v5390_v9  ;;  %20459 = vmatprep.mubr.f32.mxu0 %v22988_v36 }
 0x22d   :  { %25478 = vst [vmem:[#allocation105_spill] sm:$0xff] %v23497_v28  ;;  %20457 = vmatprep.subr.mxu0 %v5397_v2  ;;  %v5393_v40 = vand.u32 4294901760, %v5392_v10  ;;  %v5399_v63 = vsub.f32 %v5397_v2, %v5398_v31 }
 0x22e   :  { %v23505_v39 = vpop.f32.mrf.mxu0  ;;  %v23507_v12 = vpop.f32.mrf.mxu1  ;;  %20458 = vmatpush3.msra.mxu0 %v5397_v2 }
 0x22f   :  { %25479 = vst [vmem:[#allocation106_spill] sm:$0xff] %v23505_v39  ;;  %25480 = vst [vmem:[#allocation107_spill] sm:$0xff] %v23507_v12  ;;  %20469 = vmatprep.subr.mxu0 %v5391_v42  ;;  %20460 = vmatmul.mubr.f32.vlgmr.msra.gmra.mxu0 %v23173_v0  ;;  %v5400_v32 = vand.u32 4294901760, %v5399_v63  ;;  %v5938_v12 = vsub.f32 %v23199_v38, %v23503_v16 }
 0x230   :  { %20448 = vmatprep.subr.mxu1 %v5393_v40  ;;  %v20175_v9 = vpop.f32.mrf.mxu0  ;;  %v23512_v28 = vpop.f32.mrf.mxu1  ;;  %20470 = vmatpush3.msra.mxu0 %v5391_v42 }
 0x231   :  { %25481 = vst [vmem:[#allocation108_spill] sm:$0xff] %v23512_v28  ;;  %v2817_v25 = vadd.f32 %v20175_v9, %v23170_v5  ;;  %20449 = vmatpush3.msra.mxu1 %v5393_v40  ;;  %20471 = vmatprep.subr.mxu0 %v5398_v31  ;;  %v25484_v28 = vld [vmem:[#allocation14_spill] sm:$0xff]  ;;  %v5945_v5 = vsub.f32 %v2914_v24, %v23510_v52 }
 0x232   :  { %20450 = vmatprep.subr.mxu1 %v5400_v32  ;;  %v23517_v2 = vpop.f32.mrf.mxu0  ;;  %v20269_v10 = vpop.f32.mrf.mxu1  ;;  %20472 = vmatpush3.msra.mxu0 %v5398_v31  ;;  %v1536_v42 = vadd.f32 %v22990_v3, %v25484_v28 }
 0x233   :  { %25482 = vst [vmem:[#allocation109_spill] sm:$0xff] %v23517_v2  ;;  %v23519_v39 = vadd.f32 %v20269_v10, %v2817_v25  ;;  %20451 = vmatpush3.msra.mxu1 %v5400_v32  ;;  %20473 = vmatprep.mubr.f32.mxu0 %v22974_v18  ;;  %v5939_v32 = vand.u32 4294901760, %v5938_v12  ;;  %v23554_v10 = vand.u32 4294901760, %v23270_v20 }
 0x234   :  { %20453 = vmatmul.mubr.f32.vlgmr.msra.gmra.mxu1 %v23163_v7  ;;  %20462 = vmatprep.subr.mxu1 %v23470_v54  ;;  %v20178_v38 = vpop.f32.mrf.mxu0  ;;  %v23527_v40 = vpop.f32.mrf.mxu1  ;;  %v2038_v24 = vadd.f32 %v22996_v23, %v1536_v42 }
 0x235   :  { %25483 = vst [vmem:[#allocation110_spill] sm:$0xff] %v23519_v39  ;;  %25485 = vst [vmem:[#allocation14_spill] sm:$0xff] %v23527_v40  ;;  %20483 = vmatprep.subr.mxu0 %v23503_v16  ;;  %v2829_v25 = vadd.f32 %v20178_v38, %v23180_v56  ;;  %20463 = vmatpush3.msra.mxu1 %v23470_v54  ;;  %v5946_v56 = vand.u32 4294901760, %v5945_v5  ;;  %v5940_v63 = vsub.f32 %v5938_v12, %v5939_v32  ;;  %v25526_v40 = vld [vmem:[#allocation91_spill] sm:$0xff] }
 0x236   :  { %20474 = vmatmul.mubr.f32.vlgmr.msra.gmra.mxu0 %v23163_v7  ;;  %20464 = vmatprep.subr.mxu1 %v23478_v17  ;;  %v20272_v3 = vpop.f32.mrf.mxu1  ;;  %v2559_v28 = vadd.f32 %v23265_v35, %v2038_v24  ;;  %v23591_v24 = vand.u32 4294901760, %v23339_v49 }
 0x237   :  { %20484 = vmatpush3.msra.mxu0 %v23503_v16  ;;  %v23535_v31 = vadd.f32 %v20272_v3, %v2829_v25  ;;  %20465 = vmatpush3.msra.mxu1 %v23478_v17  ;;  %v5947_v23 = vsub.f32 %v5945_v5, %v5946_v56  ;;  %v5941_v35 = vand.u32 4294901760, %v5940_v63 }
 0x238   :  { %20485 = vmatprep.subr.mxu0 %v23510_v52  ;;  %20466 = vmatprep.mubr.f32.mxu1 %v23002_v46  ;;  %v2986_v9 = vadd.f32 %v23273_v8, %v2559_v28  ;;  %v6440_v8 = vsub.f32 %v23270_v20, %v23554_v10  ;;  %v25489_v28 = vld [vmem:[#allocation33_spill] sm:$0xff] }
 0x239   :  { %25486 = vst [vmem:[#allocation111_spill] sm:$0xff] %v23535_v31  ;;  %20486 = vmatpush3.msra.mxu0 %v23510_v52  ;;  %20467 = vmatmul.mubr.f32.vlgmr.msra.gmra.mxu1 %v23183_v50 }
 0x23a   :  { %20476 = vmatprep.subr.mxu1 %v23470_v54  ;;  %20487 = vmatprep.mubr.f32.mxu0 %v23028_v13  ;;  %v6441_v20 = vand.u32 4294901760, %v6440_v8 }
 0x23b   :  { %20497 = vmatprep.subr.mxu0 %v5938_v12  ;;  %20477 = vmatpush3.msra.mxu1 %v23470_v54  ;;  %v5948_v54 = vand.u32 4294901760, %v5947_v23 }
 0x23c   :  { %20488 = vmatmul.mubr.f32.vlgmr.msra.gmra.mxu0 %v23202_v45  ;;  %20478 = vmatprep.subr.mxu1 %v23478_v17  ;;  %v6442_v3 = vsub.f32 %v6440_v8, %v6441_v20 }
 0x23d   :  { %20498 = vmatpush3.msra.mxu0 %v5938_v12  ;;  %20479 = vmatpush3.msra.mxu1 %v23478_v17  ;;  %v23557_v12 = vand.u32 4294901760, %v2986_v9  ;;  %v25487_v17 = vld [vmem:[#allocation28_spill] sm:$0xff] }
 0x23e   :  { %20499 = vmatprep.subr.mxu0 %v5945_v5  ;;  %20480 = vmatprep.mubr.f32.mxu1 %v22974_v18  ;;  %v1620_v42 = vadd.f32 %v23057_v30, %v25487_v17 }
 0x23f   :  { %20500 = vmatpush3.msra.mxu0 %v5945_v5  ;;  %20481 = vmatmul.mubr.f32.vlgmr.msra.gmra.mxu1 %v23163_v7  ;;  %v6447_v5 = vsub.f32 %v2986_v9, %v23557_v12  ;;  %v25490_v9 = vld [vmem:[#allocation34_spill] sm:$0xff] }
 0x240   :  { %20490 = vmatprep.subr.mxu1 %v5941_v35  ;;  %20501 = vmatprep.mubr.f32.mxu0 %v22988_v36  ;;  %v2134_v30 = vadd.f32 %v23061_v37, %v1620_v42 }
 0x241   :  { %20511 = vmatprep.subr.mxu0 %v5939_v32  ;;  %20491 = vmatpush3.msra.mxu1 %v5941_v35  ;;  %v6448_v38 = vand.u32 4294901760, %v6447_v5 }
 0x242   :  { %20502 = vmatmul.mubr.f32.vlgmr.msra.gmra.mxu0 %v23173_v0  ;;  %20492 = vmatprep.subr.mxu1 %v5948_v54  ;;  %v2631_v25 = vadd.f32 %v23334_v14, %v2134_v30  ;;  %v6443_v14 = vand.u32 4294901760, %v6442_v3 }
 0x243   :  { %20512 = vmatpush3.msra.mxu0 %v5939_v32  ;;  %20493 = vmatpush3.msra.mxu1 %v5948_v54  ;;  %v6449_v37 = vsub.f32 %v6447_v5, %v6448_v38 }
 0x244   :  { %20513 = vmatprep.subr.mxu0 %v5946_v56  ;;  %20494 = vmatprep.mubr.f32.mxu1 %v22974_v18  ;;  %v3058_v32 = vadd.f32 %v23342_v34, %v2631_v25  ;;  %v6942_v34 = vsub.f32 %v23339_v49, %v23591_v24 }
 0x245   :  { %20514 = vmatpush3.msra.mxu0 %v5946_v56  ;;  %20495 = vmatmul.mubr.f32.vlgmr.msra.gmra.mxu1 %v23163_v7 }
 0x246   :  { %20504 = vmatprep.subr.mxu1 %v23503_v16  ;;  %20515 = vmatprep.mubr.f32.mxu0 %v22974_v18  ;;  %v23594_v56 = vand.u32 4294901760, %v3058_v32  ;;  %v6943_v49 = vand.u32 4294901760, %v6942_v34 }
 0x247   :  { %20525 = vmatprep.subr.mxu0 %v23554_v10  ;;  %20505 = vmatpush3.msra.mxu1 %v23503_v16 }
 0x248   :  { %20516 = vmatmul.mubr.f32.vlgmr.msra.gmra.mxu0 %v23163_v7  ;;  %20506 = vmatprep.subr.mxu1 %v23510_v52  ;;  %v6949_v23 = vsub.f32 %v3058_v32, %v23594_v56  ;;  %v6944_v17 = vsub.f32 %v6942_v34, %v6943_v49 }
 0x249   :  { %20526 = vmatpush3.msra.mxu0 %v23554_v10  ;;  %20507 = vmatpush3.msra.mxu1 %v23510_v52 }
 0x24a   :  { %20527 = vmatprep.subr.mxu0 %v23557_v12  ;;  %20508 = vmatprep.mubr.f32.mxu1 %v23002_v46  ;;  %v6950_v54 = vand.u32 4294901760, %v6949_v23 }
 0x24b   :  { %20528 = vmatpush3.msra.mxu0 %v23557_v12  ;;  %20509 = vmatmul.mubr.f32.vlgmr.msra.gmra.mxu1 %v23183_v50 }
 0x24c   :  { %20518 = vmatprep.subr.mxu1 %v23503_v16  ;;  %20529 = vmatprep.mubr.f32.mxu0 %v23028_v13  ;;  %v6951_v42 = vsub.f32 %v6949_v23, %v6950_v54 }
 0x24d   :  { %20539 = vmatprep.subr.mxu0 %v6440_v8  ;;  %20519 = vmatpush3.msra.mxu1 %v23503_v16  ;;  %v6450_v16 = vand.u32 4294901760, %v6449_v37  ;;  %v25493_v37 = vld [vmem:[#allocation55_spill] sm:$0xff] }
 0x24e   :  { %20530 = vmatmul.mubr.f32.vlgmr.msra.gmra.mxu0 %v23202_v45  ;;  %20520 = vmatprep.subr.mxu1 %v23510_v52 }
 0x24f   :  { %20540 = vmatpush3.msra.mxu0 %v6440_v8  ;;  %20521 = vmatpush3.msra.mxu1 %v23510_v52  ;;  %v25488_v52 = vld [vmem:[#allocation39_spill] sm:$0xff] }
 0x250   :  { %20541 = vmatprep.subr.mxu0 %v6447_v5  ;;  %20522 = vmatprep.mubr.f32.mxu1 %v22974_v18  ;;  %v1704_v63 = vadd.f32 %v25489_v28, %v25488_v52 }
 0x251   :  { %20542 = vmatpush3.msra.mxu0 %v6447_v5  ;;  %20523 = vmatmul.mubr.f32.vlgmr.msra.gmra.mxu1 %v23163_v7 }
 0x252   :  { %20532 = vmatprep.subr.mxu1 %v6443_v14  ;;  %20543 = vmatprep.mubr.f32.mxu0 %v22988_v36  ;;  %v2230_v35 = vadd.f32 %v25490_v9, %v1704_v63 }
 0x253   :  { %20553 = vmatprep.subr.mxu0 %v6441_v20  ;;  %20533 = vmatpush3.msra.mxu1 %v6443_v14  ;;  %v25494_v14 = vld [vmem:[#allocation54_spill] sm:$0xff] }
 0x254   :  { %20544 = vmatmul.mubr.f32.vlgmr.msra.gmra.mxu0 %v23173_v0  ;;  %20534 = vmatprep.subr.mxu1 %v6450_v16  ;;  %v2703_v8 = vadd.f32 %v23403_v57, %v2230_v35  ;;  %v6945_v57 = vand.u32 4294901760, %v6944_v17 }
 0x255   :  { %20554 = vmatpush3.msra.mxu0 %v6441_v20  ;;  %20535 = vmatpush3.msra.mxu1 %v6450_v16  ;;  %v23628_v20 = vand.u32 4294901760, %v23408_v58  ;;  %v2781_v16 = vadd.f32 %v23467_v47, %v25494_v14 }
 0x256   :  { %20555 = vmatprep.subr.mxu0 %v6448_v38  ;;  %20536 = vmatprep.mubr.f32.mxu1 %v22974_v18  ;;  %v3130_v5 = vadd.f32 %v23411_v44, %v2703_v8  ;;  %v25496_v8 = vld [vmem:[#allocation51_spill] sm:$0xff] }
 0x257   :  { %20556 = vmatpush3.msra.mxu0 %v6448_v38  ;;  %20537 = vmatmul.mubr.f32.vlgmr.msra.gmra.mxu1 %v23163_v7  ;;  %v7444_v44 = vsub.f32 %v23408_v58, %v23628_v20  ;;  %v25492_v38 = vld [vmem:[#allocation52_spill] sm:$0xff]  ;;  %v3208_v47 = vadd.f32 %v23475_v51, %v2781_v16 }
 0x258   :  { %20546 = vmatprep.subr.mxu1 %v23554_v10  ;;  %20557 = vmatprep.mubr.f32.mxu0 %v22974_v18  ;;  %v23631_v30 = vand.u32 4294901760, %v3130_v5 }
 0x259   :  { %20567 = vmatprep.subr.mxu0 %v23591_v24  ;;  %20547 = vmatpush3.msra.mxu1 %v23554_v10  ;;  %v7445_v58 = vand.u32 4294901760, %v7444_v44 }
 0x25a   :  { %20558 = vmatmul.mubr.f32.vlgmr.msra.gmra.mxu0 %v23163_v7  ;;  %20548 = vmatprep.subr.mxu1 %v23557_v12  ;;  %v7451_v3 = vsub.f32 %v3130_v5, %v23631_v30 }
 0x25b   :  { %20568 = vmatpush3.msra.mxu0 %v23591_v24  ;;  %20549 = vmatpush3.msra.mxu1 %v23557_v12  ;;  %v7446_v28 = vsub.f32 %v7444_v44, %v7445_v58 }
 0x25c   :  { %20569 = vmatprep.subr.mxu0 %v23594_v56  ;;  %20550 = vmatprep.mubr.f32.mxu1 %v23002_v46 }
 0x25d   :  { %20570 = vmatpush3.msra.mxu0 %v23594_v56  ;;  %20551 = vmatmul.mubr.f32.vlgmr.msra.gmra.mxu1 %v23183_v50 }
 0x25e   :  { %20560 = vmatprep.subr.mxu1 %v23554_v10  ;;  %20571 = vmatprep.mubr.f32.mxu0 %v23028_v13 }
 0x25f   :  { %20581 = vmatprep.subr.mxu0 %v6942_v34  ;;  %20561 = vmatpush3.msra.mxu1 %v23554_v10  ;;  %v6952_v10 = vand.u32 4294901760, %v6951_v42 }
 0x260   :  { %20572 = vmatmul.mubr.f32.vlgmr.msra.gmra.mxu0 %v23202_v45  ;;  %20562 = vmatprep.subr.mxu1 %v23557_v12 }
 0x261   :  { %20582 = vmatpush3.msra.mxu0 %v6942_v34  ;;  %20563 = vmatpush3.msra.mxu1 %v23557_v12  ;;  %v25491_v12 = vld [vmem:[#allocation58_spill] sm:$0xff]  ;;  %v7452_v34 = vand.u32 4294901760, %v7451_v3 }
 0x262   :  { %20583 = vmatprep.subr.mxu0 %v6949_v23  ;;  %20564 = vmatprep.mubr.f32.mxu1 %v22974_v18  ;;  %v1788_v25 = vadd.f32 %v25492_v38, %v25491_v12  ;;  %v25498_v12 = vld [vmem:[#allocation56_spill] sm:$0xff] }
 0x263   :  { %20584 = vmatpush3.msra.mxu0 %v6949_v23  ;;  %20565 = vmatmul.mubr.f32.vlgmr.msra.gmra.mxu1 %v23163_v7  ;;  %v7453_v63 = vsub.f32 %v7451_v3, %v7452_v34  ;;  %v7447_v23 = vand.u32 4294901760, %v7446_v28  ;;  %v23701_v38 = vand.u32 4294901760, %v25498_v12  ;;  %v25502_v28 = vld [vmem:[#allocation6_spill] sm:$0xff] }
 0x264   :  { %20574 = vmatprep.subr.mxu1 %v6945_v57  ;;  %20585 = vmatprep.mubr.f32.mxu0 %v22988_v36  ;;  %v2326_v32 = vadd.f32 %v25493_v37, %v1788_v25  ;;  %v23704_v25 = vpop.f32.mrf.mxu0  ;;  %v25500_v37 = vld [vmem:[#allocation17_spill] sm:$0xff] }
 0x265   :  { %20595 = vmatprep.subr.mxu0 %v6943_v49  ;;  %20575 = vmatpush3.msra.mxu1 %v6945_v57  ;;  %v7454_v51 = vand.u32 4294901760, %v7453_v63  ;;  %v25497_v57 = vld [vmem:[#allocation78_spill] sm:$0xff]  ;;  %25499 = vst [vmem:[#allocation28_spill] sm:$0xff] %v23704_v25  ;;  %v23727_v63 = vpop.f32.mrf.mxu1 }
 0x266   :  { %20586 = vmatmul.mubr.f32.vlgmr.msra.gmra.mxu0 %v23173_v0  ;;  %20576 = vmatprep.subr.mxu1 %v6952_v10  ;;  %v2775_v52 = vadd.f32 %v23473_v1, %v2326_v32  ;;  %v25501_v32 = vld [vmem:[#allocation75_spill] sm:$0xff]  ;;  %25503 = vst [vmem:[#allocation39_spill] sm:$0xff] %v23727_v63 }
 0x267   :  { %20596 = vmatpush3.msra.mxu0 %v6943_v49  ;;  %20577 = vmatpush3.msra.mxu1 %v6952_v10  ;;  %v1550_v14 = vadd.f32 %v25501_v32, %v25500_v37  ;;  %v25504_v32 = vld [vmem:[#allocation29_spill] sm:$0xff] }
 0x268   :  { %20597 = vmatprep.subr.mxu0 %v6950_v54  ;;  %20578 = vmatprep.mubr.f32.mxu1 %v22974_v18  ;;  %v3202_v1 = vadd.f32 %v23485_v11, %v2775_v52 }
 0x269   :  { %20598 = vmatpush3.msra.mxu0 %v6950_v54  ;;  %20579 = vmatmul.mubr.f32.vlgmr.msra.gmra.mxu1 %v23163_v7  ;;  %v25495_v54 = vld [vmem:[#allocation67_spill] sm:$0xff] }
 0x26a   :  { %20588 = vmatprep.subr.mxu1 %v23591_v24  ;;  %20599 = vmatprep.mubr.f32.mxu0 %v22974_v18  ;;  %v23670_v49 = vand.u32 4294901760, %v3202_v1  ;;  %v2499_v17 = vadd.f32 %v25496_v8, %v25495_v54 }
 0x26b   :  { %20609 = vmatprep.subr.mxu0 %v23628_v20  ;;  %20589 = vmatpush3.msra.mxu1 %v23591_v24 }
 0x26c   :  { %20600 = vmatmul.mubr.f32.vlgmr.msra.gmra.mxu0 %v23163_v7  ;;  %20590 = vmatprep.subr.mxu1 %v23594_v56  ;;  %v2926_v10 = vadd.f32 %v25497_v57, %v2499_v17  ;;  %v23748_v57 = vand.u32 4294901760, %v23282_v26 }
 0x26d   :  { %20610 = vmatpush3.msra.mxu0 %v23628_v20  ;;  %20591 = vmatpush3.msra.mxu1 %v23594_v56 }
 0x26e   :  { %20611 = vmatprep.subr.mxu0 %v23631_v30  ;;  %20592 = vmatprep.mubr.f32.mxu1 %v23002_v46 }
 0x26f   :  { %20612 = vmatpush3.msra.mxu0 %v23631_v30  ;;  %20593 = vmatmul.mubr.f32.vlgmr.msra.gmra.mxu1 %v23183_v50 }
 0x270   :  { %20602 = vmatprep.subr.mxu1 %v23591_v24  ;;  %20613 = vmatprep.mubr.f32.mxu0 %v23028_v13 }
 0x271   :  { %20623 = vmatprep.subr.mxu0 %v7444_v44  ;;  %20603 = vmatpush3.msra.mxu1 %v23591_v24  ;;  %v23667_v24 = vand.u32 4294901760, %v3208_v47 }
 0x272   :  { %20614 = vmatmul.mubr.f32.vlgmr.msra.gmra.mxu0 %v23202_v45  ;;  %20604 = vmatprep.subr.mxu1 %v23594_v56 }
 0x273   :  { %20624 = vmatpush3.msra.mxu0 %v7444_v44  ;;  %20605 = vmatpush3.msra.mxu1 %v23594_v56  ;;  %v7946_v11 = vsub.f32 %v3208_v47, %v23667_v24  ;;  %v7953_v56 = vsub.f32 %v3202_v1, %v23670_v49  ;;  %v2054_v47 = vadd.f32 %v25502_v28, %v1550_v14  ;;  %v25505_v14 = vld [vmem:[#allocation16_spill] sm:$0xff] }
 0x274   :  { %20625 = vmatprep.subr.mxu0 %v7451_v3  ;;  %20606 = vmatprep.mubr.f32.mxu1 %v22974_v18 }
 0x275   :  { %20626 = vmatpush3.msra.mxu0 %v7451_v3  ;;  %20607 = vmatmul.mubr.f32.vlgmr.msra.gmra.mxu1 %v23163_v7  ;;  %v7947_v9 = vand.u32 4294901760, %v7946_v11  ;;  %v7954_v35 = vand.u32 4294901760, %v7953_v56 }
 0x276   :  { %20616 = vmatprep.subr.mxu1 %v7447_v23  ;;  %20627 = vmatprep.mubr.f32.mxu0 %v22988_v36 }
 0x277   :  { %20637 = vmatprep.subr.mxu0 %v7445_v58  ;;  %20617 = vmatpush3.msra.mxu1 %v7447_v23  ;;  %v7948_v42 = vsub.f32 %v7946_v11, %v7947_v9  ;;  %v7955_v5 = vsub.f32 %v7953_v56, %v7954_v35 }
 0x278   :  { %20628 = vmatmul.mubr.f32.vlgmr.msra.gmra.mxu0 %v23173_v0  ;;  %20618 = vmatprep.subr.mxu1 %v7454_v51 }
 0x279   :  { %20638 = vmatpush3.msra.mxu0 %v7445_v58  ;;  %20619 = vmatpush3.msra.mxu1 %v7454_v51  ;;  %v7949_v44 = vand.u32 4294901760, %v7948_v42  ;;  %v8494_v58 = vsub.f32 %v25498_v12, %v23701_v38  ;;  %v2571_v51 = vadd.f32 %v23279_v43, %v2054_v47  ;;  %v25506_v47 = vld [vmem:[#allocation19_spill] sm:$0xff] }
 0x27a   :  { %20639 = vmatprep.subr.mxu0 %v7452_v34  ;;  %20620 = vmatprep.mubr.f32.mxu1 %v22974_v18 }
 0x27b   :  { %20640 = vmatpush3.msra.mxu0 %v7452_v34  ;;  %20621 = vmatmul.mubr.f32.vlgmr.msra.gmra.mxu1 %v23163_v7  ;;  %v8495_v52 = vand.u32 4294901760, %v8494_v58  ;;  %v2998_v17 = vadd.f32 %v23285_v27, %v2571_v51 }
 0x27c   :  { %20630 = vmatprep.subr.mxu1 %v23628_v20  ;;  %20641 = vmatprep.mubr.f32.mxu0 %v22974_v18 }
 0x27d   :  { %20651 = vmatprep.subr.mxu0 %v23667_v24  ;;  %20631 = vmatpush3.msra.mxu1 %v23628_v20  ;;  %v23753_v12 = vand.u32 4294901760, %v2998_v17 }
 0x27e   :  { %20642 = vmatmul.mubr.f32.vlgmr.msra.gmra.mxu0 %v23163_v7  ;;  %20632 = vmatprep.subr.mxu1 %v23631_v30 }
 0x27f   :  { %20652 = vmatpush3.msra.mxu0 %v23667_v24  ;;  %20633 = vmatpush3.msra.mxu1 %v23631_v30  ;;  %v9003_v28 = vsub.f32 %v2998_v17, %v23753_v12 }
 0x280   :  { %20653 = vmatprep.subr.mxu0 %v23670_v49  ;;  %20634 = vmatprep.mubr.f32.mxu1 %v23002_v46 }
 0x281   :  { %20654 = vmatpush3.msra.mxu0 %v23670_v49  ;;  %20635 = vmatmul.mubr.f32.vlgmr.msra.gmra.mxu1 %v23183_v50 }
 0x282   :  { %20644 = vmatprep.subr.mxu1 %v23628_v20  ;;  %20655 = vmatprep.mubr.f32.mxu0 %v23028_v13 }
 0x283   :  { %20665 = vmatprep.subr.mxu0 %v7946_v11  ;;  %20645 = vmatpush3.msra.mxu1 %v23628_v20  ;;  %v7956_v20 = vand.u32 4294901760, %v7955_v5 }
 0x284   :  { %20656 = vmatmul.mubr.f32.vlgmr.msra.gmra.mxu0 %v23202_v45  ;;  %20646 = vmatprep.subr.mxu1 %v23631_v30 }
 0x285   :  { %20666 = vmatpush3.msra.mxu0 %v7946_v11  ;;  %20647 = vmatpush3.msra.mxu1 %v23631_v30  ;;  %v23706_v30 = vand.u32 4294901760, %v2926_v10  ;;  %v8496_v11 = vsub.f32 %v8494_v58, %v8495_v52 }
 0x286   :  { %20667 = vmatprep.subr.mxu0 %v7953_v56  ;;  %20648 = vmatprep.mubr.f32.mxu1 %v22974_v18 }
 0x287   :  { %20668 = vmatpush3.msra.mxu0 %v7953_v56  ;;  %20649 = vmatmul.mubr.f32.vlgmr.msra.gmra.mxu1 %v23163_v7  ;;  %v8501_v16 = vsub.f32 %v2926_v10, %v23706_v30 }
 0x288   :  { %20658 = vmatprep.subr.mxu1 %v7949_v44  ;;  %20669 = vmatprep.mubr.f32.mxu0 %v22988_v36 }
 0x289   :  { %20679 = vmatprep.subr.mxu0 %v7947_v9  ;;  %20659 = vmatpush3.msra.mxu1 %v7949_v44  ;;  %v8502_v1 = vand.u32 4294901760, %v8501_v16 }
 0x28a   :  { %20670 = vmatmul.mubr.f32.vlgmr.msra.gmra.mxu0 %v23173_v0  ;;  %20660 = vmatprep.subr.mxu1 %v7956_v20 }
 0x28b   :  { %20680 = vmatpush3.msra.mxu0 %v7947_v9  ;;  %20661 = vmatpush3.msra.mxu1 %v7956_v20  ;;  %v20279_v3 = vpop.f32.mrf.mxu0 }
 0x28c   :  { %20681 = vmatprep.subr.mxu0 %v7954_v35  ;;  %20662 = vmatprep.mubr.f32.mxu1 %v22974_v18 }
 0x28d   :  { %20682 = vmatpush3.msra.mxu0 %v7954_v35  ;;  %20663 = vmatmul.mubr.f32.vlgmr.msra.gmra.mxu1 %v23163_v7  ;;  %v23718_v34 = vpop.f32.mrf.mxu0  ;;  %v8503_v35 = vsub.f32 %v8501_v16, %v8502_v1 }
 0x28e   :  { %20672 = vmatprep.subr.mxu1 %v23667_v24  ;;  %20683 = vmatprep.mubr.f32.mxu0 %v22974_v18 }
 0x28f   :  { %20693 = vmatprep.subr.mxu0 %v23701_v38  ;;  %20673 = vmatpush3.msra.mxu1 %v23667_v24  ;;  %v20293_v23 = vpop.f32.mrf.mxu0  ;;  %v8504_v10 = vand.u32 4294901760, %v8503_v35 }
 0x290   :  { %20684 = vmatmul.mubr.f32.vlgmr.msra.gmra.mxu0 %v23163_v7  ;;  %20674 = vmatprep.subr.mxu1 %v23670_v49 }
 0x291   :  { %20694 = vmatpush3.msra.mxu0 %v23701_v38  ;;  %20675 = vmatpush3.msra.mxu1 %v23670_v49  ;;  %v23741_v8 = vpop.f32.mrf.mxu0 }
 0x292   :  { %20695 = vmatprep.subr.mxu0 %v23706_v30  ;;  %20676 = vmatprep.mubr.f32.mxu1 %v23002_v46 }
 0x293   :  { %20696 = vmatpush3.msra.mxu0 %v23706_v30  ;;  %20677 = vmatmul.mubr.f32.vlgmr.msra.gmra.mxu1 %v23183_v50 }
 0x294   :  { %20686 = vmatprep.subr.mxu1 %v23667_v24  ;;  %20697 = vmatprep.mubr.f32.mxu0 %v23028_v13  ;;  %v20286_v56 = vpop.f32.mrf.mxu1 }
 0x295   :  { %20707 = vmatprep.subr.mxu0 %v8494_v58  ;;  %20687 = vmatpush3.msra.mxu1 %v23667_v24  ;;  %v3436_v9 = vadd.f32 %v20286_v56, %v20279_v3  ;;  %v8497_v24 = vand.u32 4294901760, %v8496_v11 }
 0x296   :  { %20698 = vmatmul.mubr.f32.vlgmr.msra.gmra.mxu0 %v23202_v45  ;;  %20688 = vmatprep.subr.mxu1 %v23670_v49  ;;  %v23739_v54 = vpop.f32.mrf.mxu1  ;;  %v20307_v44 = vpop.f32.mrf.mxu0 }
 0x297   :  { %20708 = vmatpush3.msra.mxu0 %v8494_v58  ;;  %20689 = vmatpush3.msra.mxu1 %v23670_v49  ;;  %v3519_v43 = vadd.f32 %v20293_v23, %v3436_v9  ;;  %v8996_v58 = vsub.f32 %v23282_v26, %v23748_v57  ;;  %v9004_v23 = vand.u32 4294901760, %v9003_v28 }
 0x298   :  { %20709 = vmatprep.subr.mxu0 %v8501_v16  ;;  %20690 = vmatprep.mubr.f32.mxu1 %v22974_v18  ;;  %v20300_v42 = vpop.f32.mrf.mxu1  ;;  %v23762_v37 = vpop.f32.mrf.mxu0 }
 0x299   :  { %20710 = vmatpush3.msra.mxu0 %v8501_v16  ;;  %20691 = vmatmul.mubr.f32.vlgmr.msra.gmra.mxu1 %v23163_v7  ;;  %v3602_v5 = vadd.f32 %v20300_v42, %v3519_v43  ;;  %v1634_v16 = vadd.f32 %v25505_v14, %v25504_v32  ;;  %v8997_v26 = vand.u32 4294901760, %v8996_v58  ;;  %v9005_v9 = vsub.f32 %v9003_v28, %v9004_v23  ;;  %v25507_v32 = vld [vmem:[#allocation41_spill] sm:$0xff]  ;;  %v25508_v14 = vld [vmem:[#allocation36_spill] sm:$0xff] }
 0x29a   :  { %20700 = vmatprep.subr.mxu1 %v8497_v24  ;;  %20711 = vmatprep.mubr.f32.mxu0 %v22988_v36  ;;  %v23751_v49 = vpop.f32.mrf.mxu1 }
 0x29b   :  { %20721 = vmatprep.subr.mxu0 %v8495_v52  ;;  %20701 = vmatpush3.msra.mxu1 %v8497_v24  ;;  %v3685_v27 = vadd.f32 %v20307_v44, %v3602_v5  ;;  %v8998_v11 = vsub.f32 %v8996_v58, %v8997_v26  ;;  %v9006_v24 = vand.u32 4294901760, %v9005_v9 }
 0x29c   :  { %20712 = vmatmul.mubr.f32.vlgmr.msra.gmra.mxu0 %v23173_v0  ;;  %20702 = vmatprep.subr.mxu1 %v8504_v10  ;;  %v20314_v20 = vpop.f32.mrf.mxu1 }
 0x29d   :  { %20722 = vmatpush3.msra.mxu0 %v8495_v52  ;;  %20703 = vmatpush3.msra.mxu1 %v8504_v10  ;;  %v23756_v3 = vadd.f32 %v20314_v20, %v3685_v27  ;;  %v8999_v43 = vand.u32 4294901760, %v8998_v11  ;;  %v25509_v11 = vld [vmem:[#allocation38_spill] sm:$0xff] }
 0x29e   :  { %20723 = vmatprep.subr.mxu0 %v8502_v1  ;;  %20704 = vmatprep.mubr.f32.mxu1 %v22974_v18  ;;  %v23788_v35 = vpop.f32.mrf.mxu1 }
 0x29f   :  { %20724 = vmatpush3.msra.mxu0 %v8502_v1  ;;  %20705 = vmatmul.mubr.f32.vlgmr.msra.gmra.mxu1 %v23163_v7  ;;  %v2150_v1 = vadd.f32 %v25506_v47, %v1634_v16  ;;  %v1718_v16 = vadd.f32 %v25508_v14, %v25507_v32  ;;  %v23855_v32 = vand.u32 4294901760, %v23420_v59 }
 0x2a0   :  { %20714 = vmatprep.subr.mxu1 %v23701_v38  ;;  %20725 = vmatprep.mubr.f32.mxu0 %v22974_v18 }
 0x2a1   :  { %20735 = vmatprep.subr.mxu0 %v23748_v57  ;;  %20715 = vmatpush3.msra.mxu1 %v23701_v38  ;;  %v2643_v51 = vadd.f32 %v23348_v60, %v2150_v1  ;;  %v2246_v9 = vadd.f32 %v25509_v11, %v1718_v16  ;;  %v10000_v16 = vsub.f32 %v23420_v59, %v23855_v32 }
 0x2a2   :  { %20726 = vmatmul.mubr.f32.vlgmr.msra.gmra.mxu0 %v23163_v7  ;;  %20716 = vmatprep.subr.mxu1 %v23706_v30 }
 0x2a3   :  { %20736 = vmatpush3.msra.mxu0 %v23748_v57  ;;  %20717 = vmatpush3.msra.mxu1 %v23706_v30  ;;  %v20321_v52 = vpop.f32.mrf.mxu0  ;;  %v3070_v60 = vadd.f32 %v23354_v4, %v2643_v51  ;;  %v10001_v11 = vand.u32 4294901760, %v10000_v16 }
 0x2a4   :  { %20737 = vmatprep.subr.mxu0 %v23753_v12  ;;  %20718 = vmatprep.mubr.f32.mxu1 %v23002_v46 }
 0x2a5   :  { %20738 = vmatpush3.msra.mxu0 %v23753_v12  ;;  %20719 = vmatmul.mubr.f32.vlgmr.msra.gmra.mxu1 %v23183_v50  ;;  %v23783_v56 = vpop.f32.mrf.mxu0  ;;  %v23798_v4 = vand.u32 4294901760, %v3070_v60 }
 0x2a6   :  { %20728 = vmatprep.subr.mxu1 %v23701_v38  ;;  %20739 = vmatprep.mubr.f32.mxu0 %v23028_v13 }
 0x2a7   :  { %20749 = vmatprep.subr.mxu0 %v8996_v58  ;;  %20729 = vmatpush3.msra.mxu1 %v23701_v38  ;;  %v20335_v17 = vpop.f32.mrf.mxu0  ;;  %v23795_v38 = vand.u32 4294901760, %v23351_v6 }
 0x2a8   :  { %20740 = vmatmul.mubr.f32.vlgmr.msra.gmra.mxu0 %v23202_v45  ;;  %20730 = vmatprep.subr.mxu1 %v23706_v30 }
 0x2a9   :  { %20750 = vmatpush3.msra.mxu0 %v8996_v58  ;;  %20731 = vmatpush3.msra.mxu1 %v23706_v30  ;;  %v23803_v10 = vpop.f32.mrf.mxu0  ;;  %v9498_v27 = vsub.f32 %v23351_v6, %v23795_v38 }
 0x2aa   :  { %20751 = vmatprep.subr.mxu0 %v9003_v28  ;;  %20732 = vmatprep.mubr.f32.mxu1 %v22974_v18 }
 0x2ab   :  { %20752 = vmatpush3.msra.mxu0 %v9003_v28  ;;  %20733 = vmatmul.mubr.f32.vlgmr.msra.gmra.mxu1 %v23163_v7  ;;  %v9505_v28 = vsub.f32 %v3070_v60, %v23798_v4  ;;  %v9499_v47 = vand.u32 4294901760, %v9498_v27 }
 0x2ac   :  { %20742 = vmatprep.subr.mxu1 %v8999_v43  ;;  %20753 = vmatprep.mubr.f32.mxu0 %v22988_v36  ;;  %v20328_v42 = vpop.f32.mrf.mxu1 }
 0x2ad   :  { %20763 = vmatprep.subr.mxu0 %v8997_v26  ;;  %20743 = vmatpush3.msra.mxu1 %v8999_v43  ;;  %v3938_v30 = vadd.f32 %v20328_v42, %v20321_v52  ;;  %v9506_v60 = vand.u32 4294901760, %v9505_v28  ;;  %v2715_v42 = vadd.f32 %v23417_v62, %v2246_v9 }
 0x2ae   :  { %20754 = vmatmul.mubr.f32.vlgmr.msra.gmra.mxu0 %v23173_v0  ;;  %20744 = vmatprep.subr.mxu1 %v9006_v24  ;;  %v23801_v5 = vpop.f32.mrf.mxu1  ;;  %v20349_v6 = vpop.f32.mrf.mxu0 }
 0x2af   :  { %20764 = vmatpush3.msra.mxu0 %v8997_v26  ;;  %20745 = vmatpush3.msra.mxu1 %v9006_v24  ;;  %v4021_v44 = vadd.f32 %v20335_v17, %v3938_v30  ;;  %v9500_v30 = vsub.f32 %v9498_v27, %v9499_v47 }
 0x2b0   :  { %20765 = vmatprep.subr.mxu0 %v9004_v23  ;;  %20746 = vmatprep.mubr.f32.mxu1 %v22974_v18  ;;  %v20342_v20 = vpop.f32.mrf.mxu1  ;;  %v23831_v43 = vpop.f32.mrf.mxu0 }
 0x2b1   :  { %20766 = vmatpush3.msra.mxu0 %v9004_v23  ;;  %20747 = vmatmul.mubr.f32.vlgmr.msra.gmra.mxu1 %v23163_v7  ;;  %v4104_v58 = vadd.f32 %v20342_v20, %v4021_v44  ;;  %v23824_v23 = vmul.f32 %v23756_v3, %v23756_v3  ;;  %v3142_v20 = vadd.f32 %v23423_v55, %v2715_v42  ;;  %v25512_v42 = vld [vmem:[#allocation62_spill] sm:$0xff] }
 0x2b2   :  { %20756 = vmatprep.subr.mxu1 %v23748_v57  ;;  %20767 = vmatprep.mubr.f32.mxu0 %v22974_v18  ;;  %v23814_v26 = vpop.f32.mrf.mxu1 }
 0x2b3   :  { %20777 = vmatprep.subr.mxu0 %v23795_v38  ;;  %20757 = vmatpush3.msra.mxu1 %v23748_v57  ;;  %v4187_v52 = vadd.f32 %v20349_v6, %v4104_v58  ;;  %v9501_v58 = vand.u32 4294901760, %v9500_v30  ;;  %v25511_v6 = vld [vmem:[#allocation57_spill] sm:$0xff] }
 0x2b4   :  { %20768 = vmatmul.mubr.f32.vlgmr.msra.gmra.mxu0 %v23163_v7  ;;  %20758 = vmatprep.subr.mxu1 %v23753_v12  ;;  %v20356_v1 = vpop.f32.mrf.mxu1 }
 0x2b5   :  { %20778 = vmatpush3.msra.mxu0 %v23795_v38  ;;  %20759 = vmatpush3.msra.mxu1 %v23753_v12  ;;  %v4266_v51 = vadd.f32 %v20356_v1, %v4187_v52 }
 0x2b6   :  { %20779 = vmatprep.subr.mxu0 %v23798_v4  ;;  %20760 = vmatprep.mubr.f32.mxu1 %v23002_v46  ;;  %v23861_v55 = vpop.f32.mrf.mxu1 }
 0x2b7   :  { %20780 = vmatpush3.msra.mxu0 %v23798_v4  ;;  %20761 = vmatmul.mubr.f32.vlgmr.msra.gmra.mxu1 %v23183_v50  ;;  %v23833_v17 = vmul.f32 %v4266_v51, %v4266_v51  ;;  %v23836_v24 = vmul.f32 %v4266_v51, %v23756_v3  ;;  %v9507_v3 = vsub.f32 %v9505_v28, %v9506_v60 }
 0x2b8   :  { %20770 = vmatprep.subr.mxu1 %v23748_v57  ;;  %20781 = vmatprep.mubr.f32.mxu0 %v23028_v13 }
 0x2b9   :  { %20791 = vmatprep.subr.mxu0 %v9498_v27  ;;  %20771 = vmatpush3.msra.mxu1 %v23748_v57  ;;  %v23844_v44 = vadd.f32 %v23833_v17, %v23824_v23 }
 0x2ba   :  { %20782 = vmatmul.mubr.f32.vlgmr.msra.gmra.mxu0 %v23202_v45  ;;  %20772 = vmatprep.subr.mxu1 %v23753_v12 }
 0x2bb   :  { %20792 = vmatpush3.msra.mxu0 %v9498_v27  ;;  %20773 = vmatpush3.msra.mxu1 %v23753_v12  ;;  %v20363_v62 = vpop.f32.mrf.mxu0  ;;  %v9508_v27 = vand.u32 4294901760, %v9507_v3  ;;  %v23858_v12 = vand.u32 4294901760, %v3142_v20  ;;  %v25513_v3 = vld [vmem:[#allocation61_spill] sm:$0xff] }
 0x2bc   :  { %20793 = vmatprep.subr.mxu0 %v9505_v28  ;;  %20774 = vmatprep.mubr.f32.mxu1 %v22974_v18 }
 0x2bd   :  { %20794 = vmatpush3.msra.mxu0 %v9505_v28  ;;  %20775 = vmatmul.mubr.f32.vlgmr.msra.gmra.mxu1 %v23163_v7  ;;  %v23852_v57 = vpop.f32.mrf.mxu0  ;;  %v25510_v28 = vld [vmem:[#allocation59_spill] sm:$0xff]  ;;  %v10007_v1 = vsub.f32 %v3142_v20, %v23858_v12  ;;  %v2793_v20 = vadd.f32 %v23483_v21, %v25513_v3 }
 0x2be   :  { %20784 = vmatprep.subr.mxu1 %v9501_v58  ;;  %20795 = vmatprep.mubr.f32.mxu0 %v22988_v36  ;;  %v1802_v52 = vadd.f32 %v25511_v6, %v25510_v28 }
 0x2bf   :  { %20805 = vmatprep.subr.mxu0 %v9499_v47  ;;  %20785 = vmatpush3.msra.mxu1 %v9501_v58  ;;  %v20377_v14 = vpop.f32.mrf.mxu0 }
 0x2c0   :  { %20796 = vmatmul.mubr.f32.vlgmr.msra.gmra.mxu0 %v23173_v0  ;;  %20786 = vmatprep.subr.mxu1 %v9508_v27  ;;  %v2342_v30 = vadd.f32 %v25512_v42, %v1802_v52 }
 0x2c1   :  { %20806 = vmatpush3.msra.mxu0 %v9499_v47  ;;  %20787 = vmatpush3.msra.mxu1 %v9508_v27  ;;  %v23872_v51 = vpop.f32.mrf.mxu0 }
 0x2c2   :  { %20807 = vmatprep.subr.mxu0 %v9506_v60  ;;  %20788 = vmatprep.mubr.f32.mxu1 %v22974_v18  ;;  %v2787_v6 = vadd.f32 %v23490_v15, %v2342_v30 }
 0x2c3   :  { %20808 = vmatpush3.msra.mxu0 %v9506_v60  ;;  %20789 = vmatmul.mubr.f32.vlgmr.msra.gmra.mxu1 %v23163_v7 }
 0x2c4   :  { %20798 = vmatprep.subr.mxu1 %v23795_v38  ;;  %20809 = vmatprep.mubr.f32.mxu0 %v22974_v18  ;;  %v20370_v47 = vpop.f32.mrf.mxu1  ;;  %v3214_v42 = vadd.f32 %v23499_v53, %v2787_v6  ;;  %v25514_v6 = vld [vmem:[#allocation69_spill] sm:$0xff] }
 0x2c5   :  { %20819 = vmatprep.subr.mxu0 %v23855_v32  ;;  %20799 = vmatpush3.msra.mxu1 %v23795_v38  ;;  %v4440_v59 = vadd.f32 %v20370_v47, %v20363_v62  ;;  %v10008_v62 = vand.u32 4294901760, %v10007_v1  ;;  %v3220_v47 = vadd.f32 %v23492_v29, %v2793_v20 }
 0x2c6   :  { %20810 = vmatmul.mubr.f32.vlgmr.msra.gmra.mxu0 %v23163_v7  ;;  %20800 = vmatprep.subr.mxu1 %v23798_v4  ;;  %v23878_v9 = vpop.f32.mrf.mxu1  ;;  %v20391_v27 = vpop.f32.mrf.mxu0  ;;  %v23911_v53 = vand.u32 4294901760, %v3214_v42 }
 0x2c7   :  { %20820 = vmatpush3.msra.mxu0 %v23855_v32  ;;  %20801 = vmatpush3.msra.mxu1 %v23798_v4  ;;  %v4523_v60 = vadd.f32 %v20377_v14, %v4440_v59  ;;  %v10002_v14 = vsub.f32 %v10000_v16, %v10001_v11  ;;  %v10009_v59 = vsub.f32 %v10007_v1, %v10008_v62  ;;  %v23906_v30 = vand.u32 4294901760, %v3220_v47 }
 0x2c8   :  { %20821 = vmatprep.subr.mxu0 %v23858_v12  ;;  %20802 = vmatprep.mubr.f32.mxu1 %v23002_v46  ;;  %v20384_v58 = vpop.f32.mrf.mxu1 }
 0x2c9   :  { %20822 = vmatpush3.msra.mxu0 %v23858_v12  ;;  %20803 = vmatmul.mubr.f32.vlgmr.msra.gmra.mxu1 %v23183_v50  ;;  %v4606_v28 = vadd.f32 %v20384_v58, %v4523_v60  ;;  %v10502_v3 = vsub.f32 %v3220_v47, %v23906_v30  ;;  %v10509_v58 = vsub.f32 %v3214_v42, %v23911_v53 }
 0x2ca   :  { %20812 = vmatprep.subr.mxu1 %v23795_v38  ;;  %20823 = vmatprep.mubr.f32.mxu0 %v23028_v13  ;;  %v23892_v21 = vpop.f32.mrf.mxu1 }
 0x2cb   :  { %20833 = vmatprep.subr.mxu0 %v10000_v16  ;;  %20813 = vmatpush3.msra.mxu1 %v23795_v38  ;;  %v4689_v52 = vadd.f32 %v20391_v27, %v4606_v28  ;;  %v10003_v38 = vand.u32 4294901760, %v10002_v14  ;;  %v10510_v27 = vand.u32 4294901760, %v10509_v58  ;;  %v2511_v14 = vadd.f32 %v23220_v19, %v25514_v6 }
 0x2cc   :  { %20824 = vmatmul.mubr.f32.vlgmr.msra.gmra.mxu0 %v23202_v45  ;;  %20814 = vmatprep.subr.mxu1 %v23798_v4  ;;  %v20398_v60 = vpop.f32.mrf.mxu1 }
 0x2cd   :  { %20834 = vmatpush3.msra.mxu0 %v10000_v16  ;;  %20815 = vmatpush3.msra.mxu1 %v23798_v4  ;;  %v23899_v15 = vadd.f32 %v20398_v60, %v4689_v52  ;;  %v10010_v4 = vand.u32 4294901760, %v10009_v59  ;;  %v23909_v16 = vpop.f32.mrf.mxu0  ;;  %v10511_v42 = vsub.f32 %v10509_v58, %v10510_v27 }
 0x2ce   :  { %20835 = vmatprep.subr.mxu0 %v10007_v1  ;;  %20816 = vmatprep.mubr.f32.mxu1 %v22974_v18  ;;  %v23930_v28 = vpop.f32.mrf.mxu1 }
 0x2cf   :  { %20836 = vmatpush3.msra.mxu0 %v10007_v1  ;;  %20817 = vmatmul.mubr.f32.vlgmr.msra.gmra.mxu1 %v23163_v7 }
 0x2d0   :  { %20826 = vmatprep.subr.mxu1 %v10003_v38  ;;  %20837 = vmatprep.mubr.f32.mxu0 %v22988_v36 }
 0x2d1   :  { %20847 = vmatprep.subr.mxu0 %v10001_v11  ;;  %20827 = vmatpush3.msra.mxu1 %v10003_v38 }
 0x2d2   :  { %20838 = vmatmul.mubr.f32.vlgmr.msra.gmra.mxu0 %v23173_v0  ;;  %20828 = vmatprep.subr.mxu1 %v10010_v4 }
 0x2d3   :  { %20848 = vmatpush3.msra.mxu0 %v10001_v11  ;;  %20829 = vmatpush3.msra.mxu1 %v10010_v4  ;;  %v20405_v1 = vpop.f32.mrf.mxu0  ;;  %v10503_v11 = vand.u32 4294901760, %v10502_v3  ;;  %v2938_v4 = vadd.f32 %v23225_v22, %v2511_v14 }
 0x2d4   :  { %20849 = vmatprep.subr.mxu0 %v10008_v62  ;;  %20830 = vmatprep.mubr.f32.mxu1 %v22974_v18 }
 0x2d5   :  { %20850 = vmatpush3.msra.mxu0 %v10008_v62  ;;  %20831 = vmatmul.mubr.f32.vlgmr.msra.gmra.mxu1 %v23163_v7  ;;  %v23917_v20 = vpop.f32.mrf.mxu0  ;;  %v10504_v52 = vsub.f32 %v10502_v3, %v10503_v11 }
 0x2d6   :  { %20840 = vmatprep.subr.mxu1 %v23855_v32  ;;  %20851 = vmatprep.mubr.f32.mxu0 %v22974_v18 }
 0x2d7   :  { %20861 = vmatprep.subr.mxu0 %v23906_v30  ;;  %20841 = vmatpush3.msra.mxu1 %v23855_v32  ;;  %v20419_v62 = vpop.f32.mrf.mxu0  ;;  %v10505_v6 = vand.u32 4294901760, %v10504_v52  ;;  %v25516_v52 = vld [vmem:[#allocation18_spill] sm:$0xff] }
 0x2d8   :  { %20852 = vmatmul.mubr.f32.vlgmr.msra.gmra.mxu0 %v23163_v7  ;;  %20842 = vmatprep.subr.mxu1 %v23858_v12 }
 0x2d9   :  { %20862 = vmatpush3.msra.mxu0 %v23906_v30  ;;  %20843 = vmatpush3.msra.mxu1 %v23858_v12  ;;  %v23938_v59 = vpop.f32.mrf.mxu0 }
 0x2da   :  { %20863 = vmatprep.subr.mxu0 %v23911_v53  ;;  %20844 = vmatprep.mubr.f32.mxu1 %v23002_v46 }
 0x2db   :  { %20864 = vmatpush3.msra.mxu0 %v23911_v53  ;;  %20845 = vmatmul.mubr.f32.vlgmr.msra.gmra.mxu1 %v23183_v50 }
 0x2dc   :  { %20854 = vmatprep.subr.mxu1 %v23855_v32  ;;  %20865 = vmatprep.mubr.f32.mxu0 %v23028_v13  ;;  %v20412_v47 = vpop.f32.mrf.mxu1 }
 0x2dd   :  { %20875 = vmatprep.subr.mxu0 %v10502_v3  ;;  %20855 = vmatpush3.msra.mxu1 %v23855_v32  ;;  %v4942_v60 = vadd.f32 %v20412_v47, %v20405_v1  ;;  %v25515_v47 = vld [vmem:[#allocation79_spill] sm:$0xff] }
 0x2de   :  { %20866 = vmatmul.mubr.f32.vlgmr.msra.gmra.mxu0 %v23202_v45  ;;  %20856 = vmatprep.subr.mxu1 %v23858_v12  ;;  %v23943_v38 = vpop.f32.mrf.mxu1  ;;  %v20433_v32 = vpop.f32.mrf.mxu0  ;;  %v23950_v31 = vand.u32 4294901760, %v25515_v47 }
 0x2df   :  { %20876 = vmatpush3.msra.mxu0 %v10502_v3  ;;  %20857 = vmatpush3.msra.mxu1 %v23858_v12  ;;  %v5025_v19 = vadd.f32 %v20419_v62, %v4942_v60  ;;  %v10512_v12 = vand.u32 4294901760, %v10511_v42  ;;  %v23955_v62 = vand.u32 4294901760, %v2938_v4  ;;  %v25517_v60 = vld [vmem:[#allocation7_spill] sm:$0xff] }
 0x2e0   :  { %20877 = vmatprep.subr.mxu0 %v10509_v58  ;;  %20858 = vmatprep.mubr.f32.mxu1 %v22974_v18  ;;  %v20426_v29 = vpop.f32.mrf.mxu1  ;;  %v11050_v14 = vsub.f32 %v25515_v47, %v23950_v31  ;;  %v1564_v42 = vadd.f32 %v25517_v60, %v25516_v52  ;;  %v5800_v47 = vadd.f32 0.0001, %v23844_v44 }
 0x2e1   :  { %20878 = vmatpush3.msra.mxu0 %v10509_v58  ;;  %20859 = vmatmul.mubr.f32.vlgmr.msra.gmra.mxu1 %v23163_v7  ;;  %v5108_v1 = vadd.f32 %v20426_v29, %v5025_v19 }
 0x2e2   :  { %20868 = vmatprep.subr.mxu1 %v10505_v6  ;;  %20879 = vmatprep.mubr.f32.mxu0 %v22988_v36  ;;  %v23953_v3 = vpop.f32.mrf.mxu1 }
 0x2e3   :  { %20889 = vmatprep.subr.mxu0 %v10503_v11  ;;  %20869 = vmatpush3.msra.mxu1 %v10505_v6  ;;  %v5191_v22 = vadd.f32 %v20433_v32, %v5108_v1  ;;  %v11057_v6 = vsub.f32 %v2938_v4, %v23955_v62  ;;  %v25518_v32 = vsub.f32 %v23899_v15, %v23824_v23  ;;  %v25519_v4 = vld [vmem:[#allocation8_spill] sm:$0xff] }
 0x2e4   :  { %20880 = vmatmul.mubr.f32.vlgmr.msra.gmra.mxu0 %v23173_v0  ;;  %20870 = vmatprep.subr.mxu1 %v10512_v12  ;;  %v20440_v58 = vpop.f32.mrf.mxu1  ;;  %v2070_v1 = vadd.f32 %v25519_v4, %v1564_v42 }
 0x2e5   :  { %20890 = vmatpush3.msra.mxu0 %v10503_v11  ;;  %20871 = vmatpush3.msra.mxu1 %v10512_v12  ;;  %v5270_v29 = vadd.f32 %v20440_v58, %v5191_v22  ;;  %v23970_v11 = vpop.f32.mrf.mxu0  ;;  %v11058_v23 = vand.u32 4294901760, %v11057_v6 }
 0x2e6   :  { %20891 = vmatprep.subr.mxu0 %v10510_v27  ;;  %20872 = vmatprep.mubr.f32.mxu1 %v22974_v18  ;;  %v2583_v15 = vadd.f32 %v23289_v61, %v2070_v1 }
 0x2e7   :  { %20892 = vmatpush3.msra.mxu0 %v10510_v27  ;;  %20873 = vmatmul.mubr.f32.vlgmr.msra.gmra.mxu1 %v23163_v7  ;;  %v5784_v19 = vsub.f32 %v5270_v29, %v23833_v17  ;;  %v11051_v17 = vand.u32 4294901760, %v11050_v14  ;;  %v11059_v61 = vsub.f32 %v11057_v6, %v11058_v23 }
 0x2e8   :  { %20882 = vmatprep.subr.mxu1 %v23906_v30  ;;  %20893 = vmatprep.mubr.f32.mxu0 %v22974_v18  ;;  %v3010_v60 = vadd.f32 %v23294_v48, %v2583_v15 }
 0x2e9   :  { %20903 = vmatprep.subr.mxu0 %v23950_v31  ;;  %20883 = vmatpush3.msra.mxu1 %v23906_v30  ;;  %v5802_v27 = vadd.f32 %v5784_v19, %v25518_v32  ;;  %v11052_v44 = vsub.f32 %v11050_v14, %v11051_v17  ;;  %v23996_v19 = vpop.f32.mrf.mxu1  ;;  %v11060_v48 = vand.u32 4294901760, %v11059_v61  ;;  %v25522_v61 = vld [vmem:[#allocation30_spill] sm:$0xff] }
 0x2ea   :  { %20894 = vmatmul.mubr.f32.vlgmr.msra.gmra.mxu0 %v23163_v7  ;;  %20884 = vmatprep.subr.mxu1 %v23911_v53 }
 0x2eb   :  { %20904 = vmatpush3.msra.mxu0 %v23950_v31  ;;  %20885 = vmatpush3.msra.mxu1 %v23911_v53  ;;  %v5804_v12 = vadd.f32 0.0009, %v5802_v27  ;;  %v20447_v22 = vpop.f32.mrf.mxu0  ;;  %v11053_v42 = vand.u32 4294901760, %v11052_v44 }
 0x2ec   :  { %20905 = vmatprep.subr.mxu0 %v23955_v62  ;;  %20886 = vmatprep.mubr.f32.mxu1 %v23002_v46 }
 0x2ed   :  { %20906 = vmatpush3.msra.mxu0 %v23955_v62  ;;  %20887 = vmatmul.mubr.f32.vlgmr.msra.gmra.mxu1 %v23183_v50  ;;  %v5806_v58 = vmul.f32 %v5804_v12, %v5800_v47  ;;  %v23986_v29 = vpop.f32.mrf.mxu0 }
 0x2ee   :  { %20896 = vmatprep.subr.mxu1 %v23906_v30  ;;  %20907 = vmatprep.mubr.f32.mxu0 %v23028_v13 }
 0x2ef   :  { %20917 = vmatprep.subr.mxu0 %v11050_v14  ;;  %20897 = vmatpush3.msra.mxu1 %v23906_v30  ;;  %v20461_v52 = vpop.f32.mrf.mxu0  ;;  %v25520_v30 = vld [vmem:[#allocation85_spill] sm:$0xff]  ;;  %21534 = vrcp.f32 %v5806_v58 }
 0x2f0   :  { %20908 = vmatmul.mubr.f32.vlgmr.msra.gmra.mxu0 %v23202_v45  ;;  %20898 = vmatprep.subr.mxu1 %v23911_v53  ;;  %v24002_v27 = vand.u32 4294901760, %v25520_v30 }
 0x2f1   :  { %20918 = vmatpush3.msra.mxu0 %v11050_v14  ;;  %20899 = vmatpush3.msra.mxu1 %v23911_v53  ;;  %v23998_v32 = vpop.f32.mrf.mxu0  ;;  %v24005_v53 = vand.u32 4294901760, %v3010_v60 }
 0x2f2   :  { %20919 = vmatprep.subr.mxu0 %v11057_v6  ;;  %20900 = vmatprep.mubr.f32.mxu1 %v22974_v18  ;;  %v11552_v12 = vsub.f32 %v25520_v30, %v24002_v27 }
 0x2f3   :  { %20920 = vmatpush3.msra.mxu0 %v11057_v6  ;;  %20901 = vmatmul.mubr.f32.vlgmr.msra.gmra.mxu1 %v23163_v7  ;;  %v11559_v44 = vsub.f32 %v3010_v60, %v24005_v53 }
 0x2f4   :  { %20910 = vmatprep.subr.mxu1 %v11053_v42  ;;  %20921 = vmatprep.mubr.f32.mxu0 %v22988_v36  ;;  %v20454_v14 = vpop.f32.mrf.mxu1 }
 0x2f5   :  { %20931 = vmatprep.subr.mxu0 %v11051_v17  ;;  %20911 = vmatpush3.msra.mxu1 %v11053_v42  ;;  %v5444_v4 = vadd.f32 %v20454_v14, %v20447_v22  ;;  %v25523_v42 = vld [vmem:[#allocation20_spill] sm:$0xff] }
 0x2f6   :  { %20922 = vmatmul.mubr.f32.vlgmr.msra.gmra.mxu0 %v23173_v0  ;;  %20912 = vmatprep.subr.mxu1 %v11060_v48  ;;  %v24008_v1 = vpop.f32.mrf.mxu1  ;;  %v20475_v6 = vpop.f32.mrf.mxu0  ;;  %v1648_v14 = vadd.f32 %v25523_v42, %v25522_v61 }
 0x2f7   :  { %20932 = vmatpush3.msra.mxu0 %v11051_v17  ;;  %20913 = vmatpush3.msra.mxu1 %v11060_v48  ;;  %v5527_v47 = vadd.f32 %v20461_v52, %v5444_v4  ;;  %v11560_v48 = vand.u32 4294901760, %v11559_v44  ;;  %v25524_v4 = vld [vmem:[#allocation21_spill] sm:$0xff] }
 0x2f8   :  { %20933 = vmatprep.subr.mxu0 %v11058_v23  ;;  %20914 = vmatprep.mubr.f32.mxu1 %v22974_v18  ;;  %v24013_v15 = vpop.f32.mrf.mxu0 }
 0x2f9   :  { %25521 = vst [vmem:[#allocation33_spill] sm:$0xff] %v24013_v15  ;;  %20934 = vmatpush3.msra.mxu0 %v11058_v23  ;;  %20915 = vmatmul.mubr.f32.vlgmr.msra.gmra.mxu1 %v23163_v7  ;;  %v20468_v22 = vpop.f32.mrf.mxu1  ;;  %v11553_v23 = vand.u32 4294901760, %v11552_v12 }
 0x2fa   :  { %20924 = vmatprep.subr.mxu1 %v23950_v31  ;;  %20935 = vmatprep.mubr.f32.mxu0 %v22974_v18  ;;  %v5610_v17 = vadd.f32 %v20468_v22, %v5527_v47  ;;  %v2166_v47 = vadd.f32 %v25524_v4, %v1648_v14  ;;  %v11561_v14 = vsub.f32 %v11559_v44, %v11560_v48  ;;  %v5788_v4 = vmul.f32 2.0, %v23836_v24 }
 0x2fb   :  { %20945 = vmatprep.subr.mxu0 %v24002_v27  ;;  %20925 = vmatpush3.msra.mxu1 %v23950_v31  ;;  %v24023_v52 = vpop.f32.mrf.mxu1  ;;  %v11554_v61 = vsub.f32 %v11552_v12, %v11553_v23 }
 0x2fc   :  { %20936 = vmatmul.mubr.f32.vlgmr.msra.gmra.mxu0 %v23163_v7  ;;  %20926 = vmatprep.subr.mxu1 %v23955_v62  ;;  %v5693_v60 = vadd.f32 %v20475_v6, %v5610_v17  ;;  %v20489_v30 = vpop.f32.mrf.mxu0  ;;  %v2655_v6 = vadd.f32 %v23358_v41, %v2166_v47  ;;  %v11562_v25 = vand.u32 4294901760, %v11561_v14 }
 0x2fd   :  { %20946 = vmatpush3.msra.mxu0 %v24002_v27  ;;  %20927 = vmatpush3.msra.mxu1 %v23955_v62 }
 0x2fe   :  { %20947 = vmatprep.subr.mxu0 %v24005_v53  ;;  %20928 = vmatprep.mubr.f32.mxu1 %v23002_v46  ;;  %v24032_v22 = vpop.f32.mrf.mxu0 }
 0x2ff   :  { %20948 = vmatpush3.msra.mxu0 %v24005_v53  ;;  %20929 = vmatmul.mubr.f32.vlgmr.msra.gmra.mxu1 %v23183_v50  ;;  %v20482_v58 = vpop.f32.mrf.mxu1 }
 0x300   :  { %20938 = vmatprep.subr.mxu1 %v23950_v31  ;;  %20949 = vmatprep.mubr.f32.mxu0 %v23028_v13  ;;  %v5772_v42 = vadd.f32 %v20482_v58, %v5693_v60  ;;  %v3082_v60 = vadd.f32 %v23363_v33, %v2655_v6 }
 0x301   :  { %20959 = vmatprep.subr.mxu0 %v11552_v12  ;;  %20939 = vmatpush3.msra.mxu1 %v23950_v31  ;;  %v24040_v17 = vpop.f32.mrf.mxu1  ;;  %v11555_v31 = vand.u32 4294901760, %v11554_v61 }
 0x302   :  { %25525 = vst [vmem:[#allocation34_spill] sm:$0xff] %v24040_v17  ;;  %20950 = vmatmul.mubr.f32.vlgmr.msra.gmra.mxu0 %v23202_v45  ;;  %20940 = vmatprep.subr.mxu1 %v23955_v62  ;;  %v5786_v41 = vsub.f32 %v5772_v42, %v23836_v24  ;;  %v20503_v47 = vpop.f32.mrf.mxu0  ;;  %v24053_v24 = vand.u32 4294901760, %v25526_v40  ;;  %v24058_v61 = vand.u32 4294901760, %v3082_v60  ;;  %v25542_v17 = vld [vmem:[#allocation105_spill] sm:$0xff] }
 0x303   :  { %20960 = vmatpush3.msra.mxu0 %v11552_v12  ;;  %20941 = vmatpush3.msra.mxu1 %v23955_v62  ;;  %v5790_v62 = vadd.f32 0.0001, %v5788_v4 }
 0x304   :  { %20961 = vmatprep.subr.mxu0 %v11559_v44  ;;  %20942 = vmatprep.mubr.f32.mxu1 %v22974_v18  ;;  %v5792_v58 = vmul.f32 2.0, %v5786_v41  ;;  %v24049_v63 = vpop.f32.mrf.mxu0  ;;  %v21535_v41 = vpop.eup %21534  ;;  %v12054_v4 = vsub.f32 %v25526_v40, %v24053_v24 }
 0x305   :  { %20962 = vmatpush3.msra.mxu0 %v11559_v44  ;;  %20943 = vmatmul.mubr.f32.vlgmr.msra.gmra.mxu1 %v23163_v7  ;;  %v20496_v39 = vpop.f32.mrf.mxu1 }
 0x306   :  { %20952 = vmatprep.subr.mxu1 %v11555_v31  ;;  %20963 = vmatprep.mubr.f32.mxu0 %v22988_v36  ;;  %v5794_v33 = vadd.f32 0.0009, %v5792_v58  ;;  %v5992_v12 = vadd.f32 %v20496_v39, %v20489_v30  ;;  %v25530_v58 = vld [vmem:[#allocation40_spill] sm:$0xff] }
 0x307   :  { %20973 = vmatprep.subr.mxu0 %v11553_v23  ;;  %20953 = vmatpush3.msra.mxu1 %v11555_v31  ;;  %v24056_v6 = vpop.f32.mrf.mxu1  ;;  %v25529_v31 = vld [vmem:[#allocation43_spill] sm:$0xff] }
 0x308   :  { %20964 = vmatmul.mubr.f32.vlgmr.msra.gmra.mxu0 %v23173_v0  ;;  %20954 = vmatprep.subr.mxu1 %v11562_v25  ;;  %v5796_v44 = vmul.f32 %v5794_v33, %v5790_v62  ;;  %v6075_v42 = vadd.f32 %v20503_v47, %v5992_v12  ;;  %v20517_v14 = vpop.f32.mrf.mxu0  ;;  %v1732_v2 = vadd.f32 %v25530_v58, %v25529_v31  ;;  %v25532_v12 = vld [vmem:[#allocation42_spill] sm:$0xff] }
 0x309   :  { %20974 = vmatpush3.msra.mxu0 %v11553_v23  ;;  %20955 = vmatpush3.msra.mxu1 %v11562_v25  ;;  %v12061_v23 = vsub.f32 %v3082_v60, %v24058_v61 }
 0x30a   :  { %20975 = vmatprep.subr.mxu0 %v11560_v48  ;;  %20956 = vmatprep.mubr.f32.mxu1 %v22974_v18  ;;  %v24064_v39 = vmul.f32 %v21535_v41, %v5796_v44  ;;  %v24066_v30 = vpop.f32.mrf.mxu0  ;;  %v2262_v60 = vadd.f32 %v25532_v12, %v1732_v2  ;;  %v25533_v41 = vld [vmem:[#allocation97_spill] sm:$0xff] }
 0x30b   :  { %25528 = vst [vmem:[#allocation52_spill] sm:$0xff] %v24066_v30  ;;  %20976 = vmatpush3.msra.mxu0 %v11560_v48  ;;  %20957 = vmatmul.mubr.f32.vlgmr.msra.gmra.mxu1 %v23163_v7  ;;  %v20510_v47 = vpop.f32.mrf.mxu1  ;;  %v12055_v48 = vand.u32 4294901760, %v12054_v4  ;;  %v12062_v44 = vand.u32 4294901760, %v12061_v23 }
 0x30c   :  { %25527 = vst [vmem:[#allocation58_spill] sm:$0xff] %v24064_v39  ;;  %20966 = vmatprep.subr.mxu1 %v24002_v27  ;;  %20977 = vmatprep.mubr.f32.mxu0 %v22974_v18  ;;  %v6158_v40 = vadd.f32 %v20510_v47, %v6075_v42  ;;  %v2727_v31 = vadd.f32 %v25533_v41, %v2262_v60  ;;  %v25535_v60 = vld [vmem:[#allocation99_spill] sm:$0xff] }
 0x30d   :  { %20987 = vmatprep.subr.mxu0 %v24053_v24  ;;  %20967 = vmatpush3.msra.mxu1 %v24002_v27  ;;  %v24076_v25 = vpop.f32.mrf.mxu1  ;;  %v12056_v2 = vsub.f32 %v12054_v4, %v12055_v48 }
 0x30e   :  { %25531 = vst [vmem:[#allocation55_spill] sm:$0xff] %v24076_v25  ;;  %20978 = vmatmul.mubr.f32.vlgmr.msra.gmra.mxu0 %v23163_v7  ;;  %20968 = vmatprep.subr.mxu1 %v24005_v53  ;;  %v6241_v62 = vadd.f32 %v20517_v14, %v6158_v40  ;;  %v20531_v33 = vpop.f32.mrf.mxu0  ;;  %v12063_v40 = vsub.f32 %v12061_v23, %v12062_v44 }
 0x30f   :  { %20988 = vmatpush3.msra.mxu0 %v24053_v24  ;;  %20969 = vmatpush3.msra.mxu1 %v24005_v53  ;;  %v3154_v41 = vadd.f32 %v25535_v60, %v2727_v31 }
 0x310   :  { %20989 = vmatprep.subr.mxu0 %v24058_v61  ;;  %20970 = vmatprep.mubr.f32.mxu1 %v23002_v46  ;;  %v24085_v42 = vpop.f32.mrf.mxu0  ;;  %v12064_v31 = vand.u32 4294901760, %v12063_v40 }
 0x311   :  { %20990 = vmatpush3.msra.mxu0 %v24058_v61  ;;  %20971 = vmatmul.mubr.f32.vlgmr.msra.gmra.mxu1 %v23183_v50  ;;  %v20524_v14 = vpop.f32.mrf.mxu1  ;;  %v24109_v60 = vand.u32 4294901760, %v3154_v41 }
 0x312   :  { %20980 = vmatprep.subr.mxu1 %v24002_v27  ;;  %20991 = vmatprep.mubr.f32.mxu0 %v23028_v13  ;;  %v24092_v58 = vadd.f32 %v20524_v14, %v6241_v62  ;;  %v12057_v62 = vand.u32 4294901760, %v12056_v2 }
 0x313   :  { %21001 = vmatprep.subr.mxu0 %v12054_v4  ;;  %20981 = vmatpush3.msra.mxu1 %v24002_v27  ;;  %v24095_v47 = vpop.f32.mrf.mxu1  ;;  %v25536_v27 = vld [vmem:[#allocation98_spill] sm:$0xff] }
 0x314   :  { %25534 = vst [vmem:[#allocation54_spill] sm:$0xff] %v24095_v47  ;;  %20992 = vmatmul.mubr.f32.vlgmr.msra.gmra.mxu0 %v23202_v45  ;;  %20982 = vmatprep.subr.mxu1 %v24005_v53  ;;  %v20545_v12 = vpop.f32.mrf.mxu0  ;;  %v24105_v39 = vand.u32 4294901760, %v25536_v27 }
 0x315   :  { %21002 = vmatpush3.msra.mxu0 %v12054_v4  ;;  %20983 = vmatpush3.msra.mxu1 %v24005_v53 }
 0x316   :  { %21003 = vmatprep.subr.mxu0 %v12061_v23  ;;  %20984 = vmatprep.mubr.f32.mxu1 %v22974_v18  ;;  %v24102_v14 = vpop.f32.mrf.mxu0 }
 0x317   :  { %21004 = vmatpush3.msra.mxu0 %v12061_v23  ;;  %20985 = vmatmul.mubr.f32.vlgmr.msra.gmra.mxu1 %v23163_v7  ;;  %v20538_v47 = vpop.f32.mrf.mxu1  ;;  %v12556_v23 = vsub.f32 %v25536_v27, %v24105_v39 }
 0x318   :  { %20994 = vmatprep.subr.mxu1 %v12057_v62  ;;  %21005 = vmatprep.mubr.f32.mxu0 %v22988_v36  ;;  %v6494_v4 = vadd.f32 %v20538_v47, %v20531_v33  ;;  %v24120_v47 = vsub.f32 %v3154_v41, %v24109_v60 }
 0x319   :  { %21015 = vmatprep.subr.mxu0 %v12055_v48  ;;  %20995 = vmatpush3.msra.mxu1 %v12057_v62  ;;  %v24111_v53 = vpop.f32.mrf.mxu1  ;;  %v25538_v62 = vld [vmem:[#allocation60_spill] sm:$0xff]  ;;  %v24129_v27 = vand.u32 4294901760, %v12556_v23 }
 0x31a   :  { %21006 = vmatmul.mubr.f32.vlgmr.msra.gmra.mxu0 %v23173_v0  ;;  %20996 = vmatprep.subr.mxu1 %v12064_v31  ;;  %v6577_v2 = vadd.f32 %v20545_v12, %v6494_v4  ;;  %v20559_v30 = vpop.f32.mrf.mxu0  ;;  %v25539_v12 = vld [vmem:[#allocation64_spill] sm:$0xff] }
 0x31b   :  { %21016 = vmatpush3.msra.mxu0 %v12055_v48  ;;  %20997 = vmatpush3.msra.mxu1 %v12064_v31  ;;  %v1816_v4 = vadd.f32 %v25539_v12, %v25538_v62  ;;  %v25541_v12 = vld [vmem:[#allocation66_spill] sm:$0xff] }
 0x31c   :  { %21017 = vmatprep.subr.mxu0 %v12062_v44  ;;  %20998 = vmatprep.mubr.f32.mxu1 %v22974_v18  ;;  %v24117_v33 = vpop.f32.mrf.mxu0 }
 0x31d   :  { %25537 = vst [vmem:[#allocation67_spill] sm:$0xff] %v24117_v33  ;;  %21018 = vmatpush3.msra.mxu0 %v12062_v44  ;;  %20999 = vmatmul.mubr.f32.vlgmr.msra.gmra.mxu1 %v23163_v7  ;;  %v20552_v40 = vpop.f32.mrf.mxu1  ;;  %v3932_v44 = vadd.f32 %v23801_v5, %v23783_v56  ;;  %v25543_v33 = vld [vmem:[#allocation68_spill] sm:$0xff]  ;;  %v3430_v5 = vadd.f32 %v23739_v54, %v23718_v34  ;;  %v25545_v34 = vld [vmem:[#allocation107_spill] sm:$0xff] }
 0x31e   :  { %21008 = vmatprep.subr.mxu1 %v24053_v24  ;;  %21019 = vmatprep.mubr.f32.mxu0 %v22974_v18  ;;  %v6660_v48 = vadd.f32 %v20552_v40, %v6577_v2  ;;  %v2805_v2 = vadd.f32 %v25542_v17, %v25541_v12  ;;  %v24142_v40 = vand.u32 4294901760, %v24120_v47  ;;  %v2358_v25 = vadd.f32 %v25543_v33, %v1816_v4  ;;  %v25544_v33 = vld [vmem:[#allocation106_spill] sm:$0xff] }
 0x31f   :  { %21029 = vmatprep.subr.mxu0 %v24105_v39  ;;  %21009 = vmatpush3.msra.mxu1 %v24053_v24  ;;  %v24131_v41 = vpop.f32.mrf.mxu1  ;;  %v12558_v17 = vsub.f32 %v12556_v23, %v24129_v27  ;;  %v4014_v12 = vadd.f32 %v23803_v10, %v3932_v44  ;;  %v24172_v10 = vmul.f32 %v24092_v58, %v24092_v58 }
 0x320   :  { %25540 = vst [vmem:[#allocation51_spill] sm:$0xff] %v24131_v41  ;;  %21020 = vmatmul.mubr.f32.vlgmr.msra.gmra.mxu0 %v23163_v7  ;;  %21010 = vmatprep.subr.mxu1 %v24058_v61  ;;  %v6743_v31 = vadd.f32 %v20559_v30, %v6660_v48  ;;  %v20573_v62 = vpop.f32.mrf.mxu0  ;;  %v4936_v30 = vadd.f32 %v23943_v38, %v23917_v20 }
 0x321   :  { %21030 = vmatpush3.msra.mxu0 %v24105_v39  ;;  %21011 = vmatpush3.msra.mxu1 %v24058_v61  ;;  %v2799_v4 = vadd.f32 %v25544_v33, %v2358_v25  ;;  %v3232_v54 = vadd.f32 %v25545_v34, %v2805_v2  ;;  %v12565_v41 = vsub.f32 %v24120_v47, %v24142_v40  ;;  %v12559_v33 = vand.u32 4294901760, %v12558_v17 }
 0x322   :  { %21031 = vmatprep.subr.mxu0 %v24109_v60  ;;  %21012 = vmatprep.mubr.f32.mxu1 %v23002_v46  ;;  %v24147_v56 = vpop.f32.mrf.mxu0  ;;  %v4434_v20 = vadd.f32 %v23878_v9, %v23852_v57  ;;  %v5018_v57 = vadd.f32 %v23938_v59, %v4936_v30  ;;  %v25546_v9 = vld [vmem:[#allocation108_spill] sm:$0xff] }
 0x323   :  { %21032 = vmatpush3.msra.mxu0 %v24109_v60  ;;  %21013 = vmatmul.mubr.f32.vlgmr.msra.gmra.mxu1 %v23183_v50  ;;  %v20566_v48 = vpop.f32.mrf.mxu1  ;;  %v3226_v2 = vadd.f32 %v25546_v9, %v2799_v4  ;;  %v12566_v17 = vand.u32 4294901760, %v12565_v41 }
 0x324   :  { %21022 = vmatprep.subr.mxu1 %v24053_v24  ;;  %21033 = vmatprep.mubr.f32.mxu0 %v23028_v13  ;;  %v6822_v15 = vadd.f32 %v20566_v48, %v6743_v31  ;;  %v3512_v31 = vadd.f32 %v23741_v8, %v3430_v5  ;;  %v4096_v48 = vadd.f32 %v23814_v26, %v4014_v12  ;;  %v25548_v26 = vld [vmem:[#allocation70_spill] sm:$0xff]  ;;  %v24197_v5 = vand.u32 4294901760, %v3232_v54 }
 0x325   :  { %21043 = vmatprep.subr.mxu0 %v12556_v23  ;;  %21023 = vmatpush3.msra.mxu1 %v24053_v24  ;;  %v24166_v38 = vpop.f32.mrf.mxu1  ;;  %v4516_v8 = vadd.f32 %v23872_v51, %v4434_v20  ;;  %v24205_v51 = vand.u32 4294901760, %v3226_v2 }
 0x326   :  { %21034 = vmatmul.mubr.f32.vlgmr.msra.gmra.mxu0 %v23202_v45  ;;  %21024 = vmatprep.subr.mxu1 %v24058_v61  ;;  %v24174_v25 = vmul.f32 %v6822_v15, %v6822_v15  ;;  %v24177_v24 = vmul.f32 %v6822_v15, %v24092_v58  ;;  %v20587_v44 = vpop.f32.mrf.mxu0  ;;  %v3594_v30 = vadd.f32 %v23751_v49, %v3512_v31 }
 0x327   :  { %21044 = vmatpush3.msra.mxu0 %v12556_v23  ;;  %21025 = vmatpush3.msra.mxu1 %v24058_v61  ;;  %v25547_v61 = vld [vmem:[#allocation12_spill] sm:$0xff]  ;;  %v4181_v34 = vadd.f32 %v23831_v43, %v4096_v48  ;;  %v4598_v49 = vadd.f32 %v23892_v21, %v4516_v8  ;;  %v24212_v31 = vsub.f32 %v3232_v54, %v24197_v5  ;;  %v25549_v43 = vld [vmem:[#allocation71_spill] sm:$0xff] }
 0x328   :  { %21045 = vmatprep.subr.mxu0 %v24120_v47  ;;  %21026 = vmatprep.mubr.f32.mxu1 %v22974_v18  ;;  %v24188_v15 = vadd.f32 %v24174_v25, %v24172_v10  ;;  %v24190_v58 = vpop.f32.mrf.mxu0  ;;  %v1494_v23 = vadd.f32 %v25548_v26, %v25547_v61  ;;  %v24224_v54 = vsub.f32 %v3226_v2, %v24205_v51  ;;  %v25550_v2 = vld [vmem:[#allocation80_spill] sm:$0xff] }
 0x329   :  { %21046 = vmatpush3.msra.mxu0 %v24120_v47  ;;  %21027 = vmatmul.mubr.f32.vlgmr.msra.gmra.mxu1 %v23163_v7  ;;  %v20580_v59 = vpop.f32.mrf.mxu1  ;;  %v5100_v47 = vadd.f32 %v23953_v3, %v5018_v57  ;;  %v3679_v57 = vadd.f32 %v23762_v37, %v3594_v30  ;;  %v4683_v37 = vadd.f32 %v23909_v16, %v4598_v49 }
 0x32a   :  { %21036 = vmatprep.subr.mxu1 %v12559_v33  ;;  %21047 = vmatprep.mubr.f32.mxu0 %v22988_v36  ;;  %v6996_v4 = vadd.f32 %v20580_v59, %v20573_v62  ;;  %v1990_v62 = vadd.f32 %v25549_v43, %v1494_v23  ;;  %v24257_v61 = vand.u32 4294901760, %v24224_v54  ;;  %v25551_v23 = vld [vmem:[#allocation82_spill] sm:$0xff] }
 0x32b   :  { %21057 = vmatprep.subr.mxu0 %v24129_v27  ;;  %21037 = vmatpush3.msra.mxu1 %v12559_v33  ;;  %v24203_v12 = vpop.f32.mrf.mxu1  ;;  %v5185_v21 = vadd.f32 %v23970_v11, %v5100_v47  ;;  %v5438_v11 = vadd.f32 %v24008_v1, %v23986_v29  ;;  %v24245_v59 = vadd.f32 %v23788_v35, %v3679_v57 }
 0x32c   :  { %21048 = vmatmul.mubr.f32.vlgmr.msra.gmra.mxu0 %v23173_v0  ;;  %21038 = vmatprep.subr.mxu1 %v12566_v17  ;;  %v20601_v20 = vpop.f32.mrf.mxu0  ;;  %v7079_v41 = vadd.f32 %v20587_v44, %v6996_v4  ;;  %v24227_v44 = vadd.f32 %v23861_v55, %v4181_v34  ;;  %v2523_v48 = vadd.f32 %v25550_v2, %v1990_v62  ;;  %v24242_v55 = vand.u32 4294901760, %v24212_v31  ;;  %v25555_v2 = vld [vmem:[#allocation55_spill] sm:$0xff] }
 0x32d   :  { %21058 = vmatpush3.msra.mxu0 %v24129_v27  ;;  %21039 = vmatpush3.msra.mxu1 %v12566_v17  ;;  %v5264_v16 = vadd.f32 %v23996_v19, %v5185_v21  ;;  %v6488_v29 = vadd.f32 %v24111_v53, %v24085_v42  ;;  %v4762_v19 = vadd.f32 %v23930_v28, %v4683_v37 }
 0x32e   :  { %21059 = vmatprep.subr.mxu0 %v24142_v40  ;;  %21040 = vmatprep.mubr.f32.mxu1 %v22974_v18  ;;  %v24216_v3 = vpop.f32.mrf.mxu0  ;;  %v5777_v1 = vmul.f32 %v24227_v44, %v24227_v44  ;;  %v5520_v26 = vadd.f32 %v23998_v32, %v5438_v11  ;;  %v5986_v42 = vadd.f32 %v24056_v6, %v24032_v22 }
 0x32f   :  { %21060 = vmatpush3.msra.mxu0 %v24142_v40  ;;  %21041 = vmatmul.mubr.f32.vlgmr.msra.gmra.mxu1 %v23163_v7  ;;  %v20594_v27 = vpop.f32.mrf.mxu1  ;;  %v2950_v17 = vadd.f32 %v25551_v23, %v2523_v48  ;;  %v13060_v30 = vsub.f32 %v24212_v31, %v24242_v55  ;;  %v5775_v28 = vmul.f32 %v24245_v59, %v24245_v59 }
 0x330   :  { %21050 = vmatprep.subr.mxu1 %v24105_v39  ;;  %21061 = vmatprep.mubr.f32.mxu0 %v22974_v18  ;;  %v7162_v9 = vadd.f32 %v20594_v27, %v7079_v41  ;;  %v5783_v32 = vsub.f32 %v5264_v16, %v5777_v1  ;;  %v6570_v22 = vadd.f32 %v24102_v14, %v6488_v29 }
 0x331   :  { %21071 = vmatprep.subr.mxu0 %v24197_v5  ;;  %21051 = vmatpush3.msra.mxu1 %v24105_v39  ;;  %v24236_v40 = vpop.f32.mrf.mxu1  ;;  %v13067_v4 = vsub.f32 %v24224_v54, %v24257_v61  ;;  %v6990_v34 = vadd.f32 %v24203_v12, %v24147_v56  ;;  %v5602_v14 = vadd.f32 %v24023_v52, %v5520_v26  ;;  %v13061_v43 = vand.u32 4294901760, %v13060_v30  ;;  %v25552_v12 = vld [vmem:[#allocation51_spill] sm:$0xff]  ;;  %v25556_v26 = vld [vmem:[#allocation22_spill] sm:$0xff] }
 0x332   :  { %21062 = vmatmul.mubr.f32.vlgmr.msra.gmra.mxu0 %v23163_v7  ;;  %21052 = vmatprep.subr.mxu1 %v24109_v60  ;;  %v7245_v33 = vadd.f32 %v20601_v20, %v7162_v9  ;;  %v20615_v8 = vpop.f32.mrf.mxu0  ;;  %v6068_v41 = vadd.f32 %v24049_v63, %v5986_v42  ;;  %v24301_v9 = vand.u32 4294901760, %v2950_v17  ;;  %v5797_v37 = vadd.f32 %v5777_v1, %v5775_v28  ;;  %v25558_v42 = vld [vmem:[#allocation67_spill] sm:$0xff] }
 0x333   :  { %21072 = vmatpush3.msra.mxu0 %v24197_v5  ;;  %21053 = vmatpush3.msra.mxu1 %v24109_v60  ;;  %v13068_v63 = vand.u32 4294901760, %v13067_v4  ;;  %v7072_v52 = vadd.f32 %v24190_v58, %v6990_v34  ;;  %v25557_v58 = vld [vmem:[#allocation9_spill] sm:$0xff]  ;;  %v25560_v34 = vld [vmem:[#allocation52_spill] sm:$0xff] }
 0x334   :  { %21073 = vmatprep.subr.mxu0 %v24205_v51  ;;  %21054 = vmatprep.mubr.f32.mxu1 %v23002_v46  ;;  %v7400_v35 = vpop.f32.mrf.mxu0  ;;  %v6150_v48 = vadd.f32 %v25555_v2, %v6068_v41 }
 0x335   :  { %21074 = vmatpush3.msra.mxu0 %v24205_v51  ;;  %21055 = vmatmul.mubr.f32.vlgmr.msra.gmra.mxu1 %v23183_v50  ;;  %v20608_v53 = vpop.f32.mrf.mxu1 }
 0x336   :  { %21064 = vmatprep.subr.mxu1 %v24105_v39  ;;  %21075 = vmatprep.mubr.f32.mxu0 %v23028_v13  ;;  %v24270_v47 = vadd.f32 %v20608_v53, %v7245_v33 }
 0x337   :  { %21085 = vmatprep.subr.mxu0 %v24212_v31  ;;  %21065 = vmatpush3.msra.mxu1 %v24105_v39  ;;  %v24277_v6 = vpop.f32.mrf.mxu1  ;;  %v5781_v39 = vsub.f32 %v4762_v19, %v5775_v28 }
 0x338   :  { %21076 = vmatmul.mubr.f32.vlgmr.msra.gmra.mxu0 %v23202_v45  ;;  %21066 = vmatprep.subr.mxu1 %v24109_v60  ;;  %v8338_v20 = vsub.f32 %v24270_v47, %v24172_v10  ;;  %v20629_v49 = vpop.f32.mrf.mxu0 }
 0x339   :  { %21086 = vmatpush3.msra.mxu0 %v24212_v31  ;;  %21067 = vmatpush3.msra.mxu1 %v24109_v60  ;;  %v5801_v56 = vadd.f32 %v5783_v32, %v5781_v39  ;;  %v6652_v31 = vadd.f32 %v25552_v12, %v6570_v22  ;;  %v25553_v60 = vld [vmem:[#allocation81_spill] sm:$0xff]  ;;  %v24319_v32 = vsub.f32 %v2950_v17, %v24301_v9  ;;  %v25559_v22 = vld [vmem:[#allocation34_spill] sm:$0xff] }
 0x33a   :  { %21087 = vmatprep.subr.mxu0 %v24224_v54  ;;  %21068 = vmatprep.mubr.f32.mxu1 %v22974_v18  ;;  %v7573_v62 = vpop.f32.mrf.mxu0  ;;  %v24297_v21 = vand.u32 4294901760, %v25553_v60  ;;  %v25561_v12 = vld [vmem:[#allocation10_spill] sm:$0xff] }
 0x33b   :  { %21088 = vmatpush3.msra.mxu0 %v24224_v54  ;;  %21069 = vmatmul.mubr.f32.vlgmr.msra.gmra.mxu1 %v23163_v7  ;;  %v20622_v57 = vpop.f32.mrf.mxu1  ;;  %v25554_v54 = vld [vmem:[#allocation33_spill] sm:$0xff]  ;;  %v5803_v1 = vadd.f32 0.0009, %v5801_v56  ;;  %v6737_v53 = vadd.f32 %v25558_v42, %v6652_v31 }
 0x33c   :  { %21078 = vmatprep.subr.mxu1 %v13061_v43  ;;  %21089 = vmatprep.mubr.f32.mxu0 %v22988_v36  ;;  %v7498_v27 = vadd.f32 %v20622_v57, %v20615_v8  ;;  %v5687_v11 = vadd.f32 %v25554_v54, %v5602_v14  ;;  %v1578_v8 = vadd.f32 %v25557_v58, %v25556_v26 }
 0x33d   :  { %21099 = vmatprep.subr.mxu0 %v24242_v55  ;;  %21079 = vmatpush3.msra.mxu1 %v13061_v43  ;;  %v7491_v33 = vpop.f32.mrf.mxu1  ;;  %v24313_v23 = vsub.f32 %v25553_v60, %v24297_v21  ;;  %v5779_v14 = vmul.f32 %v24227_v44, %v24245_v59  ;;  %v24332_v17 = vadd.f32 %v24166_v38, %v6737_v53  ;;  %v24344_v38 = vand.u32 4294901760, %v24319_v32  ;;  %v25562_v60 = vld [vmem:[#allocation54_spill] sm:$0xff] }
 0x33e   :  { %21090 = vmatmul.mubr.f32.vlgmr.msra.gmra.mxu0 %v23173_v0  ;;  %21080 = vmatprep.subr.mxu1 %v13068_v63  ;;  %v7492_v16 = vadd.f32 %v7491_v33, %v7400_v35  ;;  %v7581_v29 = vadd.f32 %v20629_v49, %v7498_v27  ;;  %v20643_v19 = vpop.f32.mrf.mxu0  ;;  %v7154_v35 = vadd.f32 %v24236_v40, %v7072_v52  ;;  %v25563_v27 = vld [vmem:[#allocation86_spill] sm:$0xff] }
 0x33f   :  { %21100 = vmatpush3.msra.mxu0 %v24242_v55  ;;  %21081 = vmatpush3.msra.mxu1 %v13068_v63  ;;  %v5799_v55 = vadd.f32 0.0001, %v5797_v37  ;;  %v5766_v4 = vadd.f32 %v25559_v22, %v5687_v11  ;;  %v6235_v49 = vadd.f32 %v25560_v34, %v6150_v48  ;;  %v24337_v43 = vand.u32 4294901760, %v24313_v23  ;;  %v25565_v22 = vld [vmem:[#allocation87_spill] sm:$0xff] }
 0x340   :  { %21101 = vmatprep.subr.mxu0 %v24257_v61  ;;  %21082 = vmatprep.mubr.f32.mxu1 %v22974_v18  ;;  %v7574_v30 = vadd.f32 %v7573_v62, %v7492_v16  ;;  %v7740_v28 = vpop.f32.mrf.mxu0  ;;  %v7239_v62 = vadd.f32 %v24216_v3, %v7154_v35  ;;  %v2086_v31 = vadd.f32 %v25561_v12, %v1578_v8  ;;  %v5787_v53 = vmul.f32 2.0, %v5779_v14 }
 0x341   :  { %21102 = vmatpush3.msra.mxu0 %v24257_v61  ;;  %21083 = vmatmul.mubr.f32.vlgmr.msra.gmra.mxu1 %v23163_v7  ;;  %v20636_v39 = vpop.f32.mrf.mxu1  ;;  %v5805_v61 = vmul.f32 %v5803_v1, %v5799_v55  ;;  %v5785_v57 = vsub.f32 %v5766_v4, %v5779_v14  ;;  %v24347_v63 = vadd.f32 %v25562_v60, %v6235_v49  ;;  %v25564_v1 = vld [vmem:[#allocation88_spill] sm:$0xff]  ;;  %v24379_v4 = vand.u32 4294901760, %v25565_v22 }
 0x342   :  { %21092 = vmatprep.subr.mxu1 %v24197_v5  ;;  %21103 = vmatprep.mubr.f32.mxu0 %v22974_v18  ;;  %v7664_v40 = vadd.f32 %v20636_v39, %v7581_v29  ;;  %v2595_v37 = vadd.f32 %v25563_v27, %v2086_v31  ;;  %v8333_v54 = vmul.f32 %v24332_v17, %v24332_v17  ;;  %v8356_v49 = vadd.f32 0.0001, %v24188_v15  ;;  %v25566_v60 = vld [vmem:[#allocation32_spill] sm:$0xff] }
 0x343   :  { %21113 = vmatprep.subr.mxu0 %v24297_v21  ;;  %21093 = vmatpush3.msra.mxu1 %v24197_v5  ;;  %v7655_v41 = vpop.f32.mrf.mxu1  ;;  %v13608_v2 = vsub.f32 %v24313_v23, %v24337_v43  ;;  %21536 = vrcp.f32 %v5805_v61  ;;  %v7318_v48 = vadd.f32 %v24277_v6, %v7239_v62  ;;  %v13615_v16 = vsub.f32 %v24319_v32, %v24344_v38 }
 0x344   :  { %21104 = vmatmul.mubr.f32.vlgmr.msra.gmra.mxu0 %v23163_v7  ;;  %21094 = vmatprep.subr.mxu1 %v24205_v51  ;;  %v7656_v56 = vadd.f32 %v7655_v41, %v7574_v30  ;;  %v7747_v44 = vadd.f32 %v20643_v19, %v7664_v40  ;;  %v20657_v59 = vpop.f32.mrf.mxu0  ;;  %v5791_v29 = vmul.f32 2.0, %v5785_v57  ;;  %v8331_v19 = vmul.f32 %v24347_v63, %v24347_v63 }
 0x345   :  { %21114 = vmatpush3.msra.mxu0 %v24297_v21  ;;  %21095 = vmatpush3.msra.mxu1 %v24205_v51  ;;  %v3022_v42 = vadd.f32 %v25564_v1, %v2595_v37  ;;  %v13609_v35 = vand.u32 4294901760, %v13608_v2  ;;  %v5789_v40 = vadd.f32 0.0001, %v5787_v53  ;;  %v24391_v15 = vsub.f32 %v25565_v22, %v24379_v4 }
 0x346   :  { %21115 = vmatprep.subr.mxu0 %v24301_v9  ;;  %21096 = vmatprep.mubr.f32.mxu1 %v23002_v46  ;;  %v7741_v3 = vadd.f32 %v7740_v28, %v7656_v56  ;;  %v7902_v52 = vpop.f32.mrf.mxu0  ;;  %v8337_v30 = vsub.f32 %v7318_v48, %v8331_v19 }
 0x347   :  { %21116 = vmatpush3.msra.mxu0 %v24301_v9  ;;  %21097 = vmatmul.mubr.f32.vlgmr.msra.gmra.mxu1 %v23183_v50  ;;  %v20650_v11 = vpop.f32.mrf.mxu1 }
 0x348   :  { %21106 = vmatprep.subr.mxu1 %v24197_v5  ;;  %21117 = vmatprep.mubr.f32.mxu0 %v23028_v13  ;;  %v7826_v33 = vadd.f32 %v20650_v11, %v7747_v44  ;;  %v24408_v11 = vand.u32 4294901760, %v24391_v15 }
 0x349   :  { %21127 = vmatprep.subr.mxu0 %v24313_v23  ;;  %21107 = vmatpush3.msra.mxu1 %v24197_v5  ;;  %v7819_v26 = vpop.f32.mrf.mxu1  ;;  %v8353_v5 = vadd.f32 %v8333_v54, %v8331_v19 }
 0x34a   :  { %21118 = vmatmul.mubr.f32.vlgmr.msra.gmra.mxu0 %v23202_v45  ;;  %21108 = vmatprep.subr.mxu1 %v24205_v51  ;;  %v8340_v58 = vsub.f32 %v7826_v33, %v24174_v25  ;;  %v7820_v6 = vadd.f32 %v7819_v26, %v7741_v3  ;;  %v20671_v8 = vpop.f32.mrf.mxu0  ;;  %v25567_v3 = vld [vmem:[#allocation25_spill] sm:$0xff]  ;;  %v14110_v53 = vsub.f32 %v24391_v15, %v24408_v11 }
 0x34b   :  { %21128 = vmatpush3.msra.mxu0 %v24313_v23  ;;  %21109 = vmatpush3.msra.mxu1 %v24205_v51  ;;  %v13616_v51 = vand.u32 4294901760, %v13615_v16  ;;  %v5793_v23 = vadd.f32 0.0009, %v5791_v29  ;;  %v25568_v29 = vld [vmem:[#allocation26_spill] sm:$0xff] }
 0x34c   :  { %21129 = vmatprep.subr.mxu0 %v24319_v32  ;;  %21110 = vmatprep.mubr.f32.mxu1 %v22974_v18  ;;  %v8358_v25 = vadd.f32 %v8340_v58, %v8338_v20  ;;  %v8339_v28 = vsub.f32 %v7820_v6, %v8333_v54  ;;  %v8075_v55 = vpop.f32.mrf.mxu0  ;;  %v24385_v20 = vand.u32 4294901760, %v3022_v42 }
 0x34d   :  { %21130 = vmatpush3.msra.mxu0 %v24319_v32  ;;  %21111 = vmatmul.mubr.f32.vlgmr.msra.gmra.mxu1 %v23163_v7  ;;  %v20664_v34 = vpop.f32.mrf.mxu1  ;;  %v8355_v32 = vadd.f32 0.0001, %v8353_v5 }
 0x34e   :  { %21120 = vmatprep.subr.mxu1 %v13609_v35  ;;  %21131 = vmatprep.mubr.f32.mxu0 %v22988_v36  ;;  %v8360_v39 = vadd.f32 0.0009, %v8358_v25  ;;  %v8357_v10 = vadd.f32 %v8339_v28, %v8337_v30  ;;  %v8000_v47 = vadd.f32 %v20664_v34, %v20657_v59  ;;  %v5795_v59 = vmul.f32 %v5793_v23, %v5789_v40  ;;  %v25571_v34 = vld [vmem:[#allocation94_spill] sm:$0xff] }
 0x34f   :  { %21141 = vmatprep.subr.mxu0 %v24337_v43  ;;  %21121 = vmatpush3.msra.mxu1 %v13609_v35  ;;  %v7993_v14 = vpop.f32.mrf.mxu1  ;;  %v24399_v27 = vsub.f32 %v3022_v42, %v24385_v20  ;;  %v8335_v35 = vmul.f32 %v24332_v17, %v24347_v63 }
 0x350   :  { %21132 = vmatmul.mubr.f32.vlgmr.msra.gmra.mxu0 %v23173_v0  ;;  %21122 = vmatprep.subr.mxu1 %v13616_v51  ;;  %v8362_v61 = vmul.f32 %v8360_v39, %v8356_v49  ;;  %v8359_v41 = vadd.f32 0.0009, %v8357_v10  ;;  %v7994_v62 = vadd.f32 %v7993_v14, %v7902_v52  ;;  %v8083_v56 = vadd.f32 %v20671_v8, %v8000_v47  ;;  %v20685_v44 = vpop.f32.mrf.mxu0  ;;  %v21537_v54 = vpop.eup %21536  ;;  %v25569_v8 = vld [vmem:[#allocation92_spill] sm:$0xff] }
 0x351   :  { %21142 = vmatpush3.msra.mxu0 %v24337_v43  ;;  %21123 = vmatpush3.msra.mxu1 %v13616_v51  ;;  %v1662_v52 = vadd.f32 %v25567_v3, %v25566_v60  ;;  %v24416_v26 = vand.u32 4294901760, %v24399_v27  ;;  %v8344_v51 = vmul.f32 2.0, %v24177_v24  ;;  %v14111_v39 = vand.u32 4294901760, %v14110_v53 }
 0x352   :  { %21143 = vmatprep.subr.mxu0 %v24344_v38  ;;  %21124 = vmatprep.mubr.f32.mxu1 %v22974_v18  ;;  %v8361_v12 = vmul.f32 %v8359_v41, %v8355_v32  ;;  %v8076_v31 = vadd.f32 %v8075_v55, %v7994_v62  ;;  %v8242_v57 = vpop.f32.mrf.mxu0  ;;  %21538 = vrcp.f32 %v8362_v61  ;;  %v25570_v55 = vld [vmem:[#allocation58_spill] sm:$0xff]  ;;  %v8343_v10 = vmul.f32 2.0, %v8335_v35 }
 0x353   :  { %21144 = vmatpush3.msra.mxu0 %v24344_v38  ;;  %21125 = vmatmul.mubr.f32.vlgmr.msra.gmra.mxu1 %v23163_v7  ;;  %v20678_v43 = vpop.f32.mrf.mxu1  ;;  %v5809_v38 = vmul.f32 %v21537_v54, %v5795_v59  ;;  %v2182_v19 = vadd.f32 %v25568_v29, %v1662_v52  ;;  %v14117_v25 = vsub.f32 %v24399_v27, %v24416_v26  ;;  %v5812_v22 = vsel %vm82_vm0, %v25570_v55, 0.0 }
 0x354   :  { %21134 = vmatprep.subr.mxu1 %v24297_v21  ;;  %21145 = vmatprep.mubr.f32.mxu0 %v22974_v18  ;;  %v8166_v37 = vadd.f32 %v20678_v43, %v8083_v56  ;;  %21540 = vrcp.f32 %v8361_v12  ;;  %v8346_v41 = vadd.f32 0.0001, %v8344_v51 }
 0x355   :  { %21155 = vmatprep.subr.mxu0 %v24379_v4  ;;  %21135 = vmatpush3.msra.mxu1 %v24297_v21  ;;  %v8157_v2 = vpop.f32.mrf.mxu1  ;;  %v2667_v1 = vadd.f32 %v25569_v8, %v2182_v19  ;;  %v5811_v5 = vsel %vm82_vm0, %v5809_v38, 0.0  ;;  %v14118_v61 = vand.u32 4294901760, %v14117_v25 }
 0x356   :  { %21146 = vmatmul.mubr.f32.vlgmr.msra.gmra.mxu0 %v23163_v7  ;;  %21136 = vmatprep.subr.mxu1 %v24301_v9  ;;  %v8158_v48 = vadd.f32 %v8157_v2, %v8076_v31  ;;  %v8249_v33 = vadd.f32 %v20685_v44, %v8166_v37  ;;  %v20699_v16 = vpop.f32.mrf.mxu0 }
 0x357   :  { %21156 = vmatpush3.msra.mxu0 %v24379_v4  ;;  %21137 = vmatpush3.msra.mxu1 %v24301_v9  ;;  %v3094_v49 = vadd.f32 %v25571_v34, %v2667_v1 }
 0x358   :  { %21157 = vmatprep.subr.mxu0 %v24385_v20  ;;  %21138 = vmatprep.mubr.f32.mxu1 %v23002_v46  ;;  %v8243_v58 = vadd.f32 %v8242_v57, %v8158_v48  ;;  %v24420_v6 = vpop.f32.mrf.mxu0  ;;  %v8345_v57 = vadd.f32 0.0001, %v8343_v10  ;;  %v25573_v48 = vld [vmem:[#allocation45_spill] sm:$0xff] }
 0x359   :  { %21158 = vmatpush3.msra.mxu0 %v24385_v20  ;;  %21139 = vmatmul.mubr.f32.vlgmr.msra.gmra.mxu1 %v23183_v50  ;;  %v20692_v42 = vpop.f32.mrf.mxu1  ;;  %v24455_v59 = vand.u32 4294901760, %v3094_v49 }
 0x35a   :  { %21148 = vmatprep.subr.mxu1 %v24297_v21  ;;  %21159 = vmatprep.mubr.f32.mxu0 %v23028_v13  ;;  %v8328_v30 = vadd.f32 %v20692_v42, %v8249_v33  ;;  %v25574_v33 = vld [vmem:[#allocation44_spill] sm:$0xff] }
 0x35b   :  { %21169 = vmatprep.subr.mxu0 %v24391_v15  ;;  %21149 = vmatpush3.msra.mxu1 %v24297_v21  ;;  %v8321_v28 = vpop.f32.mrf.mxu1  ;;  %v5813_v21 = vadd.f32 %v5812_v22, %v5811_v5  ;;  %v14617_v19 = vsub.f32 %v3094_v49, %v24455_v59 }
 0x35c   :  { %21160 = vmatmul.mubr.f32.vlgmr.msra.gmra.mxu0 %v23202_v45  ;;  %21150 = vmatprep.subr.mxu1 %v24301_v9  ;;  %v8342_v17 = vsub.f32 %v8328_v30, %v24177_v24  ;;  %v8322_v63 = vadd.f32 %v8321_v28, %v8243_v58  ;;  %v20713_v23 = vpop.f32.mrf.mxu0  ;;  %v25572_v24 = vld [vmem:[#allocation93_spill] sm:$0xff]  ;;  %v25575_v30 = vld [vmem:[#allocation46_spill] sm:$0xff] }
 0x35d   :  { %21170 = vmatpush3.msra.mxu0 %v24391_v15  ;;  %21151 = vmatpush3.msra.mxu1 %v24301_v9  ;;  %v24450_v14 = vand.u32 4294901760, %v25572_v24  ;;  %v5814_v12 = vrot.slane %v5813_v21, 4  ;;  %v14618_v22 = vand.u32 4294901760, %v14617_v19 }
 0x35e   :  { %21171 = vmatprep.subr.mxu0 %v24399_v27  ;;  %21152 = vmatprep.mubr.f32.mxu1 %v22974_v18  ;;  %v8348_v47 = vmul.f32 2.0, %v8342_v17  ;;  %v8341_v40 = vsub.f32 %v8322_v63, %v8335_v35  ;;  %v24447_v32 = vpop.f32.mrf.mxu0  ;;  %v25576_v17 = vld [vmem:[#allocation100_spill] sm:$0xff] }
 0x35f   :  { %21172 = vmatpush3.msra.mxu0 %v24399_v27  ;;  %21153 = vmatmul.mubr.f32.vlgmr.msra.gmra.mxu1 %v23163_v7  ;;  %v20706_v9 = vpop.f32.mrf.mxu1  ;;  %v21539_v15 = vpop.eup %21538  ;;  %v14610_v37 = vsub.f32 %v25572_v24, %v24450_v14  ;;  %v5815_v29 = vadd.f32 %v5814_v12, %v5813_v21  ;;  %v25578_v12 = vld [vmem:[#allocation101_spill] sm:$0xff] }
 0x360   :  { %21162 = vmatprep.subr.mxu1 %v14111_v39  ;;  %21173 = vmatprep.mubr.f32.mxu0 %v22988_v36  ;;  %v8350_v62 = vadd.f32 0.0009, %v8348_v47  ;;  %v8347_v56 = vmul.f32 2.0, %v8341_v40  ;;  %v8548_v44 = vadd.f32 %v20706_v9, %v20699_v16  ;;  %v1746_v16 = vadd.f32 %v25574_v33, %v25573_v48 }
 0x361   :  { %21183 = vmatprep.subr.mxu0 %v24408_v11  ;;  %21163 = vmatpush3.msra.mxu1 %v14111_v39  ;;  %v24458_v31 = vpop.f32.mrf.mxu1  ;;  %v21541_v43 = vpop.eup %21540  ;;  %v5816_v28 = vrot.slane %v5815_v29, 2  ;;  %v14619_v40 = vsub.f32 %v14617_v19, %v14618_v22 }
 0x362   :  { %21174 = vmatmul.mubr.f32.vlgmr.msra.gmra.mxu0 %v23173_v0  ;;  %21164 = vmatprep.subr.mxu1 %v14118_v61  ;;  %v8352_v60 = vmul.f32 %v8350_v62, %v8346_v41  ;;  %v8349_v3 = vadd.f32 0.0009, %v8347_v56  ;;  %v8631_v52 = vadd.f32 %v20713_v23, %v8548_v44  ;;  %v20727_v27 = vpop.f32.mrf.mxu0  ;;  %v2278_v25 = vadd.f32 %v25575_v30, %v1746_v16 }
 0x363   :  { %21184 = vmatpush3.msra.mxu0 %v24408_v11  ;;  %21165 = vmatpush3.msra.mxu1 %v14118_v61  ;;  %v5817_v47 = vadd.f32 %v5816_v28, %v5815_v29  ;;  %v25577_v61 = vld [vmem:[#allocation102_spill] sm:$0xff] }
 0x364   :  { %21185 = vmatprep.subr.mxu0 %v24416_v26  ;;  %21166 = vmatprep.mubr.f32.mxu1 %v22974_v18  ;;  %v8366_v54 = vmul.f32 %v21539_v15, %v8352_v60  ;;  %v8351_v2 = vmul.f32 %v8349_v3, %v8345_v57  ;;  %v24466_v38 = vpop.f32.mrf.mxu0  ;;  %v2739_v63 = vadd.f32 %v25576_v17, %v2278_v25  ;;  %v24505_v57 = vand.u32 4294901760, %v25578_v12 }
 0x365   :  { %21186 = vmatpush3.msra.mxu0 %v24416_v26  ;;  %21167 = vmatmul.mubr.f32.vlgmr.msra.gmra.mxu1 %v23163_v7  ;;  %v20720_v11 = vpop.f32.mrf.mxu1  ;;  %v14611_v26 = vand.u32 4294901760, %v14610_v37  ;;  %v5818_v44 = vrot.slane %v5817_v47, 1  ;;  %v14620_v60 = vand.u32 4294901760, %v14619_v40 }
 0x366   :  { %21176 = vmatprep.subr.mxu1 %v24379_v4  ;;  %21187 = vmatprep.mubr.f32.mxu0 %v22974_v18  ;;  %v8365_v58 = vmul.f32 %v21541_v43, %v8351_v2  ;;  %v8714_v8 = vadd.f32 %v20720_v11, %v8631_v52  ;;  %v8368_v42 = vsel %vm82_vm0, %v8366_v54, 0.0  ;;  %v3166_v9 = vadd.f32 %v25577_v61, %v2739_v63 }
 0x367   :  { %21197 = vmatprep.subr.mxu0 %v24450_v14  ;;  %21177 = vmatpush3.msra.mxu1 %v24379_v4  ;;  %v24477_v1 = vpop.f32.mrf.mxu1  ;;  %v14612_v49 = vsub.f32 %v14610_v37, %v14611_v26  ;;  %v5819_v2 = vadd.f32 %v5818_v44, %v5817_v47  ;;  %v15112_v33 = vsub.f32 %v25578_v12, %v24505_v57 }
 0x368   :  { %21188 = vmatmul.mubr.f32.vlgmr.msra.gmra.mxu0 %v23163_v7  ;;  %21178 = vmatprep.subr.mxu1 %v24385_v20  ;;  %v8367_v53 = vsel %vm82_vm0, %v8365_v58, 0.0  ;;  %v8797_v5 = vadd.f32 %v20727_v27, %v8714_v8  ;;  %v20741_v35 = vpop.f32.mrf.mxu0  ;;  %v24508_v3 = vand.u32 4294901760, %v3166_v9  ;;  %v25579_v8 = vld [vmem:[#allocation63_spill] sm:$0xff] }
 0x369   :  { %21198 = vmatpush3.msra.mxu0 %v24450_v14  ;;  %21179 = vmatpush3.msra.mxu1 %v24385_v20  ;;  %v8369_v55 = vadd.f32 %v8368_v42, %v8367_v53 }
 0x36a   :  { %21199 = vmatprep.subr.mxu0 %v24455_v59  ;;  %21180 = vmatprep.mubr.f32.mxu1 %v23002_v46  ;;  %v8952_v51 = vpop.f32.mrf.mxu0  ;;  %v15119_v11 = vsub.f32 %v3166_v9, %v24508_v3 }
 0x36b   :  { %21200 = vmatpush3.msra.mxu0 %v24455_v59  ;;  %21181 = vmatmul.mubr.f32.vlgmr.msra.gmra.mxu1 %v23183_v50  ;;  %v8370_v23 = vrot.slane %v8369_v55, 4  ;;  %v20734_v34 = vpop.f32.mrf.mxu1 }
 0x36c   :  { %21190 = vmatprep.subr.mxu1 %v24379_v4  ;;  %21201 = vmatprep.mubr.f32.mxu0 %v23028_v13  ;;  %v24493_v21 = vadd.f32 %v20734_v34, %v8797_v5  ;;  %v25582_v34 = vld [vmem:[#allocation109_spill] sm:$0xff] }
 0x36d   :  { %21211 = vmatprep.subr.mxu0 %v14610_v37  ;;  %21191 = vmatpush3.msra.mxu1 %v24379_v4  ;;  %v8371_v39 = vadd.f32 %v8370_v23, %v8369_v55  ;;  %v24496_v10 = vpop.f32.mrf.mxu1  ;;  %v14613_v4 = vand.u32 4294901760, %v14612_v49  ;;  %v15120_v55 = vand.u32 4294901760, %v15119_v11 }
 0x36e   :  { %21202 = vmatmul.mubr.f32.vlgmr.msra.gmra.mxu0 %v23202_v45  ;;  %21192 = vmatprep.subr.mxu1 %v24385_v20  ;;  %v20755_v24 = vpop.f32.mrf.mxu0 }
 0x36f   :  { %21212 = vmatpush3.msra.mxu0 %v14610_v37  ;;  %21193 = vmatpush3.msra.mxu1 %v24385_v20  ;;  %v8372_v41 = vrot.slane %v8371_v39, 2  ;;  %v15121_v40 = vsub.f32 %v15119_v11, %v15120_v55 }
 0x370   :  { %21213 = vmatprep.subr.mxu0 %v14617_v19  ;;  %21194 = vmatprep.mubr.f32.mxu1 %v22974_v18  ;;  %v9125_v62 = vpop.f32.mrf.mxu0 }
 0x371   :  { %21214 = vmatpush3.msra.mxu0 %v14617_v19  ;;  %21195 = vmatmul.mubr.f32.vlgmr.msra.gmra.mxu1 %v23163_v7  ;;  %v20748_v56 = vpop.f32.mrf.mxu1  ;;  %v8373_v15 = vadd.f32 %v8372_v41, %v8371_v39 }
 0x372   :  { %21204 = vmatprep.subr.mxu1 %v14613_v4  ;;  %21215 = vmatprep.mubr.f32.mxu0 %v22988_v36  ;;  %v9050_v20 = vadd.f32 %v20748_v56, %v20741_v35  ;;  %v15113_v35 = vand.u32 4294901760, %v15112_v33 }
 0x373   :  { %21225 = vmatprep.subr.mxu0 %v14611_v26  ;;  %21205 = vmatpush3.msra.mxu1 %v14613_v4  ;;  %v9043_v52 = vpop.f32.mrf.mxu1  ;;  %v8374_v27 = vrot.slane %v8373_v15, 1 }
 0x374   :  { %21216 = vmatmul.mubr.f32.vlgmr.msra.gmra.mxu0 %v23173_v0  ;;  %21206 = vmatprep.subr.mxu1 %v14620_v60  ;;  %v9044_v43 = vadd.f32 %v9043_v52, %v8952_v51  ;;  %v9133_v37 = vadd.f32 %v20755_v24, %v9050_v20  ;;  %v20769_v54 = vpop.f32.mrf.mxu0  ;;  %v15114_v39 = vsub.f32 %v15112_v33, %v15113_v35 }
 0x375   :  { %21226 = vmatpush3.msra.mxu0 %v14611_v26  ;;  %21207 = vmatpush3.msra.mxu1 %v14620_v60  ;;  %v8375_v48 = vadd.f32 %v8374_v27, %v8373_v15  ;;  %v25580_v26 = vld [vmem:[#allocation72_spill] sm:$0xff]  ;;  %v24539_v24 = vmul.f32 %v24493_v21, %v24493_v21  ;;  %v25584_v60 = vld [vmem:[#allocation110_spill] sm:$0xff] }
 0x376   :  { %21227 = vmatprep.subr.mxu0 %v14618_v22  ;;  %21208 = vmatprep.mubr.f32.mxu1 %v22974_v18  ;;  %v9126_v16 = vadd.f32 %v9125_v62, %v9044_v43  ;;  %v9292_v29 = vpop.f32.mrf.mxu0  ;;  %v1830_v42 = vadd.f32 %v25580_v26, %v25579_v8  ;;  %v15115_v44 = vand.u32 4294901760, %v15114_v39  ;;  %v24559_v20 = vand.u32 4294901760, %v25584_v60 }
 0x377   :  { %21228 = vmatpush3.msra.mxu0 %v14618_v22  ;;  %21209 = vmatmul.mubr.f32.vlgmr.msra.gmra.mxu1 %v23163_v7  ;;  %v20762_v19 = vpop.f32.mrf.mxu1  ;;  %v24516_v58 = vadd.f32 %v8375_v48, %v5819_v2  ;;  %v25581_v22 = vld [vmem:[#allocation76_spill] sm:$0xff] }
 0x378   :  { %21218 = vmatprep.subr.mxu1 %v24450_v14  ;;  %21229 = vmatprep.mubr.f32.mxu0 %v22974_v18  ;;  %v9216_v53 = vadd.f32 %v20762_v19, %v9133_v37  ;;  %v2374_v51 = vadd.f32 %v25581_v22, %v1830_v42  ;;  %v15614_v48 = vsub.f32 %v25584_v60, %v24559_v20  ;;  %v25590_v60 = vld [vmem:[#allocation83_spill] sm:$0xff] }
 0x379   :  { %21239 = vmatprep.subr.mxu0 %v24505_v57  ;;  %21219 = vmatpush3.msra.mxu1 %v24450_v14  ;;  %v9207_v5 = vpop.f32.mrf.mxu1 }
 0x37a   :  { %21230 = vmatmul.mubr.f32.vlgmr.msra.gmra.mxu0 %v23163_v7  ;;  %21220 = vmatprep.subr.mxu1 %v24455_v59  ;;  %v9208_v30 = vadd.f32 %v9207_v5, %v9126_v16  ;;  %v9299_v25 = vadd.f32 %v20769_v54, %v9216_v53  ;;  %v20783_v28 = vpop.f32.mrf.mxu0  ;;  %v2811_v49 = vadd.f32 %v25582_v34, %v2374_v51  ;;  %v15615_v5 = vand.u32 4294901760, %v15614_v48 }
 0x37b   :  { %21240 = vmatpush3.msra.mxu0 %v24505_v57  ;;  %21221 = vmatpush3.msra.mxu1 %v24455_v59  ;;  %v8542_v34 = vadd.f32 %v24458_v31, %v24420_v6 }
 0x37c   :  { %21241 = vmatprep.subr.mxu0 %v24508_v3  ;;  %21222 = vmatprep.mubr.f32.mxu1 %v23002_v46  ;;  %v9293_v17 = vadd.f32 %v9292_v29, %v9208_v30  ;;  %v9454_v63 = vpop.f32.mrf.mxu0  ;;  %v25585_v29 = vld [vmem:[#allocation5_spill] sm:$0xff]  ;;  %v15616_v39 = vsub.f32 %v15614_v48, %v15615_v5 }
 0x37d   :  { %21242 = vmatpush3.msra.mxu0 %v24508_v3  ;;  %21223 = vmatmul.mubr.f32.vlgmr.msra.gmra.mxu1 %v23183_v50  ;;  %v20776_v23 = vpop.f32.mrf.mxu1 }
 0x37e   :  { %21232 = vmatprep.subr.mxu1 %v24450_v14  ;;  %21243 = vmatprep.mubr.f32.mxu0 %v23028_v13  ;;  %v9378_v47 = vadd.f32 %v20776_v23, %v9299_v25 }
 0x37f   :  { %21253 = vmatprep.subr.mxu0 %v15112_v33  ;;  %21233 = vmatpush3.msra.mxu1 %v24450_v14  ;;  %v9371_v61 = vpop.f32.mrf.mxu1  ;;  %v25583_v14 = vld [vmem:[#allocation14_spill] sm:$0xff] }
 0x380   :  { %21244 = vmatmul.mubr.f32.vlgmr.msra.gmra.mxu0 %v23202_v45  ;;  %21234 = vmatprep.subr.mxu1 %v24455_v59  ;;  %v24543_v9 = vmul.f32 %v9378_v47, %v9378_v47  ;;  %v24546_v41 = vmul.f32 %v9378_v47, %v24493_v21  ;;  %v24548_v4 = vadd.f32 %v9371_v61, %v9293_v17  ;;  %v20797_v62 = vpop.f32.mrf.mxu0 }
 0x381   :  { %21254 = vmatpush3.msra.mxu0 %v15112_v33  ;;  %21235 = vmatpush3.msra.mxu1 %v24455_v59  ;;  %v3238_v56 = vadd.f32 %v25583_v14, %v2811_v49  ;;  %v15122_v59 = vand.u32 4294901760, %v15121_v40  ;;  %v25589_v14 = vld [vmem:[#allocation84_spill] sm:$0xff] }
 0x382   :  { %21255 = vmatprep.subr.mxu0 %v15119_v11  ;;  %21236 = vmatprep.mubr.f32.mxu1 %v22974_v18  ;;  %v24555_v15 = vadd.f32 %v24543_v9, %v24539_v24  ;;  %v9627_v12 = vpop.f32.mrf.mxu0 }
 0x383   :  { %21256 = vmatpush3.msra.mxu0 %v15119_v11  ;;  %21237 = vmatmul.mubr.f32.vlgmr.msra.gmra.mxu1 %v23163_v7  ;;  %v20790_v21 = vpop.f32.mrf.mxu1  ;;  %v24562_v43 = vand.u32 4294901760, %v3238_v56  ;;  %v25586_v11 = vld [vmem:[#allocation73_spill] sm:$0xff] }
 0x384   :  { %21246 = vmatprep.subr.mxu1 %v15115_v44  ;;  %21257 = vmatprep.mubr.f32.mxu0 %v22988_v36  ;;  %v9552_v52 = vadd.f32 %v20790_v21, %v20783_v28  ;;  %v1508_v19 = vadd.f32 %v25586_v11, %v25585_v29  ;;  %v25587_v28 = vld [vmem:[#allocation74_spill] sm:$0xff]  ;;  %v25591_v11 = vld [vmem:[#allocation23_spill] sm:$0xff] }
 0x385   :  { %21267 = vmatprep.subr.mxu0 %v15113_v35  ;;  %21247 = vmatpush3.msra.mxu1 %v15115_v44  ;;  %v9545_v27 = vpop.f32.mrf.mxu1  ;;  %v15621_v26 = vsub.f32 %v3238_v56, %v24562_v43  ;;  %v8624_v44 = vadd.f32 %v24447_v32, %v8542_v34 }
 0x386   :  { %21258 = vmatmul.mubr.f32.vlgmr.msra.gmra.mxu0 %v23173_v0  ;;  %21248 = vmatprep.subr.mxu1 %v15122_v59  ;;  %v9546_v37 = vadd.f32 %v9545_v27, %v9454_v63  ;;  %v20811_v54 = vpop.f32.mrf.mxu0  ;;  %v9635_v2 = vadd.f32 %v20797_v62, %v9552_v52  ;;  %v25588_v63 = vld [vmem:[#allocation13_spill] sm:$0xff] }
 0x387   :  { %21268 = vmatpush3.msra.mxu0 %v15113_v35  ;;  %21249 = vmatpush3.msra.mxu1 %v15122_v59  ;;  %v15622_v22 = vand.u32 4294901760, %v15621_v26  ;;  %v24605_v59 = vand.u32 4294901760, %v25590_v60  ;;  %v8706_v32 = vadd.f32 %v24477_v1, %v8624_v44 }
 0x388   :  { %21269 = vmatprep.subr.mxu0 %v15120_v55  ;;  %21250 = vmatprep.mubr.f32.mxu1 %v22974_v18  ;;  %v9628_v33 = vadd.f32 %v9627_v12, %v9546_v37  ;;  %v9794_v16 = vpop.f32.mrf.mxu0 }
 0x389   :  { %21270 = vmatpush3.msra.mxu0 %v15120_v55  ;;  %21251 = vmatmul.mubr.f32.vlgmr.msra.gmra.mxu1 %v23163_v7  ;;  %v20804_v8 = vpop.f32.mrf.mxu1  ;;  %v2006_v55 = vadd.f32 %v25587_v28, %v1508_v19  ;;  %v15623_v61 = vsub.f32 %v15621_v26, %v15622_v22  ;;  %v25592_v19 = vld [vmem:[#allocation11_spill] sm:$0xff] }
 0x38a   :  { %21260 = vmatprep.subr.mxu1 %v24505_v57  ;;  %21271 = vmatprep.mubr.f32.mxu0 %v22974_v18  ;;  %v9718_v42 = vadd.f32 %v20804_v8, %v9635_v2  ;;  %v1592_v1 = vadd.f32 %v25592_v19, %v25591_v11  ;;  %v25593_v28 = vld [vmem:[#allocation15_spill] sm:$0xff] }
 0x38b   :  { %21281 = vmatprep.subr.mxu0 %v24559_v20  ;;  %21261 = vmatpush3.msra.mxu1 %v24505_v57  ;;  %v9709_v53 = vpop.f32.mrf.mxu1  ;;  %v2535_v23 = vadd.f32 %v25588_v63, %v2006_v55  ;;  %v15624_v52 = vand.u32 4294901760, %v15623_v61 }
 0x38c   :  { %21272 = vmatmul.mubr.f32.vlgmr.msra.gmra.mxu0 %v23163_v7  ;;  %21262 = vmatprep.subr.mxu1 %v24508_v3  ;;  %v9710_v35 = vadd.f32 %v9709_v53, %v9628_v33  ;;  %v9801_v30 = vadd.f32 %v20811_v54, %v9718_v42  ;;  %v20825_v25 = vpop.f32.mrf.mxu0  ;;  %v16162_v33 = vsub.f32 %v25590_v60, %v24605_v59 }
 0x38d   :  { %21282 = vmatpush3.msra.mxu0 %v24559_v20  ;;  %21263 = vmatpush3.msra.mxu1 %v24508_v3  ;;  %v2962_v56 = vadd.f32 %v25589_v14, %v2535_v23  ;;  %v2102_v55 = vadd.f32 %v25593_v28, %v1592_v1  ;;  %v25594_v23 = vld [vmem:[#allocation24_spill] sm:$0xff] }
 0x38e   :  { %21283 = vmatprep.subr.mxu0 %v24562_v43  ;;  %21264 = vmatprep.mubr.f32.mxu1 %v23002_v46  ;;  %v9795_v51 = vadd.f32 %v9794_v16, %v9710_v35  ;;  %v9956_v17 = vpop.f32.mrf.mxu0  ;;  %v24626_v35 = vand.u32 4294901760, %v16162_v33 }
 0x38f   :  { %21284 = vmatpush3.msra.mxu0 %v24562_v43  ;;  %21265 = vmatmul.mubr.f32.vlgmr.msra.gmra.mxu1 %v23183_v50  ;;  %v20818_v49 = vpop.f32.mrf.mxu1  ;;  %v2607_v34 = vadd.f32 %v25594_v23, %v2102_v55 }
 0x390   :  { %21274 = vmatprep.subr.mxu1 %v24505_v57  ;;  %21285 = vmatprep.mubr.f32.mxu0 %v23028_v13  ;;  %v24590_v47 = vadd.f32 %v20818_v49, %v9801_v30  ;;  %v10889_v49 = vmul.f32 %v24548_v4, %v24548_v4 }
 0x391   :  { %21295 = vmatprep.subr.mxu0 %v15614_v48  ;;  %21275 = vmatpush3.msra.mxu1 %v24505_v57  ;;  %v9873_v40 = vpop.f32.mrf.mxu1  ;;  %v15617_v57 = vand.u32 4294901760, %v15616_v39 }
 0x392   :  { %21286 = vmatmul.mubr.f32.vlgmr.msra.gmra.mxu0 %v23202_v45  ;;  %21276 = vmatprep.subr.mxu1 %v24508_v3  ;;  %v10894_v6 = vsub.f32 %v24590_v47, %v24539_v24  ;;  %v24597_v31 = vadd.f32 %v9873_v40, %v9795_v51  ;;  %v20839_v62 = vpop.f32.mrf.mxu0 }
 0x393   :  { %21296 = vmatpush3.msra.mxu0 %v15614_v48  ;;  %21277 = vmatpush3.msra.mxu1 %v24508_v3  ;;  %v24608_v3 = vand.u32 4294901760, %v2962_v56 }
 0x394   :  { %21297 = vmatprep.subr.mxu0 %v15621_v26  ;;  %21278 = vmatprep.mubr.f32.mxu1 %v22974_v18  ;;  %v10129_v12 = vpop.f32.mrf.mxu0 }
 0x395   :  { %21298 = vmatpush3.msra.mxu0 %v15621_v26  ;;  %21279 = vmatmul.mubr.f32.vlgmr.msra.gmra.mxu1 %v23163_v7  ;;  %v20832_v21 = vpop.f32.mrf.mxu1  ;;  %v16169_v8 = vsub.f32 %v2962_v56, %v24608_v3  ;;  %v8791_v26 = vadd.f32 %v24466_v38, %v8706_v32 }
 0x396   :  { %21288 = vmatprep.subr.mxu1 %v15617_v57  ;;  %21299 = vmatprep.mubr.f32.mxu0 %v22988_v36  ;;  %v10054_v27 = vadd.f32 %v20832_v21, %v20825_v25 }
 0x397   :  { %21309 = vmatprep.subr.mxu0 %v15615_v5  ;;  %21289 = vmatpush3.msra.mxu1 %v15617_v57  ;;  %v10047_v37 = vpop.f32.mrf.mxu1  ;;  %v24634_v51 = vadd.f32 %v24496_v10, %v8791_v26  ;;  %v16164_v10 = vsub.f32 %v16162_v33, %v24626_v35 }
 0x398   :  { %21300 = vmatmul.mubr.f32.vlgmr.msra.gmra.mxu0 %v23173_v0  ;;  %21290 = vmatprep.subr.mxu1 %v15624_v52  ;;  %v10048_v54 = vadd.f32 %v10047_v37, %v9956_v17  ;;  %v10137_v2 = vadd.f32 %v20839_v62, %v10054_v27  ;;  %v20853_v48 = vpop.f32.mrf.mxu0  ;;  %v25596_v37 = vld [vmem:[#allocation89_spill] sm:$0xff] }
 0x399   :  { %21310 = vmatpush3.msra.mxu0 %v15615_v5  ;;  %21291 = vmatpush3.msra.mxu1 %v15624_v52  ;;  %v10887_v62 = vmul.f32 %v24634_v51, %v24634_v51  ;;  %v16165_v60 = vand.u32 4294901760, %v16164_v10 }
 0x39a   :  { %21311 = vmatprep.subr.mxu0 %v15622_v22  ;;  %21292 = vmatprep.mubr.f32.mxu1 %v22974_v18  ;;  %v10130_v16 = vadd.f32 %v10129_v12, %v10048_v54  ;;  %v10296_v29 = vpop.f32.mrf.mxu0  ;;  %v25595_v12 = vld [vmem:[#allocation90_spill] sm:$0xff]  ;;  %v24661_v54 = vand.u32 4294901760, %v25596_v37 }
 0x39b   :  { %21312 = vmatpush3.msra.mxu0 %v15622_v22  ;;  %21293 = vmatmul.mubr.f32.vlgmr.msra.gmra.mxu1 %v23163_v7  ;;  %v20846_v42 = vpop.f32.mrf.mxu1  ;;  %v24631_v22 = vand.u32 4294901760, %v16169_v8  ;;  %v3034_v21 = vadd.f32 %v25595_v12, %v2607_v34  ;;  %v10893_v52 = vsub.f32 %v24597_v31, %v10887_v62  ;;  %v25599_v34 = vld [vmem:[#allocation31_spill] sm:$0xff] }
 0x39c   :  { %21302 = vmatprep.subr.mxu1 %v24559_v20  ;;  %21313 = vmatprep.mubr.f32.mxu0 %v22974_v18  ;;  %v10220_v53 = vadd.f32 %v20846_v42, %v10137_v2 }
 0x39d   :  { %21323 = vmatprep.subr.mxu0 %v24605_v59  ;;  %21303 = vmatpush3.msra.mxu1 %v24559_v20  ;;  %v10211_v5 = vpop.f32.mrf.mxu1  ;;  %v16171_v61 = vsub.f32 %v16169_v8, %v24631_v22  ;;  %v24666_v24 = vand.u32 4294901760, %v3034_v21 }
 0x39e   :  { %21314 = vmatmul.mubr.f32.vlgmr.msra.gmra.mxu0 %v23163_v7  ;;  %21304 = vmatprep.subr.mxu1 %v24562_v43  ;;  %v10212_v30 = vadd.f32 %v10211_v5, %v10130_v16  ;;  %v10303_v25 = vadd.f32 %v20853_v48, %v10220_v53  ;;  %v20867_v38 = vpop.f32.mrf.mxu0  ;;  %v10912_v48 = vadd.f32 0.0001, %v24555_v15  ;;  %v16664_v15 = vsub.f32 %v25596_v37, %v24661_v54  ;;  %v25597_v5 = vld [vmem:[#allocation35_spill] sm:$0xff] }
 0x39f   :  { %21324 = vmatpush3.msra.mxu0 %v24605_v59  ;;  %21305 = vmatpush3.msra.mxu1 %v24562_v43 }
 0x3a0   :  { %21325 = vmatprep.subr.mxu0 %v24608_v3  ;;  %21306 = vmatprep.mubr.f32.mxu1 %v23002_v46  ;;  %v10297_v17 = vadd.f32 %v10296_v29, %v10212_v30  ;;  %v10458_v63 = vpop.f32.mrf.mxu0  ;;  %v25598_v30 = vld [vmem:[#allocation27_spill] sm:$0xff] }
 0x3a1   :  { %21326 = vmatpush3.msra.mxu0 %v24608_v3  ;;  %21307 = vmatmul.mubr.f32.vlgmr.msra.gmra.mxu1 %v23183_v50  ;;  %v20860_v39 = vpop.f32.mrf.mxu1 }
 0x3a2   :  { %21316 = vmatprep.subr.mxu1 %v24559_v20  ;;  %21327 = vmatprep.mubr.f32.mxu0 %v23028_v13  ;;  %v10382_v40 = vadd.f32 %v20860_v39, %v10303_v25  ;;  %v1676_v25 = vadd.f32 %v25598_v30, %v25597_v5 }
 0x3a3   :  { %21337 = vmatprep.subr.mxu0 %v16162_v33  ;;  %21317 = vmatpush3.msra.mxu1 %v24559_v20  ;;  %v10375_v14 = vpop.f32.mrf.mxu1  ;;  %v10909_v20 = vadd.f32 %v10889_v49, %v10887_v62 }
 0x3a4   :  { %21328 = vmatmul.mubr.f32.vlgmr.msra.gmra.mxu0 %v23202_v45  ;;  %21318 = vmatprep.subr.mxu1 %v24562_v43  ;;  %v10896_v56 = vsub.f32 %v10382_v40, %v24543_v9  ;;  %v10376_v44 = vadd.f32 %v10375_v14, %v10297_v17  ;;  %v20881_v57 = vpop.f32.mrf.mxu0  ;;  %v24686_v17 = vand.u32 4294901760, %v16664_v15  ;;  %v10891_v14 = vmul.f32 %v24548_v4, %v24634_v51 }
 0x3a5   :  { %21338 = vmatpush3.msra.mxu0 %v16162_v33  ;;  %21319 = vmatpush3.msra.mxu1 %v24562_v43  ;;  %v16172_v43 = vand.u32 4294901760, %v16171_v61  ;;  %v10911_v47 = vadd.f32 0.0001, %v10909_v20  ;;  %v25600_v61 = vld [vmem:[#allocation37_spill] sm:$0xff]  ;;  %v10900_v4 = vmul.f32 2.0, %v24546_v41 }
 0x3a6   :  { %21339 = vmatprep.subr.mxu0 %v16169_v8  ;;  %21320 = vmatprep.mubr.f32.mxu1 %v22974_v18  ;;  %v10914_v27 = vadd.f32 %v10896_v56, %v10894_v6  ;;  %v10895_v32 = vsub.f32 %v10376_v44, %v10889_v49  ;;  %v10631_v9 = vpop.f32.mrf.mxu0  ;;  %v2198_v49 = vadd.f32 %v25599_v34, %v1676_v25 }
 0x3a7   :  { %21340 = vmatpush3.msra.mxu0 %v16169_v8  ;;  %21321 = vmatmul.mubr.f32.vlgmr.msra.gmra.mxu1 %v23163_v7  ;;  %v20874_v2 = vpop.f32.mrf.mxu1  ;;  %v16666_v44 = vsub.f32 %v16664_v15, %v24686_v17 }
 0x3a8   :  { %21330 = vmatprep.subr.mxu1 %v16165_v60  ;;  %21341 = vmatprep.mubr.f32.mxu0 %v22988_v36  ;;  %v10916_v31 = vadd.f32 0.0009, %v10914_v27  ;;  %v10913_v33 = vadd.f32 %v10895_v32, %v10893_v52  ;;  %v10556_v16 = vadd.f32 %v20874_v2, %v20867_v38  ;;  %v16671_v38 = vsub.f32 %v3034_v21, %v24666_v24  ;;  %v25601_v52 = vld [vmem:[#allocation96_spill] sm:$0xff]  ;;  %v25602_v2 = vld [vmem:[#allocation95_spill] sm:$0xff] }
 0x3a9   :  { %21351 = vmatprep.subr.mxu0 %v24626_v35  ;;  %21331 = vmatpush3.msra.mxu1 %v16165_v60  ;;  %v10549_v6 = vpop.f32.mrf.mxu1  ;;  %v2679_v62 = vadd.f32 %v25600_v61, %v2198_v49  ;;  %v10899_v32 = vmul.f32 2.0, %v10891_v14 }
 0x3aa   :  { %21342 = vmatmul.mubr.f32.vlgmr.msra.gmra.mxu0 %v23173_v0  ;;  %21332 = vmatprep.subr.mxu1 %v16172_v43  ;;  %v10918_v29 = vmul.f32 %v10916_v31, %v10912_v48  ;;  %v10915_v11 = vadd.f32 0.0009, %v10913_v33  ;;  %v10550_v19 = vadd.f32 %v10549_v6, %v10458_v63  ;;  %v10639_v1 = vadd.f32 %v20881_v57, %v10556_v16  ;;  %v20895_v8 = vpop.f32.mrf.mxu0 }
 0x3ab   :  { %21352 = vmatpush3.msra.mxu0 %v24626_v35  ;;  %21333 = vmatpush3.msra.mxu1 %v16172_v43  ;;  %v24691_v39 = vand.u32 4294901760, %v16671_v38  ;;  %v3106_v27 = vadd.f32 %v25601_v52, %v2679_v62  ;;  %v24713_v48 = vand.u32 4294901760, %v25602_v2 }
 0x3ac   :  { %21353 = vmatprep.subr.mxu0 %v24631_v22  ;;  %21334 = vmatprep.mubr.f32.mxu1 %v22974_v18  ;;  %v10917_v26 = vmul.f32 %v10915_v11, %v10911_v47  ;;  %v10632_v42 = vadd.f32 %v10631_v9, %v10550_v19  ;;  %v10798_v53 = vpop.f32.mrf.mxu0  ;;  %21542 = vrcp.f32 %v10918_v29  ;;  %v10901_v11 = vadd.f32 0.0001, %v10899_v32 }
 0x3ad   :  { %21354 = vmatpush3.msra.mxu0 %v24631_v22  ;;  %21335 = vmatmul.mubr.f32.vlgmr.msra.gmra.mxu1 %v23163_v7  ;;  %v20888_v35 = vpop.f32.mrf.mxu1  ;;  %v16673_v12 = vsub.f32 %v16671_v38, %v24691_v39  ;;  %v24717_v29 = vand.u32 4294901760, %v3106_v27  ;;  %v17166_v5 = vsub.f32 %v25602_v2, %v24713_v48 }
 0x3ae   :  { %21344 = vmatprep.subr.mxu1 %v24605_v59  ;;  %21355 = vmatprep.mubr.f32.mxu0 %v22974_v18  ;;  %v10722_v28 = vadd.f32 %v20888_v35, %v10639_v1  ;;  %21544 = vrcp.f32 %v10917_v26 }
 0x3af   :  { %21365 = vmatprep.subr.mxu0 %v24661_v54  ;;  %21345 = vmatpush3.msra.mxu1 %v24605_v59  ;;  %v10713_v55 = vpop.f32.mrf.mxu1  ;;  %v17167_v49 = vand.u32 4294901760, %v17166_v5 }
 0x3b0   :  { %21356 = vmatmul.mubr.f32.vlgmr.msra.gmra.mxu0 %v23163_v7  ;;  %21346 = vmatprep.subr.mxu1 %v24608_v3  ;;  %v10714_v22 = vadd.f32 %v10713_v55, %v10632_v42  ;;  %v10805_v63 = vadd.f32 %v20895_v8, %v10722_v28  ;;  %v20909_v23 = vpop.f32.mrf.mxu0  ;;  %v25603_v28 = vld [vmem:[#allocation49_spill] sm:$0xff]  ;;  %v25604_v55 = vld [vmem:[#allocation48_spill] sm:$0xff] }
 0x3b1   :  { %21366 = vmatpush3.msra.mxu0 %v24661_v54  ;;  %21347 = vmatpush3.msra.mxu1 %v24608_v3 }
 0x3b2   :  { %21367 = vmatprep.subr.mxu0 %v24666_v24  ;;  %21348 = vmatprep.mubr.f32.mxu1 %v23002_v46  ;;  %v10799_v10 = vadd.f32 %v10798_v53, %v10714_v22  ;;  %v11006_v40 = vpop.f32.mrf.mxu0  ;;  %v1760_v22 = vadd.f32 %v25604_v55, %v25603_v28  ;;  %v25610_v28 = vld [vmem:[#allocation77_spill] sm:$0xff] }
 0x3b3   :  { %21368 = vmatpush3.msra.mxu0 %v24666_v24  ;;  %21349 = vmatmul.mubr.f32.vlgmr.msra.gmra.mxu1 %v23183_v50  ;;  %v20902_v56 = vpop.f32.mrf.mxu1 }
 0x3b4   :  { %21358 = vmatprep.subr.mxu1 %v24605_v59  ;;  %21369 = vmatprep.mubr.f32.mxu0 %v23028_v13  ;;  %v10884_v57 = vadd.f32 %v20902_v56, %v10805_v63  ;;  %v25605_v56 = vld [vmem:[#allocation50_spill] sm:$0xff] }
 0x3b5   :  { %21379 = vmatprep.subr.mxu0 %v16664_v15  ;;  %21359 = vmatpush3.msra.mxu1 %v24605_v59  ;;  %v10877_v21 = vpop.f32.mrf.mxu1  ;;  %v16667_v59 = vand.u32 4294901760, %v16666_v44  ;;  %v2294_v44 = vadd.f32 %v25605_v56, %v1760_v22 }
 0x3b6   :  { %21370 = vmatmul.mubr.f32.vlgmr.msra.gmra.mxu0 %v23202_v45  ;;  %21360 = vmatprep.subr.mxu1 %v24608_v3  ;;  %v10898_v51 = vsub.f32 %v10884_v57, %v24546_v41  ;;  %v10878_v20 = vadd.f32 %v10877_v21, %v10799_v10  ;;  %v20923_v60 = vpop.f32.mrf.mxu0  ;;  %v16674_v41 = vand.u32 4294901760, %v16673_v12 }
 0x3b7   :  { %21380 = vmatpush3.msra.mxu0 %v16664_v15  ;;  %21361 = vmatpush3.msra.mxu1 %v24608_v3  ;;  %v10902_v3 = vadd.f32 0.0001, %v10900_v4 }
 0x3b8   :  { %21381 = vmatprep.subr.mxu0 %v16671_v38  ;;  %21362 = vmatprep.mubr.f32.mxu1 %v22974_v18  ;;  %v10904_v9 = vmul.f32 2.0, %v10898_v51  ;;  %v10897_v37 = vsub.f32 %v10878_v20, %v10891_v14  ;;  %v11179_v43 = vpop.f32.mrf.mxu0  ;;  %v25606_v51 = vld [vmem:[#allocation53_spill] sm:$0xff] }
 0x3b9   :  { %21382 = vmatpush3.msra.mxu0 %v16671_v38  ;;  %21363 = vmatmul.mubr.f32.vlgmr.msra.gmra.mxu1 %v23163_v7  ;;  %v20916_v31 = vpop.f32.mrf.mxu1  ;;  %v21543_v6 = vpop.eup %21542  ;;  %v2751_v20 = vadd.f32 %v25606_v51, %v2294_v44  ;;  %v25612_v44 = vld [vmem:[#allocation28_spill] sm:$0xff] }
 0x3ba   :  { %21372 = vmatprep.subr.mxu1 %v16667_v59  ;;  %21383 = vmatprep.mubr.f32.mxu0 %v22988_v36  ;;  %v10906_v33 = vadd.f32 0.0009, %v10904_v9  ;;  %v10903_v16 = vmul.f32 2.0, %v10897_v37  ;;  %v11104_v47 = vadd.f32 %v20916_v31, %v20909_v23  ;;  %v17173_v23 = vsub.f32 %v3106_v27, %v24717_v29 }
 0x3bb   :  { %21393 = vmatprep.subr.mxu0 %v24686_v17  ;;  %21373 = vmatpush3.msra.mxu1 %v16667_v59  ;;  %v11097_v19 = vpop.f32.mrf.mxu1  ;;  %v21545_v53 = vpop.eup %21544  ;;  %v17168_v27 = vsub.f32 %v17166_v5, %v17167_v49 }
 0x3bc   :  { %21384 = vmatmul.mubr.f32.vlgmr.msra.gmra.mxu0 %v23173_v0  ;;  %21374 = vmatprep.subr.mxu1 %v16674_v41  ;;  %v10908_v1 = vmul.f32 %v10906_v33, %v10902_v3  ;;  %v10905_v8 = vadd.f32 0.0009, %v10903_v16  ;;  %v11098_v15 = vadd.f32 %v11097_v19, %v11006_v40  ;;  %v11187_v26 = vadd.f32 %v20923_v60, %v11104_v47  ;;  %v20937_v42 = vpop.f32.mrf.mxu0 }
 0x3bd   :  { %21394 = vmatpush3.msra.mxu0 %v24686_v17  ;;  %21375 = vmatpush3.msra.mxu1 %v16674_v41  ;;  %v17174_v12 = vand.u32 4294901760, %v17173_v23  ;;  %v25607_v41 = vld [vmem:[#allocation104_spill] sm:$0xff] }
 0x3be   :  { %21395 = vmatprep.subr.mxu0 %v24691_v39  ;;  %21376 = vmatprep.mubr.f32.mxu1 %v22974_v18  ;;  %v10922_v30 = vmul.f32 %v21543_v6, %v10908_v1  ;;  %v10907_v25 = vmul.f32 %v10905_v8, %v10901_v11  ;;  %v11180_v38 = vadd.f32 %v11179_v43, %v11098_v15  ;;  %v11346_v35 = vpop.f32.mrf.mxu0  ;;  %v25608_v6 = vld [vmem:[#allocation103_spill] sm:$0xff] }
 0x3bf   :  { %21396 = vmatpush3.msra.mxu0 %v24691_v39  ;;  %21377 = vmatmul.mubr.f32.vlgmr.msra.gmra.mxu1 %v23163_v7  ;;  %v20930_v63 = vpop.f32.mrf.mxu1  ;;  %v17175_v37 = vsub.f32 %v17173_v23, %v17174_v12  ;;  %v3178_v31 = vadd.f32 %v25607_v41, %v2751_v20  ;;  %v24761_v11 = vand.u32 4294901760, %v25608_v6 }
 0x3c0   :  { %21386 = vmatprep.subr.mxu1 %v24661_v54  ;;  %21397 = vmatprep.mubr.f32.mxu0 %v22974_v18  ;;  %v10921_v17 = vmul.f32 %v21545_v53, %v10907_v25  ;;  %v11270_v34 = vadd.f32 %v20930_v63, %v11187_v26  ;;  %v10924_v39 = vsel %vm82_vm0, %v10922_v30, 0.0 }
 0x3c1   :  { %21407 = vmatprep.subr.mxu0 %v24713_v48  ;;  %21387 = vmatpush3.msra.mxu1 %v24661_v54  ;;  %v11261_v10 = vpop.f32.mrf.mxu1  ;;  %v17176_v19 = vand.u32 4294901760, %v17175_v37  ;;  %v17668_v30 = vsub.f32 %v25608_v6, %v24761_v11  ;;  %v25613_v37 = vld [vmem:[#allocation39_spill] sm:$0xff] }
 0x3c2   :  { %21398 = vmatmul.mubr.f32.vlgmr.msra.gmra.mxu0 %v23163_v7  ;;  %21388 = vmatprep.subr.mxu1 %v24666_v24  ;;  %v10923_v40 = vsel %vm82_vm0, %v10921_v17, 0.0  ;;  %v11262_v61 = vadd.f32 %v11261_v10, %v11180_v38  ;;  %v11353_v62 = vadd.f32 %v20937_v42, %v11270_v34  ;;  %v20951_v14 = vpop.f32.mrf.mxu0 }
 0x3c3   :  { %21408 = vmatpush3.msra.mxu0 %v24713_v48  ;;  %21389 = vmatpush3.msra.mxu1 %v24666_v24  ;;  %v10925_v57 = vadd.f32 %v10924_v39, %v10923_v40 }
 0x3c4   :  { %21409 = vmatprep.subr.mxu0 %v24717_v29  ;;  %21390 = vmatprep.mubr.f32.mxu1 %v23002_v46  ;;  %v11347_v21 = vadd.f32 %v11346_v35, %v11262_v61  ;;  %v11508_v4 = vpop.f32.mrf.mxu0  ;;  %v25609_v35 = vld [vmem:[#allocation65_spill] sm:$0xff] }
 0x3c5   :  { %21410 = vmatpush3.msra.mxu0 %v24717_v29  ;;  %21391 = vmatmul.mubr.f32.vlgmr.msra.gmra.mxu1 %v23183_v50  ;;  %v10926_v60 = vrot.slane %v10925_v57, 4  ;;  %v20944_v52 = vpop.f32.mrf.mxu1  ;;  %v1844_v55 = vadd.f32 %v25610_v28, %v25609_v35 }
 0x3c6   :  { %21400 = vmatprep.subr.mxu1 %v24661_v54  ;;  %21411 = vmatprep.mubr.f32.mxu0 %v23028_v13  ;;  %v24749_v32 = vadd.f32 %v20944_v52, %v11353_v62 }
 0x3c7   :  { %21421 = vmatprep.subr.mxu0 %v17166_v5  ;;  %21401 = vmatpush3.msra.mxu1 %v24661_v54  ;;  %v10927_v59 = vadd.f32 %v10926_v60, %v10925_v57  ;;  %v11425_v9 = vpop.f32.mrf.mxu1  ;;  %v17169_v54 = vand.u32 4294901760, %v17168_v27 }
 0x3c8   :  { %21412 = vmatmul.mubr.f32.vlgmr.msra.gmra.mxu0 %v23202_v45  ;;  %21402 = vmatprep.subr.mxu1 %v24666_v24  ;;  %v24754_v43 = vadd.f32 %v11425_v9, %v11347_v21  ;;  %v20965_v2 = vpop.f32.mrf.mxu0  ;;  %v24796_v20 = vmul.f32 %v24749_v32, %v24749_v32 }
 0x3c9   :  { %21422 = vmatpush3.msra.mxu0 %v17166_v5  ;;  %21403 = vmatpush3.msra.mxu1 %v24666_v24  ;;  %v10928_v3 = vrot.slane %v10927_v59, 2  ;;  %v24764_v24 = vand.u32 4294901760, %v3178_v31 }
 0x3ca   :  { %21423 = vmatprep.subr.mxu0 %v17173_v23  ;;  %21404 = vmatprep.mubr.f32.mxu1 %v22974_v18  ;;  %v11681_v33 = vpop.f32.mrf.mxu0 }
 0x3cb   :  { %21424 = vmatpush3.msra.mxu0 %v17173_v23  ;;  %21405 = vmatmul.mubr.f32.vlgmr.msra.gmra.mxu1 %v23163_v7  ;;  %v20958_v16 = vpop.f32.mrf.mxu1  ;;  %v10929_v47 = vadd.f32 %v10928_v3, %v10927_v59  ;;  %v17675_v22 = vsub.f32 %v3178_v31, %v24764_v24 }
 0x3cc   :  { %21414 = vmatprep.subr.mxu1 %v17169_v54  ;;  %21425 = vmatprep.mubr.f32.mxu0 %v22988_v36  ;;  %v11606_v1 = vadd.f32 %v20958_v16, %v20951_v14 }
 0x3cd   :  { %21435 = vmatprep.subr.mxu0 %v17167_v49  ;;  %21415 = vmatpush3.msra.mxu1 %v17169_v54  ;;  %v11599_v8 = vpop.f32.mrf.mxu1  ;;  %v10930_v15 = vrot.slane %v10929_v47, 1  ;;  %v17676_v62 = vand.u32 4294901760, %v17675_v22 }
 0x3ce   :  { %21426 = vmatmul.mubr.f32.vlgmr.msra.gmra.mxu0 %v23173_v0  ;;  %21416 = vmatprep.subr.mxu1 %v17176_v19  ;;  %v11600_v26 = vadd.f32 %v11599_v8, %v11508_v4  ;;  %v11689_v42 = vadd.f32 %v20965_v2, %v11606_v1  ;;  %v20979_v53 = vpop.f32.mrf.mxu0 }
 0x3cf   :  { %21436 = vmatpush3.msra.mxu0 %v17167_v49  ;;  %21417 = vmatpush3.msra.mxu1 %v17176_v19  ;;  %v10931_v5 = vadd.f32 %v10930_v15, %v10929_v47  ;;  %v17669_v49 = vand.u32 4294901760, %v17668_v30  ;;  %v17677_v51 = vsub.f32 %v17675_v22, %v17676_v62 }
 0x3d0   :  { %21437 = vmatprep.subr.mxu0 %v17174_v12  ;;  %21418 = vmatprep.mubr.f32.mxu1 %v22974_v18  ;;  %v11682_v25 = vadd.f32 %v11681_v33, %v11600_v26  ;;  %v11848_v38 = vpop.f32.mrf.mxu0  ;;  %v25614_v33 = vld [vmem:[#allocation111_spill] sm:$0xff] }
 0x3d1   :  { %21438 = vmatpush3.msra.mxu0 %v17174_v12  ;;  %21419 = vmatmul.mubr.f32.vlgmr.msra.gmra.mxu1 %v23163_v7  ;;  %v20972_v63 = vpop.f32.mrf.mxu1  ;;  %v24775_v23 = vadd.f32 %v10931_v5, %v24516_v58  ;;  %v25611_v58 = vld [vmem:[#allocation47_spill] sm:$0xff]  ;;  %v17670_v21 = vsub.f32 %v17668_v30, %v17669_v49  ;;  %v24823_v16 = vand.u32 4294901760, %v25614_v33  ;;  %v17678_v47 = vand.u32 4294901760, %v17677_v51 }
 0x3d2   :  { %21428 = vmatprep.subr.mxu1 %v24713_v48  ;;  %21439 = vmatprep.mubr.f32.mxu0 %v22974_v18  ;;  %v11772_v17 = vadd.f32 %v20972_v63, %v11689_v42  ;;  %v2390_v61 = vadd.f32 %v25611_v58, %v1844_v55 }
 0x3d3   :  { %21449 = vmatprep.subr.mxu0 %v24761_v11  ;;  %21429 = vmatpush3.msra.mxu1 %v24713_v48  ;;  %v11763_v34 = vpop.f32.mrf.mxu1  ;;  %v17671_v41 = vand.u32 4294901760, %v17670_v21  ;;  %v18170_v42 = vsub.f32 %v25614_v33, %v24823_v16 }
 0x3d4   :  { %21440 = vmatmul.mubr.f32.vlgmr.msra.gmra.mxu0 %v23163_v7  ;;  %21430 = vmatprep.subr.mxu1 %v24717_v29  ;;  %v11764_v10 = vadd.f32 %v11763_v34, %v11682_v25  ;;  %v11855_v39 = vadd.f32 %v20979_v53, %v11772_v17  ;;  %v20993_v40 = vpop.f32.mrf.mxu0  ;;  %v2823_v57 = vadd.f32 %v25612_v44, %v2390_v61 }
 0x3d5   :  { %21450 = vmatpush3.msra.mxu0 %v24761_v11  ;;  %21431 = vmatpush3.msra.mxu1 %v24717_v29  ;;  %v18171_v28 = vand.u32 4294901760, %v18170_v42 }
 0x3d6   :  { %21451 = vmatprep.subr.mxu0 %v24764_v24  ;;  %21432 = vmatprep.mubr.f32.mxu1 %v23002_v46  ;;  %v11849_v14 = vadd.f32 %v11848_v38, %v11764_v10  ;;  %v12010_v56 = vpop.f32.mrf.mxu0  ;;  %v3250_v2 = vadd.f32 %v25613_v37, %v2823_v57 }
 0x3d7   :  { %21452 = vmatpush3.msra.mxu0 %v24764_v24  ;;  %21433 = vmatmul.mubr.f32.vlgmr.msra.gmra.mxu1 %v23183_v50  ;;  %v20986_v12 = vpop.f32.mrf.mxu1 }
 0x3d8   :  { %21442 = vmatprep.subr.mxu1 %v24713_v48  ;;  %21453 = vmatprep.mubr.f32.mxu0 %v23028_v13  ;;  %v11934_v4 = vadd.f32 %v20986_v12, %v11855_v39  ;;  %v24830_v1 = vand.u32 4294901760, %v3250_v2  ;;  %v18172_v39 = vsub.f32 %v18170_v42, %v18171_v28 }
 0x3d9   :  { %21463 = vmatprep.subr.mxu0 %v17668_v30  ;;  %21443 = vmatpush3.msra.mxu1 %v24713_v48  ;;  %v11927_v60 = vpop.f32.mrf.mxu1  ;;  %v24809_v48 = vmul.f32 %v24754_v43, %v24754_v43 }
 0x3da   :  { %21454 = vmatmul.mubr.f32.vlgmr.msra.gmra.mxu0 %v23202_v45  ;;  %21444 = vmatprep.subr.mxu1 %v24717_v29  ;;  %v24800_v52 = vmul.f32 %v11934_v4, %v11934_v4  ;;  %v24803_v27 = vmul.f32 %v11934_v4, %v24749_v32  ;;  %v11928_v59 = vadd.f32 %v11927_v60, %v11849_v14  ;;  %v21007_v9 = vpop.f32.mrf.mxu0 }
 0x3db   :  { %21464 = vmatpush3.msra.mxu0 %v17668_v30  ;;  %21445 = vmatpush3.msra.mxu1 %v24717_v29  ;;  %v18177_v25 = vsub.f32 %v3250_v2, %v24830_v1 }
 0x3dc   :  { %21465 = vmatprep.subr.mxu0 %v17675_v22  ;;  %21446 = vmatprep.mubr.f32.mxu1 %v22974_v18  ;;  %v24814_v31 = vadd.f32 %v24800_v52, %v24796_v20  ;;  %v24816_v32 = vmul.f32 %v11928_v59, %v11928_v59  ;;  %v24819_v3 = vmul.f32 %v11928_v59, %v24754_v43  ;;  %v12183_v54 = vpop.f32.mrf.mxu0 }
 0x3dd   :  { %21466 = vmatpush3.msra.mxu0 %v17675_v22  ;;  %21447 = vmatmul.mubr.f32.vlgmr.msra.gmra.mxu1 %v23163_v7  ;;  %v21000_v29 = vpop.f32.mrf.mxu1  ;;  %v18178_v17 = vand.u32 4294901760, %v18177_v25 }
 0x3de   :  { %21456 = vmatprep.subr.mxu1 %v17671_v41  ;;  %21467 = vmatprep.mubr.f32.mxu0 %v22988_v36  ;;  %v24828_v6 = vadd.f32 %v24816_v32, %v24809_v48  ;;  %v12108_v43 = vadd.f32 %v21000_v29, %v20993_v40 }
 0x3df   :  { %21477 = vmatprep.subr.mxu0 %v17669_v49  ;;  %21457 = vmatpush3.msra.mxu1 %v17671_v41  ;;  %v12101_v19 = vpop.f32.mrf.mxu1  ;;  %v18179_v61 = vsub.f32 %v18177_v25, %v18178_v17 }
 0x3e0   :  { %21468 = vmatmul.mubr.f32.vlgmr.msra.gmra.mxu0 %v23173_v0  ;;  %21458 = vmatprep.subr.mxu1 %v17678_v47  ;;  %v12102_v8 = vadd.f32 %v12101_v19, %v12010_v56  ;;  %v21021_v15 = vpop.f32.mrf.mxu0  ;;  %v12191_v26 = vadd.f32 %v21007_v9, %v12108_v43 }
 0x3e1   :  { %21478 = vmatpush3.msra.mxu0 %v17669_v49  ;;  %21459 = vmatpush3.msra.mxu1 %v17678_v47  ;;  %v18180_v57 = vand.u32 4294901760, %v18179_v61 }
 0x3e2   :  { %21479 = vmatprep.subr.mxu0 %v17676_v62  ;;  %21460 = vmatprep.mubr.f32.mxu1 %v22974_v18  ;;  %v12184_v53 = vadd.f32 %v12183_v54, %v12102_v8  ;;  %v12350_v5 = vpop.f32.mrf.mxu0 }
 0x3e3   :  { %21480 = vmatpush3.msra.mxu0 %v17676_v62  ;;  %21461 = vmatmul.mubr.f32.vlgmr.msra.gmra.mxu1 %v23163_v7  ;;  %v21014_v30 = vpop.f32.mrf.mxu1 }
 0x3e4   :  { %21470 = vmatprep.subr.mxu1 %v24761_v11  ;;  %21481 = vmatprep.mubr.f32.mxu0 %v22974_v18  ;;  %v12274_v38 = vadd.f32 %v21014_v30, %v12191_v26 }
 0x3e5   :  { %21491 = vmatprep.subr.mxu0 %v24823_v16  ;;  %21471 = vmatpush3.msra.mxu1 %v24761_v11  ;;  %v12265_v35 = vpop.f32.mrf.mxu1 }
 0x3e6   :  { %21482 = vmatmul.mubr.f32.vlgmr.msra.gmra.mxu0 %v23163_v7  ;;  %21472 = vmatprep.subr.mxu1 %v24764_v24  ;;  %v12266_v55 = vadd.f32 %v12265_v35, %v12184_v53  ;;  %v12357_v22 = vadd.f32 %v21021_v15, %v12274_v38  ;;  %v21035_v63 = vpop.f32.mrf.mxu0  ;;  %v13467_v53 = vadd.f32 0.0001, %v24828_v6 }
 0x3e7   :  { %21492 = vmatpush3.msra.mxu0 %v24823_v16  ;;  %21473 = vmatpush3.msra.mxu1 %v24764_v24 }
 0x3e8   :  { %21493 = vmatprep.subr.mxu0 %v24830_v1  ;;  %21474 = vmatprep.mubr.f32.mxu1 %v23002_v46  ;;  %v12351_v34 = vadd.f32 %v12350_v5, %v12266_v55  ;;  %v12512_v49 = vpop.f32.mrf.mxu0 }
 0x3e9   :  { %21494 = vmatpush3.msra.mxu0 %v24830_v1  ;;  %21475 = vmatmul.mubr.f32.vlgmr.msra.gmra.mxu1 %v23183_v50  ;;  %v21028_v10 = vpop.f32.mrf.mxu1 }
 0x3ea   :  { %21484 = vmatprep.subr.mxu1 %v24761_v11  ;;  %21495 = vmatprep.mubr.f32.mxu0 %v23028_v13  ;;  %v24852_v40 = vadd.f32 %v21028_v10, %v12357_v22  ;;  %v18173_v13 = vand.u32 4294901760, %v18172_v39 }
 0x3eb   :  { %21505 = vmatprep.subr.mxu0 %v18170_v42  ;;  %21485 = vmatpush3.msra.mxu1 %v24761_v11  ;;  %v12429_v58 = vpop.f32.mrf.mxu1 }
 0x3ec   :  { %21496 = vmatmul.mubr.f32.vlgmr.msra.gmra.mxu0 %v23202_v45  ;;  %21486 = vmatprep.subr.mxu1 %v24764_v24  ;;  %v13450_v62 = vsub.f32 %v24852_v40, %v24796_v20  ;;  %v24859_v14 = vadd.f32 %v12429_v58, %v12351_v34  ;;  %v21049_v56 = vpop.f32.mrf.mxu0  ;;  %v13456_v40 = vmul.f32 2.0, %v24803_v27 }
 0x3ed   :  { %21506 = vmatpush3.msra.mxu0 %v18170_v42  ;;  %21487 = vmatpush3.msra.mxu1 %v24764_v24 }
 0x3ee   :  { %21507 = vmatprep.subr.mxu0 %v18177_v25  ;;  %21488 = vmatprep.mubr.f32.mxu1 %v22974_v18  ;;  %v13449_v11 = vsub.f32 %v24859_v14, %v24809_v48  ;;  %v12685_v45 = vpop.f32.mrf.mxu0  ;;  %v13455_v14 = vmul.f32 2.0, %v24819_v3 }
 0x3ef   :  { %21508 = vmatpush3.msra.mxu0 %v18177_v25  ;;  %21489 = vmatmul.mubr.f32.vlgmr.msra.gmra.mxu1 %v23163_v7  ;;  %v21042_v44 = vpop.f32.mrf.mxu1 }
 0x3f0   :  { %21498 = vmatprep.subr.mxu1 %v18173_v13  ;;  %21509 = vmatprep.mubr.f32.mxu0 %v22988_v36  ;;  %v12610_v12 = vadd.f32 %v21042_v44, %v21035_v63  ;;  %v13458_v44 = vadd.f32 0.0001, %v13456_v40 }
 0x3f1   :  { %21519 = vmatprep.subr.mxu0 %v18171_v28  ;;  %21499 = vmatpush3.msra.mxu1 %v18173_v13  ;;  %v12603_v24 = vpop.f32.mrf.mxu1 }
 0x3f2   :  { %21510 = vmatmul.mubr.f32.vlgmr.msra.gmra.mxu0 %v23173_v0  ;;  %21500 = vmatprep.subr.mxu1 %v18180_v57  ;;  %v12604_v21 = vadd.f32 %v12603_v24, %v12512_v49  ;;  %v12693_v4 = vadd.f32 %v21049_v56, %v12610_v12  ;;  %v21063_v51 = vpop.f32.mrf.mxu0 }
 0x3f3   :  { %21520 = vmatpush3.msra.mxu0 %v18171_v28  ;;  %21501 = vmatpush3.msra.mxu1 %v18180_v57 }
 0x3f4   :  { %21521 = vmatprep.subr.mxu0 %v18178_v17  ;;  %21502 = vmatprep.mubr.f32.mxu1 %v22974_v18  ;;  %v12686_v20 = vadd.f32 %v12685_v45, %v12604_v21  ;;  %v12852_v60 = vpop.f32.mrf.mxu0 }
 0x3f5   :  { %21522 = vmatpush3.msra.mxu0 %v18178_v17  ;;  %21512 = vmatprep.subr.mxu1 %v24823_v16  ;;  %v21056_v36 = vpop.f32.mrf.mxu1 }
 0x3f6   :  { %21503 = vmatmul.mubr.f32.vlgmr.msra.gmra.mxu1 %v23163_v7  ;;  %21523 = vmatprep.mubr.f32.mxu0 %v22974_v18  ;;  %v12776_v0 = vadd.f32 %v21056_v36, %v12693_v4  ;;  %v13457_v4 = vadd.f32 0.0001, %v13455_v14 }
 0x3f7   :  { %21513 = vmatpush3.msra.mxu1 %v24823_v16  ;;  %21516 = vmatprep.mubr.f32.mxu1 %v23002_v46  ;;  %v12767_v59 = vpop.f32.mrf.mxu1 }
 0x3f8   :  { %21514 = vmatprep.subr.mxu1 %v24830_v1  ;;  %21524 = vmatmul.mubr.f32.vlgmr.msra.gmra.mxu0 %v23163_v7  ;;  %v12768_v9 = vadd.f32 %v12767_v59, %v12686_v20  ;;  %v12859_v37 = vadd.f32 %v21063_v51, %v12776_v0  ;;  %v21077_v2 = vpop.f32.mrf.mxu0 }
 0x3f9   :  { %21515 = vmatpush3.msra.mxu1 %v24830_v1 }
 0x3fa   :  { %21526 = vmatprep.subr.mxu1 %v24823_v16  ;;  %21517 = vmatmul.mubr.f32.vlgmr.msra.gmra.mxu1 %v23183_v50  ;;  %v12853_v48 = vadd.f32 %v12852_v60, %v12768_v9  ;;  %v13014_v41 = vpop.f32.mrf.mxu0 }
 0x3fb   :  { %21527 = vmatpush3.msra.mxu1 %v24823_v16  ;;  %21530 = vmatprep.mubr.f32.mxu1 %v22974_v18  ;;  %v21070_v46 = vpop.f32.mrf.mxu1  ;;  %v13468_v18 = vadd.f32 0.0001, %v24814_v31 }
 0x3fc   :  { %21528 = vmatprep.subr.mxu1 %v24830_v1  ;;  %v12938_v54 = vadd.f32 %v21070_v46, %v12859_v37 }
 0x3fd   :  { %21529 = vmatpush3.msra.mxu1 %v24830_v1  ;;  %v12931_v29 = vpop.f32.mrf.mxu1 }
 0x3fe   :  { %21531 = vmatmul.mubr.f32.vlgmr.msra.gmra.mxu1 %v23163_v7  ;;  %v13452_v33 = vsub.f32 %v12938_v54, %v24800_v52  ;;  %v12932_v47 = vadd.f32 %v12931_v29, %v12853_v48  ;;  %v21091_v43 = vpop.f32.mrf.mxu0 }
 0x400   :  { %v13470_v50 = vadd.f32 %v13452_v33, %v13450_v62  ;;  %v13451_v19 = vsub.f32 %v12932_v47, %v24816_v32  ;;  %v13187_v8 = vpop.f32.mrf.mxu0 }
 0x401   :  { %v21084_v16 = vpop.f32.mrf.mxu1 }
 0x402   :  { %v13472_v15 = vadd.f32 0.0009, %v13470_v50  ;;  %v13469_v26 = vadd.f32 %v13451_v19, %v13449_v11  ;;  %v13112_v42 = vadd.f32 %v21084_v16, %v21077_v2 }
 0x403   :  { %v13105_v1 = vpop.f32.mrf.mxu1 }
 0x404   :  { %v13474_v5 = vmul.f32 %v13472_v15, %v13468_v18  ;;  %v13471_v30 = vadd.f32 0.0009, %v13469_v26  ;;  %v13106_v7 = vadd.f32 %v13105_v1, %v13014_v41  ;;  %v13195_v25 = vadd.f32 %v21091_v43, %v13112_v42  ;;  %v21105_v52 = vpop.f32.mrf.mxu0 }
 0x406   :  { %v13473_v38 = vmul.f32 %v13471_v30, %v13467_v53  ;;  %v13188_v35 = vadd.f32 %v13187_v8, %v13106_v7  ;;  %v13354_v28 = vpop.f32.mrf.mxu0  ;;  %21546 = vrcp.f32 %v13474_v5 }
 0x407   :  { %v21098_v55 = vpop.f32.mrf.mxu1 }
 0x408   :  { %v13278_v32 = vadd.f32 %v21098_v55, %v13195_v25  ;;  %21548 = vrcp.f32 %v13473_v38 }
 0x409   :  { %v13269_v22 = vpop.f32.mrf.mxu1 }
 0x40a   :  { %v13270_v31 = vadd.f32 %v13269_v22, %v13188_v35  ;;  %v13361_v63 = vadd.f32 %v21105_v52, %v13278_v32  ;;  %v21119_v17 = vpop.f32.mrf.mxu0 }
 0x40c   :  { %v13355_v34 = vadd.f32 %v13354_v28, %v13270_v31  ;;  %v13562_v49 = vpop.f32.mrf.mxu0 }
 0x40d   :  { %v21112_v6 = vpop.f32.mrf.mxu1 }
 0x40e   :  { %v13440_v10 = vadd.f32 %v21112_v6, %v13361_v63 }
 0x40f   :  { %v13433_v39 = vpop.f32.mrf.mxu1 }
 0x410   :  { %v13454_v58 = vsub.f32 %v13440_v10, %v24803_v27  ;;  %v13434_v61 = vadd.f32 %v13433_v39, %v13355_v34  ;;  %v21133_v62 = vpop.f32.mrf.mxu0 }
 0x412   :  { %v13460_v56 = vmul.f32 2.0, %v13454_v58  ;;  %v13453_v13 = vsub.f32 %v13434_v61, %v24819_v3  ;;  %v13735_v11 = vpop.f32.mrf.mxu0 }
 0x413   :  { %v21126_v45 = vpop.f32.mrf.mxu1  ;;  %v21547_v21 = vpop.eup %21546 }
 0x414   :  { %v13462_v57 = vadd.f32 0.0009, %v13460_v56  ;;  %v13459_v12 = vmul.f32 2.0, %v13453_v13  ;;  %v13660_v24 = vadd.f32 %v21126_v45, %v21119_v17 }
 0x415   :  { %v13653_v51 = vpop.f32.mrf.mxu1  ;;  %v21549_v59 = vpop.eup %21548 }
 0x416   :  { %v13464_v20 = vmul.f32 %v13462_v57, %v13458_v44  ;;  %v13461_v60 = vadd.f32 0.0009, %v13459_v12  ;;  %v13654_v36 = vadd.f32 %v13653_v51, %v13562_v49  ;;  %v13743_v27 = vadd.f32 %v21133_v62, %v13660_v24  ;;  %v21147_v0 = vpop.f32.mrf.mxu0 }
 0x418   :  { %v13478_v9 = vmul.f32 %v21547_v21, %v13464_v20  ;;  %v13463_v37 = vmul.f32 %v13461_v60, %v13457_v4  ;;  %v13736_v2 = vadd.f32 %v13735_v11, %v13654_v36  ;;  %v13902_v48 = vpop.f32.mrf.mxu0 }
 0x419   :  { %v21140_v3 = vpop.f32.mrf.mxu1 }
 0x41a   :  { %v13477_v41 = vmul.f32 %v21549_v59, %v13463_v37  ;;  %v13826_v46 = vadd.f32 %v21140_v3, %v13743_v27  ;;  %v13480_v29 = vsel %vm82_vm0, %v13478_v9, 0.0 }
 0x41b   :  { %v13817_v54 = vpop.f32.mrf.mxu1 }
 0x41c   :  { %v13479_v33 = vsel %vm82_vm0, %v13477_v41, 0.0  ;;  %v13818_v47 = vadd.f32 %v13817_v54, %v13736_v2  ;;  %v13909_v43 = vadd.f32 %v21147_v0, %v13826_v46  ;;  %v21161_v50 = vpop.f32.mrf.mxu0 }
 0x41d   :  { %v13481_v19 = vadd.f32 %v13480_v29, %v13479_v33 }
 0x41e   :  { %v13903_v8 = vadd.f32 %v13902_v48, %v13818_v47  ;;  %v14064_v16 = vpop.f32.mrf.mxu0 }
 0x41f   :  { %v13482_v18 = vrot.slane %v13481_v19, 4  ;;  %v21154_v15 = vpop.f32.mrf.mxu1 }
 0x420   :  { %v13988_v26 = vadd.f32 %v21154_v15, %v13909_v43 }
 0x421   :  { %v13483_v42 = vadd.f32 %v13482_v18, %v13481_v19  ;;  %v13981_v53 = vpop.f32.mrf.mxu1 }
 0x422   :  { %v13982_v1 = vadd.f32 %v13981_v53, %v13903_v8  ;;  %v21175_v5 = vpop.f32.mrf.mxu0  ;;  %v16000_v11 = vmul.f32 %v13988_v26, %v13988_v26 }
 0x423   :  { %v13484_v30 = vrot.slane %v13483_v42, 2 }
 0x424   :  { %v14237_v7 = vpop.f32.mrf.mxu0  ;;  %v15999_v24 = vmul.f32 %v13982_v1, %v13982_v1 }
 0x425   :  { %v21168_v25 = vpop.f32.mrf.mxu1  ;;  %v13485_v52 = vadd.f32 %v13484_v30, %v13483_v42 }
 0x426   :  { %v14162_v38 = vadd.f32 %v21168_v25, %v21161_v50 }
 0x427   :  { %v14155_v35 = vpop.f32.mrf.mxu1  ;;  %v13486_v28 = vrot.slane %v13485_v52, 1 }
 0x428   :  { %v14156_v55 = vadd.f32 %v14155_v35, %v14064_v16  ;;  %v14245_v32 = vadd.f32 %v21175_v5, %v14162_v38  ;;  %v21189_v22 = vpop.f32.mrf.mxu0 }
 0x429   :  { %v13487_v31 = vadd.f32 %v13486_v28, %v13485_v52 }
 0x42a   :  { %v14238_v63 = vadd.f32 %v14237_v7, %v14156_v55  ;;  %v14404_v17 = vpop.f32.mrf.mxu0 }
 0x42b   :  { %v21182_v34 = vpop.f32.mrf.mxu1  ;;  %v24895_v49 = vadd.f32 %v13487_v31, %v24775_v23 }
 0x42c   :  { %v14328_v6 = vadd.f32 %v21182_v34, %v14245_v32 }
 0x42d   :  { %v14319_v10 = vpop.f32.mrf.mxu1 }
 0x42e   :  { %v14320_v39 = vadd.f32 %v14319_v10, %v14238_v63  ;;  %v14411_v40 = vadd.f32 %v21189_v22, %v14328_v6  ;;  %v21203_v58 = vpop.f32.mrf.mxu0 }
 0x430   :  { %v14405_v61 = vadd.f32 %v14404_v17, %v14320_v39  ;;  %v14566_v62 = vpop.f32.mrf.mxu0 }
 0x431   :  { %v21196_v14 = vpop.f32.mrf.mxu1 }
 0x432   :  { %v14490_v56 = vadd.f32 %v21196_v14, %v14411_v40 }
 0x433   :  { %v14483_v13 = vpop.f32.mrf.mxu1 }
 0x434   :  { %v16002_v45 = vmul.f32 %v14490_v56, %v14490_v56  ;;  %v24897_v44 = vmul.f32 %v14490_v56, %v13988_v26  ;;  %v14484_v57 = vadd.f32 %v14483_v13, %v14405_v61  ;;  %v21217_v12 = vpop.f32.mrf.mxu0 }
 0x436   :  { %v16022_v21 = vadd.f32 %v16002_v45, %v16000_v11  ;;  %v16001_v23 = vmul.f32 %v14484_v57, %v14484_v57  ;;  %v24899_v4 = vmul.f32 %v14484_v57, %v13982_v1  ;;  %v14739_v51 = vpop.f32.mrf.mxu0 }
 0x437   :  { %v21210_v20 = vpop.f32.mrf.mxu1 }
 0x438   :  { %v16021_v60 = vadd.f32 %v16001_v23, %v15999_v24  ;;  %v14664_v36 = vadd.f32 %v21210_v20, %v21203_v58  ;;  %v16024_v56 = vadd.f32 0.0001, %v16022_v21 }
 0x439   :  { %v14657_v27 = vpop.f32.mrf.mxu1 }
 0x43a   :  { %v14658_v0 = vadd.f32 %v14657_v27, %v14566_v62  ;;  %v21231_v59 = vpop.f32.mrf.mxu0  ;;  %v14747_v9 = vadd.f32 %v21217_v12, %v14664_v36  ;;  %v16023_v12 = vadd.f32 0.0001, %v16021_v60 }
 0x43c   :  { %v14740_v37 = vadd.f32 %v14739_v51, %v14658_v0  ;;  %v14906_v2 = vpop.f32.mrf.mxu0 }
 0x43d   :  { %v21224_v48 = vpop.f32.mrf.mxu1 }
 0x43e   :  { %v14830_v3 = vadd.f32 %v21224_v48, %v14747_v9 }
 0x43f   :  { %v14821_v41 = vpop.f32.mrf.mxu1 }
 0x440   :  { %v14822_v46 = vadd.f32 %v14821_v41, %v14740_v37  ;;  %v14913_v54 = vadd.f32 %v21231_v59, %v14830_v3  ;;  %v21245_v29 = vpop.f32.mrf.mxu0 }
 0x442   :  { %v14907_v33 = vadd.f32 %v14906_v2, %v14822_v46  ;;  %v15068_v47 = vpop.f32.mrf.mxu0 }
 0x443   :  { %v21238_v43 = vpop.f32.mrf.mxu1 }
 0x444   :  { %v14992_v50 = vadd.f32 %v21238_v43, %v14913_v54 }
 0x445   :  { %v14985_v19 = vpop.f32.mrf.mxu1 }
 0x446   :  { %v16006_v8 = vsub.f32 %v14992_v50, %v16000_v11  ;;  %v14986_v16 = vadd.f32 %v14985_v19, %v14907_v33  ;;  %v21259_v18 = vpop.f32.mrf.mxu0  ;;  %v16012_v33 = vmul.f32 2.0, %v24897_v44  ;;  %v16011_v19 = vmul.f32 2.0, %v24899_v4 }
 0x448   :  { %v16005_v15 = vsub.f32 %v14986_v16, %v15999_v24  ;;  %v15241_v26 = vpop.f32.mrf.mxu0 }
 0x449   :  { %v21252_v42 = vpop.f32.mrf.mxu1 }
 0x44a   :  { %v15166_v53 = vadd.f32 %v21252_v42, %v21245_v29 }
 0x44b   :  { %v15159_v1 = vpop.f32.mrf.mxu1 }
 0x44c   :  { %v15160_v5 = vadd.f32 %v15159_v1, %v15068_v47  ;;  %v15249_v30 = vadd.f32 %v21259_v18, %v15166_v53  ;;  %v21273_v7 = vpop.f32.mrf.mxu0 }
 0x44e   :  { %v15242_v25 = vadd.f32 %v15241_v26, %v15160_v5  ;;  %v15408_v52 = vpop.f32.mrf.mxu0  ;;  %v16014_v26 = vadd.f32 0.0001, %v16012_v33 }
 0x44f   :  { %v21266_v38 = vpop.f32.mrf.mxu1 }
 0x450   :  { %v15332_v35 = vadd.f32 %v21266_v38, %v15249_v30  ;;  %v16013_v30 = vadd.f32 0.0001, %v16011_v19 }
 0x451   :  { %v15323_v28 = vpop.f32.mrf.mxu1 }
 0x452   :  { %v15324_v55 = vadd.f32 %v15323_v28, %v15242_v25  ;;  %v15415_v32 = vadd.f32 %v21273_v7, %v15332_v35  ;;  %v21287_v22 = vpop.f32.mrf.mxu0 }
 0x454   :  { %v15409_v31 = vadd.f32 %v15408_v52, %v15324_v55  ;;  %v15570_v63 = vpop.f32.mrf.mxu0 }
 0x455   :  { %v21280_v17 = vpop.f32.mrf.mxu1 }
 0x456   :  { %v15494_v34 = vadd.f32 %v21280_v17, %v15415_v32 }
 0x457   :  { %v15487_v6 = vpop.f32.mrf.mxu1 }
 0x458   :  { %v16008_v10 = vsub.f32 %v15494_v34, %v16002_v45  ;;  %v15488_v39 = vadd.f32 %v15487_v6, %v15409_v31  ;;  %v21301_v40 = vpop.f32.mrf.mxu0 }
 0x45a   :  { %v16026_v58 = vadd.f32 %v16008_v10, %v16006_v8  ;;  %v16007_v61 = vsub.f32 %v15488_v39, %v16001_v23  ;;  %v15743_v62 = vpop.f32.mrf.mxu0 }
 0x45b   :  { %v21294_v14 = vpop.f32.mrf.mxu1 }
 0x45c   :  { %v16028_v13 = vadd.f32 0.0009, %v16026_v58  ;;  %v16025_v11 = vadd.f32 %v16007_v61, %v16005_v15  ;;  %v15668_v57 = vadd.f32 %v21294_v14, %v21287_v22 }
 0x45d   :  { %v15661_v24 = vpop.f32.mrf.mxu1 }
 0x45e   :  { %v16030_v51 = vmul.f32 %v16028_v13, %v16024_v56  ;;  %v16027_v20 = vadd.f32 0.0009, %v16025_v11  ;;  %v15662_v36 = vadd.f32 %v15661_v24, %v15570_v63  ;;  %v15751_v27 = vadd.f32 %v21301_v40, %v15668_v57  ;;  %v21315_v0 = vpop.f32.mrf.mxu0 }
 0x460   :  { %v16029_v59 = vmul.f32 %v16027_v20, %v16023_v12  ;;  %v15744_v9 = vadd.f32 %v15743_v62, %v15662_v36  ;;  %v15910_v45 = vpop.f32.mrf.mxu0  ;;  %21550 = vrcp.f32 %v16030_v51 }
 0x461   :  { %v21308_v37 = vpop.f32.mrf.mxu1 }
 0x462   :  { %v15834_v2 = vadd.f32 %v21308_v37, %v15751_v27  ;;  %21552 = vrcp.f32 %v16029_v59 }
 0x463   :  { %v15825_v23 = vpop.f32.mrf.mxu1 }
 0x464   :  { %v15826_v48 = vadd.f32 %v15825_v23, %v15744_v9  ;;  %v15917_v21 = vadd.f32 %v21315_v0, %v15834_v2  ;;  %v24901_v3 = vpop.f32.mrf.mxu0 }
 0x466   :  { %v15911_v41 = vadd.f32 %v15910_v45, %v15826_v48  ;;  %v24903_v60 = vpop.f32.mrf.mxu0 }
 0x467   :  { %v21322_v46 = vpop.f32.mrf.mxu1 }
 0x468   :  { %v15996_v54 = vadd.f32 %v21322_v46, %v15917_v21 }
 0x469   :  { %v15989_v29 = vpop.f32.mrf.mxu1 }
 0x46a   :  { %v16010_v47 = vsub.f32 %v15996_v54, %v24897_v44  ;;  %v15990_v43 = vadd.f32 %v15989_v29, %v15911_v41  ;;  %v24907_v50 = vpop.f32.mrf.mxu0 }
 0x46c   :  { %v16016_v8 = vmul.f32 2.0, %v16010_v47  ;;  %v16009_v16 = vsub.f32 %v15990_v43, %v24899_v4  ;;  %v24911_v18 = vpop.f32.mrf.mxu0 }
 0x46d   :  { %v21336_v15 = vpop.f32.mrf.mxu1  ;;  %v21551_v1 = vpop.eup %21550 }
 0x46e   :  { %v16018_v42 = vadd.f32 0.0009, %v16016_v8  ;;  %v16015_v53 = vmul.f32 2.0, %v16009_v16  ;;  %v16216_v33 = vadd.f32 %v21336_v15, %v24901_v3 }
 0x46f   :  { %v16209_v5 = vpop.f32.mrf.mxu1  ;;  %v21553_v52 = vpop.eup %21552 }
 0x470   :  { %v16020_v7 = vmul.f32 %v16018_v42, %v16014_v26  ;;  %v16017_v25 = vadd.f32 0.0009, %v16015_v53  ;;  %v24913_v44 = vpop.f32.mrf.mxu0  ;;  %v16210_v43 = vadd.f32 %v16209_v5, %v24903_v60  ;;  %v16299_v26 = vadd.f32 %v24907_v50, %v16216_v33 }
 0x472   :  { %v16034_v38 = vmul.f32 %v21551_v1, %v16020_v7  ;;  %v16019_v35 = vmul.f32 %v16017_v25, %v16013_v30  ;;  %v24915_v28 = vpop.f32.mrf.mxu0  ;;  %v16292_v7 = vadd.f32 %v24911_v18, %v16210_v43 }
 0x473   :  { %v21350_v55 = vpop.f32.mrf.mxu1 }
 0x474   :  { %v16033_v4 = vmul.f32 %v21553_v52, %v16019_v35  ;;  %v16036_v22 = vsel %vm82_vm0, %v16034_v38, 0.0  ;;  %v16382_v35 = vadd.f32 %v21350_v55, %v16299_v26 }
 0x475   :  { %v16373_v32 = vpop.f32.mrf.mxu1 }
 0x476   :  { %v16035_v31 = vsel %vm82_vm0, %v16033_v4, 0.0  ;;  %v21371_v63 = vpop.f32.mrf.mxu0  ;;  %v16374_v60 = vadd.f32 %v16373_v32, %v16292_v7 }
 0x477   :  { %v16037_v17 = vadd.f32 %v16036_v22, %v16035_v31 }
 0x478   :  { %v16620_v34 = vpop.f32.mrf.mxu0 }
 0x479   :  { %v16038_v6 = vrot.slane %v16037_v17, 4  ;;  %v24919_v10 = vpop.f32.mrf.mxu1 }
 0x47b   :  { %v24921_v39 = vpop.f32.mrf.mxu1  ;;  %v16039_v40 = vadd.f32 %v16038_v6, %v16037_v17  ;;  %v16465_v6 = vadd.f32 %v24913_v44, %v16382_v35 }
 0x47c   :  { %v21385_v58 = vpop.f32.mrf.mxu0 }
 0x47d   :  { %v16040_v61 = vrot.slane %v16039_v40, 2  ;;  %v16544_v32 = vadd.f32 %v24919_v10, %v16465_v6 }
 0x47e   :  { %v16793_v62 = vpop.f32.mrf.mxu0 }
 0x47f   :  { %v21378_v14 = vpop.f32.mrf.mxu1  ;;  %v16041_v56 = vadd.f32 %v16040_v61, %v16039_v40  ;;  %v16459_v61 = vadd.f32 %v24915_v28, %v16374_v60 }
 0x480   :  { %v16718_v54 = vadd.f32 %v21378_v14, %v21371_v63 }
 0x481   :  { %v16711_v13 = vpop.f32.mrf.mxu1  ;;  %v16042_v11 = vrot.slane %v16041_v56, 1  ;;  %v16538_v44 = vadd.f32 %v24921_v39, %v16459_v61 }
 0x482   :  { %v21399_v57 = vpop.f32.mrf.mxu0  ;;  %v16712_v47 = vadd.f32 %v16711_v13, %v16620_v34  ;;  %v16801_v8 = vadd.f32 %v21385_v58, %v16718_v54 }
 0x483   :  { %v16043_v12 = vadd.f32 %v16042_v11, %v16041_v56 }
 0x484   :  { %v16960_v24 = vpop.f32.mrf.mxu0  ;;  %v16794_v53 = vadd.f32 %v16793_v62, %v16712_v47 }
 0x485   :  { %v21392_v51 = vpop.f32.mrf.mxu1  ;;  %v24924_v20 = vadd.f32 %v16043_v12, %v24895_v49 }
 0x486   :  { %v16884_v25 = vadd.f32 %v21392_v51, %v16801_v8 }
 0x487   :  { %v16875_v36 = vpop.f32.mrf.mxu1 }
 0x488   :  { %v21413_v27 = vpop.f32.mrf.mxu0  ;;  %v16876_v15 = vadd.f32 %v16875_v36, %v16794_v53  ;;  %v16967_v31 = vadd.f32 %v21399_v57, %v16884_v25 }
 0x48a   :  { %v17122_v0 = vpop.f32.mrf.mxu0  ;;  %v16961_v40 = vadd.f32 %v16960_v24, %v16876_v15 }
 0x48b   :  { %v21406_v59 = vpop.f32.mrf.mxu1 }
 0x48c   :  { %v17046_v55 = vadd.f32 %v21406_v59, %v16967_v31 }
 0x48d   :  { %v17039_v9 = vpop.f32.mrf.mxu1 }
 0x48e   :  { %v21427_v45 = vpop.f32.mrf.mxu0  ;;  %v17040_v57 = vadd.f32 %v17039_v9, %v16961_v40  ;;  %v18558_v24 = vmul.f32 %v17046_v55, %v17046_v55 }
 0x490   :  { %v17295_v37 = vpop.f32.mrf.mxu0  ;;  %v18557_v59 = vmul.f32 %v17040_v57, %v17040_v57 }
 0x491   :  { %v21420_v2 = vpop.f32.mrf.mxu1 }
 0x492   :  { %v17220_v16 = vadd.f32 %v21420_v2, %v21413_v27  ;;  %v18556_v2 = vmul.f32 %v16544_v32, %v16544_v32 }
 0x493   :  { %v17213_v23 = vpop.f32.mrf.mxu1 }
 0x494   :  { %v21441_v48 = vpop.f32.mrf.mxu0  ;;  %v17214_v1 = vadd.f32 %v17213_v23, %v17122_v0  ;;  %v17303_v52 = vadd.f32 %v21427_v45, %v17220_v16  ;;  %v18578_v10 = vadd.f32 %v18558_v24, %v18556_v2 }
 0x496   :  { %v17462_v21 = vpop.f32.mrf.mxu0  ;;  %v17296_v4 = vadd.f32 %v17295_v37, %v17214_v1 }
 0x497   :  { %v21434_v41 = vpop.f32.mrf.mxu1 }
 0x498   :  { %v17386_v63 = vadd.f32 %v21434_v41, %v17303_v52  ;;  %v18555_v41 = vmul.f32 %v16538_v44, %v16538_v44 }
 0x499   :  { %v17377_v46 = vpop.f32.mrf.mxu1 }
 0x49a   :  { %v21455_v29 = vpop.f32.mrf.mxu0  ;;  %v17378_v58 = vadd.f32 %v17377_v46, %v17296_v4  ;;  %v17469_v14 = vadd.f32 %v21441_v48, %v17386_v63  ;;  %v18577_v33 = vadd.f32 %v18557_v59, %v18555_v41 }
 0x49c   :  { %v17624_v49 = vpop.f32.mrf.mxu0  ;;  %v17463_v12 = vadd.f32 %v17462_v21, %v17378_v58  ;;  %v18579_v1 = vadd.f32 0.0001, %v18577_v33 }
 0x49d   :  { %v21448_v19 = vpop.f32.mrf.mxu1 }
 0x49e   :  { %v17548_v0 = vadd.f32 %v21448_v19, %v17469_v14  ;;  %v18580_v19 = vadd.f32 0.0001, %v18578_v10 }
 0x49f   :  { %v17541_v42 = vpop.f32.mrf.mxu1 }
 0x4a0   :  { %v21469_v30 = vpop.f32.mrf.mxu0  ;;  %v17542_v23 = vadd.f32 %v17541_v42, %v17463_v12  ;;  %v18562_v54 = vsub.f32 %v17548_v0, %v18556_v2 }
 0x4a2   :  { %v17797_v38 = vpop.f32.mrf.mxu0  ;;  %v18561_v47 = vsub.f32 %v17542_v23, %v18555_v41 }
 0x4a3   :  { %v21462_v3 = vpop.f32.mrf.mxu1 }
 0x4a4   :  { %v17722_v22 = vadd.f32 %v21462_v3, %v21455_v29 }
 0x4a5   :  { %v17715_v5 = vpop.f32.mrf.mxu1 }
 0x4a6   :  { %v17716_v17 = vadd.f32 %v17715_v5, %v17624_v49  ;;  %v17805_v50 = vadd.f32 %v21469_v30, %v17722_v22  ;;  %v21483_v34 = vpop.f32.mrf.mxu0  ;;  %v18560_v5 = vmul.f32 %v17046_v55, %v16544_v32 }
 0x4a8   :  { %v17798_v18 = vadd.f32 %v17797_v38, %v17716_v17  ;;  %v17964_v13 = vpop.f32.mrf.mxu0  ;;  %v18568_v58 = vmul.f32 2.0, %v18560_v5 }
 0x4a9   :  { %v21476_v62 = vpop.f32.mrf.mxu1 }
 0x4aa   :  { %v17888_v56 = vadd.f32 %v21476_v62, %v17805_v50  ;;  %v18559_v50 = vmul.f32 %v17040_v57, %v16538_v44 }
 0x4ab   :  { %v17879_v11 = vpop.f32.mrf.mxu1 }
 0x4ac   :  { %v17880_v51 = vadd.f32 %v17879_v11, %v17798_v18  ;;  %v17971_v36 = vadd.f32 %v21483_v34, %v17888_v56  ;;  %v21497_v27 = vpop.f32.mrf.mxu0  ;;  %v18567_v62 = vmul.f32 2.0, %v18559_v50 }
 0x4ae   :  { %v17965_v45 = vadd.f32 %v17964_v13, %v17880_v51  ;;  %v18126_v37 = vpop.f32.mrf.mxu0  ;;  %v18570_v13 = vadd.f32 0.0001, %v18568_v58 }
 0x4af   :  { %v21490_v28 = vpop.f32.mrf.mxu1 }
 0x4b0   :  { %v18050_v48 = vadd.f32 %v21490_v28, %v17971_v36  ;;  %v18569_v36 = vadd.f32 0.0001, %v18567_v62 }
 0x4b1   :  { %v18043_v46 = vpop.f32.mrf.mxu1 }
 0x4b2   :  { %v18564_v9 = vsub.f32 %v18050_v48, %v18558_v24  ;;  %v18044_v21 = vadd.f32 %v18043_v46, %v17965_v45  ;;  %v21511_v29 = vpop.f32.mrf.mxu0 }
 0x4b4   :  { %v18582_v49 = vadd.f32 %v18564_v9, %v18562_v54  ;;  %v18563_v39 = vsub.f32 %v18044_v21, %v18557_v59  ;;  %v18299_v43 = vpop.f32.mrf.mxu0 }
 0x4b6   :  { %v18584_v8 = vadd.f32 0.0009, %v18582_v49  ;;  %v18581_v16 = vadd.f32 %v18563_v39, %v18561_v47  ;;  %v21504_v26 = vpop.f32.mrf.mxu1 }
 0x4b7   :  { %v18224_v53 = vadd.f32 %v21504_v26, %v21497_v27 }
 0x4b8   :  { %v18586_v42 = vmul.f32 %v18584_v8, %v18580_v19  ;;  %v18583_v30 = vadd.f32 0.0009, %v18581_v16  ;;  %v18217_v7 = vpop.f32.mrf.mxu1  ;;  %v21525_v25 = vpop.f32.mrf.mxu0 }
 0x4b9   :  { %v18218_v52 = vadd.f32 %v18217_v7, %v18126_v37  ;;  %v18307_v38 = vadd.f32 %v21511_v29, %v18224_v53 }
 0x4ba   :  { %21554 = vrcp.f32 %v18586_v42  ;;  %v18585_v35 = vmul.f32 %v18583_v30, %v18579_v1  ;;  %v21518_v3 = vpop.f32.mrf.mxu1  ;;  %v18466_v60 = vpop.f32.mrf.mxu0 }
 0x4bb   :  { %v18300_v15 = vadd.f32 %v18299_v43, %v18218_v52  ;;  %v18390_v4 = vadd.f32 %v21518_v3, %v18307_v38 }
 0x4bc   :  { %21556 = vrcp.f32 %v18585_v35  ;;  %v18381_v22 = vpop.f32.mrf.mxu1 }
 0x4bd   :  { %v18382_v31 = vadd.f32 %v18381_v22, %v18300_v15  ;;  %v18473_v63 = vadd.f32 %v21525_v25, %v18390_v4 }
 0x4be   :  { %v21532_v17 = vpop.f32.mrf.mxu1 }
 0x4bf   :  { %v18467_v34 = vadd.f32 %v18466_v60, %v18382_v31  ;;  %v18552_v6 = vadd.f32 %v21532_v17, %v18473_v63 }
 0x4c0   :  { %v18545_v40 = vpop.f32.mrf.mxu1 }
 0x4c1   :  { %v18566_v18 = vsub.f32 %v18552_v6, %v18560_v5  ;;  %v18546_v61 = vadd.f32 %v18545_v40, %v18467_v34 }
 0x4c3   :  { %v18572_v14 = vmul.f32 2.0, %v18566_v18  ;;  %v18565_v56 = vsub.f32 %v18546_v61, %v18559_v50 }
 0x4c5   :  { %v18574_v11 = vadd.f32 0.0009, %v18572_v14  ;;  %v18571_v12 = vmul.f32 2.0, %v18565_v56 }
 0x4c7   :  { %v21555_v51 = vpop.eup %21554  ;;  %v18576_v27 = vmul.f32 %v18574_v11, %v18570_v13  ;;  %v18573_v55 = vadd.f32 0.0009, %v18571_v12 }
 0x4c9   :  { %v21557_v32 = vpop.eup %21556  ;;  %v18590_v24 = vmul.f32 %v21555_v51, %v18576_v27  ;;  %v18575_v0 = vmul.f32 %v18573_v55, %v18569_v36 }
 0x4cb   :  { %v18589_v57 = vmul.f32 %v21557_v32, %v18575_v0  ;;  %v18592_v44 = vsel %vm82_vm0, %v18590_v24, 0.0 }
 0x4cd   :  { %v18591_v45 = vsel %vm82_vm0, %v18589_v57, 0.0 }
 0x4ce   :  { %v18593_v37 = vadd.f32 %v18592_v44, %v18591_v45 }
 0x4d0   :  { %v18594_v28 = vrot.slane %v18593_v37, 4 }
 0x4d2   :  { %v18595_v2 = vadd.f32 %v18594_v28, %v18593_v37 }
 0x4d4   :  { %v18596_v59 = vrot.slane %v18595_v2, 2 }
 0x4d6   :  { %v18597_v23 = vadd.f32 %v18596_v59, %v18595_v2 }
 0x4d8   :  { %v18598_v48 = vrot.slane %v18597_v23, 1 }
 0x4da   :  { %v18599_v41 = vadd.f32 %v18598_v48, %v18597_v23 }
 0x4dc   :  { %v18600_v46 = vadd.f32 %v18599_v41, %v24924_v20 }
 0x4de   :  { %18602 = vst.msk [vmem:[#allocation2] sm:$0x1] %vm18601_vm1, %v18600_v46 }
 0x4df   :  { %21569 = shalt.err (!%p21566_p4)
}
 0x4e0   :  { %18612 = dma.vmem_to_hbm [thread:$0]  %s18610_s15, 16, %s24944_s4, [#allocation3]  }
 0x4e1   :  { %21578 = dma.done.wait [#allocation3], 16  }
 0x4e2   :  { %21579 = vsyncadd [#allocation3], 4294967280 }
 0x4e3   :  { %18616 = vsyncpa [#allocation3], 1 }

</bundles_post_ra>
